<compile_context>
chip_gen: v7x
topology: tpu7x:2x2x1
jax: 0.10.0
libtpu: 0.0.40
codegen_flags: <defaults>
</compile_context>

<pallas_src>
from math import exp

import jax
import jax.numpy as jnp
from jax import lax
from jax.experimental import pallas as pl
from jax.experimental.pallas import tpu as pltpu


_MSSSIM_WEIGHTS = (0.0448, 0.2856, 0.3001, 0.2363, 0.1333)

# Per-block slab budget: 2 inputs x 2 pipeline buffers x T x (H*W*4B) plus the
# ~10 live conv/SSIM temporaries of the same size stay comfortably under the
# scoped VMEM limit below (and under v7x's 64 MiB physical VMEM).
_SLAB_BLOCK_BYTES = 2 * 1024 * 1024
_VMEM_LIMIT_BYTES = 48 * 1024 * 1024


def _gaussian_1d(window_size, sigma=1.5):
    """Same taps as the PyTorch `gaussian` helper (normalized), python floats."""
    g = [exp(-((x - window_size // 2) ** 2) / float(2 * sigma ** 2))
         for x in range(window_size)]
    s = sum(g)
    return [v / s for v in g]


# ---------------------------------------------------------------------------
# Per-level SSIM Pallas kernel
# ---------------------------------------------------------------------------

def _make_ssim_level_kernel(gauss, t, bc_total, h, w):
    """Build the per-level kernel; taps / block sizes are trace-time constants."""
    win = len(gauss)
    hc = h - win + 1
    wc = w - win + 1
    ragged = (bc_total % t) != 0

    def sep_conv(x):
        # Valid separable Gaussian convolution: along W (lanes) then H
        # (sublanes).  Fully unrolled, f32 multiply-adds on the VPU.
        acc_w = gauss[0] * x[:, :, 0:wc]
        for k in range(1, win):
            acc_w = acc_w + gauss[k] * x[:, :, k:k + wc]
        acc = gauss[0] * acc_w[:, 0:hc, :]
        for k in range(1, win):
            acc = acc + gauss[k] * acc_w[:, k:k + hc, :]
        return acc

    def kernel(consts_ref, x1_ref, x2_ref, ssim_out_ref, cs_out_ref):
        c1 = consts_ref[0]          # (0.01 * L)^2  (SMEM scalar)
        c2 = consts_ref[1]          # (0.03 * L)^2

        x1 = x1_ref[...].astype(jnp.float32)        # (t, h, w)
        x2 = x2_ref[...].astype(jnp.float32)

        mu1 = sep_conv(x1)
        mu2 = sep_conv(x2)
        e11 = sep_conv(x1 * x1)
        e22 = sep_conv(x2 * x2)
        e12 = sep_conv(x1 * x2)

        mu1_sq = mu1 * mu1
        mu2_sq = mu2 * mu2
        mu1_mu2 = mu1 * mu2
        sigma1_sq = e11 - mu1_sq
        sigma2_sq = e22 - mu2_sq
        sigma12 = e12 - mu1_mu2

        v1 = 2.0 * sigma12 + c2
        v2 = sigma1_sq + sigma2_sq + c2
        cs_map = v1 / v2
        ssim_map = ((2.0 * mu1_mu2 + c1) * v1) / ((mu1_sq + mu2_sq + c1) * v2)

        if ragged:
            # Last block extends past batch*channel: mask padded slabs out of
            # the partial sums (out-of-bounds input reads are garbage).
            i = pl.program_id(0)
            valid = bc_total - i * t
            slab = lax.broadcasted_iota(jnp.int32, (t, hc, wc), 0)
            keep = slab < valid
            ssim_map = jnp.where(keep, ssim_map, 0.0)
            cs_map = jnp.where(keep, cs_map, 0.0)

        ssim_out_ref[...] = jnp.reshape(jnp.sum(ssim_map), (1, 1, 1))
        cs_out_ref[...] = jnp.reshape(jnp.sum(cs_map), (1, 1, 1))

    return kernel, hc, wc


def _ssim_level_sums(img1, img2, window_size, consts):
    """Returns (sum(ssim_map), sum(cs_map), num_elements) for one level."""
    b, c, h, w = img1.shape
    bc = b * c
    win = min(window_size, h, w)
    gauss = _gaussian_1d(win)

    slab_bytes = h * w * 4
    t = max(1, min(bc, _SLAB_BLOCK_BYTES // slab_bytes))
    nblk = pl.cdiv(bc, t)

    kernel, hc, wc = _make_ssim_level_kernel(gauss, t, bc, h, w)

    x1 = img1.reshape(bc, h, w)
    x2 = img2.reshape(bc, h, w)

    ssim_parts, cs_parts = pl.pallas_call(
        kernel,
        out_shape=(
            jax.ShapeDtypeStruct((nblk, 1, 1), jnp.float32),
            jax.ShapeDtypeStruct((nblk, 1, 1), jnp.float32),
        ),
        grid=(nblk,),
        in_specs=[
            pl.BlockSpec(memory_space=pltpu.MemorySpace.SMEM),   # [C1, C2]
            pl.BlockSpec((t, h, w), lambda i: (i, 0, 0)),
            pl.BlockSpec((t, h, w), lambda i: (i, 0, 0)),
        ],
        out_specs=(
            pl.BlockSpec((1, 1, 1), lambda i: (i, 0, 0)),
            pl.BlockSpec((1, 1, 1), lambda i: (i, 0, 0)),
        ),
        compiler_params=pltpu.CompilerParams(
            dimension_semantics=("parallel",),
            vmem_limit_bytes=_VMEM_LIMIT_BYTES,
        ),
    )(consts, x1, x2)

    n_elems = bc * hc * wc
    return jnp.sum(ssim_parts), jnp.sum(cs_parts), n_elems


# ---------------------------------------------------------------------------
# MS-SSIM wrapper (matches the PyTorch msssim / MSSSIM.forward semantics)
# ---------------------------------------------------------------------------

def _avg_pool2x2(x):
    # F.avg_pool2d(x, (2, 2)): stride 2, no padding, floor output size.
    b, c, h, w = x.shape
    h2, w2 = h // 2, w // 2
    x = x[:, :, : 2 * h2, : 2 * w2]
    return x.reshape(b, c, h2, 2, w2, 2).mean(axis=(3, 5))


def _dynamic_range(img1):
    # Mirrors the PyTorch val_range=None branch.
    max_val = jnp.where(jnp.max(img1) > 128.0, 255.0, 1.0)
    min_val = jnp.where(jnp.min(img1) < -0.5, -1.0, 0.0)
    return max_val - min_val


def msssim(img1, img2, window_size=11, size_average=True, val_range=None,
           normalize=False):
    # TODO(synk): the 2x2 avg-pool between levels and the global max/min for the
    # dynamic range L stay as plain XLA ops in the wrapper (glue between the
    # per-level pallas_calls); only the default size_average=True path is done.
    del size_average
    weights = jnp.asarray(_MSSSIM_WEIGHTS, dtype=jnp.float32)
    levels = len(_MSSSIM_WEIGHTS)

    mssim_vals = []
    mcs_vals = []
    for lvl in range(levels):
        if val_range is None:
            l_val = _dynamic_range(img1)
        else:
            l_val = jnp.float32(val_range)
        c1 = (0.01 * l_val) ** 2
        c2 = (0.03 * l_val) ** 2
        consts = jnp.stack([c1, c2]).astype(jnp.float32)

        ssim_sum, cs_sum, n_elems = _ssim_level_sums(
            img1, img2, window_size, consts)
        mssim_vals.append(ssim_sum / n_elems)
        mcs_vals.append(cs_sum / n_elems)

        if lvl + 1 < levels:
            # PyTorch also pools after the last level, but that result is never
            # used (and would error for 1x1 maps), so it is skipped here.
            img1 = _avg_pool2x2(img1)
            img2 = _avg_pool2x2(img2)

    mssim_v = jnp.stack(mssim_vals)
    mcs_v = jnp.stack(mcs_vals)
    if normalize:
        mssim_v = (mssim_v + 1.0) / 2.0
        mcs_v = (mcs_v + 1.0) / 2.0
    pow1 = mcs_v ** weights
    pow2 = mssim_v ** weights
    return jnp.prod(pow1[:-1] * pow2[-1])


class MSSSIM:
    """Forward-pass equivalent of the PyTorch MSSSIM module."""

    def __init__(self, window_size=11, size_average=True, channel=3):
        self.window_size = window_size
        self.size_average = size_average
        self.channel = channel

    def __call__(self, img1, img2):
        return msssim(img1, img2, window_size=self.window_size,
                      size_average=self.size_average)


# ---------------------------------------------------------------------------
# Pure-JAX reference (mirrors the PyTorch code: grouped 2-D window conv)
# ---------------------------------------------------------------------------

def _ssim_ref(img1, img2, window_size=11, val_range=None):
    if val_range is None:
        l_val = _dynamic_range(img1)
    else:
        l_val = val_range
    _, channel, height, width = img1.shape
    real_size = min(window_size, height, width)
    g = jnp.asarray(_gaussian_1d(real_size), dtype=jnp.float32)
    w2d = jnp.outer(g, g)
    window = jnp.broadcast_to(w2d, (channel, 1, real_size, real_size))

    def conv(x):
        return lax.conv_general_dilated(
            x, window, window_strides=(1, 1), padding="VALID",
            dimension_numbers=("NCHW", "OIHW", "NCHW"),
            feature_group_count=channel,
            precision=lax.Precision.HIGHEST)

    mu1 = conv(img1)
    mu2 = conv(img2)
    mu1_sq = mu1 * mu1
    mu2_sq = mu2 * mu2
    mu1_mu2 = mu1 * mu2
    sigma1_sq = conv(img1 * img1) - mu1_sq
    sigma2_sq = conv(img2 * img2) - mu2_sq
    sigma12 = conv(img1 * img2) - mu1_mu2
    c1 = (0.01 * l_val) ** 2
    c2 = (0.03 * l_val) ** 2
    v1 = 2.0 * sigma12 + c2
    v2 = sigma1_sq + sigma2_sq + c2
    cs = jnp.mean(v1 / v2)
    ssim_map = (2.0 * mu1_mu2 + c1) * v1 / ((mu1_sq + mu2_sq + c1) * v2)
    return jnp.mean(ssim_map), cs


def msssim_ref(img1, img2, window_size=11, normalize=False):
    weights = jnp.asarray(_MSSSIM_WEIGHTS, dtype=jnp.float32)
    levels = len(_MSSSIM_WEIGHTS)
    mssim_vals, mcs_vals = [], []
    for lvl in range(levels):
        sim, cs = _ssim_ref(img1, img2, window_size=window_size)
        mssim_vals.append(sim)
        mcs_vals.append(cs)
        if lvl + 1 < levels:
            img1 = _avg_pool2x2(img1)
            img2 = _avg_pool2x2(img2)
    mssim_v = jnp.stack(mssim_vals)
    mcs_v = jnp.stack(mcs_vals)
    if normalize:
        mssim_v = (mssim_v + 1.0) / 2.0
        mcs_v = (mcs_v + 1.0) / 2.0
    pow1 = mcs_v ** weights
    pow2 = mssim_v ** weights
    return jnp.prod(pow1[:-1] * pow2[-1])


if __name__ == "__main__":
    key = jax.random.PRNGKey(0)
    k1, k2 = jax.random.split(key)
    b, c, h, w = 2, 3, 16, 16
    img1 = jax.random.uniform(k1, (b, c, h, w), dtype=jnp.float32)
    noise = 0.05 * jax.random.normal(k2, (b, c, h, w), dtype=jnp.float32)
    img2 = jnp.clip(img1 + noise, 0.0, 1.0)

    model = MSSSIM(window_size=11, size_average=True, channel=c)
    out = jax.block_until_ready(model(img1, img2))
    ref = jax.block_until_ready(msssim_ref(img1, img2, window_size=11))

    assert bool(jnp.isfinite(out)), ("non-finite output", out)
    assert jnp.allclose(out, ref, rtol=1e-4, atol=1e-5), (out, ref)
    print("KERNEL_OK")
</pallas_src>

<mosaic_0001>
module attributes {stable_mosaic.version = 11 : i64} {
  func.func @kernel(%arg0: i32, %arg1: memref<2xf32, #tpu.memory_space<smem>>, %arg2: memref<6x16x16xf32, #tpu.memory_space<vmem>>, %arg3: memref<6x16x16xf32, #tpu.memory_space<vmem>>, %arg4: memref<1x1x1xf32, #tpu.memory_space<vmem>>, %arg5: memref<1x1x1xf32, #tpu.memory_space<vmem>>) attributes {dimension_semantics = [#tpu.dimension_semantics<parallel>], iteration_bounds = array<i64: 1>, scalar_prefetch = 0 : i64, scratch_operands = 0 : i64, tpu.core_type = #tpu.core_type<tc>, window_params = [{transform_indices = @transform_0, window_bounds = array<i64: 2>}, {transform_indices = @transform_1, window_bounds = array<i64: 6, 16, 16>}, {transform_indices = @transform_2, window_bounds = array<i64: 6, 16, 16>}, {transform_indices = @transform_3, window_bounds = array<i64: 1, 1, 1>}, {transform_indices = @transform_4, window_bounds = array<i64: 1, 1, 1>}]} {
    %c0 = arith.constant 0 : index
    %0 = memref.load %arg1[%c0] : memref<2xf32, #tpu.memory_space<smem>>
    %c1 = arith.constant 1 : index
    %1 = memref.load %arg1[%c1] : memref<2xf32, #tpu.memory_space<smem>>
    %c0_0 = arith.constant 0 : index
    %c0_1 = arith.constant 0 : index
    %c0_2 = arith.constant 0 : index
    %2 = vector.load %arg2[%c0_0, %c0_1, %c0_2] : memref<6x16x16xf32, #tpu.memory_space<vmem>>, vector<6x16x16xf32>
    %c0_3 = arith.constant 0 : index
    %c0_4 = arith.constant 0 : index
    %c0_5 = arith.constant 0 : index
    %3 = vector.load %arg3[%c0_3, %c0_4, %c0_5] : memref<6x16x16xf32, #tpu.memory_space<vmem>>, vector<6x16x16xf32>
    %4 = vector.extract_strided_slice %2 {offsets = [0, 0, 0], sizes = [6, 16, 6], strides = [1, 1, 1]} : vector<6x16x16xf32> to vector<6x16x6xf32>
    %cst = arith.constant 0.00102838012 : f32
    %5 = vector.broadcast %cst : f32 to vector<6x16x6xf32>
    %6 = arith.mulf %5, %4 : vector<6x16x6xf32>
    %7 = vector.extract_strided_slice %2 {offsets = [0, 0, 1], sizes = [6, 16, 6], strides = [1, 1, 1]} : vector<6x16x16xf32> to vector<6x16x6xf32>
    %cst_6 = arith.constant 0.00759875821 : f32
    %8 = vector.broadcast %cst_6 : f32 to vector<6x16x6xf32>
    %9 = arith.mulf %8, %7 : vector<6x16x6xf32>
    %10 = arith.addf %6, %9 : vector<6x16x6xf32>
    %11 = vector.extract_strided_slice %2 {offsets = [0, 0, 2], sizes = [6, 16, 6], strides = [1, 1, 1]} : vector<6x16x16xf32> to vector<6x16x6xf32>
    %cst_7 = arith.constant 0.0360007733 : f32
    %12 = vector.broadcast %cst_7 : f32 to vector<6x16x6xf32>
    %13 = arith.mulf %12, %11 : vector<6x16x6xf32>
    %14 = arith.addf %10, %13 : vector<6x16x6xf32>
    %15 = vector.extract_strided_slice %2 {offsets = [0, 0, 3], sizes = [6, 16, 6], strides = [1, 1, 1]} : vector<6x16x16xf32> to vector<6x16x6xf32>
    %cst_8 = arith.constant 0.109360687 : f32
    %16 = vector.broadcast %cst_8 : f32 to vector<6x16x6xf32>
    %17 = arith.mulf %16, %15 : vector<6x16x6xf32>
    %18 = arith.addf %14, %17 : vector<6x16x6xf32>
    %19 = vector.extract_strided_slice %2 {offsets = [0, 0, 4], sizes = [6, 16, 6], strides = [1, 1, 1]} : vector<6x16x16xf32> to vector<6x16x6xf32>
    %cst_9 = arith.constant 0.213005543 : f32
    %20 = vector.broadcast %cst_9 : f32 to vector<6x16x6xf32>
    %21 = arith.mulf %20, %19 : vector<6x16x6xf32>
    %22 = arith.addf %18, %21 : vector<6x16x6xf32>
    %23 = vector.extract_strided_slice %2 {offsets = [0, 0, 5], sizes = [6, 16, 6], strides = [1, 1, 1]} : vector<6x16x16xf32> to vector<6x16x6xf32>
    %cst_10 = arith.constant 0.266011715 : f32
    %24 = vector.broadcast %cst_10 : f32 to vector<6x16x6xf32>
    %25 = arith.mulf %24, %23 : vector<6x16x6xf32>
    %26 = arith.addf %22, %25 : vector<6x16x6xf32>
    %27 = vector.extract_strided_slice %2 {offsets = [0, 0, 6], sizes = [6, 16, 6], strides = [1, 1, 1]} : vector<6x16x16xf32> to vector<6x16x6xf32>
    %cst_11 = arith.constant 0.213005543 : f32
    %28 = vector.broadcast %cst_11 : f32 to vector<6x16x6xf32>
    %29 = arith.mulf %28, %27 : vector<6x16x6xf32>
    %30 = arith.addf %26, %29 : vector<6x16x6xf32>
    %31 = vector.extract_strided_slice %2 {offsets = [0, 0, 7], sizes = [6, 16, 6], strides = [1, 1, 1]} : vector<6x16x16xf32> to vector<6x16x6xf32>
    %cst_12 = arith.constant 0.109360687 : f32
    %32 = vector.broadcast %cst_12 : f32 to vector<6x16x6xf32>
    %33 = arith.mulf %32, %31 : vector<6x16x6xf32>
    %34 = arith.addf %30, %33 : vector<6x16x6xf32>
    %35 = vector.extract_strided_slice %2 {offsets = [0, 0, 8], sizes = [6, 16, 6], strides = [1, 1, 1]} : vector<6x16x16xf32> to vector<6x16x6xf32>
    %cst_13 = arith.constant 0.0360007733 : f32
    %36 = vector.broadcast %cst_13 : f32 to vector<6x16x6xf32>
    %37 = arith.mulf %36, %35 : vector<6x16x6xf32>
    %38 = arith.addf %34, %37 : vector<6x16x6xf32>
    %39 = vector.extract_strided_slice %2 {offsets = [0, 0, 9], sizes = [6, 16, 6], strides = [1, 1, 1]} : vector<6x16x16xf32> to vector<6x16x6xf32>
    %cst_14 = arith.constant 0.00759875821 : f32
    %40 = vector.broadcast %cst_14 : f32 to vector<6x16x6xf32>
    %41 = arith.mulf %40, %39 : vector<6x16x6xf32>
    %42 = arith.addf %38, %41 : vector<6x16x6xf32>
    %43 = vector.extract_strided_slice %2 {offsets = [0, 0, 10], sizes = [6, 16, 6], strides = [1, 1, 1]} : vector<6x16x16xf32> to vector<6x16x6xf32>
    %cst_15 = arith.constant 0.00102838012 : f32
    %44 = vector.broadcast %cst_15 : f32 to vector<6x16x6xf32>
    %45 = arith.mulf %44, %43 : vector<6x16x6xf32>
    %46 = arith.addf %42, %45 : vector<6x16x6xf32>
    %47 = vector.extract_strided_slice %46 {offsets = [0, 0, 0], sizes = [6, 6, 6], strides = [1, 1, 1]} : vector<6x16x6xf32> to vector<6x6x6xf32>
    %cst_16 = arith.constant 0.00102838012 : f32
    %48 = vector.broadcast %cst_16 : f32 to vector<6x6x6xf32>
    %49 = arith.mulf %48, %47 : vector<6x6x6xf32>
    %50 = vector.extract_strided_slice %46 {offsets = [0, 1, 0], sizes = [6, 6, 6], strides = [1, 1, 1]} : vector<6x16x6xf32> to vector<6x6x6xf32>
    %cst_17 = arith.constant 0.00759875821 : f32
    %51 = vector.broadcast %cst_17 : f32 to vector<6x6x6xf32>
    %52 = arith.mulf %51, %50 : vector<6x6x6xf32>
    %53 = arith.addf %49, %52 : vector<6x6x6xf32>
    %54 = vector.extract_strided_slice %46 {offsets = [0, 2, 0], sizes = [6, 6, 6], strides = [1, 1, 1]} : vector<6x16x6xf32> to vector<6x6x6xf32>
    %cst_18 = arith.constant 0.0360007733 : f32
    %55 = vector.broadcast %cst_18 : f32 to vector<6x6x6xf32>
    %56 = arith.mulf %55, %54 : vector<6x6x6xf32>
    %57 = arith.addf %53, %56 : vector<6x6x6xf32>
    %58 = vector.extract_strided_slice %46 {offsets = [0, 3, 0], sizes = [6, 6, 6], strides = [1, 1, 1]} : vector<6x16x6xf32> to vector<6x6x6xf32>
    %cst_19 = arith.constant 0.109360687 : f32
    %59 = vector.broadcast %cst_19 : f32 to vector<6x6x6xf32>
    %60 = arith.mulf %59, %58 : vector<6x6x6xf32>
    %61 = arith.addf %57, %60 : vector<6x6x6xf32>
    %62 = vector.extract_strided_slice %46 {offsets = [0, 4, 0], sizes = [6, 6, 6], strides = [1, 1, 1]} : vector<6x16x6xf32> to vector<6x6x6xf32>
    %cst_20 = arith.constant 0.213005543 : f32
    %63 = vector.broadcast %cst_20 : f32 to vector<6x6x6xf32>
    %64 = arith.mulf %63, %62 : vector<6x6x6xf32>
    %65 = arith.addf %61, %64 : vector<6x6x6xf32>
    %66 = vector.extract_strided_slice %46 {offsets = [0, 5, 0], sizes = [6, 6, 6], strides = [1, 1, 1]} : vector<6x16x6xf32> to vector<6x6x6xf32>
    %cst_21 = arith.constant 0.266011715 : f32
    %67 = vector.broadcast %cst_21 : f32 to vector<6x6x6xf32>
    %68 = arith.mulf %67, %66 : vector<6x6x6xf32>
    %69 = arith.addf %65, %68 : vector<6x6x6xf32>
    %70 = vector.extract_strided_slice %46 {offsets = [0, 6, 0], sizes = [6, 6, 6], strides = [1, 1, 1]} : vector<6x16x6xf32> to vector<6x6x6xf32>
    %cst_22 = arith.constant 0.213005543 : f32
    %71 = vector.broadcast %cst_22 : f32 to vector<6x6x6xf32>
    %72 = arith.mulf %71, %70 : vector<6x6x6xf32>
    %73 = arith.addf %69, %72 : vector<6x6x6xf32>
    %74 = vector.extract_strided_slice %46 {offsets = [0, 7, 0], sizes = [6, 6, 6], strides = [1, 1, 1]} : vector<6x16x6xf32> to vector<6x6x6xf32>
    %cst_23 = arith.constant 0.109360687 : f32
    %75 = vector.broadcast %cst_23 : f32 to vector<6x6x6xf32>
    %76 = arith.mulf %75, %74 : vector<6x6x6xf32>
    %77 = arith.addf %73, %76 : vector<6x6x6xf32>
    %78 = vector.extract_strided_slice %46 {offsets = [0, 8, 0], sizes = [6, 6, 6], strides = [1, 1, 1]} : vector<6x16x6xf32> to vector<6x6x6xf32>
    %cst_24 = arith.constant 0.0360007733 : f32
    %79 = vector.broadcast %cst_24 : f32 to vector<6x6x6xf32>
    %80 = arith.mulf %79, %78 : vector<6x6x6xf32>
    %81 = arith.addf %77, %80 : vector<6x6x6xf32>
    %82 = vector.extract_strided_slice %46 {offsets = [0, 9, 0], sizes = [6, 6, 6], strides = [1, 1, 1]} : vector<6x16x6xf32> to vector<6x6x6xf32>
    %cst_25 = arith.constant 0.00759875821 : f32
    %83 = vector.broadcast %cst_25 : f32 to vector<6x6x6xf32>
    %84 = arith.mulf %83, %82 : vector<6x6x6xf32>
    %85 = arith.addf %81, %84 : vector<6x6x6xf32>
    %86 = vector.extract_strided_slice %46 {offsets = [0, 10, 0], sizes = [6, 6, 6], strides = [1, 1, 1]} : vector<6x16x6xf32> to vector<6x6x6xf32>
    %cst_26 = arith.constant 0.00102838012 : f32
    %87 = vector.broadcast %cst_26 : f32 to vector<6x6x6xf32>
    %88 = arith.mulf %87, %86 : vector<6x6x6xf32>
    %89 = arith.addf %85, %88 : vector<6x6x6xf32>
    %90 = vector.extract_strided_slice %3 {offsets = [0, 0, 0], sizes = [6, 16, 6], strides = [1, 1, 1]} : vector<6x16x16xf32> to vector<6x16x6xf32>
    %cst_27 = arith.constant 0.00102838012 : f32
    %91 = vector.broadcast %cst_27 : f32 to vector<6x16x6xf32>
    %92 = arith.mulf %91, %90 : vector<6x16x6xf32>
    %93 = vector.extract_strided_slice %3 {offsets = [0, 0, 1], sizes = [6, 16, 6], strides = [1, 1, 1]} : vector<6x16x16xf32> to vector<6x16x6xf32>
    %cst_28 = arith.constant 0.00759875821 : f32
    %94 = vector.broadcast %cst_28 : f32 to vector<6x16x6xf32>
    %95 = arith.mulf %94, %93 : vector<6x16x6xf32>
    %96 = arith.addf %92, %95 : vector<6x16x6xf32>
    %97 = vector.extract_strided_slice %3 {offsets = [0, 0, 2], sizes = [6, 16, 6], strides = [1, 1, 1]} : vector<6x16x16xf32> to vector<6x16x6xf32>
    %cst_29 = arith.constant 0.0360007733 : f32
    %98 = vector.broadcast %cst_29 : f32 to vector<6x16x6xf32>
    %99 = arith.mulf %98, %97 : vector<6x16x6xf32>
    %100 = arith.addf %96, %99 : vector<6x16x6xf32>
    %101 = vector.extract_strided_slice %3 {offsets = [0, 0, 3], sizes = [6, 16, 6], strides = [1, 1, 1]} : vector<6x16x16xf32> to vector<6x16x6xf32>
    %cst_30 = arith.constant 0.109360687 : f32
    %102 = vector.broadcast %cst_30 : f32 to vector<6x16x6xf32>
    %103 = arith.mulf %102, %101 : vector<6x16x6xf32>
    %104 = arith.addf %100, %103 : vector<6x16x6xf32>
    %105 = vector.extract_strided_slice %3 {offsets = [0, 0, 4], sizes = [6, 16, 6], strides = [1, 1, 1]} : vector<6x16x16xf32> to vector<6x16x6xf32>
    %cst_31 = arith.constant 0.213005543 : f32
    %106 = vector.broadcast %cst_31 : f32 to vector<6x16x6xf32>
    %107 = arith.mulf %106, %105 : vector<6x16x6xf32>
    %108 = arith.addf %104, %107 : vector<6x16x6xf32>
    %109 = vector.extract_strided_slice %3 {offsets = [0, 0, 5], sizes = [6, 16, 6], strides = [1, 1, 1]} : vector<6x16x16xf32> to vector<6x16x6xf32>
    %cst_32 = arith.constant 0.266011715 : f32
    %110 = vector.broadcast %cst_32 : f32 to vector<6x16x6xf32>
    %111 = arith.mulf %110, %109 : vector<6x16x6xf32>
    %112 = arith.addf %108, %111 : vector<6x16x6xf32>
    %113 = vector.extract_strided_slice %3 {offsets = [0, 0, 6], sizes = [6, 16, 6], strides = [1, 1, 1]} : vector<6x16x16xf32> to vector<6x16x6xf32>
    %cst_33 = arith.constant 0.213005543 : f32
    %114 = vector.broadcast %cst_33 : f32 to vector<6x16x6xf32>
    %115 = arith.mulf %114, %113 : vector<6x16x6xf32>
    %116 = arith.addf %112, %115 : vector<6x16x6xf32>
    %117 = vector.extract_strided_slice %3 {offsets = [0, 0, 7], sizes = [6, 16, 6], strides = [1, 1, 1]} : vector<6x16x16xf32> to vector<6x16x6xf32>
    %cst_34 = arith.constant 0.109360687 : f32
    %118 = vector.broadcast %cst_34 : f32 to vector<6x16x6xf32>
    %119 = arith.mulf %118, %117 : vector<6x16x6xf32>
    %120 = arith.addf %116, %119 : vector<6x16x6xf32>
    %121 = vector.extract_strided_slice %3 {offsets = [0, 0, 8], sizes = [6, 16, 6], strides = [1, 1, 1]} : vector<6x16x16xf32> to vector<6x16x6xf32>
    %cst_35 = arith.constant 0.0360007733 : f32
    %122 = vector.broadcast %cst_35 : f32 to vector<6x16x6xf32>
    %123 = arith.mulf %122, %121 : vector<6x16x6xf32>
    %124 = arith.addf %120, %123 : vector<6x16x6xf32>
    %125 = vector.extract_strided_slice %3 {offsets = [0, 0, 9], sizes = [6, 16, 6], strides = [1, 1, 1]} : vector<6x16x16xf32> to vector<6x16x6xf32>
    %cst_36 = arith.constant 0.00759875821 : f32
    %126 = vector.broadcast %cst_36 : f32 to vector<6x16x6xf32>
    %127 = arith.mulf %126, %125 : vector<6x16x6xf32>
    %128 = arith.addf %124, %127 : vector<6x16x6xf32>
    %129 = vector.extract_strided_slice %3 {offsets = [0, 0, 10], sizes = [6, 16, 6], strides = [1, 1, 1]} : vector<6x16x16xf32> to vector<6x16x6xf32>
    %cst_37 = arith.constant 0.00102838012 : f32
    %130 = vector.broadcast %cst_37 : f32 to vector<6x16x6xf32>
    %131 = arith.mulf %130, %129 : vector<6x16x6xf32>
    %132 = arith.addf %128, %131 : vector<6x16x6xf32>
    %133 = vector.extract_strided_slice %132 {offsets = [0, 0, 0], sizes = [6, 6, 6], strides = [1, 1, 1]} : vector<6x16x6xf32> to vector<6x6x6xf32>
    %cst_38 = arith.constant 0.00102838012 : f32
    %134 = vector.broadcast %cst_38 : f32 to vector<6x6x6xf32>
    %135 = arith.mulf %134, %133 : vector<6x6x6xf32>
    %136 = vector.extract_strided_slice %132 {offsets = [0, 1, 0], sizes = [6, 6, 6], strides = [1, 1, 1]} : vector<6x16x6xf32> to vector<6x6x6xf32>
    %cst_39 = arith.constant 0.00759875821 : f32
    %137 = vector.broadcast %cst_39 : f32 to vector<6x6x6xf32>
    %138 = arith.mulf %137, %136 : vector<6x6x6xf32>
    %139 = arith.addf %135, %138 : vector<6x6x6xf32>
    %140 = vector.extract_strided_slice %132 {offsets = [0, 2, 0], sizes = [6, 6, 6], strides = [1, 1, 1]} : vector<6x16x6xf32> to vector<6x6x6xf32>
    %cst_40 = arith.constant 0.0360007733 : f32
    %141 = vector.broadcast %cst_40 : f32 to vector<6x6x6xf32>
    %142 = arith.mulf %141, %140 : vector<6x6x6xf32>
    %143 = arith.addf %139, %142 : vector<6x6x6xf32>
    %144 = vector.extract_strided_slice %132 {offsets = [0, 3, 0], sizes = [6, 6, 6], strides = [1, 1, 1]} : vector<6x16x6xf32> to vector<6x6x6xf32>
    %cst_41 = arith.constant 0.109360687 : f32
    %145 = vector.broadcast %cst_41 : f32 to vector<6x6x6xf32>
    %146 = arith.mulf %145, %144 : vector<6x6x6xf32>
    %147 = arith.addf %143, %146 : vector<6x6x6xf32>
    %148 = vector.extract_strided_slice %132 {offsets = [0, 4, 0], sizes = [6, 6, 6], strides = [1, 1, 1]} : vector<6x16x6xf32> to vector<6x6x6xf32>
    %cst_42 = arith.constant 0.213005543 : f32
    %149 = vector.broadcast %cst_42 : f32 to vector<6x6x6xf32>
    %150 = arith.mulf %149, %148 : vector<6x6x6xf32>
    %151 = arith.addf %147, %150 : vector<6x6x6xf32>
    %152 = vector.extract_strided_slice %132 {offsets = [0, 5, 0], sizes = [6, 6, 6], strides = [1, 1, 1]} : vector<6x16x6xf32> to vector<6x6x6xf32>
    %cst_43 = arith.constant 0.266011715 : f32
    %153 = vector.broadcast %cst_43 : f32 to vector<6x6x6xf32>
    %154 = arith.mulf %153, %152 : vector<6x6x6xf32>
    %155 = arith.addf %151, %154 : vector<6x6x6xf32>
    %156 = vector.extract_strided_slice %132 {offsets = [0, 6, 0], sizes = [6, 6, 6], strides = [1, 1, 1]} : vector<6x16x6xf32> to vector<6x6x6xf32>
    %cst_44 = arith.constant 0.213005543 : f32
    %157 = vector.broadcast %cst_44 : f32 to vector<6x6x6xf32>
    %158 = arith.mulf %157, %156 : vector<6x6x6xf32>
    %159 = arith.addf %155, %158 : vector<6x6x6xf32>
    %160 = vector.extract_strided_slice %132 {offsets = [0, 7, 0], sizes = [6, 6, 6], strides = [1, 1, 1]} : vector<6x16x6xf32> to vector<6x6x6xf32>
    %cst_45 = arith.constant 0.109360687 : f32
    %161 = vector.broadcast %cst_45 : f32 to vector<6x6x6xf32>
    %162 = arith.mulf %161, %160 : vector<6x6x6xf32>
    %163 = arith.addf %159, %162 : vector<6x6x6xf32>
    %164 = vector.extract_strided_slice %132 {offsets = [0, 8, 0], sizes = [6, 6, 6], strides = [1, 1, 1]} : vector<6x16x6xf32> to vector<6x6x6xf32>
    %cst_46 = arith.constant 0.0360007733 : f32
    %165 = vector.broadcast %cst_46 : f32 to vector<6x6x6xf32>
    %166 = arith.mulf %165, %164 : vector<6x6x6xf32>
    %167 = arith.addf %163, %166 : vector<6x6x6xf32>
    %168 = vector.extract_strided_slice %132 {offsets = [0, 9, 0], sizes = [6, 6, 6], strides = [1, 1, 1]} : vector<6x16x6xf32> to vector<6x6x6xf32>
    %cst_47 = arith.constant 0.00759875821 : f32
    %169 = vector.broadcast %cst_47 : f32 to vector<6x6x6xf32>
    %170 = arith.mulf %169, %168 : vector<6x6x6xf32>
    %171 = arith.addf %167, %170 : vector<6x6x6xf32>
    %172 = vector.extract_strided_slice %132 {offsets = [0, 10, 0], sizes = [6, 6, 6], strides = [1, 1, 1]} : vector<6x16x6xf32> to vector<6x6x6xf32>
    %cst_48 = arith.constant 0.00102838012 : f32
    %173 = vector.broadcast %cst_48 : f32 to vector<6x6x6xf32>
    %174 = arith.mulf %173, %172 : vector<6x6x6xf32>
    %175 = arith.addf %171, %174 : vector<6x6x6xf32>
    %176 = arith.mulf %2, %2 : vector<6x16x16xf32>
    %177 = vector.extract_strided_slice %176 {offsets = [0, 0, 0], sizes = [6, 16, 6], strides = [1, 1, 1]} : vector<6x16x16xf32> to vector<6x16x6xf32>
    %cst_49 = arith.constant 0.00102838012 : f32
    %178 = vector.broadcast %cst_49 : f32 to vector<6x16x6xf32>
    %179 = arith.mulf %178, %177 : vector<6x16x6xf32>
    %180 = vector.extract_strided_slice %176 {offsets = [0, 0, 1], sizes = [6, 16, 6], strides = [1, 1, 1]} : vector<6x16x16xf32> to vector<6x16x6xf32>
    %cst_50 = arith.constant 0.00759875821 : f32
    %181 = vector.broadcast %cst_50 : f32 to vector<6x16x6xf32>
    %182 = arith.mulf %181, %180 : vector<6x16x6xf32>
    %183 = arith.addf %179, %182 : vector<6x16x6xf32>
    %184 = vector.extract_strided_slice %176 {offsets = [0, 0, 2], sizes = [6, 16, 6], strides = [1, 1, 1]} : vector<6x16x16xf32> to vector<6x16x6xf32>
    %cst_51 = arith.constant 0.0360007733 : f32
    %185 = vector.broadcast %cst_51 : f32 to vector<6x16x6xf32>
    %186 = arith.mulf %185, %184 : vector<6x16x6xf32>
    %187 = arith.addf %183, %186 : vector<6x16x6xf32>
    %188 = vector.extract_strided_slice %176 {offsets = [0, 0, 3], sizes = [6, 16, 6], strides = [1, 1, 1]} : vector<6x16x16xf32> to vector<6x16x6xf32>
    %cst_52 = arith.constant 0.109360687 : f32
    %189 = vector.broadcast %cst_52 : f32 to vector<6x16x6xf32>
    %190 = arith.mulf %189, %188 : vector<6x16x6xf32>
    %191 = arith.addf %187, %190 : vector<6x16x6xf32>
    %192 = vector.extract_strided_slice %176 {offsets = [0, 0, 4], sizes = [6, 16, 6], strides = [1, 1, 1]} : vector<6x16x16xf32> to vector<6x16x6xf32>
    %cst_53 = arith.constant 0.213005543 : f32
    %193 = vector.broadcast %cst_53 : f32 to vector<6x16x6xf32>
    %194 = arith.mulf %193, %192 : vector<6x16x6xf32>
    %195 = arith.addf %191, %194 : vector<6x16x6xf32>
    %196 = vector.extract_strided_slice %176 {offsets = [0, 0, 5], sizes = [6, 16, 6], strides = [1, 1, 1]} : vector<6x16x16xf32> to vector<6x16x6xf32>
    %cst_54 = arith.constant 0.266011715 : f32
    %197 = vector.broadcast %cst_54 : f32 to vector<6x16x6xf32>
    %198 = arith.mulf %197, %196 : vector<6x16x6xf32>
    %199 = arith.addf %195, %198 : vector<6x16x6xf32>
    %200 = vector.extract_strided_slice %176 {offsets = [0, 0, 6], sizes = [6, 16, 6], strides = [1, 1, 1]} : vector<6x16x16xf32> to vector<6x16x6xf32>
    %cst_55 = arith.constant 0.213005543 : f32
    %201 = vector.broadcast %cst_55 : f32 to vector<6x16x6xf32>
    %202 = arith.mulf %201, %200 : vector<6x16x6xf32>
    %203 = arith.addf %199, %202 : vector<6x16x6xf32>
    %204 = vector.extract_strided_slice %176 {offsets = [0, 0, 7], sizes = [6, 16, 6], strides = [1, 1, 1]} : vector<6x16x16xf32> to vector<6x16x6xf32>
    %cst_56 = arith.constant 0.109360687 : f32
    %205 = vector.broadcast %cst_56 : f32 to vector<6x16x6xf32>
    %206 = arith.mulf %205, %204 : vector<6x16x6xf32>
    %207 = arith.addf %203, %206 : vector<6x16x6xf32>
    %208 = vector.extract_strided_slice %176 {offsets = [0, 0, 8], sizes = [6, 16, 6], strides = [1, 1, 1]} : vector<6x16x16xf32> to vector<6x16x6xf32>
    %cst_57 = arith.constant 0.0360007733 : f32
    %209 = vector.broadcast %cst_57 : f32 to vector<6x16x6xf32>
    %210 = arith.mulf %209, %208 : vector<6x16x6xf32>
    %211 = arith.addf %207, %210 : vector<6x16x6xf32>
    %212 = vector.extract_strided_slice %176 {offsets = [0, 0, 9], sizes = [6, 16, 6], strides = [1, 1, 1]} : vector<6x16x16xf32> to vector<6x16x6xf32>
    %cst_58 = arith.constant 0.00759875821 : f32
    %213 = vector.broadcast %cst_58 : f32 to vector<6x16x6xf32>
    %214 = arith.mulf %213, %212 : vector<6x16x6xf32>
    %215 = arith.addf %211, %214 : vector<6x16x6xf32>
    %216 = vector.extract_strided_slice %176 {offsets = [0, 0, 10], sizes = [6, 16, 6], strides = [1, 1, 1]} : vector<6x16x16xf32> to vector<6x16x6xf32>
    %cst_59 = arith.constant 0.00102838012 : f32
    %217 = vector.broadcast %cst_59 : f32 to vector<6x16x6xf32>
    %218 = arith.mulf %217, %216 : vector<6x16x6xf32>
    %219 = arith.addf %215, %218 : vector<6x16x6xf32>
    %220 = vector.extract_strided_slice %219 {offsets = [0, 0, 0], sizes = [6, 6, 6], strides = [1, 1, 1]} : vector<6x16x6xf32> to vector<6x6x6xf32>
    %cst_60 = arith.constant 0.00102838012 : f32
    %221 = vector.broadcast %cst_60 : f32 to vector<6x6x6xf32>
    %222 = arith.mulf %221, %220 : vector<6x6x6xf32>
    %223 = vector.extract_strided_slice %219 {offsets = [0, 1, 0], sizes = [6, 6, 6], strides = [1, 1, 1]} : vector<6x16x6xf32> to vector<6x6x6xf32>
    %cst_61 = arith.constant 0.00759875821 : f32
    %224 = vector.broadcast %cst_61 : f32 to vector<6x6x6xf32>
    %225 = arith.mulf %224, %223 : vector<6x6x6xf32>
    %226 = arith.addf %222, %225 : vector<6x6x6xf32>
    %227 = vector.extract_strided_slice %219 {offsets = [0, 2, 0], sizes = [6, 6, 6], strides = [1, 1, 1]} : vector<6x16x6xf32> to vector<6x6x6xf32>
    %cst_62 = arith.constant 0.0360007733 : f32
    %228 = vector.broadcast %cst_62 : f32 to vector<6x6x6xf32>
    %229 = arith.mulf %228, %227 : vector<6x6x6xf32>
    %230 = arith.addf %226, %229 : vector<6x6x6xf32>
    %231 = vector.extract_strided_slice %219 {offsets = [0, 3, 0], sizes = [6, 6, 6], strides = [1, 1, 1]} : vector<6x16x6xf32> to vector<6x6x6xf32>
    %cst_63 = arith.constant 0.109360687 : f32
    %232 = vector.broadcast %cst_63 : f32 to vector<6x6x6xf32>
    %233 = arith.mulf %232, %231 : vector<6x6x6xf32>
    %234 = arith.addf %230, %233 : vector<6x6x6xf32>
    %235 = vector.extract_strided_slice %219 {offsets = [0, 4, 0], sizes = [6, 6, 6], strides = [1, 1, 1]} : vector<6x16x6xf32> to vector<6x6x6xf32>
    %cst_64 = arith.constant 0.213005543 : f32
    %236 = vector.broadcast %cst_64 : f32 to vector<6x6x6xf32>
    %237 = arith.mulf %236, %235 : vector<6x6x6xf32>
    %238 = arith.addf %234, %237 : vector<6x6x6xf32>
    %239 = vector.extract_strided_slice %219 {offsets = [0, 5, 0], sizes = [6, 6, 6], strides = [1, 1, 1]} : vector<6x16x6xf32> to vector<6x6x6xf32>
    %cst_65 = arith.constant 0.266011715 : f32
    %240 = vector.broadcast %cst_65 : f32 to vector<6x6x6xf32>
    %241 = arith.mulf %240, %239 : vector<6x6x6xf32>
    %242 = arith.addf %238, %241 : vector<6x6x6xf32>
    %243 = vector.extract_strided_slice %219 {offsets = [0, 6, 0], sizes = [6, 6, 6], strides = [1, 1, 1]} : vector<6x16x6xf32> to vector<6x6x6xf32>
    %cst_66 = arith.constant 0.213005543 : f32
    %244 = vector.broadcast %cst_66 : f32 to vector<6x6x6xf32>
    %245 = arith.mulf %244, %243 : vector<6x6x6xf32>
    %246 = arith.addf %242, %245 : vector<6x6x6xf32>
    %247 = vector.extract_strided_slice %219 {offsets = [0, 7, 0], sizes = [6, 6, 6], strides = [1, 1, 1]} : vector<6x16x6xf32> to vector<6x6x6xf32>
    %cst_67 = arith.constant 0.109360687 : f32
    %248 = vector.broadcast %cst_67 : f32 to vector<6x6x6xf32>
    %249 = arith.mulf %248, %247 : vector<6x6x6xf32>
    %250 = arith.addf %246, %249 : vector<6x6x6xf32>
    %251 = vector.extract_strided_slice %219 {offsets = [0, 8, 0], sizes = [6, 6, 6], strides = [1, 1, 1]} : vector<6x16x6xf32> to vector<6x6x6xf32>
    %cst_68 = arith.constant 0.0360007733 : f32
    %252 = vector.broadcast %cst_68 : f32 to vector<6x6x6xf32>
    %253 = arith.mulf %252, %251 : vector<6x6x6xf32>
    %254 = arith.addf %250, %253 : vector<6x6x6xf32>
    %255 = vector.extract_strided_slice %219 {offsets = [0, 9, 0], sizes = [6, 6, 6], strides = [1, 1, 1]} : vector<6x16x6xf32> to vector<6x6x6xf32>
    %cst_69 = arith.constant 0.00759875821 : f32
    %256 = vector.broadcast %cst_69 : f32 to vector<6x6x6xf32>
    %257 = arith.mulf %256, %255 : vector<6x6x6xf32>
    %258 = arith.addf %254, %257 : vector<6x6x6xf32>
    %259 = vector.extract_strided_slice %219 {offsets = [0, 10, 0], sizes = [6, 6, 6], strides = [1, 1, 1]} : vector<6x16x6xf32> to vector<6x6x6xf32>
    %cst_70 = arith.constant 0.00102838012 : f32
    %260 = vector.broadcast %cst_70 : f32 to vector<6x6x6xf32>
    %261 = arith.mulf %260, %259 : vector<6x6x6xf32>
    %262 = arith.addf %258, %261 : vector<6x6x6xf32>
    %263 = arith.mulf %3, %3 : vector<6x16x16xf32>
    %264 = vector.extract_strided_slice %263 {offsets = [0, 0, 0], sizes = [6, 16, 6], strides = [1, 1, 1]} : vector<6x16x16xf32> to vector<6x16x6xf32>
    %cst_71 = arith.constant 0.00102838012 : f32
    %265 = vector.broadcast %cst_71 : f32 to vector<6x16x6xf32>
    %266 = arith.mulf %265, %264 : vector<6x16x6xf32>
    %267 = vector.extract_strided_slice %263 {offsets = [0, 0, 1], sizes = [6, 16, 6], strides = [1, 1, 1]} : vector<6x16x16xf32> to vector<6x16x6xf32>
    %cst_72 = arith.constant 0.00759875821 : f32
    %268 = vector.broadcast %cst_72 : f32 to vector<6x16x6xf32>
    %269 = arith.mulf %268, %267 : vector<6x16x6xf32>
    %270 = arith.addf %266, %269 : vector<6x16x6xf32>
    %271 = vector.extract_strided_slice %263 {offsets = [0, 0, 2], sizes = [6, 16, 6], strides = [1, 1, 1]} : vector<6x16x16xf32> to vector<6x16x6xf32>
    %cst_73 = arith.constant 0.0360007733 : f32
    %272 = vector.broadcast %cst_73 : f32 to vector<6x16x6xf32>
    %273 = arith.mulf %272, %271 : vector<6x16x6xf32>
    %274 = arith.addf %270, %273 : vector<6x16x6xf32>
    %275 = vector.extract_strided_slice %263 {offsets = [0, 0, 3], sizes = [6, 16, 6], strides = [1, 1, 1]} : vector<6x16x16xf32> to vector<6x16x6xf32>
    %cst_74 = arith.constant 0.109360687 : f32
    %276 = vector.broadcast %cst_74 : f32 to vector<6x16x6xf32>
    %277 = arith.mulf %276, %275 : vector<6x16x6xf32>
    %278 = arith.addf %274, %277 : vector<6x16x6xf32>
    %279 = vector.extract_strided_slice %263 {offsets = [0, 0, 4], sizes = [6, 16, 6], strides = [1, 1, 1]} : vector<6x16x16xf32> to vector<6x16x6xf32>
    %cst_75 = arith.constant 0.213005543 : f32
    %280 = vector.broadcast %cst_75 : f32 to vector<6x16x6xf32>
    %281 = arith.mulf %280, %279 : vector<6x16x6xf32>
    %282 = arith.addf %278, %281 : vector<6x16x6xf32>
    %283 = vector.extract_strided_slice %263 {offsets = [0, 0, 5], sizes = [6, 16, 6], strides = [1, 1, 1]} : vector<6x16x16xf32> to vector<6x16x6xf32>
    %cst_76 = arith.constant 0.266011715 : f32
    %284 = vector.broadcast %cst_76 : f32 to vector<6x16x6xf32>
    %285 = arith.mulf %284, %283 : vector<6x16x6xf32>
    %286 = arith.addf %282, %285 : vector<6x16x6xf32>
    %287 = vector.extract_strided_slice %263 {offsets = [0, 0, 6], sizes = [6, 16, 6], strides = [1, 1, 1]} : vector<6x16x16xf32> to vector<6x16x6xf32>
    %cst_77 = arith.constant 0.213005543 : f32
    %288 = vector.broadcast %cst_77 : f32 to vector<6x16x6xf32>
    %289 = arith.mulf %288, %287 : vector<6x16x6xf32>
    %290 = arith.addf %286, %289 : vector<6x16x6xf32>
    %291 = vector.extract_strided_slice %263 {offsets = [0, 0, 7], sizes = [6, 16, 6], strides = [1, 1, 1]} : vector<6x16x16xf32> to vector<6x16x6xf32>
    %cst_78 = arith.constant 0.109360687 : f32
    %292 = vector.broadcast %cst_78 : f32 to vector<6x16x6xf32>
    %293 = arith.mulf %292, %291 : vector<6x16x6xf32>
    %294 = arith.addf %290, %293 : vector<6x16x6xf32>
    %295 = vector.extract_strided_slice %263 {offsets = [0, 0, 8], sizes = [6, 16, 6], strides = [1, 1, 1]} : vector<6x16x16xf32> to vector<6x16x6xf32>
    %cst_79 = arith.constant 0.0360007733 : f32
    %296 = vector.broadcast %cst_79 : f32 to vector<6x16x6xf32>
    %297 = arith.mulf %296, %295 : vector<6x16x6xf32>
    %298 = arith.addf %294, %297 : vector<6x16x6xf32>
    %299 = vector.extract_strided_slice %263 {offsets = [0, 0, 9], sizes = [6, 16, 6], strides = [1, 1, 1]} : vector<6x16x16xf32> to vector<6x16x6xf32>
    %cst_80 = arith.constant 0.00759875821 : f32
    %300 = vector.broadcast %cst_80 : f32 to vector<6x16x6xf32>
    %301 = arith.mulf %300, %299 : vector<6x16x6xf32>
    %302 = arith.addf %298, %301 : vector<6x16x6xf32>
    %303 = vector.extract_strided_slice %263 {offsets = [0, 0, 10], sizes = [6, 16, 6], strides = [1, 1, 1]} : vector<6x16x16xf32> to vector<6x16x6xf32>
    %cst_81 = arith.constant 0.00102838012 : f32
    %304 = vector.broadcast %cst_81 : f32 to vector<6x16x6xf32>
    %305 = arith.mulf %304, %303 : vector<6x16x6xf32>
    %306 = arith.addf %302, %305 : vector<6x16x6xf32>
    %307 = vector.extract_strided_slice %306 {offsets = [0, 0, 0], sizes = [6, 6, 6], strides = [1, 1, 1]} : vector<6x16x6xf32> to vector<6x6x6xf32>
    %cst_82 = arith.constant 0.00102838012 : f32
    %308 = vector.broadcast %cst_82 : f32 to vector<6x6x6xf32>
    %309 = arith.mulf %308, %307 : vector<6x6x6xf32>
    %310 = vector.extract_strided_slice %306 {offsets = [0, 1, 0], sizes = [6, 6, 6], strides = [1, 1, 1]} : vector<6x16x6xf32> to vector<6x6x6xf32>
    %cst_83 = arith.constant 0.00759875821 : f32
    %311 = vector.broadcast %cst_83 : f32 to vector<6x6x6xf32>
    %312 = arith.mulf %311, %310 : vector<6x6x6xf32>
    %313 = arith.addf %309, %312 : vector<6x6x6xf32>
    %314 = vector.extract_strided_slice %306 {offsets = [0, 2, 0], sizes = [6, 6, 6], strides = [1, 1, 1]} : vector<6x16x6xf32> to vector<6x6x6xf32>
    %cst_84 = arith.constant 0.0360007733 : f32
    %315 = vector.broadcast %cst_84 : f32 to vector<6x6x6xf32>
    %316 = arith.mulf %315, %314 : vector<6x6x6xf32>
    %317 = arith.addf %313, %316 : vector<6x6x6xf32>
    %318 = vector.extract_strided_slice %306 {offsets = [0, 3, 0], sizes = [6, 6, 6], strides = [1, 1, 1]} : vector<6x16x6xf32> to vector<6x6x6xf32>
    %cst_85 = arith.constant 0.109360687 : f32
    %319 = vector.broadcast %cst_85 : f32 to vector<6x6x6xf32>
    %320 = arith.mulf %319, %318 : vector<6x6x6xf32>
    %321 = arith.addf %317, %320 : vector<6x6x6xf32>
    %322 = vector.extract_strided_slice %306 {offsets = [0, 4, 0], sizes = [6, 6, 6], strides = [1, 1, 1]} : vector<6x16x6xf32> to vector<6x6x6xf32>
    %cst_86 = arith.constant 0.213005543 : f32
    %323 = vector.broadcast %cst_86 : f32 to vector<6x6x6xf32>
    %324 = arith.mulf %323, %322 : vector<6x6x6xf32>
    %325 = arith.addf %321, %324 : vector<6x6x6xf32>
    %326 = vector.extract_strided_slice %306 {offsets = [0, 5, 0], sizes = [6, 6, 6], strides = [1, 1, 1]} : vector<6x16x6xf32> to vector<6x6x6xf32>
    %cst_87 = arith.constant 0.266011715 : f32
    %327 = vector.broadcast %cst_87 : f32 to vector<6x6x6xf32>
    %328 = arith.mulf %327, %326 : vector<6x6x6xf32>
    %329 = arith.addf %325, %328 : vector<6x6x6xf32>
    %330 = vector.extract_strided_slice %306 {offsets = [0, 6, 0], sizes = [6, 6, 6], strides = [1, 1, 1]} : vector<6x16x6xf32> to vector<6x6x6xf32>
    %cst_88 = arith.constant 0.213005543 : f32
    %331 = vector.broadcast %cst_88 : f32 to vector<6x6x6xf32>
    %332 = arith.mulf %331, %330 : vector<6x6x6xf32>
    %333 = arith.addf %329, %332 : vector<6x6x6xf32>
    %334 = vector.extract_strided_slice %306 {offsets = [0, 7, 0], sizes = [6, 6, 6], strides = [1, 1, 1]} : vector<6x16x6xf32> to vector<6x6x6xf32>
    %cst_89 = arith.constant 0.109360687 : f32
    %335 = vector.broadcast %cst_89 : f32 to vector<6x6x6xf32>
    %336 = arith.mulf %335, %334 : vector<6x6x6xf32>
    %337 = arith.addf %333, %336 : vector<6x6x6xf32>
    %338 = vector.extract_strided_slice %306 {offsets = [0, 8, 0], sizes = [6, 6, 6], strides = [1, 1, 1]} : vector<6x16x6xf32> to vector<6x6x6xf32>
    %cst_90 = arith.constant 0.0360007733 : f32
    %339 = vector.broadcast %cst_90 : f32 to vector<6x6x6xf32>
    %340 = arith.mulf %339, %338 : vector<6x6x6xf32>
    %341 = arith.addf %337, %340 : vector<6x6x6xf32>
    %342 = vector.extract_strided_slice %306 {offsets = [0, 9, 0], sizes = [6, 6, 6], strides = [1, 1, 1]} : vector<6x16x6xf32> to vector<6x6x6xf32>
    %cst_91 = arith.constant 0.00759875821 : f32
    %343 = vector.broadcast %cst_91 : f32 to vector<6x6x6xf32>
    %344 = arith.mulf %343, %342 : vector<6x6x6xf32>
    %345 = arith.addf %341, %344 : vector<6x6x6xf32>
    %346 = vector.extract_strided_slice %306 {offsets = [0, 10, 0], sizes = [6, 6, 6], strides = [1, 1, 1]} : vector<6x16x6xf32> to vector<6x6x6xf32>
    %cst_92 = arith.constant 0.00102838012 : f32
    %347 = vector.broadcast %cst_92 : f32 to vector<6x6x6xf32>
    %348 = arith.mulf %347, %346 : vector<6x6x6xf32>
    %349 = arith.addf %345, %348 : vector<6x6x6xf32>
    %350 = arith.mulf %2, %3 : vector<6x16x16xf32>
    %351 = vector.extract_strided_slice %350 {offsets = [0, 0, 0], sizes = [6, 16, 6], strides = [1, 1, 1]} : vector<6x16x16xf32> to vector<6x16x6xf32>
    %cst_93 = arith.constant 0.00102838012 : f32
    %352 = vector.broadcast %cst_93 : f32 to vector<6x16x6xf32>
    %353 = arith.mulf %352, %351 : vector<6x16x6xf32>
    %354 = vector.extract_strided_slice %350 {offsets = [0, 0, 1], sizes = [6, 16, 6], strides = [1, 1, 1]} : vector<6x16x16xf32> to vector<6x16x6xf32>
    %cst_94 = arith.constant 0.00759875821 : f32
    %355 = vector.broadcast %cst_94 : f32 to vector<6x16x6xf32>
    %356 = arith.mulf %355, %354 : vector<6x16x6xf32>
    %357 = arith.addf %353, %356 : vector<6x16x6xf32>
    %358 = vector.extract_strided_slice %350 {offsets = [0, 0, 2], sizes = [6, 16, 6], strides = [1, 1, 1]} : vector<6x16x16xf32> to vector<6x16x6xf32>
    %cst_95 = arith.constant 0.0360007733 : f32
    %359 = vector.broadcast %cst_95 : f32 to vector<6x16x6xf32>
    %360 = arith.mulf %359, %358 : vector<6x16x6xf32>
    %361 = arith.addf %357, %360 : vector<6x16x6xf32>
    %362 = vector.extract_strided_slice %350 {offsets = [0, 0, 3], sizes = [6, 16, 6], strides = [1, 1, 1]} : vector<6x16x16xf32> to vector<6x16x6xf32>
    %cst_96 = arith.constant 0.109360687 : f32
    %363 = vector.broadcast %cst_96 : f32 to vector<6x16x6xf32>
    %364 = arith.mulf %363, %362 : vector<6x16x6xf32>
    %365 = arith.addf %361, %364 : vector<6x16x6xf32>
    %366 = vector.extract_strided_slice %350 {offsets = [0, 0, 4], sizes = [6, 16, 6], strides = [1, 1, 1]} : vector<6x16x16xf32> to vector<6x16x6xf32>
    %cst_97 = arith.constant 0.213005543 : f32
    %367 = vector.broadcast %cst_97 : f32 to vector<6x16x6xf32>
    %368 = arith.mulf %367, %366 : vector<6x16x6xf32>
    %369 = arith.addf %365, %368 : vector<6x16x6xf32>
    %370 = vector.extract_strided_slice %350 {offsets = [0, 0, 5], sizes = [6, 16, 6], strides = [1, 1, 1]} : vector<6x16x16xf32> to vector<6x16x6xf32>
    %cst_98 = arith.constant 0.266011715 : f32
    %371 = vector.broadcast %cst_98 : f32 to vector<6x16x6xf32>
    %372 = arith.mulf %371, %370 : vector<6x16x6xf32>
    %373 = arith.addf %369, %372 : vector<6x16x6xf32>
    %374 = vector.extract_strided_slice %350 {offsets = [0, 0, 6], sizes = [6, 16, 6], strides = [1, 1, 1]} : vector<6x16x16xf32> to vector<6x16x6xf32>
    %cst_99 = arith.constant 0.213005543 : f32
    %375 = vector.broadcast %cst_99 : f32 to vector<6x16x6xf32>
    %376 = arith.mulf %375, %374 : vector<6x16x6xf32>
    %377 = arith.addf %373, %376 : vector<6x16x6xf32>
    %378 = vector.extract_strided_slice %350 {offsets = [0, 0, 7], sizes = [6, 16, 6], strides = [1, 1, 1]} : vector<6x16x16xf32> to vector<6x16x6xf32>
    %cst_100 = arith.constant 0.109360687 : f32
    %379 = vector.broadcast %cst_100 : f32 to vector<6x16x6xf32>
    %380 = arith.mulf %379, %378 : vector<6x16x6xf32>
    %381 = arith.addf %377, %380 : vector<6x16x6xf32>
    %382 = vector.extract_strided_slice %350 {offsets = [0, 0, 8], sizes = [6, 16, 6], strides = [1, 1, 1]} : vector<6x16x16xf32> to vector<6x16x6xf32>
    %cst_101 = arith.constant 0.0360007733 : f32
    %383 = vector.broadcast %cst_101 : f32 to vector<6x16x6xf32>
    %384 = arith.mulf %383, %382 : vector<6x16x6xf32>
    %385 = arith.addf %381, %384 : vector<6x16x6xf32>
    %386 = vector.extract_strided_slice %350 {offsets = [0, 0, 9], sizes = [6, 16, 6], strides = [1, 1, 1]} : vector<6x16x16xf32> to vector<6x16x6xf32>
    %cst_102 = arith.constant 0.00759875821 : f32
    %387 = vector.broadcast %cst_102 : f32 to vector<6x16x6xf32>
    %388 = arith.mulf %387, %386 : vector<6x16x6xf32>
    %389 = arith.addf %385, %388 : vector<6x16x6xf32>
    %390 = vector.extract_strided_slice %350 {offsets = [0, 0, 10], sizes = [6, 16, 6], strides = [1, 1, 1]} : vector<6x16x16xf32> to vector<6x16x6xf32>
    %cst_103 = arith.constant 0.00102838012 : f32
    %391 = vector.broadcast %cst_103 : f32 to vector<6x16x6xf32>
    %392 = arith.mulf %391, %390 : vector<6x16x6xf32>
    %393 = arith.addf %389, %392 : vector<6x16x6xf32>
    %394 = vector.extract_strided_slice %393 {offsets = [0, 0, 0], sizes = [6, 6, 6], strides = [1, 1, 1]} : vector<6x16x6xf32> to vector<6x6x6xf32>
    %cst_104 = arith.constant 0.00102838012 : f32
    %395 = vector.broadcast %cst_104 : f32 to vector<6x6x6xf32>
    %396 = arith.mulf %395, %394 : vector<6x6x6xf32>
    %397 = vector.extract_strided_slice %393 {offsets = [0, 1, 0], sizes = [6, 6, 6], strides = [1, 1, 1]} : vector<6x16x6xf32> to vector<6x6x6xf32>
    %cst_105 = arith.constant 0.00759875821 : f32
    %398 = vector.broadcast %cst_105 : f32 to vector<6x6x6xf32>
    %399 = arith.mulf %398, %397 : vector<6x6x6xf32>
    %400 = arith.addf %396, %399 : vector<6x6x6xf32>
    %401 = vector.extract_strided_slice %393 {offsets = [0, 2, 0], sizes = [6, 6, 6], strides = [1, 1, 1]} : vector<6x16x6xf32> to vector<6x6x6xf32>
    %cst_106 = arith.constant 0.0360007733 : f32
    %402 = vector.broadcast %cst_106 : f32 to vector<6x6x6xf32>
    %403 = arith.mulf %402, %401 : vector<6x6x6xf32>
    %404 = arith.addf %400, %403 : vector<6x6x6xf32>
    %405 = vector.extract_strided_slice %393 {offsets = [0, 3, 0], sizes = [6, 6, 6], strides = [1, 1, 1]} : vector<6x16x6xf32> to vector<6x6x6xf32>
    %cst_107 = arith.constant 0.109360687 : f32
    %406 = vector.broadcast %cst_107 : f32 to vector<6x6x6xf32>
    %407 = arith.mulf %406, %405 : vector<6x6x6xf32>
    %408 = arith.addf %404, %407 : vector<6x6x6xf32>
    %409 = vector.extract_strided_slice %393 {offsets = [0, 4, 0], sizes = [6, 6, 6], strides = [1, 1, 1]} : vector<6x16x6xf32> to vector<6x6x6xf32>
    %cst_108 = arith.constant 0.213005543 : f32
    %410 = vector.broadcast %cst_108 : f32 to vector<6x6x6xf32>
    %411 = arith.mulf %410, %409 : vector<6x6x6xf32>
    %412 = arith.addf %408, %411 : vector<6x6x6xf32>
    %413 = vector.extract_strided_slice %393 {offsets = [0, 5, 0], sizes = [6, 6, 6], strides = [1, 1, 1]} : vector<6x16x6xf32> to vector<6x6x6xf32>
    %cst_109 = arith.constant 0.266011715 : f32
    %414 = vector.broadcast %cst_109 : f32 to vector<6x6x6xf32>
    %415 = arith.mulf %414, %413 : vector<6x6x6xf32>
    %416 = arith.addf %412, %415 : vector<6x6x6xf32>
    %417 = vector.extract_strided_slice %393 {offsets = [0, 6, 0], sizes = [6, 6, 6], strides = [1, 1, 1]} : vector<6x16x6xf32> to vector<6x6x6xf32>
    %cst_110 = arith.constant 0.213005543 : f32
    %418 = vector.broadcast %cst_110 : f32 to vector<6x6x6xf32>
    %419 = arith.mulf %418, %417 : vector<6x6x6xf32>
    %420 = arith.addf %416, %419 : vector<6x6x6xf32>
    %421 = vector.extract_strided_slice %393 {offsets = [0, 7, 0], sizes = [6, 6, 6], strides = [1, 1, 1]} : vector<6x16x6xf32> to vector<6x6x6xf32>
    %cst_111 = arith.constant 0.109360687 : f32
    %422 = vector.broadcast %cst_111 : f32 to vector<6x6x6xf32>
    %423 = arith.mulf %422, %421 : vector<6x6x6xf32>
    %424 = arith.addf %420, %423 : vector<6x6x6xf32>
    %425 = vector.extract_strided_slice %393 {offsets = [0, 8, 0], sizes = [6, 6, 6], strides = [1, 1, 1]} : vector<6x16x6xf32> to vector<6x6x6xf32>
    %cst_112 = arith.constant 0.0360007733 : f32
    %426 = vector.broadcast %cst_112 : f32 to vector<6x6x6xf32>
    %427 = arith.mulf %426, %425 : vector<6x6x6xf32>
    %428 = arith.addf %424, %427 : vector<6x6x6xf32>
    %429 = vector.extract_strided_slice %393 {offsets = [0, 9, 0], sizes = [6, 6, 6], strides = [1, 1, 1]} : vector<6x16x6xf32> to vector<6x6x6xf32>
    %cst_113 = arith.constant 0.00759875821 : f32
    %430 = vector.broadcast %cst_113 : f32 to vector<6x6x6xf32>
    %431 = arith.mulf %430, %429 : vector<6x6x6xf32>
    %432 = arith.addf %428, %431 : vector<6x6x6xf32>
    %433 = vector.extract_strided_slice %393 {offsets = [0, 10, 0], sizes = [6, 6, 6], strides = [1, 1, 1]} : vector<6x16x6xf32> to vector<6x6x6xf32>
    %cst_114 = arith.constant 0.00102838012 : f32
    %434 = vector.broadcast %cst_114 : f32 to vector<6x6x6xf32>
    %435 = arith.mulf %434, %433 : vector<6x6x6xf32>
    %436 = arith.addf %432, %435 : vector<6x6x6xf32>
    %437 = arith.mulf %89, %89 : vector<6x6x6xf32>
    %438 = arith.mulf %175, %175 : vector<6x6x6xf32>
    %439 = arith.mulf %89, %175 : vector<6x6x6xf32>
    %440 = arith.subf %262, %437 : vector<6x6x6xf32>
    %441 = arith.subf %349, %438 : vector<6x6x6xf32>
    %442 = arith.subf %436, %439 : vector<6x6x6xf32>
    %cst_115 = arith.constant 2.000000e+00 : f32
    %443 = vector.broadcast %cst_115 : f32 to vector<6x6x6xf32>
    %444 = arith.mulf %443, %442 : vector<6x6x6xf32>
    %445 = vector.broadcast %1 : f32 to vector<6x6x6xf32>
    %446 = arith.addf %444, %445 : vector<6x6x6xf32>
    %447 = arith.addf %440, %441 : vector<6x6x6xf32>
    %448 = vector.broadcast %1 : f32 to vector<6x6x6xf32>
    %449 = arith.addf %447, %448 : vector<6x6x6xf32>
    %450 = arith.divf %446, %449 : vector<6x6x6xf32>
    %cst_116 = arith.constant 2.000000e+00 : f32
    %451 = vector.broadcast %cst_116 : f32 to vector<6x6x6xf32>
    %452 = arith.mulf %451, %439 : vector<6x6x6xf32>
    %453 = vector.broadcast %0 : f32 to vector<6x6x6xf32>
    %454 = arith.addf %452, %453 : vector<6x6x6xf32>
    %455 = arith.mulf %454, %446 : vector<6x6x6xf32>
    %456 = arith.addf %437, %438 : vector<6x6x6xf32>
    %457 = vector.broadcast %0 : f32 to vector<6x6x6xf32>
    %458 = arith.addf %456, %457 : vector<6x6x6xf32>
    %459 = arith.mulf %458, %449 : vector<6x6x6xf32>
    %460 = arith.divf %455, %459 : vector<6x6x6xf32>
    %461 = vector.shape_cast %460 : vector<6x6x6xf32> to vector<1x6x6x6xf32>
    %cst_117 = arith.constant dense<0.000000e+00> : vector<1xf32>
    %462 = vector.multi_reduction <add>, %461, %cst_117 [1, 2, 3] : vector<1x6x6x6xf32> to vector<1xf32>
    %463 = vector.shape_cast %462 : vector<1xf32> to vector<1x1x1x1xf32>
    %464 = vector.extract %463[0, 0, 0, 0] : f32 from vector<1x1x1x1xf32>
    %465 = vector.broadcast %464 : f32 to vector<1x1x1xf32>
    %c0_118 = arith.constant 0 : index
    %c0_119 = arith.constant 0 : index
    %c0_120 = arith.constant 0 : index
    %466 = vector.load %arg4[%c0_118, %c0_119, %c0_120] : memref<1x1x1xf32, #tpu.memory_space<vmem>>, vector<1x1x1xf32>
    tpu.vector_store %arg4[%c0_118, %c0_119, %c0_120], %465 {strides = array<i32>} : memref<1x1x1xf32, #tpu.memory_space<vmem>>, vector<1x1x1xf32>,
    %467 = vector.shape_cast %450 : vector<6x6x6xf32> to vector<1x6x6x6xf32>
    %cst_121 = arith.constant dense<0.000000e+00> : vector<1xf32>
    %468 = vector.multi_reduction <add>, %467, %cst_121 [1, 2, 3] : vector<1x6x6x6xf32> to vector<1xf32>
    %469 = vector.shape_cast %468 : vector<1xf32> to vector<1x1x1x1xf32>
    %470 = vector.extract %469[0, 0, 0, 0] : f32 from vector<1x1x1x1xf32>
    %471 = vector.broadcast %470 : f32 to vector<1x1x1xf32>
    %c0_122 = arith.constant 0 : index
    %c0_123 = arith.constant 0 : index
    %c0_124 = arith.constant 0 : index
    %472 = vector.load %arg5[%c0_122, %c0_123, %c0_124] : memref<1x1x1xf32, #tpu.memory_space<vmem>>, vector<1x1x1xf32>
    tpu.vector_store %arg5[%c0_122, %c0_123, %c0_124], %471 {strides = array<i32>} : memref<1x1x1xf32, #tpu.memory_space<vmem>>, vector<1x1x1xf32>,
    return
  }
  func.func @transform_0(%arg0: i32) -> i32 {
    %c0_i32 = arith.constant 0 : i32
    %c0_i32_0 = arith.constant 0 : i32
    return %c0_i32 : i32
  }
  func.func @transform_1(%arg0: i32) -> (i32, i32, i32) {
    %c0_i32 = arith.constant 0 : i32
    %c0_i32_0 = arith.constant 0 : i32
    %c0_i32_1 = arith.constant 0 : i32
    return %arg0, %c0_i32, %c0_i32_0 : i32, i32, i32
  }
  func.func @transform_2(%arg0: i32) -> (i32, i32, i32) {
    %c0_i32 = arith.constant 0 : i32
    %c0_i32_0 = arith.constant 0 : i32
    %c0_i32_1 = arith.constant 0 : i32
    return %arg0, %c0_i32, %c0_i32_0 : i32, i32, i32
  }
  func.func @transform_3(%arg0: i32) -> (i32, i32, i32) {
    %c0_i32 = arith.constant 0 : i32
    %c0_i32_0 = arith.constant 0 : i32
    %c0_i32_1 = arith.constant 0 : i32
    return %arg0, %c0_i32, %c0_i32_0 : i32, i32, i32
  }
  func.func @transform_4(%arg0: i32) -> (i32, i32, i32) {
    %c0_i32 = arith.constant 0 : i32
    %c0_i32_0 = arith.constant 0 : i32
    %c0_i32_1 = arith.constant 0 : i32
    return %arg0, %c0_i32, %c0_i32_0 : i32, i32, i32
  }
}

</mosaic_0001>

<bundles_post_ra>
// kernel: tpu_custom_call.1
= control target key start
LH: loop header
LB: loop body
LE: loop exit
PB: predicated region body
PF: predicated region fallthrough
CT: control target
= control target key end

     0   :  { %10 = vsyncpa [#allocation5], 0  ;;  %s11175_s0 = inlined_call_operand.hbm [shape: f32[2], index: 0, kind: input, shape index: {}]   ;;  %s11176_s1 = inlined_call_operand.hbm [shape: f32[6,16,16], index: 1, kind: input, shape index: {}]   ;;  %s11177_s2 = inlined_call_operand.hbm [shape: f32[6,16,16], index: 2, kind: input, shape index: {}]   ;;  %s11178_s3 = inlined_call_operand.hbm [shape: f32[1,1,1], index: 3, kind: output, shape index: {0}]   ;;  %s11179_s4 = inlined_call_operand.hbm [shape: f32[1,1,1], index: 4, kind: output, shape index: {1}]  }
   0x1   :  { %11 = vsyncpa [#allocation3], 0 }
   0x2   :  { %12 = vsyncpa [#allocation8], 0 }
   0x3   :  { %13 = vsyncpa [#allocation4], 0 }
   0x4   :  { %14 = vsyncpa [#allocation11], 0  ;;  %s5337_s17 = scalar_lea.hbm %s11175_s0, 16 }
   0x5   :  { %p5338_p0 = scmp.ne.s32.totalorder %s11175_s0, %s5337_s17  ;;  %p5341_p1 = scmp.lt.u32.totalorder %s5337_s17, %s11175_s0 }
   0x7   :  { %p5343_p2 = pnand %p5341_p1, %p5338_p0 }
   0x9   :  { %5346 = shalt.err (!%p5343_p2)
}
   0xa   :  { %s5445_s22 = smov [#allocation2]   ;;  %s5446_s25 = smov [#allocation6]  }
   0xb   :  { %22 = dma.hbm_to_smem %s11175_s0, 16, %s5445_s22, [#allocation5]  }
   0xc   :  { %s28_s26 = sshll.u32 %s5446_s25, 4  ;;  %s5347_s29 = scalar_lea.hbm %s11176_s1, 1536  ;;  %s29_s26 = int_to_ptr.vmem [resolvable:$true] %s28_s26 }
   0xd   :  { %p5348_p3 = scmp.ne.s32.totalorder %s11176_s1, %s5347_s29  ;;  %p5351_p4 = scmp.lt.u32.totalorder %s5347_s29, %s11176_s1 }
   0xf   :  { %p5353_p5 = pnand %p5351_p4, %p5348_p3 }
  0x11   :  { %5356 = shalt.err (!%p5353_p5)
}
  0x12   :  { %s5357_s8 = scalar_lea.vmem %s29_s26, 1536  ;;  %p5362_p7 = scmp.lt.s32.totalorder %s29_s26, %s29_s26 }
  0x13   :  { %p5358_p6 = scmp.ne.s32.totalorder %s29_s26, %s5357_s8  ;;  %p5363_p8 = scmp.lt.s32.totalorder %s5357_s8, %s5357_s8 }
  0x15   :  { %p5364_p9 = por %p5363_p8, %p5362_p7 }
  0x17   :  { %p5365_p10 = pnand %p5364_p9, %p5358_p6 }
  0x19   :  { %5368 = shalt.err (!%p5365_p10)
}
  0x1a   :  { %s5447_s0 = smov 128   ;;  %s5448_s9 = smov 8  }
  0x1b   :  { %34 = dma.hbm_to_vmem [thread:$0]  %s11176_s1, 1536, %s29_s26, [#allocation3], %s5447_s0, %s5447_s0, %s5448_s9  }
  0x1c   :  { %s5449_s12 = smov [#allocation7]   ;;  %s5369_s16 = scalar_lea.hbm %s11177_s2, 1536 }
  0x1d   :  { %s40_s13 = sshll.u32 %s5449_s12, 4  ;;  %p5370_p11 = scmp.ne.s32.totalorder %s11177_s2, %s5369_s16  ;;  %s41_s13 = int_to_ptr.vmem [resolvable:$true] %s40_s13 }
  0x1e   :  { %p5373_p12 = scmp.lt.u32.totalorder %s5369_s16, %s11177_s2 }
  0x20   :  { %p5375_p13 = pnand %p5373_p12, %p5370_p11 }
  0x22   :  { %5378 = shalt.err (!%p5375_p13)
}
  0x23   :  { %s5379_s21 = scalar_lea.vmem %s41_s13, 1536  ;;  %p5384_p1 = scmp.lt.s32.totalorder %s41_s13, %s41_s13 }
  0x24   :  { %p5380_p0 = scmp.ne.s32.totalorder %s41_s13, %s5379_s21  ;;  %p5385_p2 = scmp.lt.s32.totalorder %s5379_s21, %s5379_s21 }
  0x26   :  { %p5386_p3 = por %p5385_p2, %p5384_p1 }
  0x28   :  { %p5387_p4 = pnand %p5386_p3, %p5380_p0 }
  0x2a   :  { %5390 = shalt.err (!%p5387_p4)
}
  0x2b   :  { %46 = dma.hbm_to_vmem [thread:$0]  %s11177_s2, 1536, %s41_s13, [#allocation8], %s5447_s0, %s5447_s0, %s5448_s9  }
  0x2c   :  { %5435 = dma.done.wait [#allocation5], 16  }
  0x2d   :  { %5436 = vsyncadd [#allocation5], 4294967280 }
  0x2e   :  { %5437 = dma.done.wait [#allocation3], 1536  }
  0x2f   :  { %5438 = vsyncadd [#allocation3], 4294965760 }
  0x30   :  { %5439 = dma.done.wait [#allocation8], 1536  }
  0x31   :  { %5440 = vsyncadd [#allocation8], 4294965760 }
  0x32   :  { %56 = sfence }
  0x33   :  { %v5523_v0 = vld [vmem:[#allocation6 + $0x10] sm:$0xff]  ;;  %v5525_v1 = vld [vmem:[#allocation6] sm:$0xff]  ;;  %v5527_v2 = vld [vmem:[#allocation6 + $0x18] sm:$0xff]  ;;  %s5450_s2 = smov 127   ;;  %s5451_s23 = smov 126   ;;  %vm797_vm0 = vcmask 1044480  }
  0x34   :  { %v5530_v3 = vmul.f32 0.007598758, %v5523_v0  ;;  %v5533_v4 = vmul.f32 0.007598758, %v5525_v1  ;;  %v5535_v5 = vld [vmem:[#allocation6 + $0x8] sm:$0xff]  ;;  %v5549_v9 = vld [vmem:[#allocation6 + $0x20] sm:$0xff] }
  0x35   :  { %v5542_v6 = vmul.f32 0.007598758, %v5527_v2  ;;  %v5545_v7 = vmul.f32 0.007598758, %v5535_v5  ;;  %v5547_v8 = vld [vmem:[#allocation6 + $0x28] sm:$0xff]  ;;  %11360 = vst [vmem:[#allocation17_spill] sm:$0xff] %v5549_v9 }
  0x36   :  { %123 = vrot.lane.b32.xlu1 %v5530_v3, %s5450_s2  ;;  %119 = vrot.lane.b32.xlu0 %v5533_v4, %s5450_s2  ;;  %v5556_v10 = vmul.f32 0.007598758, %v5547_v8  ;;  %v5559_v11 = vmul.f32 0.007598758, %v5549_v9  ;;  %v5561_v12 = vld [vmem:[#allocation6 + $0x38] sm:$0xff]  ;;  %v5563_v13 = vld [vmem:[#allocation6 + $0x30] sm:$0xff] }
  0x37   :  { %11361 = vst [vmem:[#allocation18_spill] sm:$0xff] %v5561_v12  ;;  %v5570_v14 = vmul.f32 0.007598758, %v5561_v12  ;;  %v5573_v15 = vmul.f32 0.007598758, %v5563_v13  ;;  %v5575_v16 = vld [vmem:[#allocation6 + $0x48] sm:$0xff] }
  0x38   :  { %v5577_v17 = vld [vmem:[#allocation6 + $0x40] sm:$0xff]  ;;  %v5584_v18 = vmul.f32 0.007598758, %v5575_v16  ;;  %v5589_v20 = vld [vmem:[#allocation6 + $0x58] sm:$0xff]  ;;  %v5591_v21 = vld [vmem:[#allocation6 + $0x50] sm:$0xff]  ;;  %s5452_s24 = smov 125  }
  0x39   :  { %v5587_v19 = vmul.f32 0.007598758, %v5577_v17  ;;  %v5598_v22 = vmul.f32 0.007598758, %v5589_v20  ;;  %v5601_v23 = vmul.f32 0.007598758, %v5591_v21 }
  0x3a   :  { %125 = vrot.lane.b32.xlu1 %v5542_v6, %s5450_s2  ;;  %121 = vrot.lane.b32.xlu0 %v5545_v7, %s5450_s2  ;;  %v5608_v24 = vmul.f32 0.036000773, %v5535_v5  ;;  %v5611_v25 = vmul.f32 0.036000773, %v5525_v1  ;;  %v5618_v26 = vmul.f32 0.036000773, %v5527_v2 }
  0x3b   :  { %11362 = vst [vmem:[#allocation19_spill] sm:$0xff] %v5598_v22  ;;  %11363 = vst [vmem:[#allocation20_spill] sm:$0xff] %v5601_v23  ;;  %v5621_v27 = vmul.f32 0.036000773, %v5523_v0  ;;  %v5628_v28 = vmul.f32 0.036000773, %v5547_v8 }
  0x3c   :  { %v5631_v29 = vmul.f32 0.036000773, %v5549_v9  ;;  %v5638_v30 = vmul.f32 0.036000773, %v5561_v12  ;;  %v5641_v31 = vmul.f32 0.036000773, %v5563_v13 }
  0x3d   :  { %v5648_v32 = vmul.f32 0.036000773, %v5575_v16  ;;  %v5651_v33 = vmul.f32 0.036000773, %v5577_v17  ;;  %v5658_v34 = vmul.f32 0.036000773, %v5589_v20 }
  0x3e   :  { %129 = vrot.lane.b32.xlu1 %v5556_v10, %s5450_s2  ;;  %127 = vrot.lane.b32.xlu0 %v5559_v11, %s5450_s2  ;;  %v5661_v35 = vmul.f32 0.036000773, %v5591_v21  ;;  %v5668_v36 = vmul.f32 0.10936069, %v5535_v5  ;;  %v5671_v37 = vmul.f32 0.10936069, %v5525_v1 }
  0x3f   :  { %v5678_v38 = vmul.f32 0.10936069, %v5527_v2  ;;  %v5681_v39 = vmul.f32 0.10936069, %v5523_v0  ;;  %v5688_v40 = vmul.f32 0.10936069, %v5547_v8 }
  0x40   :  { %v5691_v41 = vmul.f32 0.10936069, %v5549_v9  ;;  %v5698_v42 = vmul.f32 0.10936069, %v5561_v12  ;;  %v5701_v43 = vmul.f32 0.10936069, %v5563_v13 }
  0x41   :  { %v5708_v44 = vmul.f32 0.10936069, %v5575_v16  ;;  %v5711_v45 = vmul.f32 0.10936069, %v5577_v17  ;;  %v5718_v46 = vmul.f32 0.10936069, %v5589_v20 }
  0x42   :  { %133 = vrot.lane.b32.xlu1 %v5570_v14, %s5450_s2  ;;  %131 = vrot.lane.b32.xlu0 %v5573_v15, %s5450_s2  ;;  %v5721_v47 = vmul.f32 0.10936069, %v5591_v21  ;;  %v312_v48 = vmul.f32 0.21300554, %v5535_v5  ;;  %v311_v49 = vmul.f32 0.21300554, %v5525_v1 }
  0x43   :  { %s5453_s25 = smov 124   ;;  %v314_v50 = vmul.f32 0.21300554, %v5527_v2  ;;  %v313_v51 = vmul.f32 0.21300554, %v5523_v0  ;;  %s5454_s26 = smov 123  }
  0x44   :  { %v316_v52 = vmul.f32 0.21300554, %v5547_v8  ;;  %v315_v53 = vmul.f32 0.21300554, %v5549_v9  ;;  %v318_v54 = vmul.f32 0.21300554, %v5561_v12 }
  0x45   :  { %v317_v55 = vmul.f32 0.21300554, %v5563_v13  ;;  %v320_v56 = vmul.f32 0.21300554, %v5575_v16  ;;  %v319_v57 = vmul.f32 0.21300554, %v5577_v17 }
  0x46   :  { %137 = vrot.lane.b32.xlu1 %v5584_v18, %s5450_s2  ;;  %135 = vrot.lane.b32.xlu0 %v5587_v19, %s5450_s2  ;;  %v322_v58 = vmul.f32 0.21300554, %v5589_v20  ;;  %v321_v59 = vmul.f32 0.21300554, %v5591_v21  ;;  %v384_v60 = vmul.f32 0.26601171, %v5535_v5 }
  0x47   :  { %v383_v61 = vmul.f32 0.26601171, %v5525_v1  ;;  %v386_v62 = vmul.f32 0.26601171, %v5527_v2  ;;  %v385_v63 = vmul.f32 0.26601171, %v5523_v0 }
  0x48   :  { %s5455_s27 = smov 122   ;;  %s5456_s28 = smov 121   ;;  %vm852_vm1 = vcmask 1043456   ;;  %vm907_vm2 = vcmask 1042432   ;;  %vm938_vm3 = vcmask 1041408   ;;  %vm969_vm4 = vcmask 1040384  }
  0x49   :  { %s5457_s29 = smov 120   ;;  %s5458_s30 = smov 119   ;;  %vm5166_vm5 = vcmask 46080   ;;  %vm5188_vm6 = vcmask 0  }
  0x4a   :  { %141 = vrot.lane.b32.xlu1 %v5598_v22, %s5450_s2  ;;  %139 = vrot.lane.b32.xlu0 %v5601_v23, %s5450_s2  ;;  %v388_v23 = vmul.f32 0.26601171, %v5547_v8  ;;  %v387_v22 = vmul.f32 0.26601171, %v5549_v9  ;;  %s5459_s5 = smov 118   ;;  %s10739_s6 = sld [smem:[#allocation2 + $0x1]] }
  0x4b   :  { %s10755_s7 = sld [smem:[#allocation2]]  ;;  %s5460_s8 = smov [#allocation9]  }
  0x4c   :  { %s5218_s0 = sshll.u32 %s5460_s8, 4  ;;  %s5461_s9 = smov [#allocation10]   ;;  %s5219_s0 = int_to_ptr.vmem [resolvable:$true] %s5218_s0 }
  0x4d   :  { %s5228_s10 = sshll.u32 %s5461_s9, 4  ;;  %s5391_s13 = scalar_lea.vmem %s5219_s0, 16  ;;  %s11141_s10 = int_to_ptr.vmem [resolvable:$true] %s5228_s10 }
  0x4e   :  { %193 = vrot.lane.b32.xlu1 %v5608_v24, %s5451_s23  ;;  %191 = vrot.lane.b32.xlu0 %v5611_v25, %s5451_s23  ;;  %p5392_p5 = scmp.ne.s32.totalorder %s5219_s0, %s5391_s13  ;;  %s5395_s14 = scalar_lea.vmem %s5219_s0, 32 }
  0x4f   :  { %p5396_p6 = scmp.lt.s32.totalorder %s5219_s0, %s5219_s0  ;;  %p5397_p7 = scmp.lt.s32.totalorder %s5395_s14, %s5391_s13 }
  0x51   :  { %p5398_p8 = por %p5397_p7, %p5396_p6 }
  0x52   :  { %197 = vrot.lane.b32.xlu1 %v5618_v26, %s5451_s23  ;;  %195 = vrot.lane.b32.xlu0 %v5621_v27, %s5451_s23 }
  0x53   :  { %p5399_p9 = pnand %p5398_p8, %p5392_p5 }
  0x56   :  { %201 = vrot.lane.b32.xlu1 %v5628_v28, %s5451_s23  ;;  %199 = vrot.lane.b32.xlu0 %v5631_v29, %s5451_s23 }
  0x5a   :  { %205 = vrot.lane.b32.xlu1 %v5638_v30, %s5451_s23  ;;  %203 = vrot.lane.b32.xlu0 %v5641_v31, %s5451_s23 }
  0x5e   :  { %209 = vrot.lane.b32.xlu1 %v5648_v32, %s5451_s23  ;;  %207 = vrot.lane.b32.xlu0 %v5651_v33, %s5451_s23 }
  0x62   :  { %213 = vrot.lane.b32.xlu1 %v5658_v34, %s5451_s23  ;;  %211 = vrot.lane.b32.xlu0 %v5661_v35, %s5451_s23 }
  0x66   :  { %265 = vrot.lane.b32.xlu1 %v5668_v36, %s5452_s24  ;;  %263 = vrot.lane.b32.xlu0 %v5671_v37, %s5452_s24 }
  0x6a   :  { %269 = vrot.lane.b32.xlu1 %v5678_v38, %s5452_s24  ;;  %267 = vrot.lane.b32.xlu0 %v5681_v39, %s5452_s24 }
  0x6e   :  { %273 = vrot.lane.b32.xlu1 %v5688_v40, %s5452_s24  ;;  %271 = vrot.lane.b32.xlu0 %v5691_v41, %s5452_s24 }
  0x72   :  { %277 = vrot.lane.b32.xlu1 %v5698_v42, %s5452_s24  ;;  %275 = vrot.lane.b32.xlu0 %v5701_v43, %s5452_s24 }
  0x76   :  { %281 = vrot.lane.b32.xlu1 %v5708_v44, %s5452_s24  ;;  %279 = vrot.lane.b32.xlu0 %v5711_v45, %s5452_s24 }
  0x7a   :  { %285 = vrot.lane.b32.xlu1 %v5718_v46, %s5452_s24  ;;  %283 = vrot.lane.b32.xlu0 %v5721_v47, %s5452_s24 }
  0x7e   :  { %337 = vrot.lane.b32.xlu1 %v312_v48, %s5453_s25  ;;  %335 = vrot.lane.b32.xlu0 %v311_v49, %s5453_s25 }
  0x82   :  { %341 = vrot.lane.b32.xlu1 %v314_v50, %s5453_s25  ;;  %339 = vrot.lane.b32.xlu0 %v313_v51, %s5453_s25 }
  0x86   :  { %345 = vrot.lane.b32.xlu1 %v316_v52, %s5453_s25  ;;  %343 = vrot.lane.b32.xlu0 %v315_v53, %s5453_s25 }
  0x8a   :  { %349 = vrot.lane.b32.xlu1 %v318_v54, %s5453_s25  ;;  %347 = vrot.lane.b32.xlu0 %v317_v55, %s5453_s25 }
  0x8e   :  { %353 = vrot.lane.b32.xlu1 %v320_v56, %s5453_s25  ;;  %351 = vrot.lane.b32.xlu0 %v319_v57, %s5453_s25 }
  0x92   :  { %357 = vrot.lane.b32.xlu1 %v322_v58, %s5453_s25  ;;  %355 = vrot.lane.b32.xlu0 %v321_v59, %s5453_s25 }
  0x96   :  { %409 = vrot.lane.b32.xlu1 %v384_v60, %s5454_s26  ;;  %407 = vrot.lane.b32.xlu0 %v383_v61, %s5454_s26  ;;  %v390_v60 = vmul.f32 0.26601171, %v5561_v12  ;;  %v389_v61 = vmul.f32 0.26601171, %v5563_v13 }
  0x9a   :  { %413 = vrot.lane.b32.xlu1 %v386_v62, %s5454_s26  ;;  %411 = vrot.lane.b32.xlu0 %v385_v63, %s5454_s26  ;;  %v392_v62 = vmul.f32 0.26601171, %v5575_v16  ;;  %v391_v63 = vmul.f32 0.26601171, %v5577_v17 }
  0x9e   :  { %417 = vrot.lane.b32.xlu1 %v388_v23, %s5454_s26  ;;  %415 = vrot.lane.b32.xlu0 %v387_v22, %s5454_s26  ;;  %v394_v23 = vmul.f32 0.26601171, %v5589_v20  ;;  %v393_v22 = vmul.f32 0.26601171, %v5591_v21 }
  0xa2   :  { %421 = vrot.lane.b32.xlu1 %v390_v60, %s5454_s26  ;;  %419 = vrot.lane.b32.xlu0 %v389_v61, %s5454_s26 }
  0xa6   :  { %425 = vrot.lane.b32.xlu1 %v392_v62, %s5454_s26  ;;  %423 = vrot.lane.b32.xlu0 %v391_v63, %s5454_s26 }
  0xa8   :  { %v5773_v9 = vpop.permute.xlu1 %123  ;;  %v5775_v12 = vpop.permute.xlu0 %119 }
  0xa9   :  { %11364 = vst [vmem:[#allocation21_spill] sm:$0xff] %v5773_v9  ;;  %11365 = vst [vmem:[#allocation22_spill] sm:$0xff] %v5775_v12 }
  0xaa   :  { %429 = vrot.lane.b32.xlu1 %v394_v23, %s5454_s26  ;;  %427 = vrot.lane.b32.xlu0 %v393_v22, %s5454_s26 }
  0xac   :  { %v5779_v60 = vpop.permute.xlu1 %125  ;;  %v5781_v61 = vpop.permute.xlu0 %121 }
  0xad   :  { %11366 = vst [vmem:[#allocation23_spill] sm:$0xff] %v5779_v60  ;;  %11367 = vst [vmem:[#allocation24_spill] sm:$0xff] %v5781_v61 }
  0xae   :  { %457 = vrot.lane.b32.xlu1 %v312_v48, %s5455_s27  ;;  %455 = vrot.lane.b32.xlu0 %v311_v49, %s5455_s27 }
  0xb0   :  { %v5785_v62 = vpop.permute.xlu1 %129  ;;  %v5787_v63 = vpop.permute.xlu0 %127 }
  0xb1   :  { %11368 = vst [vmem:[#allocation25_spill] sm:$0xff] %v5785_v62  ;;  %11369 = vst [vmem:[#allocation26_spill] sm:$0xff] %v5787_v63 }
  0xb2   :  { %461 = vrot.lane.b32.xlu1 %v314_v50, %s5455_s27  ;;  %459 = vrot.lane.b32.xlu0 %v313_v51, %s5455_s27 }
  0xb4   :  { %v5791_v23 = vpop.permute.xlu1 %133  ;;  %v5793_v22 = vpop.permute.xlu0 %131 }
  0xb5   :  { %11370 = vst [vmem:[#allocation27_spill] sm:$0xff] %v5791_v23  ;;  %11371 = vst [vmem:[#allocation28_spill] sm:$0xff] %v5793_v22 }
  0xb6   :  { %465 = vrot.lane.b32.xlu1 %v316_v52, %s5455_s27  ;;  %463 = vrot.lane.b32.xlu0 %v315_v53, %s5455_s27 }
  0xb8   :  { %v5797_v61 = vpop.permute.xlu1 %137  ;;  %v5799_v48 = vpop.permute.xlu0 %135 }
  0xb9   :  { %11372 = vst [vmem:[#allocation29_spill] sm:$0xff] %v5797_v61  ;;  %11373 = vst [vmem:[#allocation30_spill] sm:$0xff] %v5799_v48 }
  0xba   :  { %469 = vrot.lane.b32.xlu1 %v318_v54, %s5455_s27  ;;  %467 = vrot.lane.b32.xlu0 %v317_v55, %s5455_s27 }
  0xbc   :  { %v5803_v49 = vpop.permute.xlu1 %141  ;;  %v5805_v50 = vpop.permute.xlu0 %139 }
  0xbd   :  { %11374 = vst [vmem:[#allocation31_spill] sm:$0xff] %v5803_v49  ;;  %11375 = vst [vmem:[#allocation32_spill] sm:$0xff] %v5805_v50 }
  0xbe   :  { %473 = vrot.lane.b32.xlu1 %v320_v56, %s5455_s27  ;;  %471 = vrot.lane.b32.xlu0 %v319_v57, %s5455_s27 }
  0xc0   :  { %v5809_v51 = vpop.permute.xlu1 %193  ;;  %v5811_v52 = vpop.permute.xlu0 %191 }
  0xc1   :  { %11376 = vst [vmem:[#allocation33_spill] sm:$0xff] %v5809_v51  ;;  %11377 = vst [vmem:[#allocation34_spill] sm:$0xff] %v5811_v52 }
  0xc2   :  { %477 = vrot.lane.b32.xlu1 %v322_v58, %s5455_s27  ;;  %475 = vrot.lane.b32.xlu0 %v321_v59, %s5455_s27  ;;  %v11414_v59 = vld [vmem:[#allocation19_spill] sm:$0xff] }
  0xc4   :  { %v5815_v53 = vpop.permute.xlu1 %197  ;;  %v5817_v54 = vpop.permute.xlu0 %195 }
  0xc5   :  { %11378 = vst [vmem:[#allocation35_spill] sm:$0xff] %v5815_v53  ;;  %11379 = vst [vmem:[#allocation36_spill] sm:$0xff] %v5817_v54 }
  0xc6   :  { %505 = vrot.lane.b32.xlu1 %v5668_v36, %s5456_s28  ;;  %503 = vrot.lane.b32.xlu0 %v5671_v37, %s5456_s28 }
  0xc8   :  { %v5823_v55 = vpop.permute.xlu1 %201  ;;  %v5825_v56 = vpop.permute.xlu0 %199 }
  0xc9   :  { %11380 = vst [vmem:[#allocation37_spill] sm:$0xff] %v5823_v55  ;;  %11381 = vst [vmem:[#allocation38_spill] sm:$0xff] %v5825_v56 }
  0xca   :  { %509 = vrot.lane.b32.xlu1 %v5678_v38, %s5456_s28  ;;  %507 = vrot.lane.b32.xlu0 %v5681_v39, %s5456_s28 }
  0xcc   :  { %v5831_v57 = vpop.permute.xlu1 %205  ;;  %v5833_v58 = vpop.permute.xlu0 %203 }
  0xcd   :  { %11382 = vst [vmem:[#allocation39_spill] sm:$0xff] %v5831_v57  ;;  %11383 = vst [vmem:[#allocation40_spill] sm:$0xff] %v5833_v58 }
  0xce   :  { %513 = vrot.lane.b32.xlu1 %v5688_v40, %s5456_s28  ;;  %511 = vrot.lane.b32.xlu0 %v5691_v41, %s5456_s28 }
  0xd0   :  { %v5839_v36 = vpop.permute.xlu1 %209  ;;  %v5841_v37 = vpop.permute.xlu0 %207 }
  0xd1   :  { %11384 = vst [vmem:[#allocation41_spill] sm:$0xff] %v5839_v36  ;;  %11385 = vst [vmem:[#allocation42_spill] sm:$0xff] %v5841_v37 }
  0xd2   :  { %517 = vrot.lane.b32.xlu1 %v5698_v42, %s5456_s28  ;;  %515 = vrot.lane.b32.xlu0 %v5701_v43, %s5456_s28 }
  0xd4   :  { %v5847_v38 = vpop.permute.xlu1 %213  ;;  %v5849_v39 = vpop.permute.xlu0 %211 }
  0xd5   :  { %11386 = vst [vmem:[#allocation43_spill] sm:$0xff] %v5847_v38  ;;  %11387 = vst [vmem:[#allocation44_spill] sm:$0xff] %v5849_v39 }
  0xd6   :  { %521 = vrot.lane.b32.xlu1 %v5708_v44, %s5456_s28  ;;  %519 = vrot.lane.b32.xlu0 %v5711_v45, %s5456_s28 }
  0xd8   :  { %v5855_v40 = vpop.permute.xlu1 %265  ;;  %v5857_v41 = vpop.permute.xlu0 %263 }
  0xd9   :  { %11388 = vst [vmem:[#allocation45_spill] sm:$0xff] %v5855_v40  ;;  %11389 = vst [vmem:[#allocation46_spill] sm:$0xff] %v5857_v41 }
  0xda   :  { %525 = vrot.lane.b32.xlu1 %v5718_v46, %s5456_s28  ;;  %523 = vrot.lane.b32.xlu0 %v5721_v47, %s5456_s28 }
  0xdc   :  { %v5863_v42 = vpop.permute.xlu1 %269  ;;  %v5865_v43 = vpop.permute.xlu0 %267 }
  0xdd   :  { %11390 = vst [vmem:[#allocation47_spill] sm:$0xff] %v5863_v42  ;;  %11391 = vst [vmem:[#allocation48_spill] sm:$0xff] %v5865_v43  ;;  %v6125_v43 = vld [vmem:[#allocation7 + $0x58] sm:$0xff]  ;;  %v6127_v42 = vld [vmem:[#allocation7 + $0x50] sm:$0xff] }
  0xde   :  { %553 = vrot.lane.b32.xlu1 %v5608_v24, %s5457_s29  ;;  %551 = vrot.lane.b32.xlu0 %v5611_v25, %s5457_s29  ;;  %v6141_v40 = vmul.f32 0.007598758, %v6127_v42 }
  0xe0   :  { %v5871_v44 = vpop.permute.xlu1 %273  ;;  %v5873_v45 = vpop.permute.xlu0 %271  ;;  %11456 = vst [vmem:[#allocation105_spill] sm:$0xff] %v6141_v40 }
  0xe1   :  { %11392 = vst [vmem:[#allocation49_spill] sm:$0xff] %v5871_v44  ;;  %11393 = vst [vmem:[#allocation50_spill] sm:$0xff] %v5873_v45 }
  0xe2   :  { %557 = vrot.lane.b32.xlu1 %v5618_v26, %s5457_s29  ;;  %555 = vrot.lane.b32.xlu0 %v5621_v27, %s5457_s29 }
  0xe4   :  { %v5879_v46 = vpop.permute.xlu1 %277  ;;  %v5881_v47 = vpop.permute.xlu0 %275 }
  0xe5   :  { %11394 = vst [vmem:[#allocation51_spill] sm:$0xff] %v5879_v46  ;;  %11395 = vst [vmem:[#allocation52_spill] sm:$0xff] %v5881_v47  ;;  %v6109_v46 = vld [vmem:[#allocation7 + $0x40] sm:$0xff] }
  0xe6   :  { %561 = vrot.lane.b32.xlu1 %v5628_v28, %s5457_s29  ;;  %559 = vrot.lane.b32.xlu0 %v5631_v29, %s5457_s29  ;;  %v6123_v44 = vmul.f32 0.007598758, %v6109_v46 }
  0xe8   :  { %v5887_v24 = vpop.permute.xlu1 %281  ;;  %v5889_v25 = vpop.permute.xlu0 %279  ;;  %11452 = vst [vmem:[#allocation101_spill] sm:$0xff] %v6123_v44 }
  0xe9   :  { %11396 = vst [vmem:[#allocation53_spill] sm:$0xff] %v5887_v24  ;;  %11397 = vst [vmem:[#allocation54_spill] sm:$0xff] %v5889_v25  ;;  %v6091_v25 = vld [vmem:[#allocation7 + $0x30] sm:$0xff] }
  0xea   :  { %565 = vrot.lane.b32.xlu1 %v5638_v30, %s5457_s29  ;;  %563 = vrot.lane.b32.xlu0 %v5641_v31, %s5457_s29  ;;  %v6105_v47 = vmul.f32 0.007598758, %v6091_v25 }
  0xec   :  { %v5895_v26 = vpop.permute.xlu1 %285  ;;  %v5897_v27 = vpop.permute.xlu0 %283 }
  0xed   :  { %11398 = vst [vmem:[#allocation55_spill] sm:$0xff] %v5895_v26  ;;  %11399 = vst [vmem:[#allocation56_spill] sm:$0xff] %v5897_v27  ;;  %v6089_v26 = vld [vmem:[#allocation7 + $0x38] sm:$0xff] }
  0xee   :  { %569 = vrot.lane.b32.xlu1 %v5648_v32, %s5457_s29  ;;  %567 = vrot.lane.b32.xlu0 %v5651_v33, %s5457_s29 }
  0xf0   :  { %v5903_v28 = vpop.permute.xlu1 %337  ;;  %v5905_v29 = vpop.permute.xlu0 %335 }
  0xf1   :  { %11400 = vst [vmem:[#allocation57_spill] sm:$0xff] %v5903_v28  ;;  %11401 = vst [vmem:[#allocation58_spill] sm:$0xff] %v5905_v29  ;;  %v6107_v28 = vld [vmem:[#allocation7 + $0x48] sm:$0xff] }
  0xf2   :  { %573 = vrot.lane.b32.xlu1 %v5658_v34, %s5457_s29  ;;  %571 = vrot.lane.b32.xlu0 %v5661_v35, %s5457_s29 }
  0xf4   :  { %v5911_v30 = vpop.permute.xlu1 %341  ;;  %v5913_v31 = vpop.permute.xlu0 %339 }
  0xf5   :  { %11402 = vst [vmem:[#allocation59_spill] sm:$0xff] %v5911_v30  ;;  %11403 = vst [vmem:[#allocation60_spill] sm:$0xff] %v5913_v31  ;;  %v6071_v31 = vld [vmem:[#allocation7 + $0x28] sm:$0xff] }
  0xf6   :  { %601 = vrot.lane.b32.xlu1 %v5545_v7, %s5458_s30  ;;  %599 = vrot.lane.b32.xlu0 %v5533_v4, %s5458_s30 }
  0xf8   :  { %v5919_v32 = vpop.permute.xlu1 %345  ;;  %v5921_v33 = vpop.permute.xlu0 %343 }
  0xf9   :  { %11404 = vst [vmem:[#allocation61_spill] sm:$0xff] %v5919_v32  ;;  %11405 = vst [vmem:[#allocation62_spill] sm:$0xff] %v5921_v33 }
  0xfa   :  { %605 = vrot.lane.b32.xlu1 %v5542_v6, %s5458_s30  ;;  %603 = vrot.lane.b32.xlu0 %v5530_v3, %s5458_s30 }
  0xfc   :  { %v5927_v34 = vpop.permute.xlu1 %349  ;;  %v5929_v35 = vpop.permute.xlu0 %347 }
  0xfd   :  { %11406 = vst [vmem:[#allocation63_spill] sm:$0xff] %v5927_v34  ;;  %11407 = vst [vmem:[#allocation64_spill] sm:$0xff] %v5929_v35 }
  0xfe   :  { %609 = vrot.lane.b32.xlu1 %v5556_v10, %s5458_s30  ;;  %607 = vrot.lane.b32.xlu0 %v5559_v11, %s5458_s30 }
 0x100   :  { %v5935_v4 = vpop.permute.xlu1 %353  ;;  %v5937_v7 = vpop.permute.xlu0 %351 }
 0x101   :  { %11408 = vst [vmem:[#allocation65_spill] sm:$0xff] %v5935_v4  ;;  %11409 = vst [vmem:[#allocation66_spill] sm:$0xff] %v5937_v7  ;;  %v6005_v7 = vmul.f32 0.0010283801, %v5563_v13 }
 0x102   :  { %613 = vrot.lane.b32.xlu1 %v5570_v14, %s5458_s30  ;;  %611 = vrot.lane.b32.xlu0 %v5573_v15, %s5458_s30  ;;  %v11415_v14 = vld [vmem:[#allocation20_spill] sm:$0xff]  ;;  %v5960_v15 = vmul.f32 0.0010283801, %v5525_v1  ;;  %v5977_v1 = vmul.f32 0.0010283801, %v5527_v2 }
 0x103   :  { %11431 = vst [vmem:[#allocation80_spill] sm:$0xff] %v6005_v7 }
 0x104   :  { %v5943_v3 = vpop.permute.xlu1 %357  ;;  %v5945_v6 = vpop.permute.xlu0 %355  ;;  %11416 = vst [vmem:[#allocation19_spill] sm:$0xff] %v5960_v15  ;;  %11421 = vst [vmem:[#allocation74_spill] sm:$0xff] %v5977_v1 }
 0x105   :  { %11410 = vst [vmem:[#allocation67_spill] sm:$0xff] %v5943_v3  ;;  %11411 = vst [vmem:[#allocation68_spill] sm:$0xff] %v5945_v6  ;;  %v5963_v6 = vmul.f32 0.0010283801, %v5535_v5 }
 0x106   :  { %617 = vrot.lane.b32.xlu1 %v5584_v18, %s5458_s30  ;;  %615 = vrot.lane.b32.xlu0 %v5587_v19, %s5458_s30  ;;  %v5974_v19 = vmul.f32 0.0010283801, %v5523_v0 }
 0x107   :  { %11417 = vst [vmem:[#allocation20_spill] sm:$0xff] %v5963_v6 }
 0x108   :  { %v5951_v10 = vpop.permute.xlu1 %409  ;;  %v5953_v11 = vpop.permute.xlu0 %407  ;;  %11420 = vst [vmem:[#allocation73_spill] sm:$0xff] %v5974_v19 }
 0x109   :  { %11412 = vst [vmem:[#allocation69_spill] sm:$0xff] %v5951_v10  ;;  %11413 = vst [vmem:[#allocation70_spill] sm:$0xff] %v5953_v11  ;;  %v6073_v10 = vld [vmem:[#allocation7 + $0x20] sm:$0xff] }
 0x10a   :  { %621 = vrot.lane.b32.xlu1 %v11414_v59, %s5458_s30  ;;  %619 = vrot.lane.b32.xlu0 %v11415_v14, %s5458_s30  ;;  %v5988_v14 = vmul.f32 0.0010283801, %v5547_v8  ;;  %v6087_v27 = vmul.f32 0.007598758, %v6073_v10 }
 0x10c   :  { %v5965_v18 = vpop.permute.xlu1 %413  ;;  %v5967_v3 = vpop.permute.xlu0 %411  ;;  %11424 = vst [vmem:[#allocation77_spill] sm:$0xff] %v5988_v14 }
 0x10d   :  { %11418 = vst [vmem:[#allocation71_spill] sm:$0xff] %v5965_v18  ;;  %11419 = vst [vmem:[#allocation72_spill] sm:$0xff] %v5967_v3  ;;  %v11425_v18 = vld [vmem:[#allocation17_spill] sm:$0xff] }
 0x10e   :  { %661 = vrot.lane.b32.xlu1 %v5963_v6, %s5459_s5  ;;  %659 = vrot.lane.b32.xlu0 %v5960_v15, %s5459_s5  ;;  %v5991_v3 = vmul.f32 0.0010283801, %v11425_v18 }
 0x110   :  { %v5979_v59 = vpop.permute.xlu1 %417  ;;  %v5981_v5 = vpop.permute.xlu0 %415  ;;  %11426 = vst [vmem:[#allocation17_spill] sm:$0xff] %v5991_v3 }
 0x111   :  { %11422 = vst [vmem:[#allocation75_spill] sm:$0xff] %v5979_v59  ;;  %11423 = vst [vmem:[#allocation76_spill] sm:$0xff] %v5981_v5  ;;  %v11429_v5 = vld [vmem:[#allocation18_spill] sm:$0xff] }
 0x112   :  { %665 = vrot.lane.b32.xlu1 %v5977_v1, %s5459_s5  ;;  %663 = vrot.lane.b32.xlu0 %v5974_v19, %s5459_s5  ;;  %v6002_v59 = vmul.f32 0.0010283801, %v11429_v5 }
 0x114   :  { %v5993_v0 = vpop.permute.xlu1 %421  ;;  %v5995_v2 = vpop.permute.xlu0 %419  ;;  %11430 = vst [vmem:[#allocation18_spill] sm:$0xff] %v6002_v59 }
 0x115   :  { %11427 = vst [vmem:[#allocation78_spill] sm:$0xff] %v5993_v0  ;;  %11428 = vst [vmem:[#allocation79_spill] sm:$0xff] %v5995_v2  ;;  %v6016_v2 = vmul.f32 0.0010283801, %v5575_v16  ;;  %v6019_v0 = vmul.f32 0.0010283801, %v5577_v17 }
 0x116   :  { %669 = vrot.lane.b32.xlu1 %v5988_v14, %s5459_s5  ;;  %667 = vrot.lane.b32.xlu0 %v5991_v3, %s5459_s5  ;;  %v6034_v16 = vmul.f32 0.0010283801, %v5589_v20  ;;  %v6037_v17 = vmul.f32 0.0010283801, %v5591_v21  ;;  %v6053_v20 = vld [vmem:[#allocation7 + $0x18] sm:$0xff]  ;;  %v6055_v21 = vld [vmem:[#allocation7 + $0x10] sm:$0xff] }
 0x117   :  { %11434 = vst [vmem:[#allocation83_spill] sm:$0xff] %v6016_v2  ;;  %11435 = vst [vmem:[#allocation84_spill] sm:$0xff] %v6019_v0  ;;  %v6066_v33 = vmul.f32 0.007598758, %v6053_v20  ;;  %v6069_v32 = vmul.f32 0.007598758, %v6055_v21 }
 0x118   :  { %v6007_v8 = vpop.permute.xlu1 %425  ;;  %v6009_v18 = vpop.permute.xlu0 %423  ;;  %11439 = vst [vmem:[#allocation88_spill] sm:$0xff] %v6034_v16  ;;  %11440 = vst [vmem:[#allocation89_spill] sm:$0xff] %v6037_v17 }
 0x119   :  { %11432 = vst [vmem:[#allocation81_spill] sm:$0xff] %v6007_v8  ;;  %11433 = vst [vmem:[#allocation82_spill] sm:$0xff] %v6009_v18  ;;  %v6029_v18 = vld [vmem:[#allocation7 + $0x8] sm:$0xff]  ;;  %v6031_v8 = vld [vmem:[#allocation7] sm:$0xff] }
 0x11a   :  { %673 = vrot.lane.b32.xlu1 %v6002_v59, %s5459_s5  ;;  %671 = vrot.lane.b32.xlu0 %v6005_v7, %s5459_s5  ;;  %11438 = vst [vmem:[#allocation87_spill] sm:$0xff] %v6031_v8  ;;  %v6051_v35 = vmul.f32 0.007598758, %v6031_v8 }
 0x11c   :  { %v6021_v5 = vpop.permute.xlu1 %429  ;;  %v6023_v13 = vpop.permute.xlu0 %427 }
 0x11d   :  { %11436 = vst [vmem:[#allocation85_spill] sm:$0xff] %v6021_v5  ;;  %11437 = vst [vmem:[#allocation86_spill] sm:$0xff] %v6023_v13  ;;  %v6048_v13 = vmul.f32 0.007598758, %v6029_v18 }
 0x11e   :  { %677 = vrot.lane.b32.xlu1 %v6016_v2, %s5459_s5  ;;  %675 = vrot.lane.b32.xlu0 %v6019_v0, %s5459_s5 }
 0x120   :  { %v6039_v4 = vpop.permute.xlu1 %457  ;;  %v6041_v5 = vpop.permute.xlu0 %455 }
 0x121   :  { %11441 = vst [vmem:[#allocation90_spill] sm:$0xff] %v6039_v4  ;;  %11442 = vst [vmem:[#allocation91_spill] sm:$0xff] %v6041_v5 }
 0x122   :  { %681 = vrot.lane.b32.xlu1 %v6034_v16, %s5459_s5  ;;  %679 = vrot.lane.b32.xlu0 %v6037_v17, %s5459_s5 }
 0x124   :  { %v6057_v34 = vpop.permute.xlu1 %461  ;;  %v6059_v4 = vpop.permute.xlu0 %459 }
 0x125   :  { %11443 = vst [vmem:[#allocation92_spill] sm:$0xff] %v6057_v34  ;;  %11444 = vst [vmem:[#allocation93_spill] sm:$0xff] %v6059_v4  ;;  %v6084_v4 = vmul.f32 0.007598758, %v6071_v31 }
 0x126   :  { %1110 = vrot.lane.b32.xlu1 %v6048_v13, %s5450_s2  ;;  %1108 = vrot.lane.b32.xlu0 %v6051_v35, %s5450_s2 }
 0x128   :  { %v6075_v30 = vpop.permute.xlu1 %465  ;;  %v6077_v34 = vpop.permute.xlu0 %463 }
 0x129   :  { %11445 = vst [vmem:[#allocation94_spill] sm:$0xff] %v6075_v30  ;;  %11446 = vst [vmem:[#allocation95_spill] sm:$0xff] %v6077_v34  ;;  %v6102_v34 = vmul.f32 0.007598758, %v6089_v26 }
 0x12a   :  { %1114 = vrot.lane.b32.xlu1 %v6066_v33, %s5450_s2  ;;  %1112 = vrot.lane.b32.xlu0 %v6069_v32, %s5450_s2 }
 0x12c   :  { %v6093_v24 = vpop.permute.xlu1 %469  ;;  %v6095_v30 = vpop.permute.xlu0 %467 }
 0x12d   :  { %11447 = vst [vmem:[#allocation96_spill] sm:$0xff] %v6093_v24  ;;  %11448 = vst [vmem:[#allocation97_spill] sm:$0xff] %v6095_v30  ;;  %v6120_v30 = vmul.f32 0.007598758, %v6107_v28 }
 0x12e   :  { %1118 = vrot.lane.b32.xlu1 %v6084_v4, %s5450_s2  ;;  %1116 = vrot.lane.b32.xlu0 %v6087_v27, %s5450_s2 }
 0x12f   :  { %11451 = vst [vmem:[#allocation100_spill] sm:$0xff] %v6120_v30 }
 0x130   :  { %v6111_v45 = vpop.permute.xlu1 %473  ;;  %v6113_v24 = vpop.permute.xlu0 %471 }
 0x131   :  { %11449 = vst [vmem:[#allocation98_spill] sm:$0xff] %v6111_v45  ;;  %11450 = vst [vmem:[#allocation99_spill] sm:$0xff] %v6113_v24  ;;  %v6138_v24 = vmul.f32 0.007598758, %v6125_v43 }
 0x132   :  { %1122 = vrot.lane.b32.xlu1 %v6102_v34, %s5450_s2  ;;  %1120 = vrot.lane.b32.xlu0 %v6105_v47, %s5450_s2 }
 0x133   :  { %11455 = vst [vmem:[#allocation104_spill] sm:$0xff] %v6138_v24 }
 0x134   :  { %v6129_v39 = vpop.permute.xlu1 %477  ;;  %v6131_v45 = vpop.permute.xlu0 %475 }
 0x135   :  { %11453 = vst [vmem:[#allocation102_spill] sm:$0xff] %v6129_v39  ;;  %11454 = vst [vmem:[#allocation103_spill] sm:$0xff] %v6131_v45  ;;  %v6152_v45 = vmul.f32 0.036000773, %v6029_v18  ;;  %v6155_v39 = vmul.f32 0.036000773, %v6031_v8 }
 0x136   :  { %1126 = vrot.lane.b32.xlu1 %v6120_v30, %s5450_s2  ;;  %1124 = vrot.lane.b32.xlu0 %v6123_v44, %s5450_s2 }
 0x138   :  { %v6143_v38 = vpop.permute.xlu1 %505  ;;  %v6145_v37 = vpop.permute.xlu0 %503 }
 0x139   :  { %11457 = vst [vmem:[#allocation106_spill] sm:$0xff] %v6143_v38  ;;  %11458 = vst [vmem:[#allocation107_spill] sm:$0xff] %v6145_v37  ;;  %v6166_v38 = vmul.f32 0.036000773, %v6053_v20  ;;  %v6169_v37 = vmul.f32 0.036000773, %v6055_v21 }
 0x13a   :  { %1130 = vrot.lane.b32.xlu1 %v6138_v24, %s5450_s2  ;;  %1128 = vrot.lane.b32.xlu0 %v6141_v40, %s5450_s2 }
 0x13c   :  { %v6157_v36 = vpop.permute.xlu1 %509  ;;  %v6159_v5 = vpop.permute.xlu0 %507 }
 0x13d   :  { %11459 = vst [vmem:[#allocation108_spill] sm:$0xff] %v6157_v36  ;;  %11460 = vst [vmem:[#allocation109_spill] sm:$0xff] %v6159_v5  ;;  %v6180_v36 = vmul.f32 0.036000773, %v6071_v31  ;;  %v6183_v5 = vmul.f32 0.036000773, %v6073_v10 }
 0x13e   :  { %1182 = vrot.lane.b32.xlu1 %v6152_v45, %s5451_s23  ;;  %1180 = vrot.lane.b32.xlu0 %v6155_v39, %s5451_s23 }
 0x140   :  { %v6171_v58 = vpop.permute.xlu1 %513  ;;  %v6173_v57 = vpop.permute.xlu0 %511 }
 0x141   :  { %11461 = vst [vmem:[#allocation110_spill] sm:$0xff] %v6171_v58  ;;  %11462 = vst [vmem:[#allocation111_spill] sm:$0xff] %v6173_v57  ;;  %v6194_v57 = vmul.f32 0.036000773, %v6089_v26  ;;  %v6197_v58 = vmul.f32 0.036000773, %v6091_v25 }
 0x142   :  { %1186 = vrot.lane.b32.xlu1 %v6166_v38, %s5451_s23  ;;  %1184 = vrot.lane.b32.xlu0 %v6169_v37, %s5451_s23 }
 0x144   :  { %v6185_v56 = vpop.permute.xlu1 %517  ;;  %v6187_v55 = vpop.permute.xlu0 %515 }
 0x145   :  { %11463 = vst [vmem:[#allocation112_spill] sm:$0xff] %v6185_v56  ;;  %11464 = vst [vmem:[#allocation113_spill] sm:$0xff] %v6187_v55  ;;  %v6208_v55 = vmul.f32 0.036000773, %v6107_v28  ;;  %v6211_v56 = vmul.f32 0.036000773, %v6109_v46 }
 0x146   :  { %1190 = vrot.lane.b32.xlu1 %v6180_v36, %s5451_s23  ;;  %1188 = vrot.lane.b32.xlu0 %v6183_v5, %s5451_s23 }
 0x148   :  { %v6199_v54 = vpop.permute.xlu1 %521  ;;  %v6201_v53 = vpop.permute.xlu0 %519 }
 0x149   :  { %11465 = vst [vmem:[#allocation114_spill] sm:$0xff] %v6199_v54  ;;  %11466 = vst [vmem:[#allocation115_spill] sm:$0xff] %v6201_v53  ;;  %v6222_v53 = vmul.f32 0.036000773, %v6125_v43  ;;  %v6225_v54 = vmul.f32 0.036000773, %v6127_v42 }
 0x14a   :  { %1194 = vrot.lane.b32.xlu1 %v6194_v57, %s5451_s23  ;;  %1192 = vrot.lane.b32.xlu0 %v6197_v58, %s5451_s23 }
 0x14c   :  { %v6213_v51 = vpop.permute.xlu1 %525  ;;  %v6215_v11 = vpop.permute.xlu0 %523 }
 0x14d   :  { %11467 = vst [vmem:[#allocation116_spill] sm:$0xff] %v6213_v51  ;;  %11468 = vst [vmem:[#allocation117_spill] sm:$0xff] %v6215_v11  ;;  %v6236_v11 = vmul.f32 0.10936069, %v6029_v18  ;;  %v6239_v51 = vmul.f32 0.10936069, %v6031_v8 }
 0x14e   :  { %1198 = vrot.lane.b32.xlu1 %v6208_v55, %s5451_s23  ;;  %1196 = vrot.lane.b32.xlu0 %v6211_v56, %s5451_s23 }
 0x150   :  { %v6227_v50 = vpop.permute.xlu1 %553  ;;  %v6229_v17 = vpop.permute.xlu0 %551 }
 0x151   :  { %11469 = vst [vmem:[#allocation118_spill] sm:$0xff] %v6227_v50  ;;  %11470 = vst [vmem:[#allocation119_spill] sm:$0xff] %v6229_v17  ;;  %v6250_v50 = vmul.f32 0.10936069, %v6053_v20  ;;  %v6253_v17 = vmul.f32 0.10936069, %v6055_v21 }
 0x152   :  { %1202 = vrot.lane.b32.xlu1 %v6222_v53, %s5451_s23  ;;  %1200 = vrot.lane.b32.xlu0 %v6225_v54, %s5451_s23 }
 0x154   :  { %v6241_v49 = vpop.permute.xlu1 %557  ;;  %v6243_v16 = vpop.permute.xlu0 %555 }
 0x155   :  { %11471 = vst [vmem:[#allocation120_spill] sm:$0xff] %v6241_v49  ;;  %11472 = vst [vmem:[#allocation121_spill] sm:$0xff] %v6243_v16  ;;  %v6264_v49 = vmul.f32 0.10936069, %v6071_v31  ;;  %v6267_v16 = vmul.f32 0.10936069, %v6073_v10 }
 0x156   :  { %1254 = vrot.lane.b32.xlu1 %v6236_v11, %s5452_s24  ;;  %1252 = vrot.lane.b32.xlu0 %v6239_v51, %s5452_s24 }
 0x158   :  { %v6255_v48 = vpop.permute.xlu1 %561  ;;  %v6257_v0 = vpop.permute.xlu0 %559 }
 0x159   :  { %11473 = vst [vmem:[#allocation122_spill] sm:$0xff] %v6255_v48  ;;  %11474 = vst [vmem:[#allocation123_spill] sm:$0xff] %v6257_v0  ;;  %v6278_v0 = vmul.f32 0.10936069, %v6089_v26  ;;  %v6281_v48 = vmul.f32 0.10936069, %v6091_v25 }
 0x15a   :  { %1258 = vrot.lane.b32.xlu1 %v6250_v50, %s5452_s24  ;;  %1256 = vrot.lane.b32.xlu0 %v6253_v17, %s5452_s24 }
 0x15c   :  { %v6269_v61 = vpop.permute.xlu1 %565  ;;  %v6271_v2 = vpop.permute.xlu0 %563 }
 0x15d   :  { %11475 = vst [vmem:[#allocation124_spill] sm:$0xff] %v6269_v61  ;;  %11476 = vst [vmem:[#allocation125_spill] sm:$0xff] %v6271_v2  ;;  %v6292_v2 = vmul.f32 0.10936069, %v6107_v28  ;;  %v6295_v61 = vmul.f32 0.10936069, %v6109_v46 }
 0x15e   :  { %1262 = vrot.lane.b32.xlu1 %v6264_v49, %s5452_s24  ;;  %1260 = vrot.lane.b32.xlu0 %v6267_v16, %s5452_s24 }
 0x160   :  { %v6283_v22 = vpop.permute.xlu1 %569  ;;  %v6285_v7 = vpop.permute.xlu0 %567 }
 0x161   :  { %11477 = vst [vmem:[#allocation126_spill] sm:$0xff] %v6283_v22  ;;  %11478 = vst [vmem:[#allocation127_spill] sm:$0xff] %v6285_v7  ;;  %v6306_v7 = vmul.f32 0.10936069, %v6125_v43  ;;  %v6309_v22 = vmul.f32 0.10936069, %v6127_v42 }
 0x162   :  { %1266 = vrot.lane.b32.xlu1 %v6278_v0, %s5452_s24  ;;  %1264 = vrot.lane.b32.xlu0 %v6281_v48, %s5452_s24 }
 0x164   :  { %v6297_v23 = vpop.permute.xlu1 %573  ;;  %v6299_v59 = vpop.permute.xlu0 %571 }
 0x165   :  { %11479 = vst [vmem:[#allocation128_spill] sm:$0xff] %v6297_v23  ;;  %11480 = vst [vmem:[#allocation129_spill] sm:$0xff] %v6299_v59  ;;  %v6320_v59 = vmul.f32 0.21300554, %v6029_v18  ;;  %v6323_v23 = vmul.f32 0.21300554, %v6031_v8 }
 0x166   :  { %1270 = vrot.lane.b32.xlu1 %v6292_v2, %s5452_s24  ;;  %1268 = vrot.lane.b32.xlu0 %v6295_v61, %s5452_s24 }
 0x168   :  { %v6311_v63 = vpop.permute.xlu1 %601  ;;  %v6313_v3 = vpop.permute.xlu0 %599 }
 0x169   :  { %11481 = vst [vmem:[#allocation130_spill] sm:$0xff] %v6311_v63  ;;  %11482 = vst [vmem:[#allocation131_spill] sm:$0xff] %v6313_v3  ;;  %v6334_v63 = vmul.f32 0.21300554, %v6053_v20  ;;  %v6337_v3 = vmul.f32 0.21300554, %v6055_v21 }
 0x16a   :  { %1274 = vrot.lane.b32.xlu1 %v6306_v7, %s5452_s24  ;;  %1272 = vrot.lane.b32.xlu0 %v6309_v22, %s5452_s24 }
 0x16c   :  { %v6325_v29 = vpop.permute.xlu1 %605  ;;  %v6327_v62 = vpop.permute.xlu0 %603 }
 0x16d   :  { %11483 = vst [vmem:[#allocation132_spill] sm:$0xff] %v6325_v29  ;;  %11484 = vst [vmem:[#allocation133_spill] sm:$0xff] %v6327_v62  ;;  %v6348_v29 = vmul.f32 0.21300554, %v6071_v31  ;;  %v6351_v62 = vmul.f32 0.21300554, %v6073_v10 }
 0x16e   :  { %1326 = vrot.lane.b32.xlu1 %v6320_v59, %s5453_s25  ;;  %1324 = vrot.lane.b32.xlu0 %v6323_v23, %s5453_s25 }
 0x170   :  { %v6339_v14 = vpop.permute.xlu1 %609  ;;  %v6341_v6 = vpop.permute.xlu0 %607 }
 0x171   :  { %11485 = vst [vmem:[#allocation134_spill] sm:$0xff] %v6339_v14  ;;  %11486 = vst [vmem:[#allocation135_spill] sm:$0xff] %v6341_v6  ;;  %v6362_v6 = vmul.f32 0.21300554, %v6089_v26  ;;  %v6365_v14 = vmul.f32 0.21300554, %v6091_v25 }
 0x172   :  { %1330 = vrot.lane.b32.xlu1 %v6334_v63, %s5453_s25  ;;  %1328 = vrot.lane.b32.xlu0 %v6337_v3, %s5453_s25 }
 0x174   :  { %v6353_v60 = vpop.permute.xlu1 %613  ;;  %v6355_v1 = vpop.permute.xlu0 %611 }
 0x175   :  { %11487 = vst [vmem:[#allocation136_spill] sm:$0xff] %v6353_v60  ;;  %11488 = vst [vmem:[#allocation137_spill] sm:$0xff] %v6355_v1  ;;  %v6376_v1 = vmul.f32 0.21300554, %v6107_v28  ;;  %v6379_v60 = vmul.f32 0.21300554, %v6109_v46 }
 0x176   :  { %1334 = vrot.lane.b32.xlu1 %v6348_v29, %s5453_s25  ;;  %1332 = vrot.lane.b32.xlu0 %v6351_v62, %s5453_s25 }
 0x178   :  { %v6367_v9 = vpop.permute.xlu1 %617  ;;  %v6369_v19 = vpop.permute.xlu0 %615 }
 0x179   :  { %11489 = vst [vmem:[#allocation138_spill] sm:$0xff] %v6367_v9  ;;  %11490 = vst [vmem:[#allocation139_spill] sm:$0xff] %v6369_v19  ;;  %v6390_v19 = vmul.f32 0.21300554, %v6125_v43  ;;  %v6393_v9 = vmul.f32 0.21300554, %v6127_v42 }
 0x17a   :  { %1338 = vrot.lane.b32.xlu1 %v6362_v6, %s5453_s25  ;;  %1336 = vrot.lane.b32.xlu0 %v6365_v14, %s5453_s25 }
 0x17c   :  { %v6381_v41 = vpop.permute.xlu1 %621  ;;  %v6383_v52 = vpop.permute.xlu0 %619 }
 0x17d   :  { %11491 = vst [vmem:[#allocation140_spill] sm:$0xff] %v6381_v41  ;;  %11492 = vst [vmem:[#allocation141_spill] sm:$0xff] %v6383_v52  ;;  %v1373_v52 = vmul.f32 0.26601171, %v6029_v18  ;;  %v1372_v41 = vmul.f32 0.26601171, %v6031_v8 }
 0x17e   :  { %1342 = vrot.lane.b32.xlu1 %v6376_v1, %s5453_s25  ;;  %1340 = vrot.lane.b32.xlu0 %v6379_v60, %s5453_s25 }
 0x180   :  { %v6395_v12 = vpop.permute.xlu1 %661  ;;  %v6397_v15 = vpop.permute.xlu0 %659 }
 0x181   :  { %11493 = vst [vmem:[#allocation142_spill] sm:$0xff] %v6395_v12  ;;  %11494 = vst [vmem:[#allocation143_spill] sm:$0xff] %v6397_v15  ;;  %v1375_v12 = vmul.f32 0.26601171, %v6053_v20  ;;  %v1374_v15 = vmul.f32 0.26601171, %v6055_v21 }
 0x182   :  { %1346 = vrot.lane.b32.xlu1 %v6390_v19, %s5453_s25  ;;  %1344 = vrot.lane.b32.xlu0 %v6393_v9, %s5453_s25 }
 0x184   :  { %v6405_v40 = vpop.permute.xlu1 %665  ;;  %v6407_v24 = vpop.permute.xlu0 %663 }
 0x185   :  { %11495 = vst [vmem:[#allocation144_spill] sm:$0xff] %v6405_v40  ;;  %11496 = vst [vmem:[#allocation145_spill] sm:$0xff] %v6407_v24  ;;  %v1377_v40 = vmul.f32 0.26601171, %v6071_v31  ;;  %v1376_v24 = vmul.f32 0.26601171, %v6073_v10 }
 0x186   :  { %1398 = vrot.lane.b32.xlu1 %v1373_v52, %s5454_s26  ;;  %1396 = vrot.lane.b32.xlu0 %v1372_v41, %s5454_s26  ;;  %v1379_v41 = vmul.f32 0.26601171, %v6089_v26 }
 0x188   :  { %v6413_v44 = vpop.permute.xlu1 %669  ;;  %v6415_v30 = vpop.permute.xlu0 %667 }
 0x189   :  { %11497 = vst [vmem:[#allocation146_spill] sm:$0xff] %v6413_v44  ;;  %11498 = vst [vmem:[#allocation147_spill] sm:$0xff] %v6415_v30  ;;  %v1378_v30 = vmul.f32 0.26601171, %v6091_v25 }
 0x18a   :  { %1402 = vrot.lane.b32.xlu1 %v1375_v12, %s5454_s26  ;;  %1400 = vrot.lane.b32.xlu0 %v1374_v15, %s5454_s26  ;;  %v1381_v15 = vmul.f32 0.26601171, %v6107_v28 }
 0x18c   :  { %v6421_v8 = vpop.permute.xlu1 %673  ;;  %v6423_v52 = vpop.permute.xlu0 %671 }
 0x18d   :  { %11499 = vst [vmem:[#allocation148_spill] sm:$0xff] %v6421_v8  ;;  %11500 = vst [vmem:[#allocation149_spill] sm:$0xff] %v6423_v52  ;;  %v1380_v8 = vmul.f32 0.26601171, %v6109_v46 }
 0x18e   :  { %1406 = vrot.lane.b32.xlu1 %v1377_v40, %s5454_s26  ;;  %1404 = vrot.lane.b32.xlu0 %v1376_v24, %s5454_s26  ;;  %v1383_v24 = vmul.f32 0.26601171, %v6125_v43 }
 0x190   :  { %v6429_v44 = vpop.permute.xlu1 %677  ;;  %v6431_v12 = vpop.permute.xlu0 %675 }
 0x191   :  { %11501 = vst [vmem:[#allocation150_spill] sm:$0xff] %v6429_v44  ;;  %11502 = vst [vmem:[#allocation151_spill] sm:$0xff] %v6431_v12  ;;  %v1382_v44 = vmul.f32 0.26601171, %v6127_v42 }
 0x192   :  { %1410 = vrot.lane.b32.xlu1 %v1379_v41, %s5454_s26  ;;  %1408 = vrot.lane.b32.xlu0 %v1378_v30, %s5454_s26 }
 0x194   :  { %v6437_v52 = vpop.permute.xlu1 %681  ;;  %v6439_v40 = vpop.permute.xlu0 %679 }
 0x195   :  { %11503 = vst [vmem:[#allocation152_spill] sm:$0xff] %v6437_v52  ;;  %11504 = vst [vmem:[#allocation153_spill] sm:$0xff] %v6439_v40 }
 0x196   :  { %1414 = vrot.lane.b32.xlu1 %v1381_v15, %s5454_s26  ;;  %1412 = vrot.lane.b32.xlu0 %v1380_v8, %s5454_s26 }
 0x198   :  { %v6445_v12 = vpop.permute.xlu1 %1110  ;;  %v6447_v41 = vpop.permute.xlu0 %1108 }
 0x199   :  { %11505 = vst [vmem:[#allocation154_spill] sm:$0xff] %v6445_v12  ;;  %11506 = vst [vmem:[#allocation155_spill] sm:$0xff] %v6447_v41 }
 0x19a   :  { %1418 = vrot.lane.b32.xlu1 %v1383_v24, %s5454_s26  ;;  %1416 = vrot.lane.b32.xlu0 %v1382_v44, %s5454_s26 }
 0x19c   :  { %v6451_v30 = vpop.permute.xlu1 %1114  ;;  %v6453_v52 = vpop.permute.xlu0 %1112 }
 0x19d   :  { %11507 = vst [vmem:[#allocation156_spill] sm:$0xff] %v6451_v30  ;;  %11508 = vst [vmem:[#allocation157_spill] sm:$0xff] %v6453_v52 }
 0x19e   :  { %1446 = vrot.lane.b32.xlu1 %v6320_v59, %s5455_s27  ;;  %1444 = vrot.lane.b32.xlu0 %v6323_v23, %s5455_s27 }
 0x1a0   :  { %v6459_v8 = vpop.permute.xlu1 %1118  ;;  %v6461_v15 = vpop.permute.xlu0 %1116 }
 0x1a1   :  { %11509 = vst [vmem:[#allocation158_spill] sm:$0xff] %v6459_v8  ;;  %11510 = vst [vmem:[#allocation159_spill] sm:$0xff] %v6461_v15 }
 0x1a2   :  { %1450 = vrot.lane.b32.xlu1 %v6334_v63, %s5455_s27  ;;  %1448 = vrot.lane.b32.xlu0 %v6337_v3, %s5455_s27 }
 0x1a4   :  { %v6467_v44 = vpop.permute.xlu1 %1122  ;;  %v6469_v24 = vpop.permute.xlu0 %1120 }
 0x1a5   :  { %11511 = vst [vmem:[#allocation160_spill] sm:$0xff] %v6467_v44  ;;  %11512 = vst [vmem:[#allocation161_spill] sm:$0xff] %v6469_v24 }
 0x1a6   :  { %1454 = vrot.lane.b32.xlu1 %v6348_v29, %s5455_s27  ;;  %1452 = vrot.lane.b32.xlu0 %v6351_v62, %s5455_s27 }
 0x1a8   :  { %v6475_v23 = vpop.permute.xlu1 %1126  ;;  %v6477_v59 = vpop.permute.xlu0 %1124 }
 0x1a9   :  { %11513 = vst [vmem:[#allocation162_spill] sm:$0xff] %v6475_v23  ;;  %11514 = vst [vmem:[#allocation163_spill] sm:$0xff] %v6477_v59 }
 0x1aa   :  { %1458 = vrot.lane.b32.xlu1 %v6362_v6, %s5455_s27  ;;  %1456 = vrot.lane.b32.xlu0 %v6365_v14, %s5455_s27 }
 0x1ac   :  { %v6483_v63 = vpop.permute.xlu1 %1130  ;;  %v6485_v3 = vpop.permute.xlu0 %1128 }
 0x1ad   :  { %11515 = vst [vmem:[#allocation164_spill] sm:$0xff] %v6483_v63  ;;  %11516 = vst [vmem:[#allocation165_spill] sm:$0xff] %v6485_v3 }
 0x1ae   :  { %1462 = vrot.lane.b32.xlu1 %v6376_v1, %s5455_s27  ;;  %1460 = vrot.lane.b32.xlu0 %v6379_v60, %s5455_s27 }
 0x1b0   :  { %v6491_v62 = vpop.permute.xlu1 %1182  ;;  %v6493_v29 = vpop.permute.xlu0 %1180 }
 0x1b1   :  { %11517 = vst [vmem:[#allocation166_spill] sm:$0xff] %v6491_v62  ;;  %11518 = vst [vmem:[#allocation167_spill] sm:$0xff] %v6493_v29 }
 0x1b2   :  { %1466 = vrot.lane.b32.xlu1 %v6390_v19, %s5455_s27  ;;  %1464 = vrot.lane.b32.xlu0 %v6393_v9, %s5455_s27 }
 0x1b4   :  { %v6499_v6 = vpop.permute.xlu1 %1186  ;;  %v6501_v14 = vpop.permute.xlu0 %1184 }
 0x1b5   :  { %11519 = vst [vmem:[#allocation168_spill] sm:$0xff] %v6499_v6  ;;  %11520 = vst [vmem:[#allocation169_spill] sm:$0xff] %v6501_v14 }
 0x1b6   :  { %1494 = vrot.lane.b32.xlu1 %v6236_v11, %s5456_s28  ;;  %1492 = vrot.lane.b32.xlu0 %v6239_v51, %s5456_s28 }
 0x1b8   :  { %v6507_v60 = vpop.permute.xlu1 %1190  ;;  %v6509_v1 = vpop.permute.xlu0 %1188 }
 0x1b9   :  { %11521 = vst [vmem:[#allocation170_spill] sm:$0xff] %v6507_v60  ;;  %11522 = vst [vmem:[#allocation171_spill] sm:$0xff] %v6509_v1 }
 0x1ba   :  { %1498 = vrot.lane.b32.xlu1 %v6250_v50, %s5456_s28  ;;  %1496 = vrot.lane.b32.xlu0 %v6253_v17, %s5456_s28 }
 0x1bc   :  { %v6515_v9 = vpop.permute.xlu1 %1194  ;;  %v6517_v19 = vpop.permute.xlu0 %1192 }
 0x1bd   :  { %11523 = vst [vmem:[#allocation172_spill] sm:$0xff] %v6515_v9  ;;  %11524 = vst [vmem:[#allocation173_spill] sm:$0xff] %v6517_v19 }
 0x1be   :  { %1502 = vrot.lane.b32.xlu1 %v6264_v49, %s5456_s28  ;;  %1500 = vrot.lane.b32.xlu0 %v6267_v16, %s5456_s28 }
 0x1c0   :  { %v6523_v51 = vpop.permute.xlu1 %1198  ;;  %v6525_v11 = vpop.permute.xlu0 %1196 }
 0x1c1   :  { %11525 = vst [vmem:[#allocation174_spill] sm:$0xff] %v6523_v51  ;;  %11526 = vst [vmem:[#allocation175_spill] sm:$0xff] %v6525_v11 }
 0x1c2   :  { %1506 = vrot.lane.b32.xlu1 %v6278_v0, %s5456_s28  ;;  %1504 = vrot.lane.b32.xlu0 %v6281_v48, %s5456_s28 }
 0x1c4   :  { %v6531_v50 = vpop.permute.xlu1 %1202  ;;  %v6533_v17 = vpop.permute.xlu0 %1200 }
 0x1c5   :  { %11527 = vst [vmem:[#allocation176_spill] sm:$0xff] %v6531_v50  ;;  %11528 = vst [vmem:[#allocation177_spill] sm:$0xff] %v6533_v17 }
 0x1c6   :  { %1510 = vrot.lane.b32.xlu1 %v6292_v2, %s5456_s28  ;;  %1508 = vrot.lane.b32.xlu0 %v6295_v61, %s5456_s28 }
 0x1c8   :  { %v6539_v49 = vpop.permute.xlu1 %1254  ;;  %v6541_v16 = vpop.permute.xlu0 %1252 }
 0x1c9   :  { %11529 = vst [vmem:[#allocation178_spill] sm:$0xff] %v6539_v49  ;;  %11530 = vst [vmem:[#allocation179_spill] sm:$0xff] %v6541_v16 }
 0x1ca   :  { %1514 = vrot.lane.b32.xlu1 %v6306_v7, %s5456_s28  ;;  %1512 = vrot.lane.b32.xlu0 %v6309_v22, %s5456_s28 }
 0x1cc   :  { %v6547_v48 = vpop.permute.xlu1 %1258  ;;  %v6549_v0 = vpop.permute.xlu0 %1256 }
 0x1cd   :  { %11531 = vst [vmem:[#allocation180_spill] sm:$0xff] %v6547_v48  ;;  %11532 = vst [vmem:[#allocation181_spill] sm:$0xff] %v6549_v0 }
 0x1ce   :  { %1542 = vrot.lane.b32.xlu1 %v6152_v45, %s5457_s29  ;;  %1540 = vrot.lane.b32.xlu0 %v6155_v39, %s5457_s29 }
 0x1d0   :  { %v6555_v61 = vpop.permute.xlu1 %1262  ;;  %v6557_v2 = vpop.permute.xlu0 %1260 }
 0x1d1   :  { %11533 = vst [vmem:[#allocation182_spill] sm:$0xff] %v6555_v61  ;;  %11534 = vst [vmem:[#allocation183_spill] sm:$0xff] %v6557_v2 }
 0x1d2   :  { %1546 = vrot.lane.b32.xlu1 %v6166_v38, %s5457_s29  ;;  %1544 = vrot.lane.b32.xlu0 %v6169_v37, %s5457_s29 }
 0x1d4   :  { %v6563_v22 = vpop.permute.xlu1 %1266  ;;  %v6565_v7 = vpop.permute.xlu0 %1264 }
 0x1d5   :  { %11535 = vst [vmem:[#allocation184_spill] sm:$0xff] %v6563_v22  ;;  %11536 = vst [vmem:[#allocation185_spill] sm:$0xff] %v6565_v7 }
 0x1d6   :  { %1550 = vrot.lane.b32.xlu1 %v6180_v36, %s5457_s29  ;;  %1548 = vrot.lane.b32.xlu0 %v6183_v5, %s5457_s29 }
 0x1d8   :  { %v6571_v39 = vpop.permute.xlu1 %1270  ;;  %v6573_v45 = vpop.permute.xlu0 %1268 }
 0x1d9   :  { %11537 = vst [vmem:[#allocation186_spill] sm:$0xff] %v6571_v39  ;;  %11538 = vst [vmem:[#allocation187_spill] sm:$0xff] %v6573_v45 }
 0x1da   :  { %1554 = vrot.lane.b32.xlu1 %v6194_v57, %s5457_s29  ;;  %1552 = vrot.lane.b32.xlu0 %v6197_v58, %s5457_s29 }
 0x1dc   :  { %v6579_v37 = vpop.permute.xlu1 %1274  ;;  %v6581_v38 = vpop.permute.xlu0 %1272 }
 0x1dd   :  { %11539 = vst [vmem:[#allocation188_spill] sm:$0xff] %v6579_v37  ;;  %11540 = vst [vmem:[#allocation189_spill] sm:$0xff] %v6581_v38 }
 0x1de   :  { %1558 = vrot.lane.b32.xlu1 %v6208_v55, %s5457_s29  ;;  %1556 = vrot.lane.b32.xlu0 %v6211_v56, %s5457_s29 }
 0x1e0   :  { %v6587_v36 = vpop.permute.xlu1 %1326  ;;  %v6589_v5 = vpop.permute.xlu0 %1324 }
 0x1e1   :  { %11541 = vst [vmem:[#allocation190_spill] sm:$0xff] %v6587_v36  ;;  %11542 = vst [vmem:[#allocation191_spill] sm:$0xff] %v6589_v5 }
 0x1e2   :  { %1562 = vrot.lane.b32.xlu1 %v6222_v53, %s5457_s29  ;;  %1560 = vrot.lane.b32.xlu0 %v6225_v54, %s5457_s29 }
 0x1e4   :  { %v6595_v57 = vpop.permute.xlu1 %1330  ;;  %v6597_v58 = vpop.permute.xlu0 %1328 }
 0x1e5   :  { %11543 = vst [vmem:[#allocation192_spill] sm:$0xff] %v6595_v57  ;;  %11544 = vst [vmem:[#allocation193_spill] sm:$0xff] %v6597_v58 }
 0x1e6   :  { %1590 = vrot.lane.b32.xlu1 %v6048_v13, %s5458_s30  ;;  %1588 = vrot.lane.b32.xlu0 %v6051_v35, %s5458_s30 }
 0x1e8   :  { %v6603_v55 = vpop.permute.xlu1 %1334  ;;  %v6605_v56 = vpop.permute.xlu0 %1332 }
 0x1e9   :  { %11545 = vst [vmem:[#allocation194_spill] sm:$0xff] %v6603_v55  ;;  %11546 = vst [vmem:[#allocation195_spill] sm:$0xff] %v6605_v56 }
 0x1ea   :  { %1594 = vrot.lane.b32.xlu1 %v6066_v33, %s5458_s30  ;;  %1592 = vrot.lane.b32.xlu0 %v6069_v32, %s5458_s30 }
 0x1ec   :  { %v6611_v53 = vpop.permute.xlu1 %1338  ;;  %v6613_v54 = vpop.permute.xlu0 %1336 }
 0x1ed   :  { %11547 = vst [vmem:[#allocation196_spill] sm:$0xff] %v6611_v53  ;;  %11548 = vst [vmem:[#allocation197_spill] sm:$0xff] %v6613_v54  ;;  %v11553_v54 = vld [vmem:[#allocation100_spill] sm:$0xff] }
 0x1ee   :  { %1598 = vrot.lane.b32.xlu1 %v6084_v4, %s5458_s30  ;;  %1596 = vrot.lane.b32.xlu0 %v6087_v27, %s5458_s30  ;;  %v11554_v4 = vld [vmem:[#allocation101_spill] sm:$0xff] }
 0x1f0   :  { %v6619_v35 = vpop.permute.xlu1 %1342  ;;  %v6621_v13 = vpop.permute.xlu0 %1340 }
 0x1f1   :  { %11549 = vst [vmem:[#allocation198_spill] sm:$0xff] %v6619_v35  ;;  %11550 = vst [vmem:[#allocation199_spill] sm:$0xff] %v6621_v13  ;;  %v11557_v13 = vld [vmem:[#allocation104_spill] sm:$0xff] }
 0x1f2   :  { %1602 = vrot.lane.b32.xlu1 %v6102_v34, %s5458_s30  ;;  %1600 = vrot.lane.b32.xlu0 %v6105_v47, %s5458_s30  ;;  %v11558_v34 = vld [vmem:[#allocation105_spill] sm:$0xff]  ;;  %v6644_v47 = vmul.f32 0.0010283801, %v6029_v18 }
 0x1f4   :  { %v6627_v32 = vpop.permute.xlu1 %1346  ;;  %v6629_v33 = vpop.permute.xlu0 %1344  ;;  %11559 = vst [vmem:[#allocation104_spill] sm:$0xff] %v6644_v47 }
 0x1f5   :  { %11551 = vst [vmem:[#allocation200_spill] sm:$0xff] %v6627_v32  ;;  %11552 = vst [vmem:[#allocation201_spill] sm:$0xff] %v6629_v33 }
 0x1f6   :  { %1606 = vrot.lane.b32.xlu1 %v11553_v54, %s5458_s30  ;;  %1604 = vrot.lane.b32.xlu0 %v11554_v4, %s5458_s30  ;;  %v11562_v54 = vld [vmem:[#allocation87_spill] sm:$0xff] }
 0x1f7   :  { %v6651_v53 = vmul.f32 0.0010283801, %v11562_v54  ;;  %v6672_v54 = vmul.f32 0.0010283801, %v6071_v31 }
 0x1f8   :  { %v6635_v27 = vpop.permute.xlu1 %1398  ;;  %v6637_v35 = vpop.permute.xlu0 %1396 }
 0x1f9   :  { %11555 = vst [vmem:[#allocation100_spill] sm:$0xff] %v6635_v27  ;;  %11556 = vst [vmem:[#allocation101_spill] sm:$0xff] %v6637_v35  ;;  %v5291_v35 = vld [vmem:[#allocation6 + $0x18] sm:$0xff] }
 0x1fa   :  { %1610 = vrot.lane.b32.xlu1 %v11557_v13, %s5458_s30  ;;  %1608 = vrot.lane.b32.xlu0 %v11558_v34, %s5458_s30  ;;  %11563 = vst [vmem:[#allocation87_spill] sm:$0xff] %v6651_v53  ;;  %v6658_v13 = vmul.f32 0.0010283801, %v6053_v20  ;;  %v6665_v34 = vmul.f32 0.0010283801, %v6055_v21  ;;  %11568 = vst [vmem:[#allocation207_spill] sm:$0xff] %v6672_v54  ;;  %v6732_v56 = vmul.f32 %v5291_v35, %v5291_v35 }
 0x1fb   :  { %v6686_v21 = vmul.f32 0.0010283801, %v6089_v26  ;;  %v5293_v35 = vld [vmem:[#allocation6 + $0x28] sm:$0xff] }
 0x1fc   :  { %v6646_v33 = vpop.permute.xlu1 %1402  ;;  %v6648_v32 = vpop.permute.xlu0 %1400  ;;  %11564 = vst [vmem:[#allocation203_spill] sm:$0xff] %v6658_v13  ;;  %11567 = vst [vmem:[#allocation206_spill] sm:$0xff] %v6665_v34  ;;  %v6748_v55 = vmul.f32 0.007598758, %v6732_v56  ;;  %v6750_v58 = vmul.f32 %v5293_v35, %v5293_v35  ;;  %v5295_v35 = vld [vmem:[#allocation6 + $0x38] sm:$0xff] }
 0x1fd   :  { %11560 = vst [vmem:[#allocation105_spill] sm:$0xff] %v6646_v33  ;;  %11561 = vst [vmem:[#allocation202_spill] sm:$0xff] %v6648_v32  ;;  %v5290_v33 = vld [vmem:[#allocation6] sm:$0xff]  ;;  %v6768_v38 = vmul.f32 %v5295_v35, %v5295_v35  ;;  %v5297_v35 = vld [vmem:[#allocation6 + $0x48] sm:$0xff] }
 0x1fe   :  { %1650 = vrot.lane.b32.xlu1 %v6644_v47, %s5459_s5  ;;  %1648 = vrot.lane.b32.xlu0 %v6651_v53, %s5459_s5  ;;  %11572 = vst [vmem:[#allocation211_spill] sm:$0xff] %v6686_v21  ;;  %v6715_v27 = vmul.f32 %v5290_v33, %v5290_v33  ;;  %v5292_v33 = vld [vmem:[#allocation6 + $0x10] sm:$0xff]  ;;  %v6766_v36 = vmul.f32 0.007598758, %v6750_v58  ;;  %v6786_v7 = vmul.f32 %v5297_v35, %v5297_v35  ;;  %v5299_v35 = vld [vmem:[#allocation6 + $0x58] sm:$0xff] }
 0x1ff   :  { %v6784_v39 = vmul.f32 0.007598758, %v6768_v38  ;;  %v6804_v0 = vmul.f32 %v5299_v35, %v5299_v35 }
 0x200   :  { %v6660_v4 = vpop.permute.xlu1 %1406  ;;  %v6662_v18 = vpop.permute.xlu0 %1404  ;;  %11581 = vst [vmem:[#allocation220_spill] sm:$0xff] %v6715_v27  ;;  %v6802_v61 = vmul.f32 0.007598758, %v6786_v7 }
 0x201   :  { %11565 = vst [vmem:[#allocation204_spill] sm:$0xff] %v6660_v4  ;;  %11566 = vst [vmem:[#allocation205_spill] sm:$0xff] %v6662_v18  ;;  %v6679_v4 = vmul.f32 0.0010283801, %v6073_v10  ;;  %v6700_v10 = vmul.f32 0.0010283801, %v6107_v28 }
 0x202   :  { %1654 = vrot.lane.b32.xlu1 %v6658_v13, %s5459_s5  ;;  %1652 = vrot.lane.b32.xlu0 %v6665_v34, %s5459_s5  ;;  %v6718_v28 = vmul.f32 0.0010283801, %v6125_v43  ;;  %v6737_v43 = vmul.f32 0.007598758, %v6715_v27  ;;  %v6820_v49 = vmul.f32 0.007598758, %v6804_v0 }
 0x203   :  { %11571 = vst [vmem:[#allocation210_spill] sm:$0xff] %v6679_v4  ;;  %11576 = vst [vmem:[#allocation215_spill] sm:$0xff] %v6700_v10 }
 0x204   :  { %v6674_v32 = vpop.permute.xlu1 %1410  ;;  %v6676_v20 = vpop.permute.xlu0 %1408  ;;  %11582 = vst [vmem:[#allocation221_spill] sm:$0xff] %v6718_v28  ;;  %11597 = vst [vmem:[#allocation236_spill] sm:$0xff] %v6820_v49 }
 0x205   :  { %11569 = vst [vmem:[#allocation208_spill] sm:$0xff] %v6674_v32  ;;  %11570 = vst [vmem:[#allocation209_spill] sm:$0xff] %v6676_v20  ;;  %v6693_v32 = vmul.f32 0.0010283801, %v6091_v25  ;;  %v5289_v25 = vld [vmem:[#allocation6 + $0x8] sm:$0xff] }
 0x206   :  { %1658 = vrot.lane.b32.xlu1 %v6672_v54, %s5459_s5  ;;  %1656 = vrot.lane.b32.xlu0 %v6679_v4, %s5459_s5 }
 0x207   :  { %11575 = vst [vmem:[#allocation214_spill] sm:$0xff] %v6693_v32 }
 0x208   :  { %v6688_v18 = vpop.permute.xlu1 %1414  ;;  %v6690_v31 = vpop.permute.xlu0 %1412 }
 0x209   :  { %11573 = vst [vmem:[#allocation212_spill] sm:$0xff] %v6688_v18  ;;  %11574 = vst [vmem:[#allocation213_spill] sm:$0xff] %v6690_v31  ;;  %v6707_v18 = vmul.f32 0.0010283801, %v6109_v46  ;;  %v6711_v31 = vmul.f32 %v5289_v25, %v5289_v25  ;;  %v6725_v46 = vmul.f32 0.0010283801, %v6127_v42 }
 0x20a   :  { %1662 = vrot.lane.b32.xlu1 %v6686_v21, %s5459_s5  ;;  %1660 = vrot.lane.b32.xlu0 %v6693_v32, %s5459_s5 }
 0x20b   :  { %11579 = vst [vmem:[#allocation218_spill] sm:$0xff] %v6707_v18  ;;  %11580 = vst [vmem:[#allocation219_spill] sm:$0xff] %v6711_v31  ;;  %v6730_v25 = vmul.f32 0.007598758, %v6711_v31 }
 0x20c   :  { %v6702_v20 = vpop.permute.xlu1 %1418  ;;  %v6704_v26 = vpop.permute.xlu0 %1416  ;;  %11585 = vst [vmem:[#allocation224_spill] sm:$0xff] %v6725_v46 }
 0x20d   :  { %11577 = vst [vmem:[#allocation216_spill] sm:$0xff] %v6702_v20  ;;  %11578 = vst [vmem:[#allocation217_spill] sm:$0xff] %v6704_v26 }
 0x20e   :  { %1666 = vrot.lane.b32.xlu1 %v6700_v10, %s5459_s5  ;;  %1664 = vrot.lane.b32.xlu0 %v6707_v18, %s5459_s5 }
 0x210   :  { %v6720_v20 = vpop.permute.xlu1 %1446  ;;  %v6722_v26 = vpop.permute.xlu0 %1444 }
 0x211   :  { %11583 = vst [vmem:[#allocation222_spill] sm:$0xff] %v6720_v20  ;;  %11584 = vst [vmem:[#allocation223_spill] sm:$0xff] %v6722_v26  ;;  %v6739_v20 = vmul.f32 %v5292_v33, %v5292_v33  ;;  %v5294_v33 = vld [vmem:[#allocation6 + $0x20] sm:$0xff] }
 0x212   :  { %1670 = vrot.lane.b32.xlu1 %v6718_v28, %s5459_s5  ;;  %1668 = vrot.lane.b32.xlu0 %v6725_v46, %s5459_s5  ;;  %v6757_v5 = vmul.f32 %v5294_v33, %v5294_v33  ;;  %v5296_v33 = vld [vmem:[#allocation6 + $0x30] sm:$0xff] }
 0x213   :  { %v6755_v57 = vmul.f32 0.007598758, %v6739_v20  ;;  %v6775_v45 = vmul.f32 %v5296_v33, %v5296_v33  ;;  %v5298_v33 = vld [vmem:[#allocation6 + $0x40] sm:$0xff] }
 0x214   :  { %v6741_v42 = vpop.permute.xlu1 %1450  ;;  %v6743_v26 = vpop.permute.xlu0 %1448  ;;  %v6773_v37 = vmul.f32 0.007598758, %v6757_v5  ;;  %v6793_v2 = vmul.f32 %v5298_v33, %v5298_v33  ;;  %v5300_v33 = vld [vmem:[#allocation6 + $0x50] sm:$0xff] }
 0x215   :  { %11586 = vst [vmem:[#allocation225_spill] sm:$0xff] %v6741_v42  ;;  %11587 = vst [vmem:[#allocation226_spill] sm:$0xff] %v6743_v26  ;;  %v6791_v22 = vmul.f32 0.007598758, %v6775_v45  ;;  %v6811_v16 = vmul.f32 %v5300_v33, %v5300_v33 }
 0x216   :  { %2106 = vrot.lane.b32.xlu1 %v6730_v25, %s5450_s2  ;;  %2104 = vrot.lane.b32.xlu0 %v6737_v43, %s5450_s2  ;;  %v6809_v48 = vmul.f32 0.007598758, %v6793_v2 }
 0x217   :  { %v6825_v35 = vmul.f32 0.007598758, %v6811_v16 }
 0x218   :  { %v6759_v42 = vpop.permute.xlu1 %1454  ;;  %v6761_v26 = vpop.permute.xlu0 %1452  ;;  %11594 = vst [vmem:[#allocation233_spill] sm:$0xff] %v6809_v48 }
 0x219   :  { %11588 = vst [vmem:[#allocation227_spill] sm:$0xff] %v6759_v42  ;;  %11589 = vst [vmem:[#allocation228_spill] sm:$0xff] %v6761_v26 }
 0x21a   :  { %2110 = vrot.lane.b32.xlu1 %v6748_v55, %s5450_s2  ;;  %2108 = vrot.lane.b32.xlu0 %v6755_v57, %s5450_s2  ;;  %11598 = vst [vmem:[#allocation237_spill] sm:$0xff] %v6825_v35 }
 0x21c   :  { %v6777_v42 = vpop.permute.xlu1 %1458  ;;  %v6779_v26 = vpop.permute.xlu0 %1456 }
 0x21d   :  { %11590 = vst [vmem:[#allocation229_spill] sm:$0xff] %v6777_v42  ;;  %11591 = vst [vmem:[#allocation230_spill] sm:$0xff] %v6779_v26 }
 0x21e   :  { %2114 = vrot.lane.b32.xlu1 %v6766_v36, %s5450_s2  ;;  %2112 = vrot.lane.b32.xlu0 %v6773_v37, %s5450_s2 }
 0x220   :  { %v6795_v42 = vpop.permute.xlu1 %1462  ;;  %v6797_v26 = vpop.permute.xlu0 %1460 }
 0x221   :  { %11592 = vst [vmem:[#allocation231_spill] sm:$0xff] %v6795_v42  ;;  %11593 = vst [vmem:[#allocation232_spill] sm:$0xff] %v6797_v26 }
 0x222   :  { %2118 = vrot.lane.b32.xlu1 %v6784_v39, %s5450_s2  ;;  %2116 = vrot.lane.b32.xlu0 %v6791_v22, %s5450_s2 }
 0x224   :  { %v6813_v42 = vpop.permute.xlu1 %1466  ;;  %v6815_v26 = vpop.permute.xlu0 %1464 }
 0x225   :  { %11595 = vst [vmem:[#allocation234_spill] sm:$0xff] %v6813_v42  ;;  %11596 = vst [vmem:[#allocation235_spill] sm:$0xff] %v6815_v26  ;;  %v6834_v26 = vmul.f32 0.036000773, %v6711_v31  ;;  %v6839_v42 = vmul.f32 0.036000773, %v6715_v27 }
 0x226   :  { %2122 = vrot.lane.b32.xlu1 %v6802_v61, %s5450_s2  ;;  %2120 = vrot.lane.b32.xlu0 %v6809_v48, %s5450_s2 }
 0x228   :  { %v6827_v17 = vpop.permute.xlu1 %1494  ;;  %v6829_v33 = vpop.permute.xlu0 %1492 }
 0x229   :  { %11599 = vst [vmem:[#allocation238_spill] sm:$0xff] %v6827_v17  ;;  %11600 = vst [vmem:[#allocation239_spill] sm:$0xff] %v6829_v33  ;;  %v6848_v17 = vmul.f32 0.036000773, %v6732_v56  ;;  %v6853_v33 = vmul.f32 0.036000773, %v6739_v20 }
 0x22a   :  { %2126 = vrot.lane.b32.xlu1 %v6820_v49, %s5450_s2  ;;  %2124 = vrot.lane.b32.xlu0 %v6825_v35, %s5450_s2 }
 0x22c   :  { %v6841_v50 = vpop.permute.xlu1 %1498  ;;  %v6843_v11 = vpop.permute.xlu0 %1496 }
 0x22d   :  { %11601 = vst [vmem:[#allocation240_spill] sm:$0xff] %v6841_v50  ;;  %11602 = vst [vmem:[#allocation241_spill] sm:$0xff] %v6843_v11  ;;  %v6862_v11 = vmul.f32 0.036000773, %v6750_v58  ;;  %v6867_v50 = vmul.f32 0.036000773, %v6757_v5 }
 0x22e   :  { %2178 = vrot.lane.b32.xlu1 %v6834_v26, %s5451_s23  ;;  %2176 = vrot.lane.b32.xlu0 %v6839_v42, %s5451_s23 }
 0x230   :  { %v6855_v51 = vpop.permute.xlu1 %1502  ;;  %v6857_v19 = vpop.permute.xlu0 %1500 }
 0x231   :  { %11603 = vst [vmem:[#allocation242_spill] sm:$0xff] %v6855_v51  ;;  %11604 = vst [vmem:[#allocation243_spill] sm:$0xff] %v6857_v19  ;;  %v6876_v19 = vmul.f32 0.036000773, %v6768_v38  ;;  %v6881_v51 = vmul.f32 0.036000773, %v6775_v45 }
 0x232   :  { %2182 = vrot.lane.b32.xlu1 %v6848_v17, %s5451_s23  ;;  %2180 = vrot.lane.b32.xlu0 %v6853_v33, %s5451_s23 }
 0x234   :  { %v6869_v9 = vpop.permute.xlu1 %1506  ;;  %v6871_v1 = vpop.permute.xlu0 %1504 }
 0x235   :  { %11605 = vst [vmem:[#allocation244_spill] sm:$0xff] %v6869_v9  ;;  %11606 = vst [vmem:[#allocation245_spill] sm:$0xff] %v6871_v1  ;;  %v6890_v1 = vmul.f32 0.036000773, %v6786_v7  ;;  %v6895_v9 = vmul.f32 0.036000773, %v6793_v2 }
 0x236   :  { %2186 = vrot.lane.b32.xlu1 %v6862_v11, %s5451_s23  ;;  %2184 = vrot.lane.b32.xlu0 %v6867_v50, %s5451_s23 }
 0x238   :  { %v6883_v60 = vpop.permute.xlu1 %1510  ;;  %v6885_v14 = vpop.permute.xlu0 %1508 }
 0x239   :  { %11607 = vst [vmem:[#allocation246_spill] sm:$0xff] %v6883_v60  ;;  %11608 = vst [vmem:[#allocation247_spill] sm:$0xff] %v6885_v14  ;;  %v6904_v14 = vmul.f32 0.036000773, %v6804_v0  ;;  %v6909_v60 = vmul.f32 0.036000773, %v6811_v16 }
 0x23a   :  { %2190 = vrot.lane.b32.xlu1 %v6876_v19, %s5451_s23  ;;  %2188 = vrot.lane.b32.xlu0 %v6881_v51, %s5451_s23 }
 0x23c   :  { %v6897_v6 = vpop.permute.xlu1 %1514  ;;  %v6899_v29 = vpop.permute.xlu0 %1512 }
 0x23d   :  { %11609 = vst [vmem:[#allocation248_spill] sm:$0xff] %v6897_v6  ;;  %11610 = vst [vmem:[#allocation249_spill] sm:$0xff] %v6899_v29  ;;  %v6918_v29 = vmul.f32 0.10936069, %v6711_v31  ;;  %v6923_v6 = vmul.f32 0.10936069, %v6715_v27 }
 0x23e   :  { %2194 = vrot.lane.b32.xlu1 %v6890_v1, %s5451_s23  ;;  %2192 = vrot.lane.b32.xlu0 %v6895_v9, %s5451_s23 }
 0x240   :  { %v6911_v62 = vpop.permute.xlu1 %1542  ;;  %v6913_v3 = vpop.permute.xlu0 %1540 }
 0x241   :  { %11611 = vst [vmem:[#allocation250_spill] sm:$0xff] %v6911_v62  ;;  %11612 = vst [vmem:[#allocation251_spill] sm:$0xff] %v6913_v3  ;;  %v6932_v62 = vmul.f32 0.10936069, %v6732_v56  ;;  %v6937_v3 = vmul.f32 0.10936069, %v6739_v20 }
 0x242   :  { %2198 = vrot.lane.b32.xlu1 %v6904_v14, %s5451_s23  ;;  %2196 = vrot.lane.b32.xlu0 %v6909_v60, %s5451_s23 }
 0x244   :  { %v6925_v46 = vpop.permute.xlu1 %1546  ;;  %v6927_v63 = vpop.permute.xlu0 %1544 }
 0x245   :  { %11613 = vst [vmem:[#allocation252_spill] sm:$0xff] %v6925_v46  ;;  %11614 = vst [vmem:[#allocation253_spill] sm:$0xff] %v6927_v63  ;;  %v6946_v63 = vmul.f32 0.10936069, %v6750_v58  ;;  %v6951_v46 = vmul.f32 0.10936069, %v6757_v5 }
 0x246   :  { %2250 = vrot.lane.b32.xlu1 %v6918_v29, %s5452_s24  ;;  %2248 = vrot.lane.b32.xlu0 %v6923_v6, %s5452_s24 }
 0x248   :  { %v6939_v28 = vpop.permute.xlu1 %1550  ;;  %v6941_v59 = vpop.permute.xlu0 %1548 }
 0x249   :  { %11615 = vst [vmem:[#allocation254_spill] sm:$0xff] %v6939_v28  ;;  %11616 = vst [vmem:[#allocation255_spill] sm:$0xff] %v6941_v59  ;;  %v6960_v59 = vmul.f32 0.10936069, %v6768_v38  ;;  %v6965_v28 = vmul.f32 0.10936069, %v6775_v45 }
 0x24a   :  { %2254 = vrot.lane.b32.xlu1 %v6932_v62, %s5452_s24  ;;  %2252 = vrot.lane.b32.xlu0 %v6937_v3, %s5452_s24 }
 0x24c   :  { %v6953_v18 = vpop.permute.xlu1 %1554  ;;  %v6955_v23 = vpop.permute.xlu0 %1552 }
 0x24d   :  { %11617 = vst [vmem:[#allocation256_spill] sm:$0xff] %v6953_v18  ;;  %11618 = vst [vmem:[#allocation257_spill] sm:$0xff] %v6955_v23  ;;  %v6974_v23 = vmul.f32 0.10936069, %v6786_v7  ;;  %v6979_v18 = vmul.f32 0.10936069, %v6793_v2 }
 0x24e   :  { %2258 = vrot.lane.b32.xlu1 %v6946_v63, %s5452_s24  ;;  %2256 = vrot.lane.b32.xlu0 %v6951_v46, %s5452_s24 }
 0x250   :  { %v6967_v10 = vpop.permute.xlu1 %1558  ;;  %v6969_v24 = vpop.permute.xlu0 %1556 }
 0x251   :  { %11619 = vst [vmem:[#allocation258_spill] sm:$0xff] %v6967_v10  ;;  %11620 = vst [vmem:[#allocation259_spill] sm:$0xff] %v6969_v24  ;;  %v6988_v24 = vmul.f32 0.10936069, %v6804_v0  ;;  %v6993_v10 = vmul.f32 0.10936069, %v6811_v16 }
 0x252   :  { %2262 = vrot.lane.b32.xlu1 %v6960_v59, %s5452_s24  ;;  %2260 = vrot.lane.b32.xlu0 %v6965_v28, %s5452_s24 }
 0x254   :  { %v6981_v32 = vpop.permute.xlu1 %1562  ;;  %v6983_v44 = vpop.permute.xlu0 %1560 }
 0x255   :  { %11621 = vst [vmem:[#allocation260_spill] sm:$0xff] %v6981_v32  ;;  %11622 = vst [vmem:[#allocation261_spill] sm:$0xff] %v6983_v44  ;;  %v7002_v44 = vmul.f32 0.21300554, %v6711_v31  ;;  %v7007_v32 = vmul.f32 0.21300554, %v6715_v27 }
 0x256   :  { %2266 = vrot.lane.b32.xlu1 %v6974_v23, %s5452_s24  ;;  %2264 = vrot.lane.b32.xlu0 %v6979_v18, %s5452_s24 }
 0x258   :  { %v6995_v21 = vpop.permute.xlu1 %1590  ;;  %v6997_v15 = vpop.permute.xlu0 %1588 }
 0x259   :  { %11623 = vst [vmem:[#allocation262_spill] sm:$0xff] %v6995_v21  ;;  %11624 = vst [vmem:[#allocation263_spill] sm:$0xff] %v6997_v15  ;;  %v7016_v21 = vmul.f32 0.21300554, %v6732_v56  ;;  %v7021_v15 = vmul.f32 0.21300554, %v6739_v20 }
 0x25a   :  { %2270 = vrot.lane.b32.xlu1 %v6988_v24, %s5452_s24  ;;  %2268 = vrot.lane.b32.xlu0 %v6993_v10, %s5452_s24 }
 0x25c   :  { %v7009_v4 = vpop.permute.xlu1 %1594  ;;  %v7011_v8 = vpop.permute.xlu0 %1592 }
 0x25d   :  { %11625 = vst [vmem:[#allocation264_spill] sm:$0xff] %v7009_v4  ;;  %11626 = vst [vmem:[#allocation265_spill] sm:$0xff] %v7011_v8  ;;  %v7030_v8 = vmul.f32 0.21300554, %v6750_v58  ;;  %v7035_v4 = vmul.f32 0.21300554, %v6757_v5 }
 0x25e   :  { %2322 = vrot.lane.b32.xlu1 %v7002_v44, %s5453_s25  ;;  %2320 = vrot.lane.b32.xlu0 %v7007_v32, %s5453_s25 }
 0x260   :  { %v7023_v54 = vpop.permute.xlu1 %1598  ;;  %v7025_v52 = vpop.permute.xlu0 %1596 }
 0x261   :  { %11627 = vst [vmem:[#allocation266_spill] sm:$0xff] %v7023_v54  ;;  %11628 = vst [vmem:[#allocation267_spill] sm:$0xff] %v7025_v52  ;;  %v7044_v52 = vmul.f32 0.21300554, %v6768_v38  ;;  %v7049_v54 = vmul.f32 0.21300554, %v6775_v45 }
 0x262   :  { %2326 = vrot.lane.b32.xlu1 %v7016_v21, %s5453_s25  ;;  %2324 = vrot.lane.b32.xlu0 %v7021_v15, %s5453_s25 }
 0x264   :  { %v7037_v34 = vpop.permute.xlu1 %1602  ;;  %v7039_v30 = vpop.permute.xlu0 %1600 }
 0x265   :  { %11629 = vst [vmem:[#allocation268_spill] sm:$0xff] %v7037_v34  ;;  %11630 = vst [vmem:[#allocation269_spill] sm:$0xff] %v7039_v30  ;;  %v7058_v30 = vmul.f32 0.21300554, %v6786_v7  ;;  %v7063_v34 = vmul.f32 0.21300554, %v6793_v2 }
 0x266   :  { %2330 = vrot.lane.b32.xlu1 %v7030_v8, %s5453_s25  ;;  %2328 = vrot.lane.b32.xlu0 %v7035_v4, %s5453_s25 }
 0x268   :  { %v7051_v13 = vpop.permute.xlu1 %1606  ;;  %v7053_v41 = vpop.permute.xlu0 %1604 }
 0x269   :  { %11631 = vst [vmem:[#allocation270_spill] sm:$0xff] %v7051_v13  ;;  %11632 = vst [vmem:[#allocation271_spill] sm:$0xff] %v7053_v41  ;;  %v7072_v41 = vmul.f32 0.21300554, %v6804_v0  ;;  %v7077_v13 = vmul.f32 0.21300554, %v6811_v16 }
 0x26a   :  { %2334 = vrot.lane.b32.xlu1 %v7044_v52, %s5453_s25  ;;  %2332 = vrot.lane.b32.xlu0 %v7049_v54, %s5453_s25 }
 0x26c   :  { %v7065_v53 = vpop.permute.xlu1 %1610  ;;  %v7067_v12 = vpop.permute.xlu0 %1608 }
 0x26d   :  { %11633 = vst [vmem:[#allocation272_spill] sm:$0xff] %v7065_v53  ;;  %11634 = vst [vmem:[#allocation273_spill] sm:$0xff] %v7067_v12  ;;  %v2369_v12 = vmul.f32 0.26601171, %v6711_v31  ;;  %v2368_v53 = vmul.f32 0.26601171, %v6715_v27 }
 0x26e   :  { %2338 = vrot.lane.b32.xlu1 %v7058_v30, %s5453_s25  ;;  %2336 = vrot.lane.b32.xlu0 %v7063_v34, %s5453_s25  ;;  %v2373_v27 = vmul.f32 0.26601171, %v6750_v58 }
 0x270   :  { %v7079_v47 = vpop.permute.xlu1 %1650  ;;  %v7081_v40 = vpop.permute.xlu0 %1648 }
 0x271   :  { %11635 = vst [vmem:[#allocation274_spill] sm:$0xff] %v7079_v47  ;;  %11636 = vst [vmem:[#allocation275_spill] sm:$0xff] %v7081_v40  ;;  %v2371_v47 = vmul.f32 0.26601171, %v6732_v56  ;;  %v2370_v40 = vmul.f32 0.26601171, %v6739_v20 }
 0x272   :  { %2342 = vrot.lane.b32.xlu1 %v7072_v41, %s5453_s25  ;;  %2340 = vrot.lane.b32.xlu0 %v7077_v13, %s5453_s25 }
 0x274   :  { %v7089_v35 = vpop.permute.xlu1 %1654  ;;  %v7091_v49 = vpop.permute.xlu0 %1652 }
 0x275   :  { %11637 = vst [vmem:[#allocation276_spill] sm:$0xff] %v7089_v35  ;;  %11638 = vst [vmem:[#allocation277_spill] sm:$0xff] %v7091_v49  ;;  %v2372_v35 = vmul.f32 0.26601171, %v6757_v5 }
 0x276   :  { %2394 = vrot.lane.b32.xlu1 %v2369_v12, %s5454_s26  ;;  %2392 = vrot.lane.b32.xlu0 %v2368_v53, %s5454_s26  ;;  %v2375_v53 = vmul.f32 0.26601171, %v6768_v38 }
 0x278   :  { %v7097_v48 = vpop.permute.xlu1 %1658  ;;  %v7099_v31 = vpop.permute.xlu0 %1656 }
 0x279   :  { %11639 = vst [vmem:[#allocation278_spill] sm:$0xff] %v7097_v48  ;;  %11640 = vst [vmem:[#allocation279_spill] sm:$0xff] %v7099_v31  ;;  %v2374_v48 = vmul.f32 0.26601171, %v6775_v45 }
 0x27a   :  { %2398 = vrot.lane.b32.xlu1 %v2371_v47, %s5454_s26  ;;  %2396 = vrot.lane.b32.xlu0 %v2370_v40, %s5454_s26  ;;  %v2377_v40 = vmul.f32 0.26601171, %v6786_v7 }
 0x27c   :  { %v7105_v49 = vpop.permute.xlu1 %1662  ;;  %v7107_v12 = vpop.permute.xlu0 %1660 }
 0x27d   :  { %11641 = vst [vmem:[#allocation280_spill] sm:$0xff] %v7105_v49  ;;  %11642 = vst [vmem:[#allocation281_spill] sm:$0xff] %v7107_v12  ;;  %v2376_v12 = vmul.f32 0.26601171, %v6793_v2 }
 0x27e   :  { %2402 = vrot.lane.b32.xlu1 %v2373_v27, %s5454_s26  ;;  %2400 = vrot.lane.b32.xlu0 %v2372_v35, %s5454_s26  ;;  %v2379_v35 = vmul.f32 0.26601171, %v6804_v0 }
 0x280   :  { %v7113_v31 = vpop.permute.xlu1 %1666  ;;  %v7115_v47 = vpop.permute.xlu0 %1664 }
 0x281   :  { %11643 = vst [vmem:[#allocation282_spill] sm:$0xff] %v7113_v31  ;;  %11644 = vst [vmem:[#allocation283_spill] sm:$0xff] %v7115_v47  ;;  %v2378_v47 = vmul.f32 0.26601171, %v6811_v16 }
 0x282   :  { %2406 = vrot.lane.b32.xlu1 %v2375_v53, %s5454_s26  ;;  %2404 = vrot.lane.b32.xlu0 %v2374_v48, %s5454_s26 }
 0x284   :  { %v7121_v49 = vpop.permute.xlu1 %1670  ;;  %v7123_v27 = vpop.permute.xlu0 %1668 }
 0x285   :  { %11645 = vst [vmem:[#allocation284_spill] sm:$0xff] %v7121_v49  ;;  %11646 = vst [vmem:[#allocation285_spill] sm:$0xff] %v7123_v27 }
 0x286   :  { %2410 = vrot.lane.b32.xlu1 %v2377_v40, %s5454_s26  ;;  %2408 = vrot.lane.b32.xlu0 %v2376_v12, %s5454_s26 }
 0x288   :  { %v7129_v31 = vpop.permute.xlu1 %2106  ;;  %v7131_v53 = vpop.permute.xlu0 %2104 }
 0x289   :  { %11647 = vst [vmem:[#allocation286_spill] sm:$0xff] %v7129_v31  ;;  %11648 = vst [vmem:[#allocation287_spill] sm:$0xff] %v7131_v53 }
 0x28a   :  { %2414 = vrot.lane.b32.xlu1 %v2379_v35, %s5454_s26  ;;  %2412 = vrot.lane.b32.xlu0 %v2378_v47, %s5454_s26 }
 0x28c   :  { %v7135_v48 = vpop.permute.xlu1 %2110  ;;  %v7137_v49 = vpop.permute.xlu0 %2108 }
 0x28d   :  { %11649 = vst [vmem:[#allocation288_spill] sm:$0xff] %v7135_v48  ;;  %11650 = vst [vmem:[#allocation289_spill] sm:$0xff] %v7137_v49 }
 0x28e   :  { %2442 = vrot.lane.b32.xlu1 %v7002_v44, %s5455_s27  ;;  %2440 = vrot.lane.b32.xlu0 %v7007_v32, %s5455_s27 }
 0x290   :  { %v7143_v12 = vpop.permute.xlu1 %2114  ;;  %v7145_v40 = vpop.permute.xlu0 %2112 }
 0x291   :  { %11651 = vst [vmem:[#allocation290_spill] sm:$0xff] %v7143_v12  ;;  %11652 = vst [vmem:[#allocation291_spill] sm:$0xff] %v7145_v40 }
 0x292   :  { %2446 = vrot.lane.b32.xlu1 %v7016_v21, %s5455_s27  ;;  %2444 = vrot.lane.b32.xlu0 %v7021_v15, %s5455_s27 }
 0x294   :  { %v7151_v47 = vpop.permute.xlu1 %2118  ;;  %v7153_v35 = vpop.permute.xlu0 %2116 }
 0x295   :  { %11653 = vst [vmem:[#allocation292_spill] sm:$0xff] %v7151_v47  ;;  %11654 = vst [vmem:[#allocation293_spill] sm:$0xff] %v7153_v35 }
 0x296   :  { %2450 = vrot.lane.b32.xlu1 %v7030_v8, %s5455_s27  ;;  %2448 = vrot.lane.b32.xlu0 %v7035_v4, %s5455_s27 }
 0x298   :  { %v7159_v44 = vpop.permute.xlu1 %2122  ;;  %v7161_v32 = vpop.permute.xlu0 %2120 }
 0x299   :  { %11655 = vst [vmem:[#allocation294_spill] sm:$0xff] %v7159_v44  ;;  %11656 = vst [vmem:[#allocation295_spill] sm:$0xff] %v7161_v32 }
 0x29a   :  { %2454 = vrot.lane.b32.xlu1 %v7044_v52, %s5455_s27  ;;  %2452 = vrot.lane.b32.xlu0 %v7049_v54, %s5455_s27 }
 0x29c   :  { %v7167_v15 = vpop.permute.xlu1 %2126  ;;  %v7169_v21 = vpop.permute.xlu0 %2124 }
 0x29d   :  { %11657 = vst [vmem:[#allocation296_spill] sm:$0xff] %v7167_v15  ;;  %11658 = vst [vmem:[#allocation297_spill] sm:$0xff] %v7169_v21 }
 0x29e   :  { %2458 = vrot.lane.b32.xlu1 %v7058_v30, %s5455_s27  ;;  %2456 = vrot.lane.b32.xlu0 %v7063_v34, %s5455_s27 }
 0x2a0   :  { %v7175_v8 = vpop.permute.xlu1 %2178  ;;  %v7177_v4 = vpop.permute.xlu0 %2176 }
 0x2a1   :  { %11659 = vst [vmem:[#allocation298_spill] sm:$0xff] %v7175_v8  ;;  %11660 = vst [vmem:[#allocation299_spill] sm:$0xff] %v7177_v4 }
 0x2a2   :  { %2462 = vrot.lane.b32.xlu1 %v7072_v41, %s5455_s27  ;;  %2460 = vrot.lane.b32.xlu0 %v7077_v13, %s5455_s27 }
 0x2a4   :  { %v7183_v52 = vpop.permute.xlu1 %2182  ;;  %v7185_v54 = vpop.permute.xlu0 %2180 }
 0x2a5   :  { %11661 = vst [vmem:[#allocation300_spill] sm:$0xff] %v7183_v52  ;;  %11662 = vst [vmem:[#allocation301_spill] sm:$0xff] %v7185_v54 }
 0x2a6   :  { %2490 = vrot.lane.b32.xlu1 %v6918_v29, %s5456_s28  ;;  %2488 = vrot.lane.b32.xlu0 %v6923_v6, %s5456_s28 }
 0x2a8   :  { %v7191_v30 = vpop.permute.xlu1 %2186  ;;  %v7193_v34 = vpop.permute.xlu0 %2184 }
 0x2a9   :  { %11663 = vst [vmem:[#allocation302_spill] sm:$0xff] %v7191_v30  ;;  %11664 = vst [vmem:[#allocation303_spill] sm:$0xff] %v7193_v34 }
 0x2aa   :  { %2494 = vrot.lane.b32.xlu1 %v6932_v62, %s5456_s28  ;;  %2492 = vrot.lane.b32.xlu0 %v6937_v3, %s5456_s28 }
 0x2ac   :  { %v7199_v41 = vpop.permute.xlu1 %2190  ;;  %v7201_v13 = vpop.permute.xlu0 %2188 }
 0x2ad   :  { %11665 = vst [vmem:[#allocation304_spill] sm:$0xff] %v7199_v41  ;;  %11666 = vst [vmem:[#allocation305_spill] sm:$0xff] %v7201_v13 }
 0x2ae   :  { %2498 = vrot.lane.b32.xlu1 %v6946_v63, %s5456_s28  ;;  %2496 = vrot.lane.b32.xlu0 %v6951_v46, %s5456_s28 }
 0x2b0   :  { %v7207_v29 = vpop.permute.xlu1 %2194  ;;  %v7209_v6 = vpop.permute.xlu0 %2192 }
 0x2b1   :  { %11667 = vst [vmem:[#allocation306_spill] sm:$0xff] %v7207_v29  ;;  %11668 = vst [vmem:[#allocation307_spill] sm:$0xff] %v7209_v6 }
 0x2b2   :  { %2502 = vrot.lane.b32.xlu1 %v6960_v59, %s5456_s28  ;;  %2500 = vrot.lane.b32.xlu0 %v6965_v28, %s5456_s28 }
 0x2b4   :  { %v7215_v3 = vpop.permute.xlu1 %2198  ;;  %v7217_v62 = vpop.permute.xlu0 %2196 }
 0x2b5   :  { %11669 = vst [vmem:[#allocation308_spill] sm:$0xff] %v7215_v3  ;;  %11670 = vst [vmem:[#allocation309_spill] sm:$0xff] %v7217_v62 }
 0x2b6   :  { %2506 = vrot.lane.b32.xlu1 %v6974_v23, %s5456_s28  ;;  %2504 = vrot.lane.b32.xlu0 %v6979_v18, %s5456_s28 }
 0x2b8   :  { %v7223_v63 = vpop.permute.xlu1 %2250  ;;  %v7225_v46 = vpop.permute.xlu0 %2248 }
 0x2b9   :  { %11671 = vst [vmem:[#allocation310_spill] sm:$0xff] %v7223_v63  ;;  %11672 = vst [vmem:[#allocation311_spill] sm:$0xff] %v7225_v46 }
 0x2ba   :  { %2510 = vrot.lane.b32.xlu1 %v6988_v24, %s5456_s28  ;;  %2508 = vrot.lane.b32.xlu0 %v6993_v10, %s5456_s28 }
 0x2bc   :  { %v7231_v59 = vpop.permute.xlu1 %2254  ;;  %v7233_v28 = vpop.permute.xlu0 %2252 }
 0x2bd   :  { %11673 = vst [vmem:[#allocation312_spill] sm:$0xff] %v7231_v59  ;;  %11674 = vst [vmem:[#allocation313_spill] sm:$0xff] %v7233_v28 }
 0x2be   :  { %2538 = vrot.lane.b32.xlu1 %v6834_v26, %s5457_s29  ;;  %2536 = vrot.lane.b32.xlu0 %v6839_v42, %s5457_s29 }
 0x2c0   :  { %v7239_v23 = vpop.permute.xlu1 %2258  ;;  %v7241_v18 = vpop.permute.xlu0 %2256 }
 0x2c1   :  { %11675 = vst [vmem:[#allocation314_spill] sm:$0xff] %v7239_v23  ;;  %11676 = vst [vmem:[#allocation315_spill] sm:$0xff] %v7241_v18 }
 0x2c2   :  { %2542 = vrot.lane.b32.xlu1 %v6848_v17, %s5457_s29  ;;  %2540 = vrot.lane.b32.xlu0 %v6853_v33, %s5457_s29 }
 0x2c4   :  { %v7247_v24 = vpop.permute.xlu1 %2262  ;;  %v7249_v10 = vpop.permute.xlu0 %2260 }
 0x2c5   :  { %11677 = vst [vmem:[#allocation316_spill] sm:$0xff] %v7247_v24  ;;  %11678 = vst [vmem:[#allocation317_spill] sm:$0xff] %v7249_v10 }
 0x2c6   :  { %2546 = vrot.lane.b32.xlu1 %v6862_v11, %s5457_s29  ;;  %2544 = vrot.lane.b32.xlu0 %v6867_v50, %s5457_s29 }
 0x2c8   :  { %v7255_v26 = vpop.permute.xlu1 %2266  ;;  %v7257_v42 = vpop.permute.xlu0 %2264 }
 0x2c9   :  { %11679 = vst [vmem:[#allocation318_spill] sm:$0xff] %v7255_v26  ;;  %11680 = vst [vmem:[#allocation319_spill] sm:$0xff] %v7257_v42 }
 0x2ca   :  { %2550 = vrot.lane.b32.xlu1 %v6876_v19, %s5457_s29  ;;  %2548 = vrot.lane.b32.xlu0 %v6881_v51, %s5457_s29 }
 0x2cc   :  { %v7263_v17 = vpop.permute.xlu1 %2270  ;;  %v7265_v33 = vpop.permute.xlu0 %2268 }
 0x2cd   :  { %11681 = vst [vmem:[#allocation320_spill] sm:$0xff] %v7263_v17  ;;  %11682 = vst [vmem:[#allocation321_spill] sm:$0xff] %v7265_v33 }
 0x2ce   :  { %2554 = vrot.lane.b32.xlu1 %v6890_v1, %s5457_s29  ;;  %2552 = vrot.lane.b32.xlu0 %v6895_v9, %s5457_s29 }
 0x2d0   :  { %v7271_v11 = vpop.permute.xlu1 %2322  ;;  %v7273_v50 = vpop.permute.xlu0 %2320 }
 0x2d1   :  { %11683 = vst [vmem:[#allocation322_spill] sm:$0xff] %v7271_v11  ;;  %11684 = vst [vmem:[#allocation323_spill] sm:$0xff] %v7273_v50 }
 0x2d2   :  { %2558 = vrot.lane.b32.xlu1 %v6904_v14, %s5457_s29  ;;  %2556 = vrot.lane.b32.xlu0 %v6909_v60, %s5457_s29 }
 0x2d4   :  { %v7279_v19 = vpop.permute.xlu1 %2326  ;;  %v7281_v51 = vpop.permute.xlu0 %2324 }
 0x2d5   :  { %11685 = vst [vmem:[#allocation324_spill] sm:$0xff] %v7279_v19  ;;  %11686 = vst [vmem:[#allocation325_spill] sm:$0xff] %v7281_v51 }
 0x2d6   :  { %2586 = vrot.lane.b32.xlu1 %v6730_v25, %s5458_s30  ;;  %2584 = vrot.lane.b32.xlu0 %v6737_v43, %s5458_s30 }
 0x2d8   :  { %v7287_v1 = vpop.permute.xlu1 %2330  ;;  %v7289_v9 = vpop.permute.xlu0 %2328 }
 0x2d9   :  { %11687 = vst [vmem:[#allocation326_spill] sm:$0xff] %v7287_v1  ;;  %11688 = vst [vmem:[#allocation327_spill] sm:$0xff] %v7289_v9  ;;  %v5303_v9 = vld [vmem:[#allocation7 + $0x18] sm:$0xff] }
 0x2da   :  { %2590 = vrot.lane.b32.xlu1 %v6748_v55, %s5458_s30  ;;  %2588 = vrot.lane.b32.xlu0 %v6755_v57, %s5458_s30  ;;  %v7416_v1 = vmul.f32 %v5303_v9, %v5303_v9  ;;  %v5305_v9 = vld [vmem:[#allocation7 + $0x28] sm:$0xff] }
 0x2db   :  { %v7434_v11 = vmul.f32 %v5305_v9, %v5305_v9  ;;  %v5307_v9 = vld [vmem:[#allocation7 + $0x38] sm:$0xff] }
 0x2dc   :  { %v7295_v14 = vpop.permute.xlu1 %2334  ;;  %v7297_v60 = vpop.permute.xlu0 %2332  ;;  %11729 = vst [vmem:[#allocation358_spill] sm:$0xff] %v7416_v1  ;;  %v7432_v19 = vmul.f32 0.007598758, %v7416_v1  ;;  %v7452_v26 = vmul.f32 %v5307_v9, %v5307_v9  ;;  %v5309_v9 = vld [vmem:[#allocation7 + $0x48] sm:$0xff] }
 0x2dd   :  { %11689 = vst [vmem:[#allocation328_spill] sm:$0xff] %v7295_v14  ;;  %11690 = vst [vmem:[#allocation329_spill] sm:$0xff] %v7297_v60  ;;  %v11703_v60 = vld [vmem:[#allocation220_spill] sm:$0xff]  ;;  %v7450_v42 = vmul.f32 0.007598758, %v7434_v11 }
 0x2de   :  { %2594 = vrot.lane.b32.xlu1 %v6766_v36, %s5458_s30  ;;  %2592 = vrot.lane.b32.xlu0 %v6773_v37, %s5458_s30  ;;  %v11695_v36 = vld [vmem:[#allocation233_spill] sm:$0xff]  ;;  %11734 = vst [vmem:[#allocation363_spill] sm:$0xff] %v7432_v19  ;;  %11735 = vst [vmem:[#allocation364_spill] sm:$0xff] %v7434_v11  ;;  %v7468_v24 = vmul.f32 0.007598758, %v7452_v26 }
 0x2df   :  { %11740 = vst [vmem:[#allocation369_spill] sm:$0xff] %v7450_v42  ;;  %11741 = vst [vmem:[#allocation370_spill] sm:$0xff] %v7452_v26 }
 0x2e0   :  { %v7303_v25 = vpop.permute.xlu1 %2338  ;;  %v7305_v43 = vpop.permute.xlu0 %2336  ;;  %11746 = vst [vmem:[#allocation375_spill] sm:$0xff] %v7468_v24 }
 0x2e1   :  { %11691 = vst [vmem:[#allocation330_spill] sm:$0xff] %v7303_v25  ;;  %11692 = vst [vmem:[#allocation331_spill] sm:$0xff] %v7305_v43  ;;  %v11698_v43 = vld [vmem:[#allocation236_spill] sm:$0xff] }
 0x2e2   :  { %2598 = vrot.lane.b32.xlu1 %v6784_v39, %s5458_s30  ;;  %2596 = vrot.lane.b32.xlu0 %v6791_v22, %s5458_s30  ;;  %v11699_v39 = vld [vmem:[#allocation237_spill] sm:$0xff]  ;;  %v11700_v22 = vld [vmem:[#allocation219_spill] sm:$0xff] }
 0x2e4   :  { %v7311_v57 = vpop.permute.xlu1 %2342  ;;  %v7313_v55 = vpop.permute.xlu0 %2340 }
 0x2e5   :  { %11693 = vst [vmem:[#allocation332_spill] sm:$0xff] %v7311_v57  ;;  %11694 = vst [vmem:[#allocation333_spill] sm:$0xff] %v7313_v55  ;;  %v7328_v57 = vmul.f32 0.0010283801, %v11700_v22 }
 0x2e6   :  { %2602 = vrot.lane.b32.xlu1 %v6802_v61, %s5458_s30  ;;  %2600 = vrot.lane.b32.xlu0 %v11695_v36, %s5458_s30  ;;  %v7333_v61 = vmul.f32 0.0010283801, %v11703_v60  ;;  %v7356_v60 = vmul.f32 0.0010283801, %v6750_v58  ;;  %v7375_v58 = vmul.f32 0.0010283801, %v6775_v45 }
 0x2e7   :  { %11701 = vst [vmem:[#allocation236_spill] sm:$0xff] %v7328_v57  ;;  %v5301_v45 = vld [vmem:[#allocation7 + $0x8] sm:$0xff] }
 0x2e8   :  { %v7319_v37 = vpop.permute.xlu1 %2394  ;;  %v7321_v25 = vpop.permute.xlu0 %2392  ;;  %11704 = vst [vmem:[#allocation219_spill] sm:$0xff] %v7333_v61  ;;  %11710 = vst [vmem:[#allocation339_spill] sm:$0xff] %v7356_v60 }
 0x2e9   :  { %11696 = vst [vmem:[#allocation233_spill] sm:$0xff] %v7319_v37  ;;  %11697 = vst [vmem:[#allocation334_spill] sm:$0xff] %v7321_v25  ;;  %v7470_v25 = vmul.f32 %v5309_v9, %v5309_v9  ;;  %v5311_v9 = vld [vmem:[#allocation7 + $0x58] sm:$0xff] }
 0x2ea   :  { %2606 = vrot.lane.b32.xlu1 %v11698_v43, %s5458_s30  ;;  %2604 = vrot.lane.b32.xlu0 %v11699_v39, %s5458_s30  ;;  %v7342_v43 = vmul.f32 0.0010283801, %v6732_v56  ;;  %v7347_v39 = vmul.f32 0.0010283801, %v6739_v20  ;;  %v7361_v56 = vmul.f32 0.0010283801, %v6757_v5  ;;  %v7488_v50 = vmul.f32 %v5311_v9, %v5311_v9 }
 0x2eb   :  { %v7370_v20 = vmul.f32 0.0010283801, %v6768_v38  ;;  %11716 = vst [vmem:[#allocation345_spill] sm:$0xff] %v7375_v58  ;;  %v7384_v5 = vmul.f32 0.0010283801, %v6786_v7  ;;  %11747 = vst [vmem:[#allocation376_spill] sm:$0xff] %v7470_v25 }
 0x2ec   :  { %v7330_v55 = vpop.permute.xlu1 %2398  ;;  %v7335_v14 = vpop.permute.xlu0 %2396  ;;  %11706 = vst [vmem:[#allocation335_spill] sm:$0xff] %v7342_v43  ;;  %11708 = vst [vmem:[#allocation337_spill] sm:$0xff] %v7347_v39  ;;  %v7389_v38 = vmul.f32 0.0010283801, %v6793_v2  ;;  %v7402_v7 = vmul.f32 0.0010283801, %v6804_v0 }
 0x2ed   :  { %11702 = vst [vmem:[#allocation237_spill] sm:$0xff] %v7330_v55  ;;  %11705 = vst [vmem:[#allocation220_spill] sm:$0xff] %v7335_v14  ;;  %v5302_v55 = vld [vmem:[#allocation7] sm:$0xff]  ;;  %v7407_v2 = vmul.f32 0.0010283801, %v6811_v16 }
 0x2ee   :  { %2646 = vrot.lane.b32.xlu1 %v7328_v57, %s5459_s5  ;;  %2644 = vrot.lane.b32.xlu0 %v7333_v61, %s5459_s5  ;;  %11712 = vst [vmem:[#allocation341_spill] sm:$0xff] %v7361_v56  ;;  %11714 = vst [vmem:[#allocation343_spill] sm:$0xff] %v7370_v20  ;;  %v7399_v37 = vmul.f32 %v5302_v55, %v5302_v55  ;;  %v5304_v55 = vld [vmem:[#allocation7 + $0x10] sm:$0xff]  ;;  %v7486_v28 = vmul.f32 0.007598758, %v7470_v25 }
 0x2ef   :  { %11718 = vst [vmem:[#allocation347_spill] sm:$0xff] %v7384_v5  ;;  %11720 = vst [vmem:[#allocation349_spill] sm:$0xff] %v7389_v38  ;;  %v7423_v16 = vmul.f32 %v5304_v55, %v5304_v55  ;;  %v5306_v55 = vld [vmem:[#allocation7 + $0x20] sm:$0xff]  ;;  %v7504_v63 = vmul.f32 0.007598758, %v7488_v50 }
 0x2f0   :  { %v7344_v36 = vpop.permute.xlu1 %2402  ;;  %v7349_v22 = vpop.permute.xlu0 %2400  ;;  %11723 = vst [vmem:[#allocation352_spill] sm:$0xff] %v7399_v37  ;;  %11724 = vst [vmem:[#allocation353_spill] sm:$0xff] %v7402_v7  ;;  %v7421_v0 = vmul.f32 0.007598758, %v7399_v37  ;;  %v7441_v17 = vmul.f32 %v5306_v55, %v5306_v55  ;;  %v5308_v55 = vld [vmem:[#allocation7 + $0x30] sm:$0xff] }
 0x2f1   :  { %11707 = vst [vmem:[#allocation336_spill] sm:$0xff] %v7344_v36  ;;  %11709 = vst [vmem:[#allocation338_spill] sm:$0xff] %v7349_v22  ;;  %v7439_v33 = vmul.f32 0.007598758, %v7423_v16  ;;  %v7459_v10 = vmul.f32 %v5308_v55, %v5308_v55  ;;  %v5310_v55 = vld [vmem:[#allocation7 + $0x40] sm:$0xff] }
 0x2f2   :  { %2650 = vrot.lane.b32.xlu1 %v7342_v43, %s5459_s5  ;;  %2648 = vrot.lane.b32.xlu0 %v7347_v39, %s5459_s5  ;;  %11726 = vst [vmem:[#allocation355_spill] sm:$0xff] %v7407_v2  ;;  %11730 = vst [vmem:[#allocation359_spill] sm:$0xff] %v7421_v0  ;;  %v7477_v23 = vmul.f32 %v5310_v55, %v5310_v55  ;;  %v5312_v55 = vld [vmem:[#allocation7 + $0x50] sm:$0xff] }
 0x2f3   :  { %11731 = vst [vmem:[#allocation360_spill] sm:$0xff] %v7423_v16  ;;  %11736 = vst [vmem:[#allocation365_spill] sm:$0xff] %v7439_v33  ;;  %v7475_v18 = vmul.f32 0.007598758, %v7459_v10  ;;  %v7495_v46 = vmul.f32 %v5312_v55, %v5312_v55 }
 0x2f4   :  { %v7358_v14 = vpop.permute.xlu1 %2406  ;;  %v7363_v36 = vpop.permute.xlu0 %2404  ;;  %11737 = vst [vmem:[#allocation366_spill] sm:$0xff] %v7441_v17  ;;  %11743 = vst [vmem:[#allocation372_spill] sm:$0xff] %v7459_v10  ;;  %v7493_v59 = vmul.f32 0.007598758, %v7477_v23 }
 0x2f5   :  { %11711 = vst [vmem:[#allocation340_spill] sm:$0xff] %v7358_v14  ;;  %11713 = vst [vmem:[#allocation342_spill] sm:$0xff] %v7363_v36  ;;  %v7509_v9 = vmul.f32 0.007598758, %v7495_v46 }
 0x2f6   :  { %2654 = vrot.lane.b32.xlu1 %v7356_v60, %s5459_s5  ;;  %2652 = vrot.lane.b32.xlu0 %v7361_v56, %s5459_s5  ;;  %11748 = vst [vmem:[#allocation377_spill] sm:$0xff] %v7475_v18  ;;  %11749 = vst [vmem:[#allocation378_spill] sm:$0xff] %v7477_v23 }
 0x2f7   :  { %11752 = vst [vmem:[#allocation381_spill] sm:$0xff] %v7486_v28  ;;  %11753 = vst [vmem:[#allocation382_spill] sm:$0xff] %v7488_v50 }
 0x2f8   :  { %v7372_v22 = vpop.permute.xlu1 %2410  ;;  %v7377_v14 = vpop.permute.xlu0 %2408  ;;  %11754 = vst [vmem:[#allocation383_spill] sm:$0xff] %v7493_v59  ;;  %11755 = vst [vmem:[#allocation384_spill] sm:$0xff] %v7495_v46 }
 0x2f9   :  { %11715 = vst [vmem:[#allocation344_spill] sm:$0xff] %v7372_v22  ;;  %11717 = vst [vmem:[#allocation346_spill] sm:$0xff] %v7377_v14  ;;  %v7395_v14 = vmul.f32 %v5301_v45, %v5301_v45 }
 0x2fa   :  { %2658 = vrot.lane.b32.xlu1 %v7370_v20, %s5459_s5  ;;  %2656 = vrot.lane.b32.xlu0 %v7375_v58, %s5459_s5  ;;  %11758 = vst [vmem:[#allocation387_spill] sm:$0xff] %v7504_v63  ;;  %11759 = vst [vmem:[#allocation388_spill] sm:$0xff] %v7509_v9 }
 0x2fb   :  { %11722 = vst [vmem:[#allocation351_spill] sm:$0xff] %v7395_v14  ;;  %v7414_v45 = vmul.f32 0.007598758, %v7395_v14 }
 0x2fc   :  { %v7386_v36 = vpop.permute.xlu1 %2414  ;;  %v7391_v22 = vpop.permute.xlu0 %2412 }
 0x2fd   :  { %11719 = vst [vmem:[#allocation348_spill] sm:$0xff] %v7386_v36  ;;  %11721 = vst [vmem:[#allocation350_spill] sm:$0xff] %v7391_v22 }
 0x2fe   :  { %2662 = vrot.lane.b32.xlu1 %v7384_v5, %s5459_s5  ;;  %2660 = vrot.lane.b32.xlu0 %v7389_v38, %s5459_s5  ;;  %11728 = vst [vmem:[#allocation357_spill] sm:$0xff] %v7414_v45 }
 0x300   :  { %v7404_v36 = vpop.permute.xlu1 %2442  ;;  %v7409_v22 = vpop.permute.xlu0 %2440 }
 0x301   :  { %11725 = vst [vmem:[#allocation354_spill] sm:$0xff] %v7404_v36  ;;  %11727 = vst [vmem:[#allocation356_spill] sm:$0xff] %v7409_v22  ;;  %v7457_v22 = vmul.f32 0.007598758, %v7441_v17 }
 0x302   :  { %2666 = vrot.lane.b32.xlu1 %v7402_v7, %s5459_s5  ;;  %2664 = vrot.lane.b32.xlu0 %v7407_v2, %s5459_s5 }
 0x303   :  { %11742 = vst [vmem:[#allocation371_spill] sm:$0xff] %v7457_v22 }
 0x304   :  { %v7425_v36 = vpop.permute.xlu1 %2446  ;;  %v7427_v51 = vpop.permute.xlu0 %2444 }
 0x305   :  { %11732 = vst [vmem:[#allocation361_spill] sm:$0xff] %v7425_v36  ;;  %11733 = vst [vmem:[#allocation362_spill] sm:$0xff] %v7427_v51 }
 0x306   :  { %3102 = vrot.lane.b32.xlu1 %v7414_v45, %s5450_s2  ;;  %3100 = vrot.lane.b32.xlu0 %v7421_v0, %s5450_s2 }
 0x308   :  { %v7443_v36 = vpop.permute.xlu1 %2450  ;;  %v7445_v51 = vpop.permute.xlu0 %2448 }
 0x309   :  { %11738 = vst [vmem:[#allocation367_spill] sm:$0xff] %v7443_v36  ;;  %11739 = vst [vmem:[#allocation368_spill] sm:$0xff] %v7445_v51 }
 0x30a   :  { %3106 = vrot.lane.b32.xlu1 %v7432_v19, %s5450_s2  ;;  %3104 = vrot.lane.b32.xlu0 %v7439_v33, %s5450_s2  ;;  %v11839_v19 = vld [vmem:[#allocation32_spill] sm:$0xff] }
 0x30c   :  { %v7461_v36 = vpop.permute.xlu1 %2454  ;;  %v7463_v51 = vpop.permute.xlu0 %2452 }
 0x30d   :  { %11744 = vst [vmem:[#allocation373_spill] sm:$0xff] %v7461_v36  ;;  %11745 = vst [vmem:[#allocation374_spill] sm:$0xff] %v7463_v51 }
 0x30e   :  { %3110 = vrot.lane.b32.xlu1 %v7450_v42, %s5450_s2  ;;  %3108 = vrot.lane.b32.xlu0 %v7457_v22, %s5450_s2  ;;  %v11831_v22 = vld [vmem:[#allocation28_spill] sm:$0xff] }
 0x310   :  { %v7479_v36 = vpop.permute.xlu1 %2458  ;;  %v7481_v51 = vpop.permute.xlu0 %2456 }
 0x311   :  { %11750 = vst [vmem:[#allocation379_spill] sm:$0xff] %v7479_v36  ;;  %11751 = vst [vmem:[#allocation380_spill] sm:$0xff] %v7481_v51 }
 0x312   :  { %3114 = vrot.lane.b32.xlu1 %v7468_v24, %s5450_s2  ;;  %3112 = vrot.lane.b32.xlu0 %v7475_v18, %s5450_s2  ;;  %v11825_v18 = vld [vmem:[#allocation58_spill] sm:$0xff] }
 0x313   :  { %v11828_v24 = vld [vmem:[#allocation18_spill] sm:$0xff] }
 0x314   :  { %v7497_v36 = vpop.permute.xlu1 %2462  ;;  %v7499_v51 = vpop.permute.xlu0 %2460 }
 0x315   :  { %11756 = vst [vmem:[#allocation385_spill] sm:$0xff] %v7497_v36  ;;  %11757 = vst [vmem:[#allocation386_spill] sm:$0xff] %v7499_v51  ;;  %v7518_v51 = vmul.f32 0.036000773, %v7395_v14  ;;  %v7523_v36 = vmul.f32 0.036000773, %v7399_v37 }
 0x316   :  { %3118 = vrot.lane.b32.xlu1 %v7486_v28, %s5450_s2  ;;  %3116 = vrot.lane.b32.xlu0 %v7493_v59, %s5450_s2  ;;  %v11824_v28 = vld [vmem:[#allocation25_spill] sm:$0xff] }
 0x318   :  { %v7511_v62 = vpop.permute.xlu1 %2490  ;;  %v7513_v55 = vpop.permute.xlu0 %2488 }
 0x319   :  { %11760 = vst [vmem:[#allocation389_spill] sm:$0xff] %v7511_v62  ;;  %11761 = vst [vmem:[#allocation390_spill] sm:$0xff] %v7513_v55  ;;  %v7532_v62 = vmul.f32 0.036000773, %v7416_v1  ;;  %v7537_v55 = vmul.f32 0.036000773, %v7423_v16 }
 0x31a   :  { %3122 = vrot.lane.b32.xlu1 %v7504_v63, %s5450_s2  ;;  %3120 = vrot.lane.b32.xlu0 %v7509_v9, %s5450_s2 }
 0x31c   :  { %v7525_v3 = vpop.permute.xlu1 %2494  ;;  %v7527_v6 = vpop.permute.xlu0 %2492 }
 0x31d   :  { %11762 = vst [vmem:[#allocation391_spill] sm:$0xff] %v7525_v3  ;;  %11763 = vst [vmem:[#allocation392_spill] sm:$0xff] %v7527_v6  ;;  %v7546_v3 = vmul.f32 0.036000773, %v7434_v11  ;;  %v7551_v6 = vmul.f32 0.036000773, %v7441_v17 }
 0x31e   :  { %3174 = vrot.lane.b32.xlu1 %v7518_v51, %s5451_s23  ;;  %3172 = vrot.lane.b32.xlu0 %v7523_v36, %s5451_s23 }
 0x320   :  { %v7539_v29 = vpop.permute.xlu1 %2498  ;;  %v7541_v13 = vpop.permute.xlu0 %2496 }
 0x321   :  { %11764 = vst [vmem:[#allocation393_spill] sm:$0xff] %v7539_v29  ;;  %11765 = vst [vmem:[#allocation394_spill] sm:$0xff] %v7541_v13  ;;  %v7560_v13 = vmul.f32 0.036000773, %v7452_v26  ;;  %v7565_v29 = vmul.f32 0.036000773, %v7459_v10 }
 0x322   :  { %3178 = vrot.lane.b32.xlu1 %v7532_v62, %s5451_s23  ;;  %3176 = vrot.lane.b32.xlu0 %v7537_v55, %s5451_s23 }
 0x324   :  { %v7553_v41 = vpop.permute.xlu1 %2502  ;;  %v7555_v34 = vpop.permute.xlu0 %2500 }
 0x325   :  { %11766 = vst [vmem:[#allocation395_spill] sm:$0xff] %v7553_v41  ;;  %11767 = vst [vmem:[#allocation396_spill] sm:$0xff] %v7555_v34  ;;  %v7574_v34 = vmul.f32 0.036000773, %v7470_v25  ;;  %v7579_v41 = vmul.f32 0.036000773, %v7477_v23 }
 0x326   :  { %3182 = vrot.lane.b32.xlu1 %v7546_v3, %s5451_s23  ;;  %3180 = vrot.lane.b32.xlu0 %v7551_v6, %s5451_s23 }
 0x327   :  { %11770 = vst [vmem:[#allocation399_spill] sm:$0xff] %v7579_v41 }
 0x328   :  { %v7567_v30 = vpop.permute.xlu1 %2506  ;;  %v7569_v54 = vpop.permute.xlu0 %2504 }
 0x329   :  { %11768 = vst [vmem:[#allocation397_spill] sm:$0xff] %v7567_v30  ;;  %11769 = vst [vmem:[#allocation398_spill] sm:$0xff] %v7569_v54  ;;  %v7588_v54 = vmul.f32 0.036000773, %v7488_v50  ;;  %v7593_v30 = vmul.f32 0.036000773, %v7495_v46 }
 0x32a   :  { %3186 = vrot.lane.b32.xlu1 %v7560_v13, %s5451_s23  ;;  %3184 = vrot.lane.b32.xlu0 %v7565_v29, %s5451_s23 }
 0x32b   :  { %11773 = vst [vmem:[#allocation402_spill] sm:$0xff] %v7588_v54  ;;  %11774 = vst [vmem:[#allocation403_spill] sm:$0xff] %v7593_v30 }
 0x32c   :  { %v7581_v52 = vpop.permute.xlu1 %2510  ;;  %v7583_v4 = vpop.permute.xlu0 %2508 }
 0x32d   :  { %11771 = vst [vmem:[#allocation400_spill] sm:$0xff] %v7581_v52  ;;  %11772 = vst [vmem:[#allocation401_spill] sm:$0xff] %v7583_v4  ;;  %v7602_v4 = vmul.f32 0.10936069, %v7395_v14  ;;  %v7607_v52 = vmul.f32 0.10936069, %v7399_v37 }
 0x32e   :  { %3190 = vrot.lane.b32.xlu1 %v7574_v34, %s5451_s23  ;;  %3188 = vrot.lane.b32.xlu0 %v7579_v41, %s5451_s23  ;;  %v11849_v41 = vld [vmem:[#allocation40_spill] sm:$0xff] }
 0x330   :  { %v7595_v8 = vpop.permute.xlu1 %2538  ;;  %v7597_v21 = vpop.permute.xlu0 %2536 }
 0x331   :  { %11775 = vst [vmem:[#allocation404_spill] sm:$0xff] %v7595_v8  ;;  %11776 = vst [vmem:[#allocation405_spill] sm:$0xff] %v7597_v21  ;;  %v7616_v8 = vmul.f32 0.10936069, %v7416_v1  ;;  %v7621_v21 = vmul.f32 0.10936069, %v7423_v16 }
 0x332   :  { %3194 = vrot.lane.b32.xlu1 %v7588_v54, %s5451_s23  ;;  %3192 = vrot.lane.b32.xlu0 %v7593_v30, %s5451_s23 }
 0x334   :  { %v7609_v2 = vpop.permute.xlu1 %2542  ;;  %v7611_v15 = vpop.permute.xlu0 %2540 }
 0x335   :  { %11777 = vst [vmem:[#allocation406_spill] sm:$0xff] %v7609_v2  ;;  %11778 = vst [vmem:[#allocation407_spill] sm:$0xff] %v7611_v15  ;;  %v7630_v2 = vmul.f32 0.10936069, %v7434_v11  ;;  %v7635_v15 = vmul.f32 0.10936069, %v7441_v17 }
 0x336   :  { %3246 = vrot.lane.b32.xlu1 %v7602_v4, %s5452_s24  ;;  %3244 = vrot.lane.b32.xlu0 %v7607_v52, %s5452_s24 }
 0x338   :  { %v7623_v7 = vpop.permute.xlu1 %2546  ;;  %v7625_v32 = vpop.permute.xlu0 %2544 }
 0x339   :  { %11779 = vst [vmem:[#allocation408_spill] sm:$0xff] %v7623_v7  ;;  %11780 = vst [vmem:[#allocation409_spill] sm:$0xff] %v7625_v32  ;;  %v7644_v32 = vmul.f32 0.10936069, %v7452_v26  ;;  %v7649_v7 = vmul.f32 0.10936069, %v7459_v10 }
 0x33a   :  { %3250 = vrot.lane.b32.xlu1 %v7616_v8, %s5452_s24  ;;  %3248 = vrot.lane.b32.xlu0 %v7621_v21, %s5452_s24 }
 0x33c   :  { %v7637_v38 = vpop.permute.xlu1 %2550  ;;  %v7639_v44 = vpop.permute.xlu0 %2548 }
 0x33d   :  { %11781 = vst [vmem:[#allocation410_spill] sm:$0xff] %v7637_v38  ;;  %11782 = vst [vmem:[#allocation411_spill] sm:$0xff] %v7639_v44  ;;  %v7658_v44 = vmul.f32 0.10936069, %v7470_v25  ;;  %v7663_v38 = vmul.f32 0.10936069, %v7477_v23 }
 0x33e   :  { %3254 = vrot.lane.b32.xlu1 %v7630_v2, %s5452_s24  ;;  %3252 = vrot.lane.b32.xlu0 %v7635_v15, %s5452_s24 }
 0x340   :  { %v7651_v5 = vpop.permute.xlu1 %2554  ;;  %v7653_v35 = vpop.permute.xlu0 %2552 }
 0x341   :  { %11783 = vst [vmem:[#allocation412_spill] sm:$0xff] %v7651_v5  ;;  %11784 = vst [vmem:[#allocation413_spill] sm:$0xff] %v7653_v35  ;;  %v7672_v35 = vmul.f32 0.10936069, %v7488_v50  ;;  %v7677_v5 = vmul.f32 0.10936069, %v7495_v46 }
 0x342   :  { %3258 = vrot.lane.b32.xlu1 %v7644_v32, %s5452_s24  ;;  %3256 = vrot.lane.b32.xlu0 %v7649_v7, %s5452_s24 }
 0x344   :  { %v7665_v58 = vpop.permute.xlu1 %2558  ;;  %v7667_v47 = vpop.permute.xlu0 %2556 }
 0x345   :  { %11785 = vst [vmem:[#allocation414_spill] sm:$0xff] %v7665_v58  ;;  %11786 = vst [vmem:[#allocation415_spill] sm:$0xff] %v7667_v47  ;;  %v7686_v47 = vmul.f32 0.21300554, %v7395_v14  ;;  %v7691_v58 = vmul.f32 0.21300554, %v7399_v37 }
 0x346   :  { %3262 = vrot.lane.b32.xlu1 %v7658_v44, %s5452_s24  ;;  %3260 = vrot.lane.b32.xlu0 %v7663_v38, %s5452_s24 }
 0x348   :  { %v7679_v20 = vpop.permute.xlu1 %2586  ;;  %v7681_v40 = vpop.permute.xlu0 %2584 }
 0x349   :  { %11787 = vst [vmem:[#allocation416_spill] sm:$0xff] %v7679_v20  ;;  %11788 = vst [vmem:[#allocation417_spill] sm:$0xff] %v7681_v40  ;;  %v7700_v20 = vmul.f32 0.21300554, %v7416_v1  ;;  %v7705_v40 = vmul.f32 0.21300554, %v7423_v16 }
 0x34a   :  { %3266 = vrot.lane.b32.xlu1 %v7672_v35, %s5452_s24  ;;  %3264 = vrot.lane.b32.xlu0 %v7677_v5, %s5452_s24 }
 0x34c   :  { %v7693_v56 = vpop.permute.xlu1 %2590  ;;  %v7695_v12 = vpop.permute.xlu0 %2588 }
 0x34d   :  { %11789 = vst [vmem:[#allocation418_spill] sm:$0xff] %v7693_v56  ;;  %11790 = vst [vmem:[#allocation419_spill] sm:$0xff] %v7695_v12  ;;  %v7714_v56 = vmul.f32 0.21300554, %v7434_v11  ;;  %v7719_v12 = vmul.f32 0.21300554, %v7441_v17 }
 0x34e   :  { %3318 = vrot.lane.b32.xlu1 %v7686_v47, %s5453_s25  ;;  %3316 = vrot.lane.b32.xlu0 %v7691_v58, %s5453_s25 }
 0x350   :  { %v7707_v60 = vpop.permute.xlu1 %2594  ;;  %v7709_v49 = vpop.permute.xlu0 %2592 }
 0x351   :  { %11791 = vst [vmem:[#allocation420_spill] sm:$0xff] %v7707_v60  ;;  %11792 = vst [vmem:[#allocation421_spill] sm:$0xff] %v7709_v49  ;;  %v7728_v49 = vmul.f32 0.21300554, %v7452_v26  ;;  %v7733_v60 = vmul.f32 0.21300554, %v7459_v10 }
 0x352   :  { %3322 = vrot.lane.b32.xlu1 %v7700_v20, %s5453_s25  ;;  %3320 = vrot.lane.b32.xlu0 %v7705_v40, %s5453_s25 }
 0x354   :  { %v7721_v39 = vpop.permute.xlu1 %2598  ;;  %v7723_v48 = vpop.permute.xlu0 %2596 }
 0x355   :  { %11793 = vst [vmem:[#allocation422_spill] sm:$0xff] %v7721_v39  ;;  %11794 = vst [vmem:[#allocation423_spill] sm:$0xff] %v7723_v48  ;;  %v7742_v48 = vmul.f32 0.21300554, %v7470_v25  ;;  %v7747_v39 = vmul.f32 0.21300554, %v7477_v23 }
 0x356   :  { %3326 = vrot.lane.b32.xlu1 %v7714_v56, %s5453_s25  ;;  %3324 = vrot.lane.b32.xlu0 %v7719_v12, %s5453_s25 }
 0x358   :  { %v7735_v43 = vpop.permute.xlu1 %2602  ;;  %v7737_v53 = vpop.permute.xlu0 %2600 }
 0x359   :  { %11795 = vst [vmem:[#allocation424_spill] sm:$0xff] %v7735_v43  ;;  %11796 = vst [vmem:[#allocation425_spill] sm:$0xff] %v7737_v53  ;;  %v7756_v53 = vmul.f32 0.21300554, %v7488_v50  ;;  %v7761_v43 = vmul.f32 0.21300554, %v7495_v46 }
 0x35a   :  { %3330 = vrot.lane.b32.xlu1 %v7728_v49, %s5453_s25  ;;  %3328 = vrot.lane.b32.xlu0 %v7733_v60, %s5453_s25 }
 0x35c   :  { %v7749_v61 = vpop.permute.xlu1 %2606  ;;  %v7751_v31 = vpop.permute.xlu0 %2604 }
 0x35d   :  { %11797 = vst [vmem:[#allocation426_spill] sm:$0xff] %v7749_v61  ;;  %11798 = vst [vmem:[#allocation427_spill] sm:$0xff] %v7751_v31  ;;  %v3365_v31 = vmul.f32 0.26601171, %v7395_v14  ;;  %v3364_v61 = vmul.f32 0.26601171, %v7399_v37 }
 0x35e   :  { %3334 = vrot.lane.b32.xlu1 %v7742_v48, %s5453_s25  ;;  %3332 = vrot.lane.b32.xlu0 %v7747_v39, %s5453_s25  ;;  %v3369_v37 = vmul.f32 0.26601171, %v7434_v11 }
 0x360   :  { %v7763_v57 = vpop.permute.xlu1 %2646  ;;  %v7765_v27 = vpop.permute.xlu0 %2644 }
 0x361   :  { %11799 = vst [vmem:[#allocation428_spill] sm:$0xff] %v7763_v57  ;;  %11800 = vst [vmem:[#allocation429_spill] sm:$0xff] %v7765_v27  ;;  %v3367_v57 = vmul.f32 0.26601171, %v7416_v1  ;;  %v3366_v27 = vmul.f32 0.26601171, %v7423_v16 }
 0x362   :  { %3338 = vrot.lane.b32.xlu1 %v7756_v53, %s5453_s25  ;;  %3336 = vrot.lane.b32.xlu0 %v7761_v43, %s5453_s25  ;;  %v11820_v16 = vld [vmem:[#allocation23_spill] sm:$0xff] }
 0x364   :  { %v7773_v9 = vpop.permute.xlu1 %2650  ;;  %v7775_v63 = vpop.permute.xlu0 %2648 }
 0x365   :  { %11801 = vst [vmem:[#allocation430_spill] sm:$0xff] %v7773_v9  ;;  %11802 = vst [vmem:[#allocation431_spill] sm:$0xff] %v7775_v63  ;;  %v3368_v9 = vmul.f32 0.26601171, %v7441_v17 }
 0x366   :  { %3390 = vrot.lane.b32.xlu1 %v3365_v31, %s5454_s26  ;;  %3388 = vrot.lane.b32.xlu0 %v3364_v61, %s5454_s26  ;;  %v3371_v61 = vmul.f32 0.26601171, %v7452_v26 }
 0x368   :  { %v7781_v59 = vpop.permute.xlu1 %2654  ;;  %v7783_v14 = vpop.permute.xlu0 %2652 }
 0x369   :  { %11803 = vst [vmem:[#allocation432_spill] sm:$0xff] %v7781_v59  ;;  %11804 = vst [vmem:[#allocation433_spill] sm:$0xff] %v7783_v14  ;;  %v3370_v59 = vmul.f32 0.26601171, %v7459_v10  ;;  %v11813_v10 = vld [vmem:[#allocation34_spill] sm:$0xff] }
 0x36a   :  { %3394 = vrot.lane.b32.xlu1 %v3367_v57, %s5454_s26  ;;  %3392 = vrot.lane.b32.xlu0 %v3366_v27, %s5454_s26  ;;  %v3373_v27 = vmul.f32 0.26601171, %v7470_v25  ;;  %v11816_v25 = vld [vmem:[#allocation73_spill] sm:$0xff] }
 0x36c   :  { %v7789_v63 = vpop.permute.xlu1 %2658  ;;  %v7791_v31 = vpop.permute.xlu0 %2656 }
 0x36d   :  { %11805 = vst [vmem:[#allocation434_spill] sm:$0xff] %v7789_v63  ;;  %11806 = vst [vmem:[#allocation435_spill] sm:$0xff] %v7791_v31  ;;  %v3372_v63 = vmul.f32 0.26601171, %v7477_v23  ;;  %v11809_v31 = vld [vmem:[#allocation19_spill] sm:$0xff] }
 0x36e   :  { %3398 = vrot.lane.b32.xlu1 %v3369_v37, %s5454_s26  ;;  %3396 = vrot.lane.b32.xlu0 %v3368_v9, %s5454_s26  ;;  %v11810_v37 = vld [vmem:[#allocation22_spill] sm:$0xff] }
 0x36f   :  { %v155_v17 = vadd.f32 %v11810_v37, %v11809_v31  ;;  %v11817_v31 = vld [vmem:[#allocation21_spill] sm:$0xff] }
 0x370   :  { %v7797_v14 = vpop.permute.xlu1 %2662  ;;  %v7799_v57 = vpop.permute.xlu0 %2660  ;;  %v157_v37 = vadd.f32 %v11817_v31, %v11816_v25  ;;  %v11829_v25 = vld [vmem:[#allocation27_spill] sm:$0xff] }
 0x371   :  { %11807 = vst [vmem:[#allocation436_spill] sm:$0xff] %v7797_v14  ;;  %11808 = vst [vmem:[#allocation437_spill] sm:$0xff] %v7799_v57  ;;  %v227_v11 = vadd.f32 %v11813_v10, %v155_v17  ;;  %v3375_v57 = vmul.f32 0.26601171, %v7488_v50  ;;  %v11821_v17 = vld [vmem:[#allocation20_spill] sm:$0xff]  ;;  %v11823_v50 = vld [vmem:[#allocation77_spill] sm:$0xff]  ;;  %v162_v31 = vadd.f32 %v11829_v25, %v11828_v24 }
 0x372   :  { %3402 = vrot.lane.b32.xlu1 %v3371_v61, %s5454_s26  ;;  %3400 = vrot.lane.b32.xlu0 %v3370_v59, %s5454_s26  ;;  %v3374_v61 = vmul.f32 0.26601171, %v7495_v46  ;;  %v11814_v59 = vld [vmem:[#allocation46_spill] sm:$0xff]  ;;  %v11842_v25 = vld [vmem:[#allocation33_spill] sm:$0xff] }
 0x373   :  { %v299_v14 = vadd.f32 %v11814_v59, %v227_v11  ;;  %v11826_v11 = vld [vmem:[#allocation17_spill] sm:$0xff]  ;;  %v11827_v59 = vld [vmem:[#allocation26_spill] sm:$0xff] }
 0x374   :  { %v7807_v26 = vpop.permute.xlu1 %2666  ;;  %v7809_v9 = vpop.permute.xlu0 %2664 }
 0x375   :  { %11811 = vst [vmem:[#allocation19_spill] sm:$0xff] %v7807_v26  ;;  %11812 = vst [vmem:[#allocation22_spill] sm:$0xff] %v7809_v9  ;;  %v11819_v9 = vld [vmem:[#allocation74_spill] sm:$0xff]  ;;  %v371_v46 = vadd.f32 %v11825_v18, %v299_v14  ;;  %v11836_v18 = vld [vmem:[#allocation88_spill] sm:$0xff] }
 0x376   :  { %3406 = vrot.lane.b32.xlu1 %v3373_v27, %s5454_s26  ;;  %3404 = vrot.lane.b32.xlu0 %v3372_v63, %s5454_s26  ;;  %v158_v10 = vadd.f32 %v11820_v16, %v11819_v9  ;;  %v11822_v27 = vld [vmem:[#allocation24_spill] sm:$0xff]  ;;  %v160_v63 = vadd.f32 %v11824_v28, %v11823_v50  ;;  %v11832_v16 = vld [vmem:[#allocation83_spill] sm:$0xff]  ;;  %v11833_v9 = vld [vmem:[#allocation29_spill] sm:$0xff] }
 0x377   :  { %v156_v1 = vadd.f32 %v11822_v27, %v11821_v17  ;;  %v164_v33 = vadd.f32 %v11833_v9, %v11832_v16  ;;  %v11834_v17 = vld [vmem:[#allocation84_spill] sm:$0xff]  ;;  %v11835_v28 = vld [vmem:[#allocation30_spill] sm:$0xff]  ;;  %v11837_v14 = vld [vmem:[#allocation31_spill] sm:$0xff] }
 0x378   :  { %v7817_v23 = vpop.permute.xlu1 %3102  ;;  %v7821_v26 = vpop.permute.xlu0 %3100  ;;  %v163_v50 = vadd.f32 %v11835_v28, %v11834_v17  ;;  %v11838_v27 = vld [vmem:[#allocation89_spill] sm:$0xff]  ;;  %v11844_v16 = vld [vmem:[#allocation36_spill] sm:$0xff]  ;;  %v11847_v17 = vld [vmem:[#allocation38_spill] sm:$0xff] }
 0x379   :  { %11815 = vst [vmem:[#allocation34_spill] sm:$0xff] %v7817_v23  ;;  %11818 = vst [vmem:[#allocation46_spill] sm:$0xff] %v7821_v26  ;;  %v159_v23 = vadd.f32 %v11827_v59, %v11826_v11  ;;  %v11830_v26 = vld [vmem:[#allocation80_spill] sm:$0xff]  ;;  %v165_v11 = vadd.f32 %v11839_v19, %v11838_v27  ;;  %v11840_v59 = vld [vmem:[#allocation70_spill] sm:$0xff]  ;;  %v229_v9 = vadd.f32 %v11844_v16, %v157_v37 }
 0x37a   :  { %3410 = vrot.lane.b32.xlu1 %v3375_v57, %s5454_s26  ;;  %v161_v42 = vadd.f32 %v11831_v22, %v11830_v26  ;;  %3408 = vrot.lane.b32.xlu0 %v3374_v61, %s5454_s26  ;;  %v166_v57 = vadd.f32 %v11837_v14, %v11836_v18  ;;  %v443_v0 = vadd.f32 %v11840_v59, %v371_v46  ;;  %v11843_v22 = vld [vmem:[#allocation35_spill] sm:$0xff]  ;;  %v11845_v61 = vld [vmem:[#allocation37_spill] sm:$0xff] }
 0x37b   :  { %v228_v26 = vadd.f32 %v11842_v25, %v156_v1  ;;  %v230_v45 = vadd.f32 %v11843_v22, %v158_v10  ;;  %v232_v30 = vadd.f32 %v11845_v61, %v160_v63  ;;  %v231_v28 = vadd.f32 %v11847_v17, %v159_v23  ;;  %v11848_v18 = vld [vmem:[#allocation39_spill] sm:$0xff]  ;;  %v11851_v1 = vld [vmem:[#allocation41_spill] sm:$0xff]  ;;  %v11852_v10 = vld [vmem:[#allocation42_spill] sm:$0xff] }
 0x37c   :  { %v7847_v24 = vpop.permute.xlu1 %3106  ;;  %v7853_v54 = vpop.permute.xlu0 %3104  ;;  %v234_v14 = vadd.f32 %v11848_v18, %v162_v31  ;;  %v233_v19 = vadd.f32 %v11849_v41, %v161_v42  ;;  %v11850_v27 = vld [vmem:[#allocation91_spill] sm:$0xff]  ;;  %v236_v59 = vadd.f32 %v11851_v1, %v164_v33  ;;  %v235_v25 = vadd.f32 %v11852_v10, %v163_v50  ;;  %v11854_v63 = vld [vmem:[#allocation45_spill] sm:$0xff]  ;;  %v11855_v23 = vld [vmem:[#allocation44_spill] sm:$0xff] }
 0x37d   :  { %11841 = vst [vmem:[#allocation73_spill] sm:$0xff] %v7847_v24  ;;  %11846 = vst [vmem:[#allocation21_spill] sm:$0xff] %v7853_v54  ;;  %v491_v46 = vadd.f32 %v11850_v27, %v443_v0  ;;  %v11853_v37 = vld [vmem:[#allocation43_spill] sm:$0xff]  ;;  %v300_v16 = vadd.f32 %v11854_v63, %v228_v26  ;;  %v237_v31 = vadd.f32 %v11855_v23, %v165_v11  ;;  %v11857_v42 = vld [vmem:[#allocation48_spill] sm:$0xff] }
 0x37e   :  { %3438 = vrot.lane.b32.xlu1 %v7686_v47, %s5455_s27  ;;  %v238_v22 = vadd.f32 %v11853_v37, %v166_v57  ;;  %3436 = vrot.lane.b32.xlu0 %v7691_v58, %s5455_s27  ;;  %v11856_v61 = vld [vmem:[#allocation47_spill] sm:$0xff]  ;;  %v301_v0 = vadd.f32 %v11857_v42, %v229_v9  ;;  %v11860_v33 = vld [vmem:[#allocation49_spill] sm:$0xff]  ;;  %v11861_v50 = vld [vmem:[#allocation50_spill] sm:$0xff] }
 0x37f   :  { %v302_v41 = vadd.f32 %v11856_v61, %v230_v45  ;;  %v11858_v17 = vld [vmem:[#allocation107_spill] sm:$0xff]  ;;  %v304_v27 = vadd.f32 %v11860_v33, %v232_v30  ;;  %v303_v1 = vadd.f32 %v11861_v50, %v231_v28  ;;  %v11863_v26 = vld [vmem:[#allocation57_spill] sm:$0xff]  ;;  %v11865_v58 = vld [vmem:[#allocation52_spill] sm:$0xff] }
 0x380   :  { %v539_v18 = vadd.f32 %v11858_v17, %v491_v46  ;;  %v7871_v47 = vpop.permute.xlu1 %3110  ;;  %v11862_v57 = vld [vmem:[#allocation51_spill] sm:$0xff]  ;;  %v372_v37 = vadd.f32 %v11863_v26, %v300_v16  ;;  %v7877_v63 = vpop.permute.xlu0 %3108  ;;  %v305_v11 = vadd.f32 %v11865_v58, %v233_v19  ;;  %v11866_v23 = vld [vmem:[#allocation53_spill] sm:$0xff]  ;;  %v11867_v61 = vld [vmem:[#allocation54_spill] sm:$0xff] }
 0x381   :  { %11859 = vst [vmem:[#allocation74_spill] sm:$0xff] %v7871_v47  ;;  %v306_v10 = vadd.f32 %v11862_v57, %v234_v14  ;;  %11864 = vst [vmem:[#allocation23_spill] sm:$0xff] %v7877_v63  ;;  %v308_v45 = vadd.f32 %v11866_v23, %v236_v59  ;;  %v307_v9 = vadd.f32 %v11867_v61, %v235_v25  ;;  %v11868_v42 = vld [vmem:[#allocation119_spill] sm:$0xff]  ;;  %v11870_v28 = vld [vmem:[#allocation56_spill] sm:$0xff] }
 0x382   :  { %v587_v46 = vadd.f32 %v11868_v42, %v539_v18  ;;  %3442 = vrot.lane.b32.xlu1 %v7700_v20, %s5455_s27  ;;  %v11869_v30 = vld [vmem:[#allocation55_spill] sm:$0xff]  ;;  %v309_v33 = vadd.f32 %v11870_v28, %v237_v31  ;;  %v11872_v16 = vld [vmem:[#allocation69_spill] sm:$0xff]  ;;  %3440 = vrot.lane.b32.xlu0 %v7705_v40, %s5455_s27  ;;  %v11873_v19 = vld [vmem:[#allocation60_spill] sm:$0xff] }
 0x383   :  { %v310_v17 = vadd.f32 %v11869_v30, %v238_v22  ;;  %v11871_v14 = vld [vmem:[#allocation59_spill] sm:$0xff]  ;;  %v444_v57 = vadd.f32 %v11872_v16, %v372_v37  ;;  %v373_v59 = vadd.f32 %v11873_v19, %v301_v0  ;;  %v11874_v26 = vld [vmem:[#allocation61_spill] sm:$0xff]  ;;  %v11875_v58 = vld [vmem:[#allocation62_spill] sm:$0xff] }
 0x384   :  { %v374_v50 = vadd.f32 %v11871_v14, %v302_v41  ;;  %v376_v25 = vadd.f32 %v11874_v26, %v304_v27  ;;  %v375_v18 = vadd.f32 %v11875_v58, %v303_v1  ;;  %v11876_v23 = vld [vmem:[#allocation131_spill] sm:$0xff]  ;;  %v7895_v20 = vpop.permute.xlu1 %3114  ;;  %v11879_v31 = vld [vmem:[#allocation64_spill] sm:$0xff]  ;;  %v11880_v41 = vld [vmem:[#allocation65_spill] sm:$0xff]  ;;  %v7901_v16 = vpop.permute.xlu0 %3112 }
 0x385   :  { %v635_v61 = vadd.f32 %v11876_v23, %v587_v46  ;;  %11877 = vst [vmem:[#allocation20_spill] sm:$0xff] %v7895_v20  ;;  %v11878_v22 = vld [vmem:[#allocation63_spill] sm:$0xff]  ;;  %v377_v30 = vadd.f32 %v11879_v31, %v305_v11  ;;  %v380_v28 = vadd.f32 %v11880_v41, %v308_v45  ;;  %v11881_v37 = vld [vmem:[#allocation90_spill] sm:$0xff]  ;;  %11882 = vst [vmem:[#allocation24_spill] sm:$0xff] %v7901_v16 }
 0x386   :  { %v378_v42 = vadd.f32 %v11878_v22, %v306_v10  ;;  %v492_v14 = vadd.f32 %v11881_v37, %v444_v57  ;;  %v11883_v40 = vld [vmem:[#allocation66_spill] sm:$0xff]  ;;  %v11884_v19 = vld [vmem:[#allocation67_spill] sm:$0xff]  ;;  %v11885_v26 = vld [vmem:[#allocation72_spill] sm:$0xff]  ;;  %3446 = vrot.lane.b32.xlu1 %v7714_v56, %s5455_s27  ;;  %3444 = vrot.lane.b32.xlu0 %v7719_v12, %s5455_s27 }
 0x387   :  { %v379_v0 = vadd.f32 %v11883_v40, %v307_v9  ;;  %v382_v27 = vadd.f32 %v11884_v19, %v310_v17  ;;  %v445_v1 = vadd.f32 %v11885_v26, %v373_v59  ;;  %v11886_v58 = vld [vmem:[#allocation143_spill] sm:$0xff]  ;;  %v11887_v10 = vld [vmem:[#allocation68_spill] sm:$0xff]  ;;  %v11890_v31 = vld [vmem:[#allocation106_spill] sm:$0xff] }
 0x388   :  { %v7907_v46 = vadd.f32 %v11886_v58, %v635_v61  ;;  %v381_v11 = vadd.f32 %v11887_v10, %v309_v33  ;;  %v11888_v23 = vld [vmem:[#allocation71_spill] sm:$0xff]  ;;  %v540_v41 = vadd.f32 %v11890_v31, %v492_v14  ;;  %v11891_v9 = vld [vmem:[#allocation76_spill] sm:$0xff]  ;;  %v11892_v59 = vld [vmem:[#allocation78_spill] sm:$0xff]  ;;  %v7921_v56 = vpop.permute.xlu1 %3118  ;;  %v7927_v31 = vpop.permute.xlu0 %3116 }
 0x389   :  { %v446_v45 = vadd.f32 %v11888_v23, %v374_v50  ;;  %v11889_v22 = vld [vmem:[#allocation75_spill] sm:$0xff]  ;;  %v447_v17 = vadd.f32 %v11891_v9, %v375_v18  ;;  %v450_v37 = vadd.f32 %v11892_v59, %v378_v42  ;;  %v11894_v19 = vld [vmem:[#allocation93_spill] sm:$0xff]  ;;  %11895 = vst [vmem:[#allocation77_spill] sm:$0xff] %v7921_v56  ;;  %v11897_v50 = vld [vmem:[#allocation82_spill] sm:$0xff] }
 0x38a   :  { %v448_v57 = vadd.f32 %v11889_v22, %v376_v25  ;;  %v11893_v61 = vld [vmem:[#allocation79_spill] sm:$0xff]  ;;  %v493_v26 = vadd.f32 %v11894_v19, %v445_v1  ;;  %v11896_v33 = vld [vmem:[#allocation81_spill] sm:$0xff]  ;;  %v451_v10 = vadd.f32 %v11897_v50, %v379_v0  ;;  %v11899_v14 = vld [vmem:[#allocation118_spill] sm:$0xff]  ;;  %11900 = vst [vmem:[#allocation25_spill] sm:$0xff] %v7927_v31  ;;  %v713_v1 = vmul.f32 0.007598758, %v7907_v46  ;;  %3450 = vrot.lane.b32.xlu1 %v7728_v49, %s5455_s27 }
 0x38b   :  { %v449_v40 = vadd.f32 %v11893_v61, %v377_v30  ;;  %v452_v58 = vadd.f32 %v11896_v33, %v380_v28  ;;  %v11898_v25 = vld [vmem:[#allocation85_spill] sm:$0xff]  ;;  %v588_v22 = vadd.f32 %v11899_v14, %v540_v41  ;;  %v11901_v12 = vld [vmem:[#allocation86_spill] sm:$0xff]  ;;  %v11902_v9 = vld [vmem:[#allocation92_spill] sm:$0xff]  ;;  %3448 = vrot.lane.b32.xlu0 %v7733_v60, %s5455_s27 }
 0x38c   :  { %v454_v23 = vadd.f32 %v11898_v25, %v382_v27  ;;  %v453_v18 = vadd.f32 %v11901_v12, %v381_v11  ;;  %v494_v42 = vadd.f32 %v11902_v9, %v446_v45  ;;  %v11903_v59 = vld [vmem:[#allocation109_spill] sm:$0xff]  ;;  %v11904_v28 = vld [vmem:[#allocation94_spill] sm:$0xff]  ;;  %v11905_v0 = vld [vmem:[#allocation95_spill] sm:$0xff]  ;;  %v7945_v49 = vpop.permute.xlu1 %3122  ;;  %v7953_v60 = vpop.permute.xlu0 %3120 }
 0x38d   :  { %v541_v30 = vadd.f32 %v11903_v59, %v493_v26  ;;  %v496_v61 = vadd.f32 %v11904_v28, %v448_v57  ;;  %v495_v19 = vadd.f32 %v11905_v0, %v447_v17  ;;  %v11906_v27 = vld [vmem:[#allocation96_spill] sm:$0xff]  ;;  %v11907_v41 = vld [vmem:[#allocation130_spill] sm:$0xff]  ;;  %v11908_v11 = vld [vmem:[#allocation97_spill] sm:$0xff]  ;;  %11912 = vst [vmem:[#allocation58_spill] sm:$0xff] %v7945_v49 }
 0x38e   :  { %v498_v33 = vadd.f32 %v11906_v27, %v450_v37  ;;  %v636_v50 = vadd.f32 %v11907_v41, %v588_v22  ;;  %v497_v45 = vadd.f32 %v11908_v11, %v449_v40  ;;  %v11909_v25 = vld [vmem:[#allocation98_spill] sm:$0xff]  ;;  %v11910_v14 = vld [vmem:[#allocation99_spill] sm:$0xff]  ;;  %v11911_v9 = vld [vmem:[#allocation121_spill] sm:$0xff]  ;;  %11917 = vst [vmem:[#allocation17_spill] sm:$0xff] %v7953_v60  ;;  %3454 = vrot.lane.b32.xlu1 %v7742_v48, %s5455_s27 }
 0x38f   :  { %v500_v26 = vadd.f32 %v11909_v25, %v452_v58  ;;  %v499_v12 = vadd.f32 %v11910_v14, %v451_v10  ;;  %v589_v59 = vadd.f32 %v11911_v9, %v541_v30  ;;  %v11913_v57 = vld [vmem:[#allocation102_spill] sm:$0xff]  ;;  %v11914_v17 = vld [vmem:[#allocation103_spill] sm:$0xff]  ;;  %v11915_v37 = vld [vmem:[#allocation108_spill] sm:$0xff]  ;;  %v725_v30 = vrot.slane %v713_v1, 1  ;;  %3452 = vrot.lane.b32.xlu0 %v7747_v39, %s5455_s27 }
 0x390   :  { %v502_v28 = vadd.f32 %v11913_v57, %v454_v23  ;;  %v501_v0 = vadd.f32 %v11914_v17, %v453_v18  ;;  %v542_v27 = vadd.f32 %v11915_v37, %v494_v42  ;;  %v11916_v22 = vld [vmem:[#allocation142_spill] sm:$0xff]  ;;  %v11919_v58 = vld [vmem:[#allocation111_spill] sm:$0xff]  ;;  %v11920_v10 = vld [vmem:[#allocation133_spill] sm:$0xff]  ;;  %v743_v1 = vmul.f32 0.036000773, %v7907_v46  ;;  %v7972_v48 = vpop.permute.xlu1 %3174 }
 0x391   :  { %v7951_v41 = vadd.f32 %v11916_v22, %v636_v50  ;;  %v11918_v40 = vld [vmem:[#allocation110_spill] sm:$0xff]  ;;  %v543_v25 = vadd.f32 %v11919_v58, %v495_v19  ;;  %v637_v14 = vadd.f32 %v11920_v10, %v589_v59  ;;  %v11921_v23 = vld [vmem:[#allocation112_spill] sm:$0xff]  ;;  %v11922_v9 = vld [vmem:[#allocation113_spill] sm:$0xff]  ;;  %v707_v59 = vmul.f32 0.0010283801, %v7907_v46  ;;  %11927 = vst [vmem:[#allocation26_spill] sm:$0xff] %v7972_v48 }
 0x392   :  { %v544_v11 = vadd.f32 %v11918_v40, %v496_v61  ;;  %v546_v18 = vadd.f32 %v11921_v23, %v498_v33  ;;  %v545_v42 = vadd.f32 %v11922_v9, %v497_v45  ;;  %v11923_v57 = vld [vmem:[#allocation114_spill] sm:$0xff]  ;;  %v11924_v17 = vld [vmem:[#allocation115_spill] sm:$0xff]  ;;  %v11925_v61 = vld [vmem:[#allocation116_spill] sm:$0xff]  ;;  %v7980_v39 = vmul.f32 0.10936069, %v7907_v46  ;;  %3458 = vrot.lane.b32.xlu1 %v7756_v53, %s5455_s27 }
 0x393   :  { %v548_v50 = vadd.f32 %v11923_v57, %v500_v26  ;;  %v547_v37 = vadd.f32 %v11924_v17, %v499_v12  ;;  %v550_v19 = vadd.f32 %v11925_v61, %v502_v28  ;;  %v11926_v22 = vld [vmem:[#allocation145_spill] sm:$0xff]  ;;  %v11929_v58 = vld [vmem:[#allocation120_spill] sm:$0xff]  ;;  %v7977_v12 = vmul.f32 0.10936069, %v7951_v41  ;;  %v7982_v28 = vpop.permute.xlu0 %3172  ;;  %v11931_v10 = vld [vmem:[#allocation122_spill] sm:$0xff]  ;;  %3456 = vrot.lane.b32.xlu0 %v7761_v43, %s5455_s27 }
 0x394   :  { %v7970_v40 = vadd.f32 %v11926_v22, %v637_v14  ;;  %v11928_v33 = vld [vmem:[#allocation117_spill] sm:$0xff]  ;;  %v590_v26 = vadd.f32 %v11929_v58, %v542_v27  ;;  %11930 = vst [vmem:[#allocation18_spill] sm:$0xff] %v7982_v28  ;;  %v592_v23 = vadd.f32 %v11931_v10, %v544_v11  ;;  %v11932_v9 = vld [vmem:[#allocation123_spill] sm:$0xff]  ;;  %v11933_v14 = vld [vmem:[#allocation124_spill] sm:$0xff]  ;;  %v737_v61 = vadd.f32 %v725_v30, %v707_v59  ;;  %v7998_v59 = vpop.permute.xlu1 %3178 }
 0x395   :  { %v549_v45 = vadd.f32 %v11928_v33, %v501_v0  ;;  %v591_v57 = vadd.f32 %v11932_v9, %v543_v25  ;;  %v594_v17 = vadd.f32 %v11933_v14, %v546_v18  ;;  %v11934_v0 = vld [vmem:[#allocation125_spill] sm:$0xff]  ;;  %v11935_v22 = vld [vmem:[#allocation126_spill] sm:$0xff]  ;;  %v11936_v58 = vld [vmem:[#allocation127_spill] sm:$0xff]  ;;  %v755_v9 = vrot.slane %v743_v1, 2  ;;  %11940 = vst [vmem:[#allocation27_spill] sm:$0xff] %v7998_v59 }
 0x396   :  { %v593_v27 = vadd.f32 %v11934_v0, %v545_v42  ;;  %v596_v33 = vadd.f32 %v11935_v22, %v548_v50  ;;  %v595_v48 = vadd.f32 %v11936_v58, %v547_v37  ;;  %v11937_v60 = vld [vmem:[#allocation128_spill] sm:$0xff]  ;;  %v11938_v11 = vld [vmem:[#allocation129_spill] sm:$0xff]  ;;  %v714_v30 = vmul.f32 0.007598758, %v7970_v40  ;;  %v11942_v37 = vld [vmem:[#allocation134_spill] sm:$0xff]  ;;  %3486 = vrot.lane.b32.xlu1 %v7602_v4, %s5456_s28 }
 0x397   :  { %v598_v49 = vadd.f32 %v11937_v60, %v550_v19  ;;  %v597_v25 = vadd.f32 %v11938_v11, %v549_v45  ;;  %v11939_v10 = vld [vmem:[#allocation132_spill] sm:$0xff]  ;;  %v799_v53 = vrot.slane %v7977_v12, 3  ;;  %v8002_v42 = vmul.f32 0.21300554, %v7951_v41  ;;  %v8008_v43 = vpop.permute.xlu0 %3176  ;;  %v11943_v1 = vld [vmem:[#allocation135_spill] sm:$0xff]  ;;  %v11945_v22 = vld [vmem:[#allocation137_spill] sm:$0xff]  ;;  %3484 = vrot.lane.b32.xlu0 %v7607_v52, %s5456_s28 }
 0x398   :  { %v638_v18 = vadd.f32 %v11939_v10, %v590_v26  ;;  %v798_v60 = vrot.slane %v7980_v39, 3  ;;  %v8006_v50 = vmul.f32 0.21300554, %v7907_v46  ;;  %11941 = vst [vmem:[#allocation80_spill] sm:$0xff] %v8008_v43  ;;  %v640_v19 = vadd.f32 %v11942_v37, %v592_v23  ;;  %v11944_v26 = vld [vmem:[#allocation136_spill] sm:$0xff]  ;;  %v11946_v11 = vld [vmem:[#allocation138_spill] sm:$0xff] }
 0x399   :  { %v8012_v45 = vadd.f32 %v11943_v1, %v591_v57  ;;  %v8015_v14 = vadd.f32 %v11944_v26, %v594_v17  ;;  %v767_v0 = vadd.f32 %v755_v9, %v737_v61  ;;  %v8020_v58 = vadd.f32 %v11945_v22, %v593_v27  ;;  %v11947_v59 = vld [vmem:[#allocation139_spill] sm:$0xff]  ;;  %v11948_v23 = vld [vmem:[#allocation144_spill] sm:$0xff]  ;;  %v8038_v9 = vpop.permute.xlu1 %3182  ;;  %v11952_v26 = vld [vmem:[#allocation141_spill] sm:$0xff] }
 0x39a   :  { %v8023_v10 = vadd.f32 %v11946_v11, %v596_v33  ;;  %v8026_v43 = vadd.f32 %v11947_v59, %v595_v48  ;;  %v8029_v37 = vadd.f32 %v11948_v23, %v638_v18  ;;  %v11949_v57 = vld [vmem:[#allocation140_spill] sm:$0xff]  ;;  %v884_v4 = vmul.f32 0.26601171, %v7951_v41  ;;  %11950 = vst [vmem:[#allocation28_spill] sm:$0xff] %v8038_v9  ;;  %3490 = vrot.lane.b32.xlu1 %v7616_v8, %s5456_s28  ;;  %v11955_v31 = vld [vmem:[#allocation146_spill] sm:$0xff] }
 0x39b   :  { %v8034_v17 = vadd.f32 %v11949_v57, %v598_v49  ;;  %v883_v61 = vmul.f32 0.26601171, %v7907_v46  ;;  %v726_v27 = vrot.slane %v714_v30, 1  ;;  %v854_v33 = vrot.slane %v8002_v42, 4  ;;  %v8046_v52 = vpop.permute.xlu0 %3180  ;;  %3488 = vrot.lane.b32.xlu0 %v7621_v21, %s5456_s28 }
 0x39c   :  { %v8042_v48 = vmul.f32 0.036000773, %v7951_v41  ;;  %v800_v18 = vsel %vm797_vm0, %v798_v60, %v799_v53  ;;  %v853_v59 = vrot.slane %v8006_v50, 4  ;;  %11951 = vst [vmem:[#allocation83_spill] sm:$0xff] %v8046_v52  ;;  %v8049_v49 = vmul.f32 0.007598758, %v7951_v41 }
 0x39d   :  { %v822_v46 = vadd.f32 %v800_v18, %v767_v0  ;;  %v708_v30 = vmul.f32 0.0010283801, %v7970_v40  ;;  %v744_v1 = vmul.f32 0.036000773, %v7970_v40  ;;  %v8056_v22 = vadd.f32 %v11952_v26, %v597_v25  ;;  %v8070_v18 = vpop.permute.xlu1 %3186 }
 0x39e   :  { %v8059_v53 = vmul.f32 0.0010283801, %v7951_v41  ;;  %v8062_v60 = vmul.f32 0.10936069, %v8029_v37  ;;  %v8065_v11 = vmul.f32 0.10936069, %v7970_v40  ;;  %v855_v41 = vsel %vm852_vm1, %v853_v59, %v854_v33  ;;  %3494 = vrot.lane.b32.xlu1 %v7630_v2, %s5456_s28 }
 0x39f   :  { %v909_v0 = vrot.slane %v884_v4, 5  ;;  %v940_v23 = vrot.slane %v8002_v42, 6  ;;  %v908_v57 = vrot.slane %v883_v61, 5  ;;  %v738_v8 = vadd.f32 %v726_v27, %v708_v30  ;;  %11953 = vst [vmem:[#allocation29_spill] sm:$0xff] %v8070_v18  ;;  %v8076_v9 = vpop.permute.xlu0 %3184  ;;  %3492 = vrot.lane.b32.xlu0 %v7635_v15, %s5456_s28 }
 0x3a0   :  { %v971_v25 = vrot.slane %v7977_v12, 7  ;;  %v831_v26 = vmul.f32 0.21300554, %v8029_v37  ;;  %v886_v52 = vmul.f32 0.26601171, %v8029_v37  ;;  %11954 = vst [vmem:[#allocation84_spill] sm:$0xff] %v8076_v9  ;;  %v877_v21 = vadd.f32 %v855_v41, %v822_v46 }
 0x3a1   :  { %v756_v4 = vrot.slane %v744_v1, 2  ;;  %v8080_v42 = vadd.f32 %v11955_v31, %v640_v19  ;;  %v802_v12 = vrot.slane %v8062_v60, 3  ;;  %v801_v61 = vrot.slane %v8065_v11, 3  ;;  %v8093_v30 = vpop.permute.xlu1 %3190 }
 0x3a2   :  { %v830_v27 = vmul.f32 0.21300554, %v7970_v40  ;;  %v885_v33 = vmul.f32 0.26601171, %v7970_v40  ;;  %v910_v59 = vsel %vm907_vm2, %v908_v57, %v909_v0  ;;  %v939_v46 = vrot.slane %v8006_v50, 6  ;;  %11956 = vst [vmem:[#allocation30_spill] sm:$0xff] %v8093_v30  ;;  %3498 = vrot.lane.b32.xlu1 %v7644_v32, %s5456_s28 }
 0x3a3   :  { %v970_v31 = vrot.slane %v7980_v39, 7  ;;  %v768_v19 = vadd.f32 %v756_v4, %v738_v8  ;;  %v857_v2 = vrot.slane %v831_v26, 4  ;;  %v912_v1 = vrot.slane %v886_v52, 5  ;;  %v8098_v9 = vpop.permute.xlu0 %3188  ;;  %v11958_v39 = vld [vmem:[#allocation147_spill] sm:$0xff]  ;;  %3496 = vrot.lane.b32.xlu0 %v7649_v7, %s5456_s28 }
 0x3a4   :  { %v943_v41 = vrot.slane %v831_v26, 6  ;;  %v8096_v28 = vmul.f32 0.007598758, %v8029_v37  ;;  %11957 = vst [vmem:[#allocation88_spill] sm:$0xff] %v8098_v9  ;;  %v932_v40 = vadd.f32 %v910_v59, %v877_v21  ;;  %v8101_v15 = vmul.f32 0.0010283801, %v8029_v37 }
 0x3a5   :  { %v8104_v0 = vmul.f32 0.10936069, %v8080_v42  ;;  %v699_v50 = vadd.f32 %v11958_v39, %v8012_v45  ;;  %v803_v52 = vsel %vm797_vm0, %v801_v61, %v802_v12  ;;  %v856_v57 = vrot.slane %v830_v27, 4  ;;  %v8116_v30 = vpop.permute.xlu1 %3194 }
 0x3a6   :  { %v911_v8 = vrot.slane %v885_v33, 5  ;;  %v942_v26 = vrot.slane %v830_v27, 6  ;;  %v974_v4 = vrot.slane %v8062_v60, 7  ;;  %v823_v59 = vadd.f32 %v803_v52, %v768_v19  ;;  %11959 = vst [vmem:[#allocation31_spill] sm:$0xff] %v8116_v30  ;;  %3502 = vrot.lane.b32.xlu1 %v7658_v44, %s5456_s28 }
 0x3a7   :  { %v973_v9 = vrot.slane %v8065_v11, 7  ;;  %v941_v45 = vsel %vm938_vm3, %v939_v46, %v940_v23  ;;  %v972_v32 = vsel %vm969_vm4, %v970_v31, %v971_v25  ;;  %v8121_v12 = vmul.f32 0.036000773, %v8029_v37  ;;  %v8126_v7 = vpop.permute.xlu0 %3192  ;;  %3500 = vrot.lane.b32.xlu0 %v7663_v38, %s5456_s28  ;;  %v11962_v38 = vld [vmem:[#allocation149_spill] sm:$0xff] }
 0x3a8   :  { %v8124_v61 = vmul.f32 0.21300554, %v8080_v42  ;;  %11960 = vst [vmem:[#allocation89_spill] sm:$0xff] %v8126_v7  ;;  %v805_v11 = vrot.slane %v8104_v0, 3  ;;  %v715_v33 = vmul.f32 0.007598758, %v699_v50  ;;  %v963_v23 = vadd.f32 %v941_v45, %v932_v40 }
 0x3a9   :  { %v858_v25 = vsel %vm852_vm1, %v856_v57, %v857_v2  ;;  %v913_v37 = vsel %vm907_vm2, %v911_v8, %v912_v1  ;;  %v944_v46 = vsel %vm938_vm3, %v942_v26, %v943_v41  ;;  %v8139_v19 = vsel %vm969_vm4, %v973_v9, %v974_v4  ;;  %v8145_v44 = vpop.permute.xlu1 %3246  ;;  %v11964_v4 = vld [vmem:[#allocation148_spill] sm:$0xff] }
 0x3aa   :  { %v878_v31 = vadd.f32 %v858_v25, %v823_v59  ;;  %v8142_v39 = vmul.f32 0.26601171, %v8080_v42  ;;  %11961 = vst [vmem:[#allocation32_spill] sm:$0xff] %v8145_v44  ;;  %v860_v2 = vrot.slane %v8124_v61, 4  ;;  %v8149_v1 = vmul.f32 0.036000773, %v8080_v42  ;;  %3506 = vrot.lane.b32.xlu1 %v7672_v35, %s5456_s28 }
 0x3ab   :  { %v8151_v41 = vmul.f32 0.10936069, %v699_v50  ;;  %v8155_v40 = vadd.f32 %v11962_v38, %v8020_v58  ;;  %v8157_v9 = vpop.permute.xlu0 %3244  ;;  %v946_v57 = vrot.slane %v8124_v61, 6  ;;  %v727_v8 = vrot.slane %v715_v33, 1  ;;  %3504 = vrot.lane.b32.xlu0 %v7677_v5, %s5456_s28  ;;  %v11966_v35 = vld [vmem:[#allocation153_spill] sm:$0xff] }
 0x3ac   :  { %11963 = vst [vmem:[#allocation70_spill] sm:$0xff] %v8157_v9  ;;  %v832_v26 = vmul.f32 0.21300554, %v699_v50  ;;  %v8162_v59 = vadd.f32 %v11964_v4, %v8015_v14  ;;  %v8166_v45 = vadd.f32 %v972_v32, %v963_v23  ;;  %v8169_v25 = vmul.f32 0.007598758, %v8080_v42  ;;  %v11965_v14 = vld [vmem:[#allocation151_spill] sm:$0xff] }
 0x3ad   :  { %v8172_v58 = vmul.f32 0.0010283801, %v8080_v42  ;;  %v745_v38 = vmul.f32 0.036000773, %v699_v50  ;;  %v933_v61 = vadd.f32 %v913_v37, %v878_v31  ;;  %v709_v33 = vmul.f32 0.0010283801, %v699_v50  ;;  %v8184_v23 = vpop.permute.xlu1 %3250 }
 0x3ae   :  { %v8178_v4 = vadd.f32 %v11965_v14, %v8026_v43  ;;  %v8182_v32 = vadd.f32 %v11966_v35, %v8056_v22  ;;  %11967 = vst [vmem:[#allocation33_spill] sm:$0xff] %v8184_v23  ;;  %v804_v42 = vrot.slane %v8151_v41, 3  ;;  %v8188_v21 = vmul.f32 0.26601171, %v699_v50  ;;  %3534 = vrot.lane.b32.xlu1 %v7518_v51, %s5457_s29  ;;  %v11970_v50 = vld [vmem:[#allocation150_spill] sm:$0xff] }
 0x3af   :  { %v716_v5 = vmul.f32 0.007598758, %v8155_v40  ;;  %v8191_v37 = vpop.permute.xlu0 %3248  ;;  %v739_v31 = vadd.f32 %v727_v8, %v709_v33  ;;  %v859_v27 = vrot.slane %v832_v26, 4  ;;  %v945_v43 = vrot.slane %v832_v26, 6  ;;  %3532 = vrot.lane.b32.xlu0 %v7523_v36, %s5457_s29 }
 0x3b0   :  { %11968 = vst [vmem:[#allocation35_spill] sm:$0xff] %v8191_v37  ;;  %v8194_v14 = vmul.f32 0.10936069, %v8162_v59  ;;  %v757_v52 = vrot.slane %v745_v38, 2  ;;  %v8203_v60 = vadd.f32 %v944_v46, %v933_v61  ;;  %v8206_v8 = vmul.f32 0.21300554, %v8162_v59 }
 0x3b1   :  { %v717_v26 = vmul.f32 0.007598758, %v8178_v4  ;;  %v718_v33 = vmul.f32 0.007598758, %v8182_v32  ;;  %v8210_v51 = vpop.permute.xlu1 %3254  ;;  %v806_v22 = vsel %vm797_vm0, %v804_v42, %v805_v11  ;;  %v728_v35 = vrot.slane %v716_v5, 1  ;;  %v11972_v5 = vld [vmem:[#allocation152_spill] sm:$0xff] }
 0x3b2   :  { %11969 = vst [vmem:[#allocation36_spill] sm:$0xff] %v8210_v51  ;;  %v8216_v37 = vadd.f32 %v11970_v50, %v8023_v10  ;;  %v769_v46 = vadd.f32 %v757_v52, %v739_v31  ;;  %v861_v61 = vsel %vm852_vm1, %v859_v27, %v860_v2  ;;  %v8222_v23 = vsel %vm938_vm3, %v945_v43, %v946_v57 }
 0x3b3   :  { %v8218_v36 = vpop.permute.xlu0 %3252  ;;  %v808_v9 = vrot.slane %v8194_v14, 3  ;;  %3538 = vrot.lane.b32.xlu1 %v7532_v62, %s5457_s29  ;;  %v8228_v11 = vmul.f32 0.26601171, %v8162_v59  ;;  %v710_v42 = vmul.f32 0.0010283801, %v8155_v40  ;;  %v8234_v52 = vadd.f32 %v11972_v5, %v8034_v17  ;;  %3536 = vrot.lane.b32.xlu0 %v7537_v55, %s5457_s29 }
 0x3b4   :  { %11971 = vst [vmem:[#allocation37_spill] sm:$0xff] %v8218_v36  ;;  %v746_v10 = vmul.f32 0.036000773, %v8155_v40  ;;  %v863_v27 = vrot.slane %v8206_v8, 4  ;;  %v8240_v2 = vmul.f32 0.10936069, %v8155_v40  ;;  %v824_v55 = vadd.f32 %v806_v22, %v769_v46 }
 0x3b5   :  { %v729_v62 = vrot.slane %v717_v26, 1  ;;  %v730_v57 = vrot.slane %v718_v33, 1  ;;  %v8242_v31 = vpop.permute.xlu1 %3258  ;;  %v740_v43 = vadd.f32 %v728_v35, %v710_v42  ;;  %v8245_v50 = vmul.f32 0.10936069, %v8216_v37 }
 0x3b6   :  { %11973 = vst [vmem:[#allocation38_spill] sm:$0xff] %v8242_v31  ;;  %v711_v38 = vmul.f32 0.0010283801, %v8178_v4  ;;  %v747_v17 = vmul.f32 0.036000773, %v8178_v4  ;;  %v758_v33 = vrot.slane %v746_v10, 2 }
 0x3b7   :  { %v8249_v5 = vpop.permute.xlu0 %3256  ;;  %v8252_v36 = vmul.f32 0.10936069, %v8178_v4  ;;  %v712_v51 = vmul.f32 0.0010283801, %v8182_v32  ;;  %v748_v26 = vmul.f32 0.036000773, %v8182_v32  ;;  %3542 = vrot.lane.b32.xlu1 %v7546_v3, %s5457_s29  ;;  %3540 = vrot.lane.b32.xlu0 %v7551_v6, %s5457_s29 }
 0x3b8   :  { %11974 = vst [vmem:[#allocation39_spill] sm:$0xff] %v8249_v5  ;;  %v8260_v42 = vmul.f32 0.10936069, %v8234_v52  ;;  %v8263_v31 = vmul.f32 0.10936069, %v8182_v32  ;;  %v807_v22 = vrot.slane %v8240_v2, 3  ;;  %v741_v5 = vadd.f32 %v729_v62, %v711_v38 }
 0x3b9   :  { %v8269_v46 = vmul.f32 0.21300554, %v8155_v40  ;;  %v742_v44 = vadd.f32 %v730_v57, %v712_v51  ;;  %v8271_v3 = vpop.permute.xlu1 %3262  ;;  %v770_v35 = vadd.f32 %v758_v33, %v740_v43  ;;  %v889_v10 = vmul.f32 0.26601171, %v8155_v40 }
 0x3ba   :  { %11975 = vst [vmem:[#allocation40_spill] sm:$0xff] %v8271_v3  ;;  %v811_v7 = vrot.slane %v8245_v50, 3  ;;  %v8276_v30 = vmul.f32 0.21300554, %v8216_v37  ;;  %v759_v6 = vrot.slane %v747_v17, 2  ;;  %v810_v56 = vrot.slane %v8252_v36, 3 }
 0x3bb   :  { %v8278_v18 = vpop.permute.xlu0 %3260  ;;  %v8282_v16 = vmul.f32 0.21300554, %v8178_v4  ;;  %v760_v38 = vrot.slane %v748_v26, 2  ;;  %3546 = vrot.lane.b32.xlu1 %v7560_v13, %s5457_s29  ;;  %v814_v51 = vrot.slane %v8260_v42, 3  ;;  %v8288_v40 = vmul.f32 0.21300554, %v8234_v52  ;;  %3544 = vrot.lane.b32.xlu0 %v7565_v29, %s5457_s29 }
 0x3bc   :  { %11976 = vst [vmem:[#allocation91_spill] sm:$0xff] %v8278_v18  ;;  %v813_v62 = vrot.slane %v8263_v31, 3  ;;  %v8292_v57 = vmul.f32 0.21300554, %v8182_v32  ;;  %v809_v43 = vsel %vm797_vm0, %v807_v22, %v808_v9  ;;  %v862_v17 = vrot.slane %v8269_v46, 4 }
 0x3bd   :  { %v771_v26 = vadd.f32 %v759_v6, %v741_v5  ;;  %v772_v33 = vadd.f32 %v760_v38, %v742_v44  ;;  %v8298_v13 = vpop.permute.xlu1 %3266  ;;  %v879_v18 = vadd.f32 %v861_v61, %v824_v55  ;;  %v825_v3 = vadd.f32 %v809_v43, %v770_v35  ;;  %v11979_v35 = vld [vmem:[#allocation399_spill] sm:$0xff] }
 0x3be   :  { %11977 = vst [vmem:[#allocation41_spill] sm:$0xff] %v8298_v13  ;;  %v866_v20 = vrot.slane %v8276_v30, 4  ;;  %v892_v63 = vmul.f32 0.26601171, %v8216_v37  ;;  %v812_v54 = vsel %vm797_vm0, %v810_v56, %v811_v7  ;;  %v865_v29 = vrot.slane %v8282_v16, 4 }
 0x3bf   :  { %v8302_v47 = vpop.permute.xlu0 %3264  ;;  %v891_v9 = vmul.f32 0.26601171, %v8178_v4  ;;  %v894_v22 = vmul.f32 0.26601171, %v8234_v52  ;;  %3550 = vrot.lane.b32.xlu1 %v7574_v34, %s5457_s29  ;;  %v869_v44 = vrot.slane %v8288_v40, 4  ;;  %v815_v61 = vsel %vm797_vm0, %v813_v62, %v814_v51  ;;  %3548 = vrot.lane.b32.xlu0 %v11979_v35, %s5457_s29 }
 0x3c0   :  { %11978 = vst [vmem:[#allocation42_spill] sm:$0xff] %v8302_v47  ;;  %v868_v5 = vrot.slane %v8292_v57, 4  ;;  %v893_v55 = vmul.f32 0.26601171, %v8182_v32  ;;  %v864_v56 = vsel %vm852_vm1, %v862_v17, %v863_v27  ;;  %v917_v7 = vrot.slane %v889_v10, 5 }
 0x3c1   :  { %v826_v4 = vadd.f32 %v812_v54, %v771_v26  ;;  %v827_v6 = vadd.f32 %v815_v61, %v772_v33  ;;  %v8317_v38 = vpop.permute.xlu1 %3318  ;;  %v8321_v34 = vadd.f32 %v8139_v19, %v8203_v60  ;;  %v11981_v51 = vrot.slane %v8142_v39, 5  ;;  %v11986_v39 = vld [vmem:[#allocation402_spill] sm:$0xff] }
 0x3c2   :  { %11980 = vst [vmem:[#allocation43_spill] sm:$0xff] %v8317_v38  ;;  %v11982_v62 = vrot.slane %v8188_v21, 5  ;;  %v11983_v43 = vrot.slane %v8104_v0, 7  ;;  %v11984_v35 = vrot.slane %v8151_v41, 7  ;;  %v880_v54 = vadd.f32 %v864_v56, %v825_v3  ;;  %v11987_v41 = vld [vmem:[#allocation403_spill] sm:$0xff] }
 0x3c3   :  { %v8333_v10 = vpop.permute.xlu0 %3316  ;;  %v949_v26 = vrot.slane %v8206_v8, 6  ;;  %v921_v60 = vrot.slane %v892_v63, 5  ;;  %v920_v19 = vrot.slane %v891_v9, 5  ;;  %3554 = vrot.lane.b32.xlu1 %v11986_v39, %s5457_s29  ;;  %v867_v21 = vsel %vm852_vm1, %v865_v29, %v866_v20  ;;  %3552 = vrot.lane.b32.xlu0 %v11987_v41, %s5457_s29  ;;  %v11995_v39 = vld [vmem:[#allocation363_spill] sm:$0xff] }
 0x3c4   :  { %v916_v32 = vsel %vm907_vm2, %v11982_v62, %v11981_v51  ;;  %v978_v27 = vsel %vm969_vm4, %v11984_v35, %v11983_v43  ;;  %11985 = vst [vmem:[#allocation45_spill] sm:$0xff] %v8333_v10  ;;  %v924_v33 = vrot.slane %v894_v22, 5  ;;  %v870_v0 = vsel %vm852_vm1, %v868_v5, %v869_v44 }
 0x3c5   :  { %v934_v17 = vadd.f32 %v916_v32, %v879_v18  ;;  %v923_v61 = vrot.slane %v893_v55, 5  ;;  %v11988_v3 = vrot.slane %v8228_v11, 5  ;;  %v948_v8 = vrot.slane %v8269_v46, 6  ;;  %v8346_v56 = vpop.permute.xlu1 %3322  ;;  %v11992_v32 = vld [vmem:[#allocation359_spill] sm:$0xff] }
 0x3c6   :  { %v881_v63 = vadd.f32 %v867_v21, %v826_v4  ;;  %v882_v9 = vadd.f32 %v870_v0, %v827_v6  ;;  %11989 = vst [vmem:[#allocation44_spill] sm:$0xff] %v8346_v56  ;;  %v980_v51 = vrot.slane %v8194_v14, 7  ;;  %v8350_v20 = vmul.f32 0.007598758, %v8162_v59 }
 0x3c7   :  { %v919_v18 = vsel %vm907_vm2, %v917_v7, %v11988_v3  ;;  %v8353_v29 = vmul.f32 0.0010283801, %v8162_v59  ;;  %v8355_v44 = vpop.permute.xlu0 %3320  ;;  %v965_v11 = vadd.f32 %v8222_v23, %v934_v17  ;;  %v979_v5 = vrot.slane %v8240_v2, 7  ;;  %v11991_v7 = vld [vmem:[#allocation357_spill] sm:$0xff]  ;;  %3580 = vrot.lane.b32.xlu0 %v11992_v32, %s5458_s30 }
 0x3c8   :  { %v935_v22 = vadd.f32 %v919_v18, %v880_v54  ;;  %11990 = vst [vmem:[#allocation47_spill] sm:$0xff] %v8355_v44  ;;  %v952_v46 = vrot.slane %v8276_v30, 6  ;;  %v951_v55 = vrot.slane %v8282_v16, 6  ;;  %3582 = vrot.lane.b32.xlu1 %v11991_v7, %s5458_s30  ;;  %v922_v14 = vsel %vm907_vm2, %v920_v19, %v921_v60  ;;  %v12004_v7 = vld [vmem:[#allocation156_spill] sm:$0xff]  ;;  %v12007_v32 = vld [vmem:[#allocation369_spill] sm:$0xff] }
 0x3c9   :  { %v955_v4 = vrot.slane %v8288_v40, 6  ;;  %v925_v6 = vsel %vm907_vm2, %v923_v61, %v924_v33  ;;  %v954_v62 = vrot.slane %v8292_v57, 6  ;;  %v1003_v23 = vmul.f32 0.036000773, %v8162_v59  ;;  %v8371_v16 = vpop.permute.xlu1 %3326  ;;  %v11996_v61 = vld [vmem:[#allocation365_spill] sm:$0xff] }
 0x3ca   :  { %v950_v30 = vsel %vm938_vm3, %v948_v8, %v949_v26  ;;  %v936_v2 = vadd.f32 %v922_v14, %v881_v63  ;;  %11993 = vst [vmem:[#allocation48_spill] sm:$0xff] %v8371_v16  ;;  %v937_v43 = vadd.f32 %v925_v6, %v882_v9  ;;  %v1027_v35 = vrot.slane %v8350_v20, 1  ;;  %v12006_v6 = vld [vmem:[#allocation157_spill] sm:$0xff]  ;;  %v12047_v20 = vld [vmem:[#allocation383_spill] sm:$0xff] }
 0x3cb   :  { %v1057_v54 = vrot.slane %v8353_v29, 2  ;;  %v966_v40 = vadd.f32 %v950_v30, %v935_v22  ;;  %v8376_v17 = vmul.f32 0.007598758, %v8216_v37  ;;  %v8378_v57 = vpop.permute.xlu0 %3324  ;;  %v996_v60 = vadd.f32 %v978_v27, %v965_v11  ;;  %3584 = vrot.lane.b32.xlu0 %v11996_v61, %s5458_s30  ;;  %v12000_v22 = vld [vmem:[#allocation154_spill] sm:$0xff]  ;;  %v12008_v30 = vld [vmem:[#allocation207_spill] sm:$0xff] }
 0x3cc   :  { %11994 = vst [vmem:[#allocation107_spill] sm:$0xff] %v8378_v57  ;;  %v981_v19 = vsel %vm969_vm4, %v979_v5, %v980_v51  ;;  %v983_v59 = vrot.slane %v8245_v50, 7  ;;  %v982_v26 = vrot.slane %v8252_v36, 7  ;;  %3586 = vrot.lane.b32.xlu1 %v11995_v39, %s5458_s30  ;;  %v953_v21 = vsel %vm938_vm3, %v951_v55, %v952_v46  ;;  %v11999_v51 = vld [vmem:[#allocation104_spill] sm:$0xff]  ;;  %v12001_v5 = vld [vmem:[#allocation87_spill] sm:$0xff] }
 0x3cd   :  { %v986_v33 = vrot.slane %v8260_v42, 7  ;;  %v985_v0 = vrot.slane %v8263_v31, 7  ;;  %v956_v27 = vsel %vm938_vm3, %v954_v62, %v955_v4  ;;  %v1004_v41 = vmul.f32 0.036000773, %v8216_v37  ;;  %v8395_v36 = vpop.permute.xlu1 %3330  ;;  %v12002_v46 = vld [vmem:[#allocation155_spill] sm:$0xff]  ;;  %v12005_v4 = vld [vmem:[#allocation206_spill] sm:$0xff] }
 0x3ce   :  { %v8393_v50 = vmul.f32 0.0010283801, %v8216_v37  ;;  %11997 = vst [vmem:[#allocation49_spill] sm:$0xff] %v8395_v36  ;;  %v967_v3 = vadd.f32 %v953_v21, %v936_v2  ;;  %v968_v18 = vadd.f32 %v956_v27, %v937_v43  ;;  %v1028_v8 = vrot.slane %v8376_v17, 1  ;;  %v12003_v55 = vld [vmem:[#allocation203_spill] sm:$0xff]  ;;  %v12009_v2 = vld [vmem:[#allocation158_spill] sm:$0xff] }
 0x3cf   :  { %v1005_v42 = vmul.f32 0.036000773, %v8234_v52  ;;  %v1017_v31 = vmul.f32 0.007598758, %v8234_v52  ;;  %v8400_v63 = vpop.permute.xlu0 %3328  ;;  %v997_v9 = vadd.f32 %v981_v19, %v966_v40  ;;  %v1145_v11 = vadd.f32 %v12000_v22, %v11999_v51  ;;  %v12010_v17 = vld [vmem:[#allocation210_spill] sm:$0xff]  ;;  %v12011_v40 = vld [vmem:[#allocation159_spill] sm:$0xff] }
 0x3d0   :  { %11998 = vst [vmem:[#allocation50_spill] sm:$0xff] %v8400_v63  ;;  %v1144_v37 = vadd.f32 %v12002_v46, %v12001_v5  ;;  %v1147_v14 = vadd.f32 %v12004_v7, %v12003_v55  ;;  %v1146_v62 = vadd.f32 %v12006_v6, %v12005_v4  ;;  %3590 = vrot.lane.b32.xlu1 %v12007_v32, %s5458_s30  ;;  %v12012_v39 = vld [vmem:[#allocation371_spill] sm:$0xff]  ;;  %v12014_v51 = vld [vmem:[#allocation160_spill] sm:$0xff]  ;;  %v12016_v4 = vld [vmem:[#allocation214_spill] sm:$0xff] }
 0x3d1   :  { %v1149_v43 = vadd.f32 %v12009_v2, %v12008_v30  ;;  %v1148_v19 = vadd.f32 %v12011_v40, %v12010_v17  ;;  %3588 = vrot.lane.b32.xlu0 %v12012_v39, %s5458_s30  ;;  %v984_v21 = vsel %vm969_vm4, %v982_v26, %v983_v59  ;;  %v987_v61 = vsel %vm969_vm4, %v985_v0, %v986_v33  ;;  %v12013_v27 = vld [vmem:[#allocation211_spill] sm:$0xff]  ;;  %v8422_v5 = vpop.permute.xlu1 %3334  ;;  %v12017_v6 = vld [vmem:[#allocation161_spill] sm:$0xff]  ;;  %v12020_v2 = vld [vmem:[#allocation162_spill] sm:$0xff] }
 0x3d2   :  { %v1151_v22 = vadd.f32 %v12014_v51, %v12013_v27  ;;  %12015 = vst [vmem:[#allocation51_spill] sm:$0xff] %v8422_v5  ;;  %v998_v46 = vadd.f32 %v984_v21, %v967_v3  ;;  %v999_v55 = vadd.f32 %v987_v61, %v968_v18  ;;  %v1006_v7 = vadd.f32 %v8042_v48, %v8166_v45  ;;  %v12019_v0 = vld [vmem:[#allocation215_spill] sm:$0xff]  ;;  %v12021_v40 = vld [vmem:[#allocation218_spill] sm:$0xff]  ;;  %v12023_v39 = vld [vmem:[#allocation221_spill] sm:$0xff] }
 0x3d3   :  { %v1150_v32 = vadd.f32 %v12017_v6, %v12016_v4  ;;  %v8428_v30 = vpop.permute.xlu0 %3332  ;;  %v1007_v59 = vadd.f32 %v8121_v12, %v8321_v34  ;;  %v1008_v26 = vadd.f32 %v8149_v1, %v996_v60  ;;  %v1009_v33 = vadd.f32 %v1003_v23, %v997_v9  ;;  %v12022_v3 = vld [vmem:[#allocation163_spill] sm:$0xff]  ;;  %v12024_v21 = vld [vmem:[#allocation164_spill] sm:$0xff]  ;;  %v12026_v61 = vld [vmem:[#allocation165_spill] sm:$0xff] }
 0x3d4   :  { %12018 = vst [vmem:[#allocation57_spill] sm:$0xff] %v8428_v30  ;;  %v1153_v17 = vadd.f32 %v12020_v2, %v12019_v0  ;;  %v1152_v18 = vadd.f32 %v12022_v3, %v12021_v40  ;;  %v1155_v48 = vadd.f32 %v12024_v21, %v12023_v39  ;;  %v12025_v45 = vld [vmem:[#allocation224_spill] sm:$0xff]  ;;  %v12027_v51 = vld [vmem:[#allocation375_spill] sm:$0xff]  ;;  %v12028_v4 = vld [vmem:[#allocation166_spill] sm:$0xff]  ;;  %v1010_v39 = vadd.f32 %v1004_v41, %v998_v46 }
 0x3d5   :  { %v1154_v27 = vadd.f32 %v12026_v61, %v12025_v45  ;;  %3594 = vrot.lane.b32.xlu1 %v12027_v51, %s5458_s30  ;;  %v1217_v12 = vadd.f32 %v12028_v4, %v1145_v11  ;;  %v12029_v34 = vld [vmem:[#allocation167_spill] sm:$0xff]  ;;  %v12030_v23 = vld [vmem:[#allocation168_spill] sm:$0xff]  ;;  %v12031_v9 = vld [vmem:[#allocation169_spill] sm:$0xff]  ;;  %v8450_v3 = vpop.permute.xlu1 %3338  ;;  %v1011_v21 = vadd.f32 %v1005_v42, %v999_v55  ;;  %v12035_v45 = vrot.slane %v8049_v49, 1 }
 0x3d6   :  { %v1216_v1 = vadd.f32 %v12029_v34, %v1144_v37  ;;  %v1219_v60 = vadd.f32 %v12030_v23, %v1147_v14  ;;  %v1218_v6 = vadd.f32 %v12031_v9, %v1146_v62  ;;  %v12032_v0 = vld [vmem:[#allocation377_spill] sm:$0xff]  ;;  %v12033_v2 = vld [vmem:[#allocation170_spill] sm:$0xff]  ;;  %12034 = vst [vmem:[#allocation52_spill] sm:$0xff] %v8450_v3  ;;  %v12036_v51 = vld [vmem:[#allocation171_spill] sm:$0xff]  ;;  %v12038_v37 = vrot.slane %v8096_v28, 1 }
 0x3d7   :  { %3592 = vrot.lane.b32.xlu0 %v12032_v0, %s5458_s30  ;;  %v1221_v40 = vadd.f32 %v12033_v2, %v1149_v43  ;;  %v1036_v61 = vadd.f32 %v12035_v45, %v1006_v7  ;;  %v1220_v11 = vadd.f32 %v12036_v51, %v1148_v19  ;;  %v8455_v4 = vpop.permute.xlu0 %3336  ;;  %v12039_v62 = vrot.slane %v8169_v25, 1  ;;  %v12040_v23 = vld [vmem:[#allocation172_spill] sm:$0xff]  ;;  %v12041_v41 = vld [vmem:[#allocation173_spill] sm:$0xff]  ;;  %v12043_v55 = vld [vmem:[#allocation174_spill] sm:$0xff] }
 0x3d8   :  { %12037 = vst [vmem:[#allocation53_spill] sm:$0xff] %v8455_v4  ;;  %v1037_v14 = vadd.f32 %v12038_v37, %v1007_v59  ;;  %v1039_v43 = vadd.f32 %v1027_v35, %v1009_v33  ;;  %v1223_v9 = vadd.f32 %v12040_v23, %v1151_v22  ;;  %v1222_v42 = vadd.f32 %v12041_v41, %v1150_v32  ;;  %v12042_v49 = vld [vmem:[#allocation381_spill] sm:$0xff]  ;;  %v12044_v28 = vld [vmem:[#allocation175_spill] sm:$0xff]  ;;  %v12045_v0 = vld [vmem:[#allocation176_spill] sm:$0xff] }
 0x3d9   :  { %v1038_v34 = vadd.f32 %v12039_v62, %v1008_v26  ;;  %3598 = vrot.lane.b32.xlu1 %v12042_v49, %s5458_s30  ;;  %v1029_v46 = vrot.slane %v1017_v31, 1  ;;  %v1047_v19 = vmul.f32 0.0010283801, %v8234_v52  ;;  %v1225_v7 = vadd.f32 %v12043_v55, %v1153_v17  ;;  %v12046_v26 = vld [vmem:[#allocation177_spill] sm:$0xff]  ;;  %v12048_v35 = vld [vmem:[#allocation178_spill] sm:$0xff]  ;;  %v8475_v32 = vpop.permute.xlu1 %3390  ;;  %v12052_v17 = vld [vmem:[#allocation179_spill] sm:$0xff] }
 0x3da   :  { %v1224_v59 = vadd.f32 %v12044_v28, %v1152_v18  ;;  %v1227_v25 = vadd.f32 %v12045_v0, %v1155_v48  ;;  %v1226_v2 = vadd.f32 %v12046_v26, %v1154_v27  ;;  %v1289_v22 = vadd.f32 %v12048_v35, %v1217_v12  ;;  %12049 = vst [vmem:[#allocation54_spill] sm:$0xff] %v8475_v32  ;;  %v12059_v12 = vld [vmem:[#allocation180_spill] sm:$0xff]  ;;  %v12063_v41 = vld [vmem:[#allocation183_spill] sm:$0xff]  ;;  %v12079_v26 = vld [vmem:[#allocation186_spill] sm:$0xff] }
 0x3db   :  { %3596 = vrot.lane.b32.xlu0 %v12047_v20, %s5458_s30  ;;  %v1040_v33 = vadd.f32 %v1028_v8, %v1010_v39  ;;  %v1041_v45 = vadd.f32 %v1029_v46, %v1011_v21  ;;  %v12050_v31 = vrot.slane %v8059_v53, 2  ;;  %v1288_v51 = vadd.f32 %v12052_v17, %v1216_v1  ;;  %v8482_v18 = vpop.permute.xlu0 %3388  ;;  %v12060_v39 = vld [vmem:[#allocation181_spill] sm:$0xff]  ;;  %v12061_v1 = vld [vmem:[#allocation387_spill] sm:$0xff] }
 0x3dc   :  { %12053 = vst [vmem:[#allocation55_spill] sm:$0xff] %v8482_v18  ;;  %v12054_v48 = vrot.slane %v8101_v15, 2  ;;  %v12056_v37 = vrot.slane %v8172_v58, 2  ;;  %v8494_v8 = vadd.f32 %v1057_v54, %v1039_v43  ;;  %v1291_v53 = vadd.f32 %v12059_v12, %v1219_v60  ;;  %v12065_v46 = vld [vmem:[#allocation185_spill] sm:$0xff]  ;;  %v12066_v54 = vld [vmem:[#allocation388_spill] sm:$0xff]  ;;  %v12067_v60 = vld [vmem:[#allocation351_spill] sm:$0xff] }
 0x3dd   :  { %v8479_v52 = vadd.f32 %v12050_v31, %v1036_v61  ;;  %v1290_v21 = vadd.f32 %v12060_v39, %v1218_v6  ;;  %3602 = vrot.lane.b32.xlu1 %v12061_v1, %s5458_s30  ;;  %v1058_v61 = vrot.slane %v8393_v50, 2  ;;  %v1059_v15 = vrot.slane %v1047_v19, 2  ;;  %v8510_v6 = vpop.permute.xlu1 %3394  ;;  %v12080_v35 = vld [vmem:[#allocation187_spill] sm:$0xff]  ;;  %v12082_v17 = vld [vmem:[#allocation189_spill] sm:$0xff] }
 0x3de   :  { %v8486_v27 = vadd.f32 %v12054_v48, %v1037_v14  ;;  %v8490_v62 = vadd.f32 %v12056_v37, %v1038_v34  ;;  %12058 = vst [vmem:[#allocation69_spill] sm:$0xff] %v8494_v8  ;;  %v12062_v14 = vld [vmem:[#allocation182_spill] sm:$0xff]  ;;  %v1292_v58 = vadd.f32 %v12063_v41, %v1220_v11  ;;  %v12064_v34 = vld [vmem:[#allocation184_spill] sm:$0xff]  ;;  %v1294_v29 = vadd.f32 %v12065_v46, %v1222_v42  ;;  %v12084_v39 = vld [vmem:[#allocation191_spill] sm:$0xff] }
 0x3df   :  { %12051 = vst [vmem:[#allocation119_spill] sm:$0xff] %v8479_v52  ;;  %v1293_v23 = vadd.f32 %v12062_v14, %v1221_v40  ;;  %v1295_v49 = vadd.f32 %v12064_v34, %v1223_v9  ;;  %3600 = vrot.lane.b32.xlu0 %v12066_v54, %s5458_s30  ;;  %v8508_v43 = vmul.f32 0.0010283801, %v12067_v60  ;;  %12069 = vst [vmem:[#allocation61_spill] sm:$0xff] %v8510_v6  ;;  %v12073_v11 = vld [vmem:[#allocation352_spill] sm:$0xff]  ;;  %v8523_v42 = vpop.permute.xlu0 %3392  ;;  %v12083_v37 = vld [vmem:[#allocation190_spill] sm:$0xff] }
 0x3e0   :  { %12055 = vst [vmem:[#allocation56_spill] sm:$0xff] %v8486_v27  ;;  %12057 = vst [vmem:[#allocation59_spill] sm:$0xff] %v8490_v62  ;;  %v8512_v55 = vadd.f32 %v1058_v61, %v1040_v33  ;;  %v8514_v50 = vadd.f32 %v1059_v15, %v1041_v45  ;;  %v8518_v40 = vmul.f32 %v8479_v52, %v8479_v52  ;;  %v8521_v9 = vmul.f32 0.0010283801, %v12073_v11  ;;  %v12081_v45 = vld [vmem:[#allocation188_spill] sm:$0xff]  ;;  %v12086_v14 = vld [vmem:[#allocation193_spill] sm:$0xff] }
 0x3e1   :  { %12068 = vst [vmem:[#allocation60_spill] sm:$0xff] %v8508_v43  ;;  %12075 = vst [vmem:[#allocation65_spill] sm:$0xff] %v8523_v42  ;;  %v8527_v19 = vmul.f32 %v8486_v27, %v8486_v27  ;;  %v8531_v28 = vmul.f32 %v8490_v62, %v8490_v62  ;;  %v8535_v0 = vmul.f32 %v8494_v8, %v8494_v8  ;;  %3642 = vrot.lane.b32.xlu1 %v8508_v43, %s5459_s5  ;;  %v12085_v61 = vld [vmem:[#allocation192_spill] sm:$0xff]  ;;  %v12088_v34 = vld [vmem:[#allocation195_spill] sm:$0xff]  ;;  %v8555_v11 = vpop.permute.xlu1 %3398 }
 0x3e2   :  { %12070 = vst [vmem:[#allocation62_spill] sm:$0xff] %v8512_v55  ;;  %12071 = vst [vmem:[#allocation131_spill] sm:$0xff] %v8514_v50  ;;  %v1297_v20 = vadd.f32 %v12079_v26, %v1225_v7  ;;  %v1296_v33 = vadd.f32 %v12080_v35, %v1224_v59  ;;  %v1299_v31 = vadd.f32 %v12081_v45, %v1227_v25  ;;  %v12087_v7 = vld [vmem:[#allocation194_spill] sm:$0xff]  ;;  %v12089_v46 = vld [vmem:[#allocation196_spill] sm:$0xff] }
 0x3e3   :  { %12072 = vst [vmem:[#allocation63_spill] sm:$0xff] %v8518_v40  ;;  %12074 = vst [vmem:[#allocation64_spill] sm:$0xff] %v8521_v9  ;;  %v1298_v48 = vadd.f32 %v12082_v17, %v1226_v2  ;;  %v1361_v12 = vadd.f32 %v12083_v37, %v1289_v22  ;;  %v1360_v1 = vadd.f32 %v12084_v39, %v1288_v51  ;;  %3640 = vrot.lane.b32.xlu0 %v8521_v9, %s5459_s5  ;;  %v12090_v54 = vld [vmem:[#allocation358_spill] sm:$0xff]  ;;  %v12093_v22 = vld [vmem:[#allocation197_spill] sm:$0xff]  ;;  %v8563_v37 = vpop.permute.xlu0 %3396 }
 0x3e4   :  { %12076 = vst [vmem:[#allocation90_spill] sm:$0xff] %v8527_v19  ;;  %12077 = vst [vmem:[#allocation66_spill] sm:$0xff] %v8531_v28  ;;  %v1363_v15 = vadd.f32 %v12085_v61, %v1291_v53  ;;  %v1362_v41 = vadd.f32 %v12086_v14, %v1290_v21  ;;  %v1365_v59 = vadd.f32 %v12087_v7, %v1293_v23  ;;  %v8553_v60 = vmul.f32 0.0010283801, %v12090_v54  ;;  %v12094_v26 = vld [vmem:[#allocation198_spill] sm:$0xff]  ;;  %v12095_v35 = vld [vmem:[#allocation101_spill] sm:$0xff] }
 0x3e5   :  { %12078 = vst [vmem:[#allocation67_spill] sm:$0xff] %v8535_v0  ;;  %v1364_v25 = vadd.f32 %v12088_v34, %v1292_v58  ;;  %v1367_v2 = vadd.f32 %v12089_v46, %v1295_v49  ;;  %12092 = vst [vmem:[#allocation143_spill] sm:$0xff] %v8555_v11  ;;  %v1366_v51 = vadd.f32 %v12093_v22, %v1294_v29  ;;  %v12096_v45 = vld [vmem:[#allocation360_spill] sm:$0xff]  ;;  %v12099_v23 = vld [vmem:[#allocation199_spill] sm:$0xff] }
 0x3e6   :  { %12091 = vst [vmem:[#allocation72_spill] sm:$0xff] %v8553_v60  ;;  %v1369_v53 = vadd.f32 %v12094_v26, %v1297_v20  ;;  %v1432_v21 = vadd.f32 %v12095_v35, %v1360_v1  ;;  %v8561_v17 = vmul.f32 0.0010283801, %v12096_v45  ;;  %12098 = vst [vmem:[#allocation71_spill] sm:$0xff] %v8563_v37  ;;  %v1368_v58 = vadd.f32 %v12099_v23, %v1296_v33  ;;  %v12100_v39 = vld [vmem:[#allocation200_spill] sm:$0xff]  ;;  %v12101_v61 = vld [vmem:[#allocation201_spill] sm:$0xff] }
 0x3e7   :  { %v1371_v49 = vadd.f32 %v12100_v39, %v1299_v31  ;;  %v1370_v14 = vadd.f32 %v12101_v61, %v1298_v48  ;;  %v12102_v7 = vld [vmem:[#allocation100_spill] sm:$0xff]  ;;  %3646 = vrot.lane.b32.xlu1 %v8553_v60, %s5459_s5  ;;  %v12103_v29 = vld [vmem:[#allocation105_spill] sm:$0xff]  ;;  %v12104_v46 = vld [vmem:[#allocation202_spill] sm:$0xff]  ;;  %v8591_v8 = vpop.permute.xlu0 %3400 }
 0x3e8   :  { %12097 = vst [vmem:[#allocation68_spill] sm:$0xff] %v8561_v17  ;;  %v1433_v34 = vadd.f32 %v12102_v7, %v1361_v12  ;;  %v1435_v20 = vadd.f32 %v12103_v29, %v1363_v15  ;;  %v1434_v1 = vadd.f32 %v12104_v46, %v1362_v41  ;;  %v12105_v54 = vld [vmem:[#allocation204_spill] sm:$0xff]  ;;  %v12106_v26 = vld [vmem:[#allocation223_spill] sm:$0xff]  ;;  %3644 = vrot.lane.b32.xlu0 %v8561_v17, %s5459_s5  ;;  %v12107_v33 = vld [vmem:[#allocation205_spill] sm:$0xff]  ;;  %v8583_v7 = vpop.permute.xlu1 %3402 }
 0x3e9   :  { %v1437_v22 = vadd.f32 %v12105_v54, %v1365_v59  ;;  %v1480_v35 = vadd.f32 %v12106_v26, %v1432_v21  ;;  %v1436_v31 = vadd.f32 %v12107_v33, %v1364_v25  ;;  %v12108_v45 = vld [vmem:[#allocation208_spill] sm:$0xff]  ;;  %v12109_v23 = vld [vmem:[#allocation209_spill] sm:$0xff]  ;;  %12112 = vst [vmem:[#allocation106_spill] sm:$0xff] %v8583_v7  ;;  %v12115_v46 = vld [vmem:[#allocation239_spill] sm:$0xff] }
 0x3ea   :  { %v1439_v48 = vadd.f32 %v12108_v45, %v1367_v2  ;;  %v1438_v12 = vadd.f32 %v12109_v23, %v1366_v51  ;;  %v12110_v39 = vld [vmem:[#allocation364_spill] sm:$0xff]  ;;  %v12114_v29 = vld [vmem:[#allocation213_spill] sm:$0xff]  ;;  %v12116_v54 = vld [vmem:[#allocation366_spill] sm:$0xff]  ;;  %12118 = vst [vmem:[#allocation78_spill] sm:$0xff] %v8591_v8 }
 0x3eb   :  { %v8581_v61 = vmul.f32 0.0010283801, %v12110_v39  ;;  %v12113_v15 = vld [vmem:[#allocation212_spill] sm:$0xff]  ;;  %v1440_v59 = vadd.f32 %v12114_v29, %v1368_v58  ;;  %v1528_v21 = vadd.f32 %v12115_v46, %v1480_v35  ;;  %v8589_v26 = vmul.f32 0.0010283801, %v12116_v54  ;;  %v12120_v33 = vld [vmem:[#allocation217_spill] sm:$0xff]  ;;  %v8619_v0 = vpop.permute.xlu0 %3404 }
 0x3ec   :  { %v1441_v41 = vadd.f32 %v12113_v15, %v1369_v53  ;;  %v12119_v25 = vld [vmem:[#allocation216_spill] sm:$0xff]  ;;  %v1442_v51 = vadd.f32 %v12120_v33, %v1370_v14  ;;  %v12121_v45 = vld [vmem:[#allocation222_spill] sm:$0xff]  ;;  %v12122_v39 = vld [vmem:[#allocation225_spill] sm:$0xff]  ;;  %v8611_v52 = vpop.permute.xlu1 %3406  ;;  %12138 = vst [vmem:[#allocation82_spill] sm:$0xff] %v8619_v0 }
 0x3ed   :  { %12111 = vst [vmem:[#allocation75_spill] sm:$0xff] %v8581_v61  ;;  %12117 = vst [vmem:[#allocation76_spill] sm:$0xff] %v8589_v26  ;;  %v1443_v2 = vadd.f32 %v12119_v25, %v1371_v49  ;;  %v1481_v23 = vadd.f32 %v12121_v45, %v1433_v34  ;;  %v1483_v62 = vadd.f32 %v12122_v39, %v1435_v20  ;;  %3650 = vrot.lane.b32.xlu1 %v8581_v61, %s5459_s5  ;;  %v12123_v53 = vld [vmem:[#allocation226_spill] sm:$0xff]  ;;  %v12124_v15 = vld [vmem:[#allocation227_spill] sm:$0xff] }
 0x3ee   :  { %v1482_v58 = vadd.f32 %v12123_v53, %v1434_v1  ;;  %v1485_v35 = vadd.f32 %v12124_v15, %v1437_v22  ;;  %v12125_v29 = vld [vmem:[#allocation228_spill] sm:$0xff]  ;;  %v12126_v54 = vld [vmem:[#allocation251_spill] sm:$0xff]  ;;  %3648 = vrot.lane.b32.xlu0 %v8589_v26, %s5459_s5  ;;  %v12127_v49 = vld [vmem:[#allocation229_spill] sm:$0xff]  ;;  %12132 = vst [vmem:[#allocation93_spill] sm:$0xff] %v8611_v52 }
 0x3ef   :  { %v1484_v46 = vadd.f32 %v12125_v29, %v1436_v31  ;;  %v1576_v27 = vadd.f32 %v12126_v54, %v1528_v21  ;;  %v1487_v14 = vadd.f32 %v12127_v49, %v1439_v48  ;;  %v12128_v25 = vld [vmem:[#allocation230_spill] sm:$0xff]  ;;  %v12129_v33 = vld [vmem:[#allocation231_spill] sm:$0xff]  ;;  %v12133_v1 = vld [vmem:[#allocation232_spill] sm:$0xff]  ;;  %v8649_v55 = vpop.permute.xlu0 %3408 }
 0x3f0   :  { %v1486_v34 = vadd.f32 %v12128_v25, %v1438_v12  ;;  %v1489_v20 = vadd.f32 %v12129_v33, %v1441_v41  ;;  %v12130_v45 = vld [vmem:[#allocation370_spill] sm:$0xff]  ;;  %v1488_v22 = vadd.f32 %v12133_v1, %v1440_v59  ;;  %v12135_v15 = vld [vmem:[#allocation263_spill] sm:$0xff]  ;;  %v12136_v29 = vld [vmem:[#allocation372_spill] sm:$0xff]  ;;  %12158 = vst [vmem:[#allocation92_spill] sm:$0xff] %v8649_v55 }
 0x3f1   :  { %v8609_v39 = vmul.f32 0.0010283801, %v12130_v45  ;;  %v12134_v53 = vld [vmem:[#allocation234_spill] sm:$0xff]  ;;  %v1624_v21 = vadd.f32 %v12135_v15, %v1576_v27  ;;  %v8617_v54 = vmul.f32 0.0010283801, %v12136_v29  ;;  %v12139_v48 = vld [vmem:[#allocation235_spill] sm:$0xff] }
 0x3f2   :  { %v1491_v31 = vadd.f32 %v12134_v53, %v1443_v2  ;;  %v1490_v12 = vadd.f32 %v12139_v48, %v1442_v51  ;;  %v12140_v49 = vld [vmem:[#allocation238_spill] sm:$0xff]  ;;  %v12141_v25 = vld [vmem:[#allocation240_spill] sm:$0xff]  ;;  %v12142_v45 = vld [vmem:[#allocation241_spill] sm:$0xff] }
 0x3f3   :  { %12131 = vst [vmem:[#allocation79_spill] sm:$0xff] %v8609_v39  ;;  %12137 = vst [vmem:[#allocation81_spill] sm:$0xff] %v8617_v54  ;;  %v1529_v41 = vadd.f32 %v12140_v49, %v1481_v23  ;;  %v1531_v33 = vadd.f32 %v12141_v25, %v1483_v62  ;;  %v1530_v50 = vadd.f32 %v12142_v45, %v1482_v58  ;;  %3654 = vrot.lane.b32.xlu1 %v8609_v39, %s5459_s5  ;;  %v12143_v59 = vld [vmem:[#allocation242_spill] sm:$0xff]  ;;  %v12144_v1 = vld [vmem:[#allocation243_spill] sm:$0xff] }
 0x3f4   :  { %v1533_v2 = vadd.f32 %v12143_v59, %v1485_v35  ;;  %v1532_v27 = vadd.f32 %v12144_v1, %v1484_v46  ;;  %v12145_v53 = vld [vmem:[#allocation244_spill] sm:$0xff]  ;;  %v12146_v29 = vld [vmem:[#allocation275_spill] sm:$0xff]  ;;  %3652 = vrot.lane.b32.xlu0 %v8617_v54, %s5459_s5  ;;  %v12147_v51 = vld [vmem:[#allocation245_spill] sm:$0xff]  ;;  %v8641_v35 = vpop.permute.xlu1 %3410 }
 0x3f5   :  { %v1535_v15 = vadd.f32 %v12145_v53, %v1487_v14  ;;  %v8631_v28 = vadd.f32 %v12146_v29, %v1624_v21  ;;  %v1534_v23 = vadd.f32 %v12147_v51, %v1486_v34  ;;  %v12148_v62 = vld [vmem:[#allocation246_spill] sm:$0xff]  ;;  %v12150_v25 = vld [vmem:[#allocation376_spill] sm:$0xff]  ;;  %12152 = vst [vmem:[#allocation118_spill] sm:$0xff] %v8641_v35  ;;  %v12153_v46 = vld [vmem:[#allocation247_spill] sm:$0xff] }
 0x3f6   :  { %v1537_v48 = vadd.f32 %v12148_v62, %v1489_v20  ;;  %v12149_v58 = vld [vmem:[#allocation250_spill] sm:$0xff]  ;;  %v8639_v45 = vmul.f32 0.0010283801, %v12150_v25  ;;  %v1536_v59 = vadd.f32 %v12153_v46, %v1488_v22  ;;  %v12154_v14 = vld [vmem:[#allocation248_spill] sm:$0xff]  ;;  %v12155_v21 = vld [vmem:[#allocation249_spill] sm:$0xff] }
 0x3f7   :  { %v1577_v49 = vadd.f32 %v12149_v58, %v1529_v41  ;;  %v1539_v1 = vadd.f32 %v12154_v14, %v1491_v31  ;;  %v1538_v53 = vadd.f32 %v12155_v21, %v1490_v12  ;;  %v12156_v29 = vld [vmem:[#allocation378_spill] sm:$0xff]  ;;  %v12159_v34 = vld [vmem:[#allocation252_spill] sm:$0xff]  ;;  %v12160_v51 = vld [vmem:[#allocation253_spill] sm:$0xff]  ;;  %v1870_v32 = vmul.f32 0.26601171, %v8631_v28 }
 0x3f8   :  { %12151 = vst [vmem:[#allocation85_spill] sm:$0xff] %v8639_v45  ;;  %v8647_v19 = vmul.f32 0.0010283801, %v12156_v29  ;;  %v1579_v20 = vadd.f32 %v12159_v34, %v1531_v33  ;;  %v1578_v41 = vadd.f32 %v12160_v51, %v1530_v50  ;;  %v12161_v62 = vld [vmem:[#allocation262_spill] sm:$0xff]  ;;  %3658 = vrot.lane.b32.xlu1 %v8639_v45, %s5459_s5  ;;  %v12164_v14 = vld [vmem:[#allocation255_spill] sm:$0xff]  ;;  %v5315_v33 = vld [vmem:[#allocation6] sm:$0xff] }
 0x3f9   :  { %v1625_v58 = vadd.f32 %v12161_v62, %v1577_v49  ;;  %v5313_v25 = vld [vmem:[#allocation6 + $0x10] sm:$0xff]  ;;  %v1580_v21 = vadd.f32 %v12164_v14, %v1532_v27  ;;  %v1702_v29 = vmul.f32 0.007598758, %v8631_v28  ;;  %v5316_v50 = vld [vmem:[#allocation7] sm:$0xff]  ;;  %v8673_v27 = vpop.permute.xlu1 %3438  ;;  %v5324_v30 = vld [vmem:[#allocation7 + $0x18] sm:$0xff] }
 0x3fa   :  { %12157 = vst [vmem:[#allocation86_spill] sm:$0xff] %v8647_v19  ;;  %v5314_v22 = vld [vmem:[#allocation7 + $0x10] sm:$0xff]  ;;  %3656 = vrot.lane.b32.xlu0 %v8647_v19, %s5459_s5  ;;  %v8663_v34 = vmul.f32 %v5316_v50, %v5315_v33  ;;  %v12166_v49 = vld [vmem:[#allocation256_spill] sm:$0xff]  ;;  %v12167_v62 = vld [vmem:[#allocation257_spill] sm:$0xff] }
 0x3fb   :  { %v8656_v46 = vmul.f32 %v5314_v22, %v5313_v25  ;;  %v12163_v31 = vld [vmem:[#allocation254_spill] sm:$0xff]  ;;  %v1583_v51 = vadd.f32 %v12166_v49, %v1535_v15  ;;  %v1582_v40 = vadd.f32 %v12167_v62, %v1534_v23  ;;  %12171 = vst [vmem:[#allocation96_spill] sm:$0xff] %v8673_v27  ;;  %v12173_v35 = vld [vmem:[#allocation259_spill] sm:$0xff]  ;;  %v12174_v52 = vld [vmem:[#allocation260_spill] sm:$0xff]  ;;  %v8681_v15 = vpop.permute.xlu0 %3436 }
 0x3fc   :  { %v1581_v12 = vadd.f32 %v12163_v31, %v1533_v2  ;;  %12165 = vst [vmem:[#allocation94_spill] sm:$0xff] %v8663_v34  ;;  %v12168_v55 = vld [vmem:[#allocation274_spill] sm:$0xff]  ;;  %v1584_v0 = vadd.f32 %v12173_v35, %v1536_v59  ;;  %v1587_v8 = vadd.f32 %v12174_v52, %v1539_v1  ;;  %v12175_v33 = vld [vmem:[#allocation384_spill] sm:$0xff]  ;;  %12177 = vst [vmem:[#allocation97_spill] sm:$0xff] %v8681_v15  ;;  %v1714_v52 = vrot.slane %v1702_v29, 1 }
 0x3fd   :  { %12162 = vst [vmem:[#allocation109_spill] sm:$0xff] %v8656_v46  ;;  %v8668_v25 = vadd.f32 %v12168_v55, %v1625_v58  ;;  %v12169_v22 = vld [vmem:[#allocation382_spill] sm:$0xff]  ;;  %v8679_v50 = vmul.f32 0.0010283801, %v12175_v33  ;;  %v12178_v23 = vld [vmem:[#allocation261_spill] sm:$0xff]  ;;  %v12179_v55 = vld [vmem:[#allocation264_spill] sm:$0xff] }
 0x3fe   :  { %v8671_v2 = vmul.f32 0.0010283801, %v12169_v22  ;;  %v12172_v31 = vld [vmem:[#allocation258_spill] sm:$0xff]  ;;  %v1586_v49 = vadd.f32 %v12178_v23, %v1538_v53  ;;  %v1627_v58 = vadd.f32 %v12179_v55, %v1579_v20  ;;  %v12180_v62 = vld [vmem:[#allocation265_spill] sm:$0xff]  ;;  %v8697_v1 = vmul.f32 0.007598758, %v8663_v34 }
 0x3ff   :  { %v1585_v14 = vadd.f32 %v12172_v31, %v1537_v48  ;;  %12176 = vst [vmem:[#allocation130_spill] sm:$0xff] %v8679_v50  ;;  %v1626_v22 = vadd.f32 %v12180_v62, %v1578_v41  ;;  %v8689_v48 = vmul.f32 0.007598758, %v8656_v46  ;;  %v12182_v35 = vld [vmem:[#allocation266_spill] sm:$0xff]  ;;  %3660 = vrot.lane.b32.xlu0 %v8679_v50, %s5459_s5  ;;  %v5317_v53 = vld [vmem:[#allocation6 + $0x20] sm:$0xff]  ;;  %v12185_v41 = vld [vmem:[#allocation267_spill] sm:$0xff] }
 0x400   :  { %12170 = vst [vmem:[#allocation95_spill] sm:$0xff] %v8671_v2  ;;  %3662 = vrot.lane.b32.xlu1 %v8671_v2, %s5459_s5  ;;  %v8692_v59 = vadd.f32 %v12182_v35, %v1581_v12  ;;  %12183 = vst [vmem:[#allocation99_spill] sm:$0xff] %v8697_v1  ;;  %v5318_v20 = vld [vmem:[#allocation7 + $0x20] sm:$0xff]  ;;  %v8702_v33 = vadd.f32 %v12185_v41, %v1580_v21  ;;  %v8711_v29 = vmul.f32 0.10936069, %v8668_v25  ;;  %v8713_v35 = vpop.permute.xlu1 %3442  ;;  %v12189_v27 = vld [vmem:[#allocation270_spill] sm:$0xff] }
 0x401   :  { %12181 = vst [vmem:[#allocation98_spill] sm:$0xff] %v8689_v48  ;;  %v8699_v31 = vmul.f32 %v5318_v20, %v5317_v53  ;;  %v12186_v23 = vld [vmem:[#allocation268_spill] sm:$0xff]  ;;  %v12187_v62 = vld [vmem:[#allocation269_spill] sm:$0xff]  ;;  %12188 = vst [vmem:[#allocation102_spill] sm:$0xff] %v8713_v35  ;;  %v8716_v15 = vadd.f32 %v12189_v27, %v1585_v14  ;;  %v1696_v53 = vmul.f32 0.0010283801, %v8631_v28 }
 0x402   :  { %v8705_v55 = vadd.f32 %v12186_v23, %v1583_v51  ;;  %v8708_v12 = vadd.f32 %v12187_v62, %v1582_v40  ;;  %v1732_v20 = vmul.f32 0.036000773, %v8631_v28  ;;  %v12190_v21 = vld [vmem:[#allocation277_spill] sm:$0xff]  ;;  %v8723_v51 = vpop.permute.xlu0 %3440  ;;  %v12192_v23 = vld [vmem:[#allocation271_spill] sm:$0xff]  ;;  %v8729_v62 = vmul.f32 0.10936069, %v8631_v28 }
 0x403   :  { %12184 = vst [vmem:[#allocation121_spill] sm:$0xff] %v8699_v31  ;;  %v8721_v41 = vadd.f32 %v12190_v21, %v1626_v22  ;;  %12191 = vst [vmem:[#allocation103_spill] sm:$0xff] %v8723_v51  ;;  %v8726_v40 = vadd.f32 %v12192_v23, %v1584_v0  ;;  %v8734_v27 = vmul.f32 0.036000773, %v8663_v34  ;;  %v5319_v14 = vld [vmem:[#allocation6 + $0x8] sm:$0xff]  ;;  %v12194_v22 = vld [vmem:[#allocation272_spill] sm:$0xff]  ;;  %v1726_v0 = vadd.f32 %v1714_v52, %v1696_v53 }
 0x404   :  { %4100 = vrot.lane.b32.xlu1 %v8689_v48, %s5450_s2  ;;  %v5320_v35 = vld [vmem:[#allocation7 + $0x8] sm:$0xff]  ;;  %v8739_v21 = vadd.f32 %v12194_v22, %v1587_v8  ;;  %v8742_v51 = vmul.f32 0.21300554, %v8668_v25  ;;  %4096 = vrot.lane.b32.xlu0 %v8697_v1, %s5450_s2  ;;  %v8747_v23 = vmul.f32 0.007598758, %v8699_v31  ;;  %v1787_v42 = vrot.slane %v8711_v29, 3 }
 0x405   :  { %12193 = vst [vmem:[#allocation108_spill] sm:$0xff] %v8734_v27  ;;  %v8736_v7 = vmul.f32 %v5320_v35, %v5319_v14  ;;  %v12196_v37 = vld [vmem:[#allocation273_spill] sm:$0xff]  ;;  %v1871_v35 = vmul.f32 0.26601171, %v8668_v25  ;;  %v8755_v8 = vmul.f32 0.036000773, %v8668_v25  ;;  %v8757_v14 = vpop.permute.xlu1 %3446 }
 0x406   :  { %12195 = vst [vmem:[#allocation142_spill] sm:$0xff] %v8747_v23  ;;  %v8750_v11 = vadd.f32 %v12196_v37, %v1586_v49  ;;  %12197 = vst [vmem:[#allocation110_spill] sm:$0xff] %v8757_v14  ;;  %v1744_v22 = vrot.slane %v1732_v20, 2  ;;  %v8760_v52 = vmul.f32 0.21300554, %v8631_v28  ;;  %v12198_v53 = vld [vmem:[#allocation276_spill] sm:$0xff]  ;;  %v8766_v37 = vpop.permute.xlu0 %3444 }
 0x407   :  { %v8763_v6 = vadd.f32 %v12198_v53, %v1627_v58  ;;  %v1703_v18 = vmul.f32 0.007598758, %v8721_v41  ;;  %12199 = vst [vmem:[#allocation111_spill] sm:$0xff] %v8766_v37  ;;  %v1786_v49 = vrot.slane %v8729_v62, 3  ;;  %v8773_v14 = vmul.f32 0.007598758, %v8736_v7 }
 0x408   :  { %4168 = vrot.lane.b32.xlu1 %v8734_v27, %s5451_s23  ;;  %v5321_v20 = vld [vmem:[#allocation6 + $0x30] sm:$0xff]  ;;  %v8778_v58 = vmul.f32 0.007598758, %v8668_v25  ;;  %v1756_v53 = vadd.f32 %v1744_v22, %v1726_v0  ;;  %4104 = vrot.lane.b32.xlu0 %v8747_v23, %s5450_s2  ;;  %v8783_v37 = vmul.f32 0.036000773, %v8656_v46  ;;  %v5323_v28 = vld [vmem:[#allocation6 + $0x18] sm:$0xff] }
 0x409   :  { %12200 = vst [vmem:[#allocation133_spill] sm:$0xff] %v8773_v14  ;;  %v5322_v4 = vld [vmem:[#allocation7 + $0x30] sm:$0xff]  ;;  %v8785_v5 = vmul.f32 %v5324_v30, %v5323_v28  ;;  %v1841_v63 = vrot.slane %v8742_v51, 4  ;;  %v1895_v36 = vrot.slane %v1871_v35, 5  ;;  %v8792_v57 = vpop.permute.xlu1 %3450  ;;  %v1955_v0 = vrot.slane %v8711_v29, 7  ;;  %v12242_v9 = vld [vmem:[#allocation285_spill] sm:$0xff] }
 0x40a   :  { %v8775_v3 = vmul.f32 %v5322_v4, %v5321_v20  ;;  %12201 = vst [vmem:[#allocation112_spill] sm:$0xff] %v8783_v37  ;;  %v1925_v4 = vrot.slane %v8742_v51, 6  ;;  %v8790_v20 = vmul.f32 0.0010283801, %v8668_v25  ;;  %12203 = vst [vmem:[#allocation114_spill] sm:$0xff] %v8792_v57  ;;  %v1840_v22 = vrot.slane %v8760_v52, 4  ;;  %v8797_v56 = vpop.permute.xlu0 %3448 }
 0x40b   :  { %v1954_v16 = vrot.slane %v8729_v62, 7  ;;  %v1715_v44 = vrot.slane %v1703_v18, 1  ;;  %12204 = vst [vmem:[#allocation115_spill] sm:$0xff] %v8797_v56  ;;  %v1788_v30 = vsel %vm797_vm0, %v1786_v49, %v1787_v42  ;;  %v1894_v28 = vrot.slane %v1870_v32, 5  ;;  %v12253_v48 = vld [vmem:[#allocation284_spill] sm:$0xff] }
 0x40c   :  { %12202 = vst [vmem:[#allocation113_spill] sm:$0xff] %v8790_v20  ;;  %v8801_v35 = vmul.f32 0.10936069, %v8763_v6  ;;  %4098 = vrot.lane.b32.xlu1 %v8773_v14, %s5450_s2  ;;  %v8806_v25 = vmul.f32 0.007598758, %v8775_v3  ;;  %v1810_v29 = vadd.f32 %v1788_v30, %v1756_v53  ;;  %4172 = vrot.lane.b32.xlu0 %v8783_v37, %s5451_s23  ;;  %v1842_v30 = vsel %vm852_vm1, %v1840_v22, %v1841_v63  ;;  %v5326_v63 = vld [vmem:[#allocation7 + $0x28] sm:$0xff] }
 0x40d   :  { %v1697_v51 = vmul.f32 0.0010283801, %v8721_v41  ;;  %v1733_v62 = vmul.f32 0.036000773, %v8721_v41  ;;  %v8813_v18 = vmul.f32 0.007598758, %v8785_v5  ;;  %v8823_v53 = vpop.permute.xlu1 %3454  ;;  %v8828_v10 = vsel %vm969_vm4, %v1954_v16, %v1955_v0 }
 0x40e   :  { %12205 = vst [vmem:[#allocation116_spill] sm:$0xff] %v8806_v25  ;;  %v8818_v49 = vmul.f32 0.21300554, %v8763_v6  ;;  %v8821_v56 = vmul.f32 0.10936069, %v8721_v41  ;;  %12207 = vst [vmem:[#allocation117_spill] sm:$0xff] %v8823_v53  ;;  %v8830_v47 = vpop.permute.xlu0 %3452  ;;  %v1896_v42 = vsel %vm907_vm2, %v1894_v28, %v1895_v36 }
 0x40f   :  { %12206 = vst [vmem:[#allocation145_spill] sm:$0xff] %v8813_v18  ;;  %v1924_v57 = vrot.slane %v8760_v52, 6  ;;  %v1727_v38 = vadd.f32 %v1715_v44, %v1697_v51  ;;  %12208 = vst [vmem:[#allocation120_spill] sm:$0xff] %v8830_v47  ;;  %v1790_v32 = vrot.slane %v8801_v35, 3  ;;  %v8837_v13 = vmul.f32 0.10936069, %v8663_v34 }
 0x410   :  { %4108 = vrot.lane.b32.xlu1 %v8806_v25, %s5450_s2  ;;  %v5325_v53 = vld [vmem:[#allocation6 + $0x28] sm:$0xff]  ;;  %v1864_v52 = vadd.f32 %v1842_v30, %v1810_v29  ;;  %v1745_v16 = vrot.slane %v1733_v62, 2  ;;  %v12211_v44 = vld [vmem:[#allocation279_spill] sm:$0xff]  ;;  %4102 = vrot.lane.b32.xlu0 %v8813_v18, %s5450_s2  ;;  %v8848_v36 = vmul.f32 0.036000773, %v8699_v31  ;;  %v1844_v28 = vrot.slane %v8818_v49, 4 }
 0x411   :  { %12209 = vst [vmem:[#allocation122_spill] sm:$0xff] %v8837_v13  ;;  %v8839_v22 = vmul.f32 %v5326_v63, %v5325_v53  ;;  %v8843_v0 = vadd.f32 %v12211_v44, %v8702_v33  ;;  %v1789_v51 = vrot.slane %v8821_v56, 3  ;;  %v1818_v47 = vmul.f32 0.21300554, %v8721_v41  ;;  %v12213_v53 = vld [vmem:[#allocation278_spill] sm:$0xff]  ;;  %v8857_v62 = vpop.permute.xlu1 %3458 }
 0x412   :  { %12212 = vst [vmem:[#allocation124_spill] sm:$0xff] %v8848_v36  ;;  %v8855_v29 = vadd.f32 %v12213_v53, %v8692_v59  ;;  %12214 = vst [vmem:[#allocation125_spill] sm:$0xff] %v8857_v62  ;;  %v1873_v33 = vmul.f32 0.26601171, %v8763_v6  ;;  %v1928_v30 = vrot.slane %v8818_v49, 6  ;;  %v1757_v63 = vadd.f32 %v1745_v16, %v1727_v38  ;;  %v8862_v25 = vpop.permute.xlu0 %3456 }
 0x413   :  { %12210 = vst [vmem:[#allocation123_spill] sm:$0xff] %v8839_v22  ;;  %v1872_v44 = vmul.f32 0.26601171, %v8721_v41  ;;  %12215 = vst [vmem:[#allocation126_spill] sm:$0xff] %v8862_v25  ;;  %v1926_v14 = vsel %vm938_vm3, %v1924_v57, %v1925_v4  ;;  %v8866_v18 = vmul.f32 0.007598758, %v8763_v6  ;;  %v1918_v49 = vadd.f32 %v1896_v42, %v1864_v52 }
 0x414   :  { %v8869_v50 = vmul.f32 0.0010283801, %v8763_v6  ;;  %4240 = vrot.lane.b32.xlu1 %v8837_v13, %s5452_s24  ;;  %v8874_v59 = vmul.f32 0.007598758, %v8839_v22  ;;  %v1958_v38 = vrot.slane %v8801_v35, 7  ;;  %4176 = vrot.lane.b32.xlu0 %v8848_v36, %s5451_s23  ;;  %v1791_v4 = vsel %vm797_vm0, %v1789_v51, %v1790_v32 }
 0x415   :  { %v1704_v41 = vmul.f32 0.007598758, %v8843_v0  ;;  %v8881_v57 = vmul.f32 0.10936069, %v8656_v46  ;;  %v1843_v16 = vrot.slane %v1818_v47, 4  ;;  %v1927_v53 = vrot.slane %v1818_v47, 6  ;;  %v8887_v62 = vpop.permute.xlu1 %3486 }
 0x416   :  { %12216 = vst [vmem:[#allocation127_spill] sm:$0xff] %v8869_v50  ;;  %12217 = vst [vmem:[#allocation128_spill] sm:$0xff] %v8874_v59  ;;  %v8885_v25 = vmul.f32 0.10936069, %v8855_v29  ;;  %v1898_v42 = vrot.slane %v1873_v33, 5  ;;  %v1811_v52 = vadd.f32 %v1791_v4, %v1757_v63  ;;  %v1897_v2 = vrot.slane %v1872_v44, 5  ;;  %v8892_v19 = vpop.permute.xlu0 %3484 }
 0x417   :  { %12218 = vst [vmem:[#allocation129_spill] sm:$0xff] %v8881_v57  ;;  %12219 = vst [vmem:[#allocation132_spill] sm:$0xff] %v8887_v62  ;;  %v8890_v35 = vmul.f32 0.036000773, %v8763_v6  ;;  %v1957_v32 = vrot.slane %v8821_v56, 7  ;;  %v1948_v51 = vadd.f32 %v1926_v14, %v1918_v49  ;;  %v1716_v33 = vrot.slane %v1704_v41, 1 }
 0x418   :  { %12220 = vst [vmem:[#allocation134_spill] sm:$0xff] %v8892_v19  ;;  %4106 = vrot.lane.b32.xlu1 %v8874_v59, %s5450_s2  ;;  %v8900_v47 = vmul.f32 0.036000773, %v8785_v5  ;;  %4244 = vrot.lane.b32.xlu0 %v8881_v57, %s5452_s24  ;;  %v8905_v6 = vmul.f32 0.036000773, %v8736_v7  ;;  %v5327_v63 = vld [vmem:[#allocation6 + $0x40] sm:$0xff]  ;;  %v1845_v56 = vsel %vm852_vm1, %v1843_v16, %v1844_v28  ;;  %v1929_v54 = vsel %vm938_vm3, %v1927_v53, %v1928_v30 }
 0x419   :  { %v5328_v44 = vld [vmem:[#allocation7 + $0x40] sm:$0xff]  ;;  %v1793_v45 = vrot.slane %v8885_v25, 3  ;;  %v1821_v62 = vmul.f32 0.21300554, %v8855_v29  ;;  %v8913_v14 = vpop.permute.xlu1 %3490  ;;  %v1865_v49 = vadd.f32 %v1845_v56, %v1811_v52  ;;  %v1899_v41 = vsel %vm907_vm2, %v1897_v2, %v1898_v42  ;;  %v5333_v57 = vld [vmem:[#allocation6 + $0x48] sm:$0xff] }
 0x41a   :  { %12221 = vst [vmem:[#allocation135_spill] sm:$0xff] %v8900_v47  ;;  %12222 = vst [vmem:[#allocation136_spill] sm:$0xff] %v8905_v6  ;;  %v8907_v4 = vmul.f32 %v5328_v44, %v5327_v63  ;;  %v1698_v59 = vmul.f32 0.0010283801, %v8843_v0  ;;  %v1734_v19 = vmul.f32 0.036000773, %v8843_v0  ;;  %v8918_v39 = vpop.permute.xlu0 %3488  ;;  %v8921_v63 = vsel %vm969_vm4, %v1957_v32, %v1958_v38 }
 0x41b   :  { %12223 = vst [vmem:[#allocation137_spill] sm:$0xff] %v8913_v14  ;;  %12224 = vst [vmem:[#allocation138_spill] sm:$0xff] %v8918_v39  ;;  %v8924_v28 = vmul.f32 0.10936069, %v8843_v0  ;;  %v1820_v30 = vmul.f32 0.21300554, %v8843_v0  ;;  %v8933_v2 = vadd.f32 %v8828_v10, %v1948_v51  ;;  %v1919_v39 = vadd.f32 %v1899_v41, %v1865_v49 }
 0x41c   :  { %4174 = vrot.lane.b32.xlu1 %v8900_v47, %s5451_s23  ;;  %v8930_v16 = vmul.f32 0.036000773, %v8775_v3  ;;  %v8936_v53 = vmul.f32 0.26601171, %v8855_v29  ;;  %v1728_v42 = vadd.f32 %v1716_v33, %v1698_v59  ;;  %4170 = vrot.lane.b32.xlu0 %v8905_v6, %s5451_s23  ;;  %v8941_v38 = vmul.f32 0.007598758, %v8907_v4 }
 0x41d   :  { %v1847_v52 = vrot.slane %v1821_v62, 4  ;;  %v8945_v44 = vmul.f32 0.007598758, %v8855_v29  ;;  %v12228_v56 = vld [vmem:[#allocation280_spill] sm:$0xff]  ;;  %v8949_v51 = vpop.permute.xlu1 %3494  ;;  %v8952_v59 = vmul.f32 0.0010283801, %v8855_v29  ;;  %v9075_v36 = vadd.f32 %v12253_v48, %v8739_v21 }
 0x41e   :  { %12225 = vst [vmem:[#allocation139_spill] sm:$0xff] %v8930_v16  ;;  %12226 = vst [vmem:[#allocation144_spill] sm:$0xff] %v8941_v38  ;;  %v1691_v10 = vadd.f32 %v12228_v56, %v8705_v55  ;;  %v1746_v33 = vrot.slane %v1734_v19, 2  ;;  %v1874_v14 = vmul.f32 0.26601171, %v8843_v0  ;;  %v8955_v26 = vpop.permute.xlu0 %3492  ;;  %v1792_v61 = vrot.slane %v8924_v28, 3 }
 0x41f   :  { %12227 = vst [vmem:[#allocation140_spill] sm:$0xff] %v8945_v44  ;;  %12229 = vst [vmem:[#allocation141_spill] sm:$0xff] %v8949_v51  ;;  %v1846_v32 = vrot.slane %v1820_v30, 4  ;;  %v8961_v17 = vmul.f32 0.21300554, %v8663_v34  ;;  %v5329_v55 = vld [vmem:[#allocation6 + $0x38] sm:$0xff] }
 0x420   :  { %12230 = vst [vmem:[#allocation146_spill] sm:$0xff] %v8952_v59  ;;  %12231 = vst [vmem:[#allocation147_spill] sm:$0xff] %v8955_v26  ;;  %4180 = vrot.lane.b32.xlu1 %v8930_v16, %s5451_s23  ;;  %v5330_v56 = vld [vmem:[#allocation7 + $0x38] sm:$0xff]  ;;  %v1931_v41 = vrot.slane %v1821_v62, 6  ;;  %v8966_v19 = vmul.f32 0.036000773, %v8855_v29  ;;  %v1758_v0 = vadd.f32 %v1746_v33, %v1728_v42  ;;  %4112 = vrot.lane.b32.xlu0 %v8941_v38, %s5450_s2 }
 0x421   :  { %12232 = vst [vmem:[#allocation149_spill] sm:$0xff] %v8961_v17  ;;  %v8963_v49 = vmul.f32 %v5330_v56, %v5329_v55  ;;  %v8971_v26 = vmul.f32 0.10936069, %v8699_v31  ;;  %v1901_v51 = vrot.slane %v8936_v53, 5  ;;  %v1930_v24 = vrot.slane %v1820_v30, 6  ;;  %v8977_v55 = vpop.permute.xlu1 %3498  ;;  %v12236_v33 = vld [vmem:[#allocation281_spill] sm:$0xff] }
 0x422   :  { %v8975_v60 = vmul.f32 0.10936069, %v1691_v10  ;;  %12235 = vst [vmem:[#allocation153_spill] sm:$0xff] %v8977_v55  ;;  %v8979_v62 = vadd.f32 %v1929_v54, %v1919_v39  ;;  %v1690_v56 = vadd.f32 %v12236_v33, %v8708_v12  ;;  %v8985_v38 = vpop.permute.xlu0 %3496  ;;  %v1794_v53 = vsel %vm797_vm0, %v1792_v61, %v1793_v45 }
 0x423   :  { %12233 = vst [vmem:[#allocation148_spill] sm:$0xff] %v8963_v49  ;;  %12234 = vst [vmem:[#allocation151_spill] sm:$0xff] %v8971_v26  ;;  %v1848_v16 = vsel %vm852_vm1, %v1846_v32, %v1847_v52  ;;  %v1900_v30 = vrot.slane %v1874_v14, 5  ;;  %v8992_v39 = vmul.f32 0.007598758, %v8963_v49  ;;  %v1812_v54 = vadd.f32 %v1794_v53, %v1758_v0  ;;  %v12239_v52 = vld [vmem:[#allocation282_spill] sm:$0xff] }
 0x424   :  { %12237 = vst [vmem:[#allocation150_spill] sm:$0xff] %v8985_v38  ;;  %4312 = vrot.lane.b32.xlu1 %v8961_v17, %s5453_s25  ;;  %v8994_v29 = vmul.f32 0.21300554, %v1691_v10  ;;  %v8996_v42 = vmul.f32 0.26601171, %v1691_v10  ;;  %4248 = vrot.lane.b32.xlu0 %v8971_v26, %s5452_s24  ;;  %v1932_v61 = vsel %vm938_vm3, %v1930_v24, %v1931_v41  ;;  %v9008_v32 = vadd.f32 %v12239_v52, %v8716_v15  ;;  %v12241_v38 = vld [vmem:[#allocation283_spill] sm:$0xff] }
 0x425   :  { %12238 = vst [vmem:[#allocation152_spill] sm:$0xff] %v8992_v39  ;;  %v9001_v12 = vmul.f32 0.21300554, %v8656_v46  ;;  %v9010_v0 = vpop.permute.xlu1 %3502  ;;  %v9012_v33 = vmul.f32 0.036000773, %v1691_v10  ;;  %v9016_v55 = vadd.f32 %v12241_v38, %v8726_v40  ;;  %v9020_v24 = vadd.f32 %v12242_v9, %v8750_v11  ;;  %v5331_v52 = vld [vmem:[#allocation6 + $0x50] sm:$0xff] }
 0x426   :  { %12240 = vst [vmem:[#allocation399_spill] sm:$0xff] %v9010_v0  ;;  %v1705_v53 = vmul.f32 0.007598758, %v1690_v56  ;;  %v9022_v41 = vpop.permute.xlu0 %3500  ;;  %v9024_v14 = vmul.f32 0.007598758, %v1691_v10  ;;  %v5332_v0 = vld [vmem:[#allocation7 + $0x50] sm:$0xff]  ;;  %v1866_v38 = vadd.f32 %v1848_v16, %v1812_v54 }
 0x427   :  { %12243 = vst [vmem:[#allocation402_spill] sm:$0xff] %v9022_v41  ;;  %v9026_v45 = vmul.f32 0.0010283801, %v1691_v10  ;;  %v9031_v15 = vmul.f32 0.10936069, %v8736_v7  ;;  %v9033_v40 = vmul.f32 %v5332_v0, %v5331_v52  ;;  %v12256_v37 = vrot.slane %v8885_v25, 7 }
 0x428   :  { %12244 = vst [vmem:[#allocation403_spill] sm:$0xff] %v9024_v14  ;;  %4110 = vrot.lane.b32.xlu1 %v8992_v39, %s5450_s2  ;;  %4316 = vrot.lane.b32.xlu0 %v9001_v12, %s5453_s25  ;;  %v9040_v10 = vmul.f32 0.036000773, %v8839_v22  ;;  %v1902_v39 = vsel %vm907_vm2, %v1900_v30, %v1901_v51  ;;  %v1735_v41 = vmul.f32 0.036000773, %v1690_v56  ;;  %v1717_v54 = vrot.slane %v1705_v53, 1 }
 0x429   :  { %12245 = vst [vmem:[#allocation357_spill] sm:$0xff] %v9026_v45  ;;  %12246 = vst [vmem:[#allocation359_spill] sm:$0xff] %v9031_v15  ;;  %v9043_v23 = vmul.f32 0.10936069, %v1690_v56  ;;  %v9045_v6 = vmul.f32 0.21300554, %v1690_v56  ;;  %v9047_v0 = vpop.permute.xlu1 %3506 }
 0x42a   :  { %12247 = vst [vmem:[#allocation363_spill] sm:$0xff] %v9033_v40  ;;  %12248 = vst [vmem:[#allocation365_spill] sm:$0xff] %v9040_v10  ;;  %v1706_v52 = vmul.f32 0.007598758, %v9016_v55  ;;  %v1707_v11 = vmul.f32 0.007598758, %v9020_v24  ;;  %v9052_v9 = vpop.permute.xlu0 %3504 }
 0x42b   :  { %12249 = vst [vmem:[#allocation104_spill] sm:$0xff] %v9047_v0  ;;  %12250 = vst [vmem:[#allocation154_spill] sm:$0xff] %v9052_v9  ;;  %v1699_v30 = vmul.f32 0.0010283801, %v1690_v56  ;;  %v9059_v43 = vmul.f32 0.007598758, %v9033_v40  ;;  %v1920_v0 = vadd.f32 %v1902_v39, %v1866_v38 }
 0x42c   :  { %4242 = vrot.lane.b32.xlu1 %v9031_v15, %s5452_s24  ;;  %v9061_v16 = vmul.f32 0.26601171, %v1690_v56  ;;  %v9064_v53 = vmul.f32 0.10936069, %v9008_v32  ;;  %4178 = vrot.lane.b32.xlu0 %v9040_v10, %s5451_s23  ;;  %v9069_v47 = vmul.f32 0.10936069, %v8785_v5 }
 0x42d   :  { %12251 = vst [vmem:[#allocation87_spill] sm:$0xff] %v9059_v43  ;;  %v1747_v51 = vrot.slane %v1735_v41, 2  ;;  %v1795_v9 = vrot.slane %v9043_v23, 3  ;;  %v9077_v56 = vpop.permute.xlu1 %3534  ;;  %v1729_v39 = vadd.f32 %v1717_v54, %v1699_v30  ;;  %v1700_v38 = vmul.f32 0.0010283801, %v9016_v55 }
 0x42e   :  { %12252 = vst [vmem:[#allocation155_spill] sm:$0xff] %v9069_v47  ;;  %12254 = vst [vmem:[#allocation203_spill] sm:$0xff] %v9077_v56  ;;  %v1718_v15 = vrot.slane %v1706_v52, 1  ;;  %v1719_v27 = vrot.slane %v1707_v11, 1  ;;  %v9080_v10 = vpop.permute.xlu0 %3532  ;;  %v12257_v41 = vrot.slane %v8924_v28, 7  ;;  %v9100_v11 = vadd.f32 %v8921_v63, %v8979_v62 }
 0x42f   :  { %12255 = vst [vmem:[#allocation156_spill] sm:$0xff] %v9080_v10  ;;  %v1736_v1 = vmul.f32 0.036000773, %v9016_v55  ;;  %v9091_v48 = vmul.f32 0.10936069, %v9016_v55  ;;  %v1950_v54 = vadd.f32 %v1932_v61, %v1920_v0  ;;  %v1933_v52 = vrot.slane %v9045_v6, 6 }
 0x430   :  { %v9087_v26 = vsel %vm969_vm4, %v12257_v41, %v12256_v37  ;;  %4116 = vrot.lane.b32.xlu1 %v9059_v43, %s5450_s2  ;;  %v9096_v21 = vmul.f32 0.10936069, %v8775_v3  ;;  %v1701_v25 = vmul.f32 0.0010283801, %v9020_v24  ;;  %v1737_v37 = vmul.f32 0.036000773, %v9020_v24  ;;  %4246 = vrot.lane.b32.xlu0 %v9069_v47, %s5452_s24 }
 0x431   :  { %v9107_v28 = vmul.f32 0.036000773, %v8907_v4  ;;  %v9111_v30 = vmul.f32 0.10936069, %v9075_v36  ;;  %v9114_v41 = vmul.f32 0.10936069, %v9020_v24  ;;  %v9116_v63 = vpop.permute.xlu1 %3538  ;;  %v1759_v62 = vadd.f32 %v1747_v51, %v1729_v39 }
 0x432   :  { %12258 = vst [vmem:[#allocation206_spill] sm:$0xff] %v9096_v21  ;;  %12260 = vst [vmem:[#allocation369_spill] sm:$0xff] %v9116_v63  ;;  %v1799_v43 = vrot.slane %v9064_v53, 3  ;;  %v1730_v56 = vadd.f32 %v1718_v15, %v1700_v38  ;;  %v1731_v10 = vadd.f32 %v1719_v27, %v1701_v25  ;;  %v9119_v47 = vpop.permute.xlu0 %3536  ;;  %v9122_v13 = vmul.f32 0.21300554, %v9008_v32  ;;  %v5334_v63 = vld [vmem:[#allocation7 + $0x48] sm:$0xff] }
 0x433   :  { %12259 = vst [vmem:[#allocation157_spill] sm:$0xff] %v9107_v28  ;;  %12261 = vst [vmem:[#allocation207_spill] sm:$0xff] %v9119_v47  ;;  %v9125_v61 = vmul.f32 0.21300554, %v9016_v55  ;;  %v4360_v0 = vmul.f32 0.26601171, %v8663_v34  ;;  %v9130_v51 = vmul.f32 %v5334_v63, %v5333_v57 }
 0x434   :  { %4252 = vrot.lane.b32.xlu1 %v9096_v21, %s5452_s24  ;;  %v1748_v39 = vrot.slane %v1736_v1, 2  ;;  %v1798_v27 = vrot.slane %v9091_v48, 3  ;;  %v1749_v15 = vrot.slane %v1737_v37, 2  ;;  %4184 = vrot.lane.b32.xlu0 %v9107_v28, %s5451_s23  ;;  %v9136_v38 = vmul.f32 0.21300554, %v8699_v31 }
 0x435   :  { %12262 = vst [vmem:[#allocation158_spill] sm:$0xff] %v9130_v51  ;;  %v1802_v25 = vrot.slane %v9111_v30, 3  ;;  %v9140_v47 = vmul.f32 0.21300554, %v9075_v36  ;;  %v1801_v34 = vrot.slane %v9114_v41, 3  ;;  %v9146_v1 = vpop.permute.xlu1 %3542  ;;  %v12265_v37 = vrot.slane %v8975_v60, 3 }
 0x436   :  { %12263 = vst [vmem:[#allocation210_spill] sm:$0xff] %v9136_v38  ;;  %v9144_v57 = vmul.f32 0.21300554, %v9020_v24  ;;  %12264 = vst [vmem:[#allocation159_spill] sm:$0xff] %v9146_v1  ;;  %v1879_v28 = vmul.f32 0.26601171, %v9008_v32  ;;  %v1760_v21 = vadd.f32 %v1748_v39, %v1730_v56  ;;  %v1761_v45 = vadd.f32 %v1749_v15, %v1731_v10  ;;  %v9152_v59 = vpop.permute.xlu0 %3540 }
 0x437   :  { %v1797_v63 = vsel %vm797_vm0, %v1795_v9, %v12265_v37  ;;  %12266 = vst [vmem:[#allocation371_spill] sm:$0xff] %v9152_v59  ;;  %v1853_v20 = vrot.slane %v9122_v13, 4  ;;  %v1878_v14 = vmul.f32 0.26601171, %v9016_v55  ;;  %v9158_v44 = vmul.f32 0.007598758, %v9130_v51 }
 0x438   :  { %v1813_v50 = vadd.f32 %v1797_v63, %v1759_v62  ;;  %4384 = vrot.lane.b32.xlu1 %v4360_v0, %s5454_s26  ;;  %v1800_v1 = vsel %vm797_vm0, %v1798_v27, %v1799_v43  ;;  %v1852_v9 = vrot.slane %v9125_v61, 4  ;;  %v1881_v37 = vmul.f32 0.26601171, %v9075_v36  ;;  %4320 = vrot.lane.b32.xlu0 %v9136_v38, %s5453_s25 }
 0x439   :  { %12267 = vst [vmem:[#allocation211_spill] sm:$0xff] %v9158_v44  ;;  %v4362_v10 = vmul.f32 0.26601171, %v8656_v46  ;;  %v1856_v56 = vrot.slane %v9140_v47, 4  ;;  %v1803_v55 = vsel %vm797_vm0, %v1801_v34, %v1802_v25  ;;  %v1855_v62 = vrot.slane %v9144_v57, 4  ;;  %v9170_v39 = vpop.permute.xlu1 %3546 }
 0x43a   :  { %v1880_v0 = vmul.f32 0.26601171, %v9020_v24  ;;  %12268 = vst [vmem:[#allocation160_spill] sm:$0xff] %v9170_v39  ;;  %v12269_v43 = vrot.slane %v8994_v29, 4  ;;  %v12270_v27 = vrot.slane %v9045_v6, 4  ;;  %v1903_v63 = vrot.slane %v9061_v16, 5  ;;  %v9178_v38 = vpop.permute.xlu0 %3544 }
 0x43b   :  { %v1814_v59 = vadd.f32 %v1800_v1, %v1760_v21  ;;  %v1815_v46 = vadd.f32 %v1803_v55, %v1761_v45  ;;  %12271 = vst [vmem:[#allocation214_spill] sm:$0xff] %v9178_v38  ;;  %v12272_v34 = vrot.slane %v8994_v29, 6  ;;  %v1963_v24 = vrot.slane %v9043_v23, 7  ;;  %v12297_v38 = vld [vmem:[#allocation292_spill] sm:$0xff] }
 0x43c   :  { %v1851_v15 = vsel %vm852_vm1, %v12270_v27, %v12269_v43  ;;  %4114 = vrot.lane.b32.xlu1 %v9158_v44, %s5450_s2  ;;  %v9187_v6 = vmul.f32 0.10936069, %v8839_v22  ;;  %v9190_v43 = vadd.f32 %v9087_v26, %v1950_v54  ;;  %v1907_v16 = vrot.slane %v1879_v28, 5  ;;  %4388 = vrot.lane.b32.xlu0 %v4362_v10, %s5454_s26 }
 0x43d   :  { %v1867_v17 = vadd.f32 %v1851_v15, %v1813_v50  ;;  %v1935_v25 = vsel %vm938_vm3, %v1933_v52, %v12272_v34  ;;  %v1906_v45 = vrot.slane %v1878_v14, 5  ;;  %v9194_v50 = vmul.f32 0.036000773, %v8963_v49  ;;  %v9198_v1 = vpop.permute.xlu1 %3550 }
 0x43e   :  { %v1854_v29 = vsel %vm852_vm1, %v1852_v9, %v1853_v20  ;;  %v1910_v21 = vrot.slane %v1881_v37, 5  ;;  %v1857_v23 = vsel %vm852_vm1, %v1855_v62, %v1856_v56  ;;  %v1909_v52 = vrot.slane %v1880_v0, 5  ;;  %12274 = vst [vmem:[#allocation215_spill] sm:$0xff] %v9198_v1  ;;  %v9206_v10 = vpop.permute.xlu0 %3548  ;;  %v12295_v1 = vld [vmem:[#allocation291_spill] sm:$0xff] }
 0x43f   :  { %12273 = vst [vmem:[#allocation161_spill] sm:$0xff] %v9194_v50  ;;  %v12275_v55 = vrot.slane %v8996_v42, 5  ;;  %v9204_v28 = vmul.f32 0.007598758, %v9008_v32  ;;  %v1868_v14 = vadd.f32 %v1854_v29, %v1814_v59  ;;  %v1869_v54 = vadd.f32 %v1857_v23, %v1815_v46  ;;  %12276 = vst [vmem:[#allocation162_spill] sm:$0xff] %v9206_v10  ;;  %v12283_v23 = vld [vmem:[#allocation286_spill] sm:$0xff] }
 0x440   :  { %v12277_v20 = vrot.slane %v8975_v60, 7  ;;  %v1967_v37 = vrot.slane %v9064_v53, 7  ;;  %4250 = vrot.lane.b32.xlu1 %v9187_v6, %s5452_s24  ;;  %v9215_v42 = vmul.f32 0.21300554, %v8785_v5  ;;  %v1937_v56 = vrot.slane %v9122_v13, 6  ;;  %4182 = vrot.lane.b32.xlu0 %v9194_v50, %s5451_s23  ;;  %v12293_v10 = vld [vmem:[#allocation290_spill] sm:$0xff] }
 0x441   :  { %v1905_v26 = vsel %vm907_vm2, %v1903_v63, %v12275_v55  ;;  %v9219_v59 = vmul.f32 0.036000773, %v9008_v32  ;;  %v1936_v46 = vrot.slane %v9125_v61, 6  ;;  %v9225_v60 = vmul.f32 0.21300554, %v8736_v7  ;;  %v9231_v13 = vpop.permute.xlu1 %3554  ;;  %v12284_v55 = vld [vmem:[#allocation219_spill] sm:$0xff] }
 0x442   :  { %v1921_v27 = vadd.f32 %v1905_v26, %v1867_v17  ;;  %v1965_v9 = vsel %vm969_vm4, %v1963_v24, %v12277_v20  ;;  %v1908_v17 = vsel %vm907_vm2, %v1906_v45, %v1907_v16  ;;  %v1940_v53 = vrot.slane %v9140_v47, 6  ;;  %12278 = vst [vmem:[#allocation218_spill] sm:$0xff] %v9231_v13  ;;  %v9237_v34 = vpop.permute.xlu0 %3552  ;;  %v12285_v26 = vld [vmem:[#allocation287_spill] sm:$0xff] }
 0x443   :  { %v1911_v62 = vsel %vm907_vm2, %v1909_v52, %v1910_v21  ;;  %v1939_v0 = vrot.slane %v9144_v57, 6  ;;  %v9235_v61 = vmul.f32 0.0010283801, %v9008_v32  ;;  %v1922_v63 = vadd.f32 %v1908_v17, %v1868_v14  ;;  %12279 = vst [vmem:[#allocation163_spill] sm:$0xff] %v9237_v34  ;;  %v12287_v20 = vld [vmem:[#allocation335_spill] sm:$0xff]  ;;  %v12289_v17 = vld [vmem:[#allocation337_spill] sm:$0xff] }
 0x444   :  { %v1923_v24 = vadd.f32 %v1911_v62, %v1869_v54  ;;  %v1951_v29 = vadd.f32 %v1935_v25, %v1921_v27  ;;  %v1966_v16 = vrot.slane %v9091_v48, 7  ;;  %v1970_v47 = vrot.slane %v9111_v30, 7  ;;  %4318 = vrot.lane.b32.xlu1 %v9215_v42, %s5453_s25  ;;  %4314 = vrot.lane.b32.xlu0 %v9225_v60, %s5453_s25  ;;  %v12282_v25 = vld [vmem:[#allocation236_spill] sm:$0xff]  ;;  %v12290_v62 = vld [vmem:[#allocation289_spill] sm:$0xff]  ;;  %v12292_v13 = vld [vmem:[#allocation339_spill] sm:$0xff] }
 0x445   :  { %v9244_v57 = vmul.f32 0.10936069, %v8907_v4  ;;  %v1938_v45 = vsel %vm938_vm3, %v1936_v46, %v1937_v56  ;;  %v1989_v32 = vmul.f32 0.036000773, %v9075_v36  ;;  %v9249_v21 = vmul.f32 0.007598758, %v9075_v36  ;;  %v9261_v54 = vpop.permute.xlu1 %3582 }
 0x446   :  { %v9254_v48 = vmul.f32 0.036000773, %v9033_v40  ;;  %v1969_v30 = vrot.slane %v9114_v41, 7  ;;  %v2141_v52 = vadd.f32 %v12283_v23, %v12282_v25  ;;  %v2140_v14 = vadd.f32 %v12285_v26, %v12284_v55  ;;  %12286 = vst [vmem:[#allocation224_spill] sm:$0xff] %v9261_v54  ;;  %v12288_v56 = vld [vmem:[#allocation288_spill] sm:$0xff]  ;;  %v9268_v44 = vpop.permute.xlu0 %3580  ;;  %v12294_v23 = vld [vmem:[#allocation341_spill] sm:$0xff] }
 0x447   :  { %12280 = vst [vmem:[#allocation221_spill] sm:$0xff] %v9244_v57  ;;  %v1941_v27 = vsel %vm938_vm3, %v1939_v0, %v1940_v53  ;;  %v2143_v46 = vadd.f32 %v12288_v56, %v12287_v20  ;;  %v2142_v15 = vadd.f32 %v12290_v62, %v12289_v17  ;;  %12291 = vst [vmem:[#allocation165_spill] sm:$0xff] %v9268_v44  ;;  %v12296_v26 = vld [vmem:[#allocation343_spill] sm:$0xff]  ;;  %v4364_v53 = vmul.f32 0.26601171, %v8699_v31  ;;  %v12298_v0 = vld [vmem:[#allocation345_spill] sm:$0xff] }
 0x448   :  { %12281 = vst [vmem:[#allocation164_spill] sm:$0xff] %v9254_v48  ;;  %v1952_v34 = vadd.f32 %v1938_v45, %v1922_v63  ;;  %v1953_v41 = vadd.f32 %v1941_v27, %v1923_v24  ;;  %v2145_v25 = vadd.f32 %v12293_v10, %v12292_v13  ;;  %v2144_v55 = vadd.f32 %v12295_v1, %v12294_v23  ;;  %v12299_v20 = vld [vmem:[#allocation293_spill] sm:$0xff]  ;;  %v12300_v17 = vld [vmem:[#allocation347_spill] sm:$0xff]  ;;  %v12301_v63 = vld [vmem:[#allocation294_spill] sm:$0xff] }
 0x449   :  { %v2147_v54 = vadd.f32 %v12297_v38, %v12296_v26  ;;  %4256 = vrot.lane.b32.xlu1 %v9244_v57, %s5452_s24  ;;  %v2146_v56 = vadd.f32 %v12299_v20, %v12298_v0  ;;  %v2149_v24 = vadd.f32 %v12301_v63, %v12300_v17  ;;  %4188 = vrot.lane.b32.xlu0 %v9254_v48, %s5451_s23  ;;  %v9286_v10 = vmul.f32 0.21300554, %v8775_v3  ;;  %v12302_v13 = vld [vmem:[#allocation349_spill] sm:$0xff]  ;;  %v12303_v38 = vld [vmem:[#allocation295_spill] sm:$0xff]  ;;  %v12305_v62 = vld [vmem:[#allocation296_spill] sm:$0xff]  ;;  %v9292_v26 = vpop.permute.xlu1 %3586 }
 0x44a   :  { %v1981_v1 = vadd.f32 %v1965_v9, %v1951_v29  ;;  %v2148_v45 = vadd.f32 %v12303_v38, %v12302_v13  ;;  %v12304_v27 = vld [vmem:[#allocation353_spill] sm:$0xff]  ;;  %12306 = vst [vmem:[#allocation375_spill] sm:$0xff] %v9292_v26  ;;  %v1968_v0 = vsel %vm969_vm4, %v1966_v16, %v1967_v37  ;;  %v1971_v20 = vsel %vm969_vm4, %v1969_v30, %v1970_v47  ;;  %v12307_v17 = vld [vmem:[#allocation355_spill] sm:$0xff]  ;;  %v12309_v48 = vld [vmem:[#allocation298_spill] sm:$0xff]  ;;  %v9299_v44 = vpop.permute.xlu0 %3584 }
 0x44b   :  { %v2151_v23 = vadd.f32 %v12305_v62, %v12304_v27  ;;  %v12308_v63 = vld [vmem:[#allocation297_spill] sm:$0xff]  ;;  %v2213_v50 = vadd.f32 %v12309_v48, %v2141_v52  ;;  %12310 = vst [vmem:[#allocation166_spill] sm:$0xff] %v9299_v44  ;;  %v1982_v9 = vadd.f32 %v1968_v0, %v1952_v34  ;;  %v1983_v29 = vadd.f32 %v1971_v20, %v1953_v41  ;;  %v12311_v57 = vld [vmem:[#allocation299_spill] sm:$0xff]  ;;  %v12312_v38 = vld [vmem:[#allocation300_spill] sm:$0xff] }
 0x44c   :  { %v2150_v39 = vadd.f32 %v12308_v63, %v12307_v17  ;;  %v2212_v13 = vadd.f32 %v12311_v57, %v2140_v14  ;;  %v2215_v31 = vadd.f32 %v12312_v38, %v2143_v46  ;;  %v1990_v37 = vadd.f32 %v8755_v8, %v8933_v2  ;;  %v12313_v47 = vld [vmem:[#allocation301_spill] sm:$0xff]  ;;  %v5335_v48 = vld [vmem:[#allocation6 + $0x58] sm:$0xff]  ;;  %v12314_v46 = vld [vmem:[#allocation302_spill] sm:$0xff] }
 0x44d   :  { %4392 = vrot.lane.b32.xlu1 %v4364_v53, %s5454_s26  ;;  %v1991_v16 = vadd.f32 %v8890_v35, %v9100_v11  ;;  %v2214_v30 = vadd.f32 %v12313_v47, %v2142_v15  ;;  %4324 = vrot.lane.b32.xlu0 %v9286_v10, %s5453_s25  ;;  %v5336_v34 = vld [vmem:[#allocation7 + $0x58] sm:$0xff]  ;;  %v1992_v57 = vadd.f32 %v8966_v19, %v9190_v43  ;;  %v12317_v11 = vld [vmem:[#allocation305_spill] sm:$0xff]  ;;  %v9320_v27 = vpop.permute.xlu1 %3590  ;;  %v12319_v62 = vld [vmem:[#allocation306_spill] sm:$0xff] }
 0x44e   :  { %v9311_v52 = vmul.f32 %v5336_v34, %v5335_v48  ;;  %v1993_v14 = vadd.f32 %v9012_v33, %v1981_v1  ;;  %v2217_v41 = vadd.f32 %v12314_v46, %v2145_v25  ;;  %v12315_v8 = vld [vmem:[#allocation303_spill] sm:$0xff]  ;;  %v12316_v53 = vld [vmem:[#allocation304_spill] sm:$0xff]  ;;  %v2218_v15 = vadd.f32 %v12317_v11, %v2146_v56  ;;  %12318 = vst [vmem:[#allocation167_spill] sm:$0xff] %v9320_v27  ;;  %v9324_v63 = vpop.permute.xlu0 %3588  ;;  %v12325_v1 = vld [vmem:[#allocation149_spill] sm:$0xff] }
 0x44f   :  { %v2216_v2 = vadd.f32 %v12315_v8, %v2144_v55  ;;  %v2219_v35 = vadd.f32 %v12316_v53, %v2147_v54  ;;  %v2221_v0 = vadd.f32 %v12319_v62, %v2149_v24  ;;  %v12320_v20 = vld [vmem:[#allocation307_spill] sm:$0xff]  ;;  %12321 = vst [vmem:[#allocation168_spill] sm:$0xff] %v9324_v63  ;;  %v1994_v19 = vadd.f32 %v9219_v59, %v1982_v9  ;;  %v12331_v47 = vld [vmem:[#allocation308_spill] sm:$0xff] }
 0x450   :  { %v2220_v17 = vadd.f32 %v12320_v20, %v2148_v45  ;;  %v1995_v43 = vadd.f32 %v1989_v32, %v1983_v29  ;;  %v9330_v33 = vmul.f32 0.036000773, %v9130_v51  ;;  %v2013_v54 = vrot.slane %v9249_v21, 1  ;;  %v12327_v32 = vld [vmem:[#allocation140_spill] sm:$0xff]  ;;  %v12329_v9 = vld [vmem:[#allocation403_spill] sm:$0xff] }
 0x451   :  { %4436 = vrot.lane.b32.xlu1 %v9001_v12, %s5455_s27  ;;  %v12323_v25 = vrot.slane %v8778_v58, 1  ;;  %v12324_v56 = vrot.slane %v8866_v18, 1  ;;  %4432 = vrot.lane.b32.xlu0 %v12325_v1, %s5455_s27  ;;  %v9340_v59 = vmul.f32 0.007598758, %v9311_v52  ;;  %v12328_v45 = vrot.slane %v12327_v32, 1  ;;  %v12333_v18 = vld [vmem:[#allocation310_spill] sm:$0xff]  ;;  %v9351_v8 = vpop.permute.xlu1 %3594 }
 0x452   :  { %12322 = vst [vmem:[#allocation169_spill] sm:$0xff] %v9330_v33  ;;  %v12330_v29 = vrot.slane %v12329_v9, 1  ;;  %v2031_v21 = vmul.f32 0.0010283801, %v9075_v36  ;;  %v2223_v58 = vadd.f32 %v12331_v47, %v2151_v23  ;;  %v12334_v34 = vld [vmem:[#allocation311_spill] sm:$0xff]  ;;  %12335 = vst [vmem:[#allocation170_spill] sm:$0xff] %v9351_v8  ;;  %v9354_v62 = vpop.permute.xlu0 %3592 }
 0x453   :  { %v2020_v55 = vadd.f32 %v12323_v25, %v1990_v37  ;;  %v2021_v24 = vadd.f32 %v12324_v56, %v1991_v16  ;;  %12326 = vst [vmem:[#allocation377_spill] sm:$0xff] %v9340_v59  ;;  %v2022_v12 = vadd.f32 %v12328_v45, %v1992_v57  ;;  %v12332_v37 = vld [vmem:[#allocation309_spill] sm:$0xff]  ;;  %v2285_v16 = vadd.f32 %v12333_v18, %v2213_v50  ;;  %v12336_v53 = vld [vmem:[#allocation312_spill] sm:$0xff]  ;;  %v12339_v25 = vld [vmem:[#allocation323_spill] sm:$0xff] }
 0x454   :  { %v2023_v38 = vadd.f32 %v12330_v29, %v1993_v14  ;;  %v2222_v48 = vadd.f32 %v12332_v37, %v2150_v39  ;;  %v2284_v46 = vadd.f32 %v12334_v34, %v2212_v13  ;;  %v2287_v11 = vadd.f32 %v12336_v53, %v2215_v31  ;;  %12337 = vst [vmem:[#allocation171_spill] sm:$0xff] %v9354_v62  ;;  %v12340_v50 = vld [vmem:[#allocation113_spill] sm:$0xff]  ;;  %v12343_v31 = vld [vmem:[#allocation127_spill] sm:$0xff]  ;;  %v12354_v37 = vld [vmem:[#allocation314_spill] sm:$0xff] }
 0x455   :  { %v12338_v57 = vrot.slane %v9204_v28, 1  ;;  %v2025_v14 = vadd.f32 %v2013_v54, %v1995_v43  ;;  %v2042_v36 = vrot.slane %v9235_v61, 2  ;;  %4186 = vrot.lane.b32.xlu1 %v9330_v33, %s5451_s23  ;;  %v9363_v39 = vmul.f32 0.21300554, %v8839_v22  ;;  %4118 = vrot.lane.b32.xlu0 %v9340_v59, %s5450_s2  ;;  %v12350_v45 = vld [vmem:[#allocation357_spill] sm:$0xff]  ;;  %v12355_v18 = vld [vmem:[#allocation315_spill] sm:$0xff] }
 0x456   :  { %v2356_v23 = vadd.f32 %v12339_v25, %v2284_v46  ;;  %v12341_v13 = vrot.slane %v12340_v50, 2  ;;  %v12344_v1 = vrot.slane %v12343_v31, 2  ;;  %v9376_v28 = vmul.f32 0.10936069, %v8963_v49  ;;  %v12356_v46 = vld [vmem:[#allocation334_spill] sm:$0xff]  ;;  %v12358_v25 = vld [vmem:[#allocation316_spill] sm:$0xff] }
 0x457   :  { %v2024_v20 = vadd.f32 %v12338_v57, %v1994_v19  ;;  %v2043_v61 = vrot.slane %v2031_v21, 2  ;;  %v12347_v19 = vld [vmem:[#allocation146_spill] sm:$0xff]  ;;  %v12351_v9 = vrot.slane %v12350_v45, 2  ;;  %v2288_v34 = vadd.f32 %v12355_v18, %v2216_v2  ;;  %v9390_v57 = vpop.permute.xlu1 %3598  ;;  %v12359_v50 = vld [vmem:[#allocation317_spill] sm:$0xff]  ;;  %v12467_v63 = vld [vmem:[#allocation432_spill] sm:$0xff] }
 0x458   :  { %v9367_v56 = vadd.f32 %v12341_v13, %v2020_v55  ;;  %v9371_v32 = vadd.f32 %v12344_v1, %v2021_v24  ;;  %12346 = vst [vmem:[#allocation381_spill] sm:$0xff] %v9376_v28  ;;  %v12348_v43 = vrot.slane %v12347_v19, 2  ;;  %v12353_v55 = vld [vmem:[#allocation313_spill] sm:$0xff]  ;;  %v2289_v24 = vadd.f32 %v12354_v37, %v2217_v41  ;;  %12357 = vst [vmem:[#allocation176_spill] sm:$0xff] %v9390_v57  ;;  %v12363_v1 = vld [vmem:[#allocation356_spill] sm:$0xff] }
 0x459   :  { %v9384_v29 = vadd.f32 %v12351_v9, %v2023_v38  ;;  %v2286_v47 = vadd.f32 %v12353_v55, %v2214_v30  ;;  %v2428_v53 = vadd.f32 %v12356_v46, %v2356_v23  ;;  %v2291_v21 = vadd.f32 %v12358_v25, %v2219_v35  ;;  %4322 = vrot.lane.b32.xlu1 %v9363_v39, %s5453_s25  ;;  %v12371_v9 = vld [vmem:[#allocation321_spill] sm:$0xff]  ;;  %v12374_v46 = vld [vmem:[#allocation322_spill] sm:$0xff]  ;;  %v12375_v25 = vld [vmem:[#allocation324_spill] sm:$0xff] }
 0x45a   :  { %12342 = vst [vmem:[#allocation172_spill] sm:$0xff] %v9367_v56  ;;  %12345 = vst [vmem:[#allocation173_spill] sm:$0xff] %v9371_v32  ;;  %v9380_v54 = vadd.f32 %v12348_v43, %v2022_v12  ;;  %v2290_v13 = vadd.f32 %v12359_v50, %v2218_v15  ;;  %v9394_v12 = vpop.permute.xlu0 %3596  ;;  %v9396_v31 = vadd.f32 %v2042_v36, %v2024_v20  ;;  %v4363_v41 = vmul.f32 0.26601171, %v8785_v5  ;;  %v12366_v15 = vld [vmem:[#allocation318_spill] sm:$0xff]  ;;  %v12370_v43 = vld [vmem:[#allocation320_spill] sm:$0xff] }
 0x45b   :  { %12352 = vst [vmem:[#allocation175_spill] sm:$0xff] %v9384_v29  ;;  %12360 = vst [vmem:[#allocation177_spill] sm:$0xff] %v9394_v12  ;;  %v9398_v38 = vadd.f32 %v2043_v61, %v2025_v14  ;;  %v2476_v30 = vadd.f32 %v12363_v1, %v2428_v53  ;;  %v9406_v2 = vmul.f32 %v9367_v56, %v9367_v56  ;;  %4254 = vrot.lane.b32.xlu0 %v9376_v28, %s5452_s24  ;;  %v12369_v61 = vld [vmem:[#allocation319_spill] sm:$0xff]  ;;  %v9428_v18 = vpop.permute.xlu1 %3602  ;;  %v12376_v1 = vld [vmem:[#allocation325_spill] sm:$0xff] }
 0x45c   :  { %12349 = vst [vmem:[#allocation174_spill] sm:$0xff] %v9380_v54  ;;  %12361 = vst [vmem:[#allocation383_spill] sm:$0xff] %v9396_v31  ;;  %v9410_v35 = vmul.f32 %v9371_v32, %v9371_v32  ;;  %v2293_v20 = vadd.f32 %v12366_v15, %v2221_v0  ;;  %v4361_v14 = vmul.f32 0.26601171, %v8736_v7  ;;  %v9418_v36 = vmul.f32 %v9380_v54, %v9380_v54  ;;  %v12372_v0 = vld [vmem:[#allocation390_spill] sm:$0xff]  ;;  %v12379_v56 = vld [vmem:[#allocation327_spill] sm:$0xff] }
 0x45d   :  { %12362 = vst [vmem:[#allocation178_spill] sm:$0xff] %v9398_v38  ;;  %12364 = vst [vmem:[#allocation179_spill] sm:$0xff] %v9406_v2  ;;  %v9422_v23 = vmul.f32 %v9384_v29, %v9384_v29  ;;  %v2292_v19 = vadd.f32 %v12369_v61, %v2220_v17  ;;  %v2295_v45 = vadd.f32 %v12370_v43, %v2223_v58  ;;  %v12377_v54 = vld [vmem:[#allocation326_spill] sm:$0xff]  ;;  %v12380_v61 = vld [vmem:[#allocation328_spill] sm:$0xff]  ;;  %4390 = vrot.lane.b32.xlu1 %v4363_v41, %s5454_s26 }
 0x45e   :  { %12365 = vst [vmem:[#allocation180_spill] sm:$0xff] %v9410_v35  ;;  %12367 = vst [vmem:[#allocation181_spill] sm:$0xff] %v9418_v36  ;;  %v2294_v55 = vadd.f32 %v12371_v9, %v2222_v48  ;;  %v2524_v37 = vadd.f32 %v12372_v0, %v2476_v30  ;;  %v2357_v53 = vadd.f32 %v12374_v46, %v2285_v16  ;;  %v9434_v29 = vpop.permute.xlu0 %3600  ;;  %v12381_v43 = vld [vmem:[#allocation405_spill] sm:$0xff]  ;;  %v9441_v30 = vmul.f32 0.21300554, %v8907_v4 }
 0x45f   :  { %12368 = vst [vmem:[#allocation387_spill] sm:$0xff] %v9422_v23  ;;  %12373 = vst [vmem:[#allocation182_spill] sm:$0xff] %v9428_v18  ;;  %v2359_v50 = vadd.f32 %v12375_v25, %v2287_v11  ;;  %v2358_v15 = vadd.f32 %v12376_v1, %v2286_v47  ;;  %v2361_v32 = vadd.f32 %v12377_v54, %v2289_v24  ;;  %v12382_v16 = vld [vmem:[#allocation329_spill] sm:$0xff]  ;;  %v12383_v11 = vld [vmem:[#allocation330_spill] sm:$0xff]  ;;  %4386 = vrot.lane.b32.xlu0 %v4361_v14, %s5454_s26 }
 0x460   :  { %12378 = vst [vmem:[#allocation183_spill] sm:$0xff] %v9434_v29  ;;  %v2360_v17 = vadd.f32 %v12379_v56, %v2288_v34  ;;  %v2363_v58 = vadd.f32 %v12380_v61, %v2291_v21  ;;  %v2572_v48 = vadd.f32 %v12381_v43, %v2524_v37  ;;  %v2362_v9 = vadd.f32 %v12382_v16, %v2290_v13  ;;  %v12384_v47 = vld [vmem:[#allocation233_spill] sm:$0xff]  ;;  %v12386_v56 = vld [vmem:[#allocation331_spill] sm:$0xff]  ;;  %v12387_v34 = vld [vmem:[#allocation332_spill] sm:$0xff]  ;;  %v9454_v61 = vpop.permute.xlu1 %3642 }
 0x461   :  { %v2365_v0 = vadd.f32 %v12383_v11, %v2293_v20  ;;  %v2429_v46 = vadd.f32 %v12384_v47, %v2357_v53  ;;  %v9448_v54 = vmul.f32 0.10936069, %v9033_v40  ;;  %v2364_v24 = vadd.f32 %v12386_v56, %v2292_v19  ;;  %v12388_v37 = vld [vmem:[#allocation333_spill] sm:$0xff]  ;;  %12390 = vst [vmem:[#allocation185_spill] sm:$0xff] %v9454_v61  ;;  %v12392_v20 = vld [vmem:[#allocation220_spill] sm:$0xff]  ;;  %v12394_v14 = vld [vmem:[#allocation354_spill] sm:$0xff]  ;;  %4328 = vrot.lane.b32.xlu1 %v9441_v30, %s5453_s25 }
 0x462   :  { %v2367_v21 = vadd.f32 %v12387_v34, %v2295_v45  ;;  %v2366_v41 = vadd.f32 %v12388_v37, %v2294_v55  ;;  %v12389_v25 = vld [vmem:[#allocation417_spill] sm:$0xff]  ;;  %v2430_v16 = vadd.f32 %v12392_v20, %v2358_v15  ;;  %v12393_v53 = vld [vmem:[#allocation336_spill] sm:$0xff]  ;;  %v9460_v38 = vpop.permute.xlu0 %3640  ;;  %v12396_v23 = vld [vmem:[#allocation338_spill] sm:$0xff] }
 0x463   :  { %12385 = vst [vmem:[#allocation184_spill] sm:$0xff] %v9448_v54  ;;  %v2620_v1 = vadd.f32 %v12389_v25, %v2572_v48  ;;  %v12391_v13 = vld [vmem:[#allocation237_spill] sm:$0xff]  ;;  %v2433_v11 = vadd.f32 %v12393_v53, %v2361_v32  ;;  %v2477_v47 = vadd.f32 %v12394_v14, %v2429_v46  ;;  %12395 = vst [vmem:[#allocation388_spill] sm:$0xff] %v9460_v38  ;;  %v12397_v56 = vld [vmem:[#allocation340_spill] sm:$0xff]  ;;  %4260 = vrot.lane.b32.xlu0 %v9448_v54, %s5452_s24 }
 0x464   :  { %v2431_v43 = vadd.f32 %v12391_v13, %v2359_v50  ;;  %v2432_v19 = vadd.f32 %v12396_v23, %v2360_v17  ;;  %v2435_v45 = vadd.f32 %v12397_v56, %v2363_v58  ;;  %v12398_v34 = vld [vmem:[#allocation342_spill] sm:$0xff]  ;;  %v12399_v37 = vld [vmem:[#allocation429_spill] sm:$0xff]  ;;  %v12400_v50 = vld [vmem:[#allocation344_spill] sm:$0xff]  ;;  %v4366_v23 = vmul.f32 0.26601171, %v8775_v3 }
 0x465   :  { %v2434_v55 = vadd.f32 %v12398_v34, %v2362_v9  ;;  %v9466_v48 = vadd.f32 %v12399_v37, %v2620_v1  ;;  %v2437_v15 = vadd.f32 %v12400_v50, %v2365_v0  ;;  %v12401_v25 = vld [vmem:[#allocation362_spill] sm:$0xff]  ;;  %v12402_v13 = vld [vmem:[#allocation389_spill] sm:$0xff]  ;;  %v12404_v9 = vld [vmem:[#allocation348_spill] sm:$0xff]  ;;  %v9480_v34 = vpop.permute.xlu1 %3646 }
 0x466   :  { %v2478_v32 = vadd.f32 %v12401_v25, %v2430_v16  ;;  %v2525_v46 = vadd.f32 %v12402_v13, %v2477_v47  ;;  %v12403_v17 = vld [vmem:[#allocation346_spill] sm:$0xff]  ;;  %v2439_v20 = vadd.f32 %v12404_v9, %v2367_v21  ;;  %v12406_v14 = vld [vmem:[#allocation361_spill] sm:$0xff]  ;;  %12407 = vst [vmem:[#allocation351_spill] sm:$0xff] %v9480_v34  ;;  %v12408_v0 = vld [vmem:[#allocation367_spill] sm:$0xff]  ;;  %v9486_v35 = vpop.permute.xlu0 %3644 }
 0x467   :  { %v2436_v58 = vadd.f32 %v12403_v17, %v2364_v24  ;;  %v12405_v1 = vld [vmem:[#allocation350_spill] sm:$0xff]  ;;  %v2479_v56 = vadd.f32 %v12406_v14, %v2431_v43  ;;  %v2481_v37 = vadd.f32 %v12408_v0, %v2433_v11  ;;  %v12409_v16 = vld [vmem:[#allocation368_spill] sm:$0xff]  ;;  %12412 = vst [vmem:[#allocation352_spill] sm:$0xff] %v9486_v35  ;;  %v12413_v31 = vld [vmem:[#allocation373_spill] sm:$0xff]  ;;  %v2698_v43 = vmul.f32 0.007598758, %v9466_v48  ;;  %4396 = vrot.lane.b32.xlu0 %v4366_v23, %s5454_s26 }
 0x468   :  { %v2438_v53 = vadd.f32 %v12405_v1, %v2366_v41  ;;  %v2480_v50 = vadd.f32 %v12409_v16, %v2432_v19  ;;  %v12410_v47 = vld [vmem:[#allocation392_spill] sm:$0xff]  ;;  %v2483_v24 = vadd.f32 %v12413_v31, %v2435_v45  ;;  %v12414_v17 = vld [vmem:[#allocation374_spill] sm:$0xff]  ;;  %v12415_v9 = vld [vmem:[#allocation379_spill] sm:$0xff] }
 0x469   :  { %v2526_v25 = vadd.f32 %v12410_v47, %v2478_v32  ;;  %v12411_v13 = vld [vmem:[#allocation404_spill] sm:$0xff]  ;;  %v2482_v21 = vadd.f32 %v12414_v17, %v2434_v55  ;;  %v2485_v41 = vadd.f32 %v12415_v9, %v2437_v15  ;;  %v12416_v1 = vld [vmem:[#allocation210_spill] sm:$0xff]  ;;  %v12418_v19 = vld [vmem:[#allocation385_spill] sm:$0xff]  ;;  %v9503_v59 = vpop.permute.xlu1 %3650 }
 0x46a   :  { %v2573_v36 = vadd.f32 %v12411_v13, %v2525_v46  ;;  %4440 = vrot.lane.b32.xlu1 %v12416_v1, %s5455_s27  ;;  %v12417_v11 = vld [vmem:[#allocation380_spill] sm:$0xff]  ;;  %v2487_v0 = vadd.f32 %v12418_v19, %v2439_v20  ;;  %v12419_v32 = vld [vmem:[#allocation407_spill] sm:$0xff]  ;;  %v12421_v31 = vld [vmem:[#allocation386_spill] sm:$0xff]  ;;  %12425 = vst [vmem:[#allocation186_spill] sm:$0xff] %v9503_v59  ;;  %v9511_v23 = vpop.permute.xlu0 %3648 }
 0x46b   :  { %v2484_v14 = vadd.f32 %v12417_v11, %v2436_v58  ;;  %v2574_v16 = vadd.f32 %v12419_v32, %v2526_v25  ;;  %v12420_v46 = vld [vmem:[#allocation416_spill] sm:$0xff]  ;;  %v2486_v45 = vadd.f32 %v12421_v31, %v2438_v53  ;;  %v12422_v55 = vld [vmem:[#allocation391_spill] sm:$0xff]  ;;  %v12423_v15 = vld [vmem:[#allocation393_spill] sm:$0xff]  ;;  %12430 = vst [vmem:[#allocation187_spill] sm:$0xff] %v9511_v23 }
 0x46c   :  { %v2621_v47 = vadd.f32 %v12420_v46, %v2573_v36  ;;  %v2527_v13 = vadd.f32 %v12422_v55, %v2479_v56  ;;  %v2529_v17 = vadd.f32 %v12423_v15, %v2481_v37  ;;  %v12424_v9 = vld [vmem:[#allocation394_spill] sm:$0xff]  ;;  %v12426_v1 = vld [vmem:[#allocation395_spill] sm:$0xff]  ;;  %v12427_v11 = vld [vmem:[#allocation396_spill] sm:$0xff]  ;;  %v2710_v37 = vrot.slane %v2698_v43, 1 }
 0x46d   :  { %v2528_v2 = vadd.f32 %v12424_v9, %v2480_v50  ;;  %v2531_v58 = vadd.f32 %v12426_v1, %v2483_v24  ;;  %v2530_v20 = vadd.f32 %v12427_v11, %v2482_v21  ;;  %v12428_v19 = vld [vmem:[#allocation419_spill] sm:$0xff]  ;;  %v12429_v32 = vld [vmem:[#allocation428_spill] sm:$0xff]  ;;  %v12431_v53 = vld [vmem:[#allocation397_spill] sm:$0xff]  ;;  %v9518_v55 = vmul.f32 0.10936069, %v9130_v51 }
 0x46e   :  { %v2622_v25 = vadd.f32 %v12428_v19, %v2574_v16  ;;  %v9509_v36 = vadd.f32 %v12429_v32, %v2621_v47  ;;  %v2533_v46 = vadd.f32 %v12431_v53, %v2485_v41  ;;  %v12432_v56 = vld [vmem:[#allocation398_spill] sm:$0xff]  ;;  %v12433_v50 = vld [vmem:[#allocation129_spill] sm:$0xff]  ;;  %v12435_v24 = vld [vmem:[#allocation400_spill] sm:$0xff]  ;;  %v9528_v41 = vmul.f32 0.036000773, %v9311_v52 }
 0x46f   :  { %v2532_v31 = vadd.f32 %v12432_v56, %v2484_v14  ;;  %4484 = vrot.lane.b32.xlu1 %v12433_v50, %s5456_s28  ;;  %12434 = vst [vmem:[#allocation188_spill] sm:$0xff] %v9518_v55  ;;  %v2535_v21 = vadd.f32 %v12435_v24, %v2487_v0  ;;  %v12436_v15 = vld [vmem:[#allocation401_spill] sm:$0xff]  ;;  %v12437_v9 = vld [vmem:[#allocation431_spill] sm:$0xff]  ;;  %v12438_v1 = vld [vmem:[#allocation122_spill] sm:$0xff]  ;;  %v2692_v32 = vmul.f32 0.0010283801, %v9466_v48  ;;  %v9534_v0 = vpop.permute.xlu1 %3654 }
 0x470   :  { %v2534_v16 = vadd.f32 %v12436_v15, %v2486_v45  ;;  %v9523_v47 = vadd.f32 %v12437_v9, %v2622_v25  ;;  %4480 = vrot.lane.b32.xlu0 %v12438_v1, %s5456_s28  ;;  %12439 = vst [vmem:[#allocation189_spill] sm:$0xff] %v9528_v41  ;;  %v12440_v43 = vld [vmem:[#allocation406_spill] sm:$0xff]  ;;  %v12441_v11 = vld [vmem:[#allocation408_spill] sm:$0xff]  ;;  %v2728_v53 = vmul.f32 0.036000773, %v9466_v48  ;;  %12442 = vst [vmem:[#allocation190_spill] sm:$0xff] %v9534_v0  ;;  %v9544_v9 = vpop.permute.xlu0 %3652 }
 0x471   :  { %v2575_v14 = vadd.f32 %v12440_v43, %v2527_v13  ;;  %v2577_v19 = vadd.f32 %v12441_v11, %v2529_v17  ;;  %v12443_v45 = vld [vmem:[#allocation409_spill] sm:$0xff]  ;;  %v12444_v25 = vld [vmem:[#allocation410_spill] sm:$0xff]  ;;  %v9539_v24 = vmul.f32 0.10936069, %v9509_v36  ;;  %v9542_v15 = vmul.f32 0.10936069, %v9466_v48 }
 0x472   :  { %v2576_v56 = vadd.f32 %v12443_v45, %v2528_v2  ;;  %v2579_v50 = vadd.f32 %v12444_v25, %v2531_v58  ;;  %12445 = vst [vmem:[#allocation191_spill] sm:$0xff] %v9544_v9  ;;  %v12446_v13 = vld [vmem:[#allocation411_spill] sm:$0xff]  ;;  %v12447_v1 = vld [vmem:[#allocation412_spill] sm:$0xff]  ;;  %v2722_v11 = vadd.f32 %v2710_v37, %v2692_v32  ;;  %v4365_v2 = vmul.f32 0.26601171, %v8839_v22  ;;  %v12448_v45 = vld [vmem:[#allocation413_spill] sm:$0xff] }
 0x473   :  { %v2578_v17 = vadd.f32 %v12446_v13, %v2530_v20  ;;  %v2581_v43 = vadd.f32 %v12447_v1, %v2533_v46  ;;  %4258 = vrot.lane.b32.xlu1 %v9518_v55, %s5452_s24  ;;  %v2580_v58 = vadd.f32 %v12448_v45, %v2532_v31  ;;  %v12449_v25 = vld [vmem:[#allocation414_spill] sm:$0xff]  ;;  %v2699_v59 = vmul.f32 0.007598758, %v9523_v47  ;;  %v9566_v31 = vpop.permute.xlu1 %3658  ;;  %v12453_v45 = vld [vmem:[#allocation420_spill] sm:$0xff] }
 0x474   :  { %v2583_v0 = vadd.f32 %v12449_v25, %v2535_v21  ;;  %4190 = vrot.lane.b32.xlu0 %v9528_v41, %s5451_s23  ;;  %v9557_v9 = vmul.f32 0.21300554, %v8963_v49  ;;  %v12450_v20 = vld [vmem:[#allocation418_spill] sm:$0xff]  ;;  %v9561_v37 = vmul.f32 0.21300554, %v9509_v36  ;;  %v2740_v32 = vrot.slane %v2728_v53, 2  ;;  %v9572_v33 = vpop.permute.xlu0 %3656 }
 0x475   :  { %v2623_v46 = vadd.f32 %v12450_v20, %v2575_v14  ;;  %v9564_v13 = vmul.f32 0.21300554, %v9466_v48  ;;  %12451 = vst [vmem:[#allocation192_spill] sm:$0xff] %v9566_v31  ;;  %v12452_v21 = vld [vmem:[#allocation415_spill] sm:$0xff]  ;;  %v2625_v25 = vadd.f32 %v12453_v45, %v2577_v19  ;;  %v2783_v41 = vrot.slane %v9539_v24, 3  ;;  %12454 = vst [vmem:[#allocation193_spill] sm:$0xff] %v9572_v33 }
 0x476   :  { %v2582_v1 = vadd.f32 %v12452_v21, %v2534_v16  ;;  %v2782_v23 = vrot.slane %v9542_v15, 3  ;;  %v12455_v14 = vld [vmem:[#allocation421_spill] sm:$0xff]  ;;  %v12456_v34 = vld [vmem:[#allocation422_spill] sm:$0xff]  ;;  %v2752_v53 = vadd.f32 %v2740_v32, %v2722_v11  ;;  %v12458_v16 = vld [vmem:[#allocation423_spill] sm:$0xff]  ;;  %v2711_v33 = vrot.slane %v2699_v59, 1 }
 0x477   :  { %v2624_v20 = vadd.f32 %v12455_v14, %v2576_v56  ;;  %v9576_v29 = vadd.f32 %v12456_v34, %v2579_v50  ;;  %v12457_v18 = vld [vmem:[#allocation430_spill] sm:$0xff]  ;;  %4394 = vrot.lane.b32.xlu1 %v4365_v2, %s5454_s26  ;;  %v9583_v21 = vadd.f32 %v12458_v16, %v2578_v17  ;;  %v12459_v19 = vld [vmem:[#allocation424_spill] sm:$0xff]  ;;  %v12460_v31 = vld [vmem:[#allocation425_spill] sm:$0xff]  ;;  %v2837_v34 = vrot.slane %v9561_v37, 4  ;;  %v9597_v17 = vpop.permute.xlu1 %3662 }
 0x478   :  { %v9579_v12 = vadd.f32 %v12457_v18, %v2623_v46  ;;  %v9586_v45 = vadd.f32 %v12459_v19, %v2581_v43  ;;  %v9589_v57 = vadd.f32 %v12460_v31, %v2580_v58  ;;  %4326 = vrot.lane.b32.xlu0 %v9557_v9, %s5453_s25  ;;  %v2867_v18 = vmul.f32 0.26601171, %v9509_v36  ;;  %12461 = vst [vmem:[#allocation194_spill] sm:$0xff] %v9597_v17  ;;  %v12462_v59 = vld [vmem:[#allocation433_spill] sm:$0xff]  ;;  %v9605_v46 = vpop.permute.xlu0 %3660  ;;  %v12465_v16 = vld [vmem:[#allocation427_spill] sm:$0xff] }
 0x479   :  { %v2836_v56 = vrot.slane %v9564_v13, 4  ;;  %v2866_v50 = vmul.f32 0.26601171, %v9466_v48  ;;  %v2784_v43 = vsel %vm797_vm0, %v2782_v23, %v2783_v41  ;;  %v2693_v11 = vmul.f32 0.0010283801, %v9523_v47  ;;  %12463 = vst [vmem:[#allocation195_spill] sm:$0xff] %v9605_v46 }
 0x47a   :  { %v2729_v2 = vmul.f32 0.036000773, %v9523_v47  ;;  %v9603_v58 = vadd.f32 %v12462_v59, %v2624_v20  ;;  %v2806_v32 = vadd.f32 %v2784_v43, %v2752_v53  ;;  %v9608_v31 = vmul.f32 0.10936069, %v9579_v12  ;;  %v12464_v23 = vld [vmem:[#allocation426_spill] sm:$0xff] }
 0x47b   :  { %v9611_v14 = vmul.f32 0.10936069, %v9523_v47  ;;  %4438 = vrot.lane.b32.xlu1 %v9215_v42, %s5455_s27  ;;  %v4368_v48 = vmul.f32 0.26601171, %v8907_v4  ;;  %v9617_v41 = vadd.f32 %v12464_v23, %v2583_v0  ;;  %v9620_v20 = vadd.f32 %v12465_v16, %v2582_v1  ;;  %v9633_v0 = vpop.permute.xlu1 %4100 }
 0x47c   :  { %v2723_v19 = vadd.f32 %v2711_v33, %v2693_v11  ;;  %4434 = vrot.lane.b32.xlu0 %v9225_v60, %s5455_s27  ;;  %v9625_v53 = vmul.f32 0.21300554, %v9033_v40  ;;  %v2891_v43 = vrot.slane %v2867_v18, 5  ;;  %v9628_v59 = vmul.f32 0.036000773, %v9509_v36  ;;  %v9640_v23 = vpop.permute.xlu0 %4096 }
 0x47d   :  { %v9631_v42 = vmul.f32 0.007598758, %v9509_v36  ;;  %v2890_v17 = vrot.slane %v2866_v50, 5  ;;  %v2838_v1 = vsel %vm852_vm1, %v2836_v56, %v2837_v34  ;;  %v9637_v33 = vmul.f32 0.21300554, %v9579_v12 }
 0x47e   :  { %v2741_v11 = vrot.slane %v2729_v2, 2  ;;  %v2700_v60 = vmul.f32 0.007598758, %v9603_v58  ;;  %v2860_v18 = vadd.f32 %v2838_v1, %v2806_v32  ;;  %v2786_v16 = vrot.slane %v9608_v31, 3 }
 0x47f   :  { %v2785_v46 = vrot.slane %v9611_v14, 3  ;;  %v9645_v62 = vmul.f32 0.21300554, %v9523_v47  ;;  %4400 = vrot.lane.b32.xlu1 %v4368_v48, %s5454_s26  ;;  %v2921_v34 = vrot.slane %v9561_v37, 6  ;;  %v2951_v56 = vrot.slane %v9539_v24, 7  ;;  %v9661_v48 = vpop.permute.xlu1 %4168 }
 0x480   :  { %v9651_v50 = vmul.f32 0.0010283801, %v9509_v36  ;;  %v2753_v2 = vadd.f32 %v2741_v11, %v2723_v19  ;;  %4332 = vrot.lane.b32.xlu0 %v9625_v53, %s5453_s25  ;;  %v2920_v1 = vrot.slane %v9564_v13, 6  ;;  %v2950_v8 = vrot.slane %v9542_v15, 7  ;;  %v9666_v11 = vpop.permute.xlu0 %4104 }
 0x481   :  { %v9659_v27 = vadd.f32 %v12467_v63, %v2625_v25  ;;  %v2892_v24 = vsel %vm907_vm2, %v2890_v17, %v2891_v43  ;;  %v2840_v36 = vrot.slane %v9637_v33, 4  ;;  %v2869_v37 = vmul.f32 0.26601171, %v9579_v12  ;;  %v12468_v63 = vld [vmem:[#allocation151_spill] sm:$0xff] }
 0x482   :  { %12466 = vst [vmem:[#allocation196_spill] sm:$0xff] %v9651_v50  ;;  %v2712_v19 = vrot.slane %v2700_v60, 1  ;;  %v2914_v26 = vadd.f32 %v2892_v24, %v2860_v18  ;;  %v2787_v32 = vsel %vm797_vm0, %v2785_v46, %v2786_v16  ;;  %v2839_v13 = vrot.slane %v9645_v62, 4 }
 0x483   :  { %v2868_v15 = vmul.f32 0.26601171, %v9523_v47  ;;  %4488 = vrot.lane.b32.xlu1 %v12468_v63, %s5456_s28  ;;  %v2807_v17 = vadd.f32 %v2787_v32, %v2753_v2  ;;  %v2694_v43 = vmul.f32 0.0010283801, %v9603_v58  ;;  %v2730_v61 = vmul.f32 0.036000773, %v9603_v58  ;;  %v9686_v16 = vpop.permute.xlu1 %4098 }
 0x484   :  { %4444 = vrot.lane.b32.xlu0 %v9286_v10, %s5455_s27  ;;  %v2922_v60 = vsel %vm938_vm3, %v2920_v1, %v2921_v34  ;;  %v2952_v46 = vsel %vm969_vm4, %v2950_v8, %v2951_v56  ;;  %v9681_v18 = vmul.f32 0.10936069, %v9659_v27  ;;  %v9684_v47 = vmul.f32 0.10936069, %v9603_v58  ;;  %v9690_v25 = vpop.permute.xlu0 %4172  ;;  %v12469_v56 = vld [vmem:[#allocation112_spill] sm:$0xff] }
 0x485   :  { %v2894_v2 = vrot.slane %v2869_v37, 5  ;;  %v2924_v32 = vrot.slane %v9637_v33, 6  ;;  %v2954_v24 = vrot.slane %v9608_v31, 7  ;;  %v2724_v63 = vadd.f32 %v2712_v19, %v2694_v43  ;;  %v12470_v37 = vld [vmem:[#allocation435_spill] sm:$0xff]  ;;  %v12471_v31 = vld [vmem:[#allocation108_spill] sm:$0xff] }
 0x486   :  { %v2944_v10 = vadd.f32 %v2922_v60, %v2914_v26  ;;  %v2841_v34 = vsel %vm852_vm1, %v2839_v13, %v2840_v36  ;;  %v2893_v8 = vrot.slane %v2868_v15, 5  ;;  %v9696_v1 = vmul.f32 0.21300554, %v9130_v51 }
 0x487   :  { %4532 = vrot.lane.b32.xlu1 %v12469_v56, %s5457_s29  ;;  %v2861_v50 = vadd.f32 %v2841_v34, %v2807_v17  ;;  %v2742_v35 = vrot.slane %v2730_v61, 2  ;;  %v9700_v33 = vadd.f32 %v12470_v37, %v9583_v21  ;;  %v9705_v26 = vmul.f32 0.10936069, %v9311_v52  ;;  %v9715_v61 = vpop.permute.xlu1 %4108 }
 0x488   :  { %4528 = vrot.lane.b32.xlu0 %v12471_v31, %s5457_s29  ;;  %v2789_v36 = vrot.slane %v9681_v18, 3  ;;  %v9709_v19 = vmul.f32 0.21300554, %v9659_v27  ;;  %v2788_v13 = vrot.slane %v9684_v47, 3  ;;  %v9713_v15 = vmul.f32 0.21300554, %v9603_v58  ;;  %v9724_v34 = vpop.permute.xlu0 %4102 }
 0x489   :  { %12472 = vst [vmem:[#allocation358_spill] sm:$0xff] %v9705_v26  ;;  %v9718_v21 = vmul.f32 0.007598758, %v9579_v12  ;;  %v9721_v17 = vmul.f32 0.0010283801, %v9579_v12  ;;  %v2923_v43 = vrot.slane %v9645_v62, 6  ;;  %v2754_v60 = vadd.f32 %v2742_v35, %v2724_v63 }
 0x48a   :  { %v2974_v56 = vadd.f32 %v2952_v46, %v2944_v10  ;;  %v9727_v37 = vmul.f32 0.036000773, %v9579_v12  ;;  %v2895_v31 = vsel %vm907_vm2, %v2893_v8, %v2894_v2  ;;  %v2953_v44 = vrot.slane %v9611_v14, 7 }
 0x48b   :  { %12473 = vst [vmem:[#allocation197_spill] sm:$0xff] %v9721_v17  ;;  %4330 = vrot.lane.b32.xlu1 %v9696_v1, %s5453_s25  ;;  %v2915_v38 = vadd.f32 %v2895_v31, %v2861_v50  ;;  %v2871_v55 = vmul.f32 0.26601171, %v9659_v27  ;;  %v2701_v54 = vmul.f32 0.007598758, %v9700_v33  ;;  %v2843_v12 = vrot.slane %v9709_v19, 4  ;;  %v9742_v2 = vpop.permute.xlu1 %4240 }
 0x48c   :  { %4262 = vrot.lane.b32.xlu0 %v9705_v26, %s5452_s24  ;;  %v4367_v62 = vmul.f32 0.26601171, %v8963_v49  ;;  %v2790_v35 = vsel %vm797_vm0, %v2788_v13, %v2789_v36  ;;  %v2842_v46 = vrot.slane %v9713_v15, 4  ;;  %v2870_v14 = vmul.f32 0.26601171, %v9603_v58  ;;  %v9747_v31 = vpop.permute.xlu0 %4176  ;;  %v12475_v58 = vld [vmem:[#allocation434_spill] sm:$0xff] }
 0x48d   :  { %v2925_v10 = vsel %vm938_vm3, %v2923_v43, %v2924_v32  ;;  %v2808_v8 = vadd.f32 %v2790_v35, %v2754_v60  ;;  %v2986_v26 = vadd.f32 %v9628_v59, %v2974_v56  ;;  %v2955_v49 = vsel %vm969_vm4, %v2953_v44, %v2954_v24 }
 0x48e   :  { %v9752_v36 = vmul.f32 0.007598758, %v9659_v27  ;;  %v2687_v13 = vadd.f32 %v12475_v58, %v9576_v29  ;;  %v2945_v50 = vadd.f32 %v2925_v10, %v2915_v38  ;;  %v2957_v63 = vrot.slane %v9681_v18, 7 }
 0x48f   :  { %4442 = vrot.lane.b32.xlu1 %v9363_v39, %s5455_s27  ;;  %v9760_v32 = vmul.f32 0.036000773, %v9659_v27  ;;  %v2713_v43 = vrot.slane %v2701_v54, 1  ;;  %v2897_v59 = vrot.slane %v2871_v55, 5  ;;  %v9764_v44 = vmul.f32 0.0010283801, %v9659_v27  ;;  %v9767_v29 = vpop.permute.xlu1 %4106 }
 0x490   :  { %12474 = vst [vmem:[#allocation198_spill] sm:$0xff] %v9752_v36  ;;  %4398 = vrot.lane.b32.xlu0 %v4367_v62, %s5454_s26  ;;  %v2844_v24 = vsel %vm852_vm1, %v2842_v46, %v2843_v12  ;;  %v2896_v60 = vrot.slane %v2870_v14, 5  ;;  %12477 = vst [vmem:[#allocation360_spill] sm:$0xff] %v9767_v29  ;;  %v2927_v39 = vrot.slane %v9709_v19, 6  ;;  %v2695_v18 = vmul.f32 0.0010283801, %v9700_v33  ;;  %v9772_v35 = vpop.permute.xlu0 %4244 }
 0x491   :  { %12476 = vst [vmem:[#allocation101_spill] sm:$0xff] %v9764_v44  ;;  %v2862_v38 = vadd.f32 %v2844_v24, %v2808_v8  ;;  %v2731_v56 = vmul.f32 0.036000773, %v9700_v33  ;;  %v12478_v54 = vrot.slane %v9631_v42, 1  ;;  %v9779_v62 = vmul.f32 0.10936069, %v2687_v13 }
 0x492   :  { %v9782_v12 = vmul.f32 0.10936069, %v9700_v33  ;;  %v12480_v19 = vld [vmem:[#allocation155_spill] sm:$0xff]  ;;  %v2975_v46 = vadd.f32 %v2955_v49, %v2945_v50  ;;  %v2926_v14 = vrot.slane %v9713_v15, 6  ;;  %v2725_v10 = vadd.f32 %v2713_v43, %v2695_v18  ;;  %v12482_v49 = vld [vmem:[#allocation436_spill] sm:$0xff]  ;;  %v12483_v50 = vld [vmem:[#allocation437_spill] sm:$0xff] }
 0x493   :  { %v9776_v55 = vadd.f32 %v12478_v54, %v2986_v26  ;;  %4486 = vrot.lane.b32.xlu1 %v12480_v19, %s5456_s28  ;;  %v12481_v8 = vld [vmem:[#allocation359_spill] sm:$0xff]  ;;  %v4370_v42 = vmul.f32 0.26601171, %v9033_v40  ;;  %v2898_v58 = vsel %vm907_vm2, %v2896_v60, %v2897_v59  ;;  %v2956_v24 = vrot.slane %v9684_v47, 7  ;;  %v9793_v27 = vpop.permute.xlu1 %4174  ;;  %v12490_v36 = vld [vmem:[#allocation206_spill] sm:$0xff] }
 0x494   :  { %4482 = vrot.lane.b32.xlu0 %v12481_v8, %s5456_s28  ;;  %v2819_v54 = vmul.f32 0.21300554, %v2687_v13  ;;  %v2916_v17 = vadd.f32 %v2898_v58, %v2862_v38  ;;  %v2743_v19 = vrot.slane %v2731_v56, 2  ;;  %v9797_v15 = vadd.f32 %v12482_v49, %v9586_v45  ;;  %v9803_v18 = vpop.permute.xlu0 %4170  ;;  %v12505_v29 = vld [vmem:[#allocation34_spill] sm:$0xff] }
 0x495   :  { %12479 = vst [vmem:[#allocation199_spill] sm:$0xff] %v9776_v55  ;;  %v9801_v43 = vadd.f32 %v12483_v50, %v9589_v57  ;;  %v2792_v8 = vrot.slane %v9779_v62, 3  ;;  %v2873_v59 = vmul.f32 0.26601171, %v2687_v13  ;;  %v2791_v47 = vrot.slane %v9782_v12, 3 }
 0x496   :  { %v2818_v60 = vmul.f32 0.21300554, %v9700_v33  ;;  %v2987_v38 = vadd.f32 %v9727_v37, %v2975_v46  ;;  %v2928_v45 = vsel %vm938_vm3, %v2926_v14, %v2927_v39  ;;  %v9812_v56 = vmul.f32 0.036000773, %v2687_v13 }
 0x497   :  { %4448 = vrot.lane.b32.xlu1 %v9441_v30, %s5455_s27  ;;  %v2755_v57 = vadd.f32 %v2743_v19, %v2725_v10  ;;  %v2958_v58 = vsel %vm969_vm4, %v2956_v24, %v2957_v63  ;;  %v2960_v49 = vrot.slane %v9779_v62, 7  ;;  %v9817_v50 = vmul.f32 0.007598758, %v2687_v13  ;;  %v9820_v44 = vpop.permute.xlu1 %4180  ;;  %v12489_v19 = vld [vmem:[#allocation22_spill] sm:$0xff] }
 0x498   :  { %4404 = vrot.lane.b32.xlu0 %v4370_v42, %s5454_s26  ;;  %v2872_v26 = vmul.f32 0.26601171, %v9700_v33  ;;  %v2946_v30 = vadd.f32 %v2928_v45, %v2916_v17  ;;  %v9822_v55 = vmul.f32 0.0010283801, %v2687_v13  ;;  %v9825_v37 = vmul.f32 0.10936069, %v9797_v15  ;;  %v9828_v46 = vpop.permute.xlu0 %4112 }
 0x499   :  { %12484 = vst [vmem:[#allocation200_spill] sm:$0xff] %v9817_v50  ;;  %v2702_v39 = vmul.f32 0.007598758, %v9801_v43  ;;  %v2846_v14 = vrot.slane %v2819_v54, 4  ;;  %v2900_v63 = vrot.slane %v2873_v59, 5  ;;  %v2793_v62 = vsel %vm797_vm0, %v2791_v47, %v2792_v8  ;;  %v12486_v42 = vld [vmem:[#allocation124_spill] sm:$0xff] }
 0x49a   :  { %12485 = vst [vmem:[#allocation201_spill] sm:$0xff] %v9822_v55  ;;  %v2845_v10 = vrot.slane %v2818_v60, 4  ;;  %v12487_v33 = vrot.slane %v9718_v21, 1  ;;  %v2930_v13 = vrot.slane %v2819_v54, 6  ;;  %v2809_v24 = vadd.f32 %v2793_v62, %v2755_v57 }
 0x49b   :  { %4536 = vrot.lane.b32.xlu1 %v12486_v42, %s5457_s29  ;;  %v9839_v45 = vadd.f32 %v12489_v19, %v9620_v20  ;;  %v2899_v8 = vrot.slane %v2872_v26, 5  ;;  %v2929_v47 = vrot.slane %v2818_v60, 6  ;;  %v2959_v40 = vrot.slane %v9782_v12, 7  ;;  %v9845_v42 = vpop.permute.xlu1 %4312  ;;  %v12491_v60 = vld [vmem:[#allocation98_spill] sm:$0xff] }
 0x49c   :  { %v9835_v17 = vadd.f32 %v12487_v33, %v2987_v38  ;;  %4492 = vrot.lane.b32.xlu0 %v12490_v36, %s5456_s28  ;;  %v2976_v21 = vadd.f32 %v2958_v58, %v2946_v30  ;;  %v2795_v54 = vrot.slane %v9825_v37, 3  ;;  %v2714_v57 = vrot.slane %v2702_v39, 1  ;;  %v9849_v62 = vpop.permute.xlu0 %4248  ;;  %v12492_v39 = vld [vmem:[#allocation99_spill] sm:$0xff] }
 0x49d   :  { %v2847_v20 = vsel %vm852_vm1, %v2845_v10, %v2846_v14  ;;  %v9853_v36 = vmul.f32 0.21300554, %v9797_v15  ;;  %v2696_v26 = vmul.f32 0.0010283801, %v9801_v43  ;;  %v4369_v12 = vmul.f32 0.26601171, %v9130_v51 }
 0x49e   :  { %12488 = vst [vmem:[#allocation100_spill] sm:$0xff] %v9835_v17  ;;  %v2863_v58 = vadd.f32 %v2847_v20, %v2809_v24  ;;  %v2732_v30 = vmul.f32 0.036000773, %v9801_v43  ;;  %v2703_v33 = vmul.f32 0.007598758, %v9839_v45  ;;  %v2901_v10 = vsel %vm907_vm2, %v2899_v8, %v2900_v63  ;;  %v12498_v8 = vld [vmem:[#allocation19_spill] sm:$0xff] }
 0x49f   :  { %4580 = vrot.lane.b32.xlu1 %v12491_v60, %s5458_s30  ;;  %v9864_v14 = vmul.f32 0.21300554, %v9311_v52  ;;  %v2931_v19 = vsel %vm938_vm3, %v2929_v47, %v2930_v13  ;;  %v9869_v38 = vsel %vm969_vm4, %v2959_v40, %v2960_v49  ;;  %v9872_v60 = vmul.f32 0.10936069, %v9801_v43  ;;  %v9874_v24 = vpop.permute.xlu1 %4110  ;;  %v12506_v51 = vld [vmem:[#allocation121_spill] sm:$0xff] }
 0x4a0   :  { %4576 = vrot.lane.b32.xlu0 %v12492_v39, %s5458_s30  ;;  %12494 = vst [vmem:[#allocation202_spill] sm:$0xff] %v9874_v24  ;;  %v9877_v20 = vadd.f32 %v9760_v32, %v2976_v21  ;;  %v9880_v39 = vmul.f32 0.26601171, %v9797_v15  ;;  %v2726_v55 = vadd.f32 %v2714_v57, %v2696_v26  ;;  %v9883_v63 = vpop.permute.xlu0 %4316  ;;  %v2849_v13 = vrot.slane %v9853_v36, 4 }
 0x4a1   :  { %12493 = vst [vmem:[#allocation105_spill] sm:$0xff] %v9864_v14  ;;  %v9887_v40 = vmul.f32 0.036000773, %v9797_v15  ;;  %v9890_v49 = vmul.f32 0.007598758, %v9797_v15  ;;  %v9894_v32 = vadd.f32 %v12498_v8, %v9617_v41  ;;  %v2917_v47 = vadd.f32 %v2901_v10, %v2863_v58  ;;  %v12501_v58 = vld [vmem:[#allocation94_spill] sm:$0xff] }
 0x4a2   :  { %12495 = vst [vmem:[#allocation204_spill] sm:$0xff] %v9877_v20  ;;  %v9898_v21 = vmul.f32 0.0010283801, %v9797_v15  ;;  %v2744_v57 = vrot.slane %v2732_v30, 2  ;;  %v2715_v26 = vrot.slane %v2703_v33, 1  ;;  %v2794_v17 = vrot.slane %v9872_v60, 3 }
 0x4a3   :  { %12496 = vst [vmem:[#allocation223_spill] sm:$0xff] %v9887_v40  ;;  %12497 = vst [vmem:[#allocation205_spill] sm:$0xff] %v9890_v49  ;;  %4402 = vrot.lane.b32.xlu1 %v4369_v12, %s5454_s26  ;;  %v9905_v50 = vmul.f32 0.21300554, %v9801_v43  ;;  %v2697_v41 = vmul.f32 0.0010283801, %v9839_v45  ;;  %v9908_v8 = vpop.permute.xlu1 %4242 }
 0x4a4   :  { %12499 = vst [vmem:[#allocation208_spill] sm:$0xff] %v9894_v32  ;;  %12500 = vst [vmem:[#allocation209_spill] sm:$0xff] %v9898_v21  ;;  %4334 = vrot.lane.b32.xlu0 %v9864_v14, %s5453_s25  ;;  %v2756_v12 = vadd.f32 %v2744_v57, %v2726_v55  ;;  %v2733_v15 = vmul.f32 0.036000773, %v9839_v45  ;;  %v9912_v30 = vmul.f32 0.0010283801, %v12501_v58  ;;  %v9917_v10 = vpop.permute.xlu0 %4178  ;;  %v2947_v55 = vadd.f32 %v2931_v19, %v2917_v47 }
 0x4a5   :  { %v9915_v33 = vmul.f32 0.0010283801, %v8775_v3  ;;  %12503 = vst [vmem:[#allocation212_spill] sm:$0xff] %v9917_v10  ;;  %v2903_v59 = vrot.slane %v9880_v39, 5  ;;  %v9922_v14 = vmul.f32 0.10936069, %v9894_v32  ;;  %v2727_v3 = vadd.f32 %v2715_v26, %v2697_v41 }
 0x4a6   :  { %v9925_v24 = vmul.f32 0.10936069, %v9839_v45  ;;  %v2874_v57 = vmul.f32 0.26601171, %v9801_v43  ;;  %v12504_v58 = vld [vmem:[#allocation60_spill] sm:$0xff]  ;;  %v2796_v39 = vsel %vm797_vm0, %v2794_v17, %v2795_v54  ;;  %v2848_v20 = vrot.slane %v9905_v50, 4 }
 0x4a7   :  { %12502 = vst [vmem:[#allocation364_spill] sm:$0xff] %v9915_v33  ;;  %4490 = vrot.lane.b32.xlu1 %v9187_v6, %s5456_s28  ;;  %v9932_v10 = vadd.f32 %v12505_v29, %v12504_v58  ;;  %v9939_v49 = vmul.f32 0.21300554, %v9894_v32  ;;  %v9942_v6 = vmul.f32 0.0010283801, %v12506_v51  ;;  %v9944_v19 = vpop.permute.xlu1 %4116  ;;  %v2810_v43 = vadd.f32 %v2796_v39, %v2756_v12  ;;  %v12508_v51 = vld [vmem:[#allocation109_spill] sm:$0xff] }
 0x4a8   :  { %4446 = vrot.lane.b32.xlu0 %v9557_v9, %s5455_s27  ;;  %12507 = vst [vmem:[#allocation213_spill] sm:$0xff] %v9944_v19  ;;  %v2745_v47 = vrot.slane %v2733_v15, 2  ;;  %v4132_v29 = vadd.f32 %v9640_v23, %v9912_v30  ;;  %v4138_v9 = vadd.f32 %v9715_v61, %v9915_v33  ;;  %v9950_v26 = vpop.permute.xlu0 %4246  ;;  %v2798_v17 = vrot.slane %v9922_v14, 3  ;;  %v12509_v12 = vld [vmem:[#allocation135_spill] sm:$0xff]  ;;  %v12510_v33 = vld [vmem:[#allocation136_spill] sm:$0xff] }
 0x4a9   :  { %v2797_v54 = vrot.slane %v9925_v24, 3  ;;  %v9955_v41 = vmul.f32 0.21300554, %v9839_v45  ;;  %v4062_v58 = vmul.f32 0.0010283801, %v12508_v51  ;;  %v2902_v15 = vrot.slane %v2874_v57, 5 }
 0x4aa   :  { %v2757_v39 = vadd.f32 %v2745_v47, %v2727_v3  ;;  %v4204_v23 = vadd.f32 %v9661_v48, %v4132_v29  ;;  %v4210_v61 = vadd.f32 %v9820_v44, %v4138_v9  ;;  %v2850_v19 = vsel %vm852_vm1, %v2848_v20, %v2849_v13 }
 0x4ab   :  { %4534 = vrot.lane.b32.xlu1 %v12509_v12, %s5457_s29  ;;  %v2852_v22 = vrot.slane %v9939_v49, 4  ;;  %v2877_v40 = vmul.f32 0.26601171, %v9894_v32  ;;  %v4136_v51 = vadd.f32 %v9666_v11, %v9942_v6  ;;  %v4253_v28 = vpop.permute.xlu1 %4252  ;;  %v2864_v12 = vadd.f32 %v2850_v19, %v2810_v43  ;;  %v12511_v11 = vld [vmem:[#allocation221_spill] sm:$0xff] }
 0x4ac   :  { %4530 = vrot.lane.b32.xlu0 %v12510_v33, %s5457_s29  ;;  %v2876_v57 = vmul.f32 0.26601171, %v9839_v45  ;;  %v4276_v48 = vadd.f32 %v9742_v2, %v4204_v23  ;;  %v9971_v3 = vadd.f32 %v4253_v28, %v4210_v61  ;;  %v9973_v44 = vpop.permute.xlu0 %4184  ;;  %v2799_v33 = vsel %vm797_vm0, %v2797_v54, %v2798_v17 }
 0x4ad   :  { %v2851_v20 = vrot.slane %v9955_v41, 4  ;;  %v4134_v13 = vadd.f32 %v9633_v0, %v4062_v58  ;;  %v4208_v47 = vadd.f32 %v9747_v31, %v4136_v51  ;;  %v2932_v45 = vrot.slane %v9905_v50, 6 }
 0x4ae   :  { %v2811_v2 = vadd.f32 %v2799_v33, %v2757_v39  ;;  %v4348_v28 = vadd.f32 %v9845_v42, %v4276_v48  ;;  %v2904_v43 = vsel %vm907_vm2, %v2902_v15, %v2903_v59  ;;  %v2962_v29 = vrot.slane %v9872_v60, 7  ;;  %v12512_v60 = vld [vmem:[#allocation142_spill] sm:$0xff] }
 0x4af   :  { %4496 = vrot.lane.b32.xlu1 %v12511_v11, %s5456_s28  ;;  %v4206_v0 = vadd.f32 %v9690_v25, %v4134_v13  ;;  %v4280_v31 = vadd.f32 %v9849_v62, %v4208_v47  ;;  %v4385_v9 = vpop.permute.xlu1 %4384  ;;  %v2977_v17 = vadd.f32 %v9869_v38, %v2947_v55  ;;  %v2918_v54 = vadd.f32 %v2904_v43, %v2864_v12  ;;  %v12513_v62 = vld [vmem:[#allocation64_spill] sm:$0xff]  ;;  %v12514_v15 = vld [vmem:[#allocation46_spill] sm:$0xff]  ;;  %v12516_v55 = vld [vmem:[#allocation73_spill] sm:$0xff] }
 0x4b0   :  { %4452 = vrot.lane.b32.xlu0 %v9625_v53, %s5455_s27  ;;  %v2906_v23 = vrot.slane %v2877_v40, 5  ;;  %v9991_v50 = vadd.f32 %v4385_v9, %v4348_v28  ;;  %v4321_v39 = vpop.permute.xlu0 %4320  ;;  %v2853_v42 = vsel %vm852_vm1, %v2851_v20, %v2852_v22  ;;  %v2905_v61 = vrot.slane %v2876_v57, 5  ;;  %v12515_v38 = vld [vmem:[#allocation72_spill] sm:$0xff]  ;;  %v12517_v22 = vld [vmem:[#allocation139_spill] sm:$0xff] }
 0x4b1   :  { %v4278_v53 = vadd.f32 %v9772_v35, %v4206_v0  ;;  %v9995_v59 = vadd.f32 %v4321_v39, %v4280_v31  ;;  %v2865_v25 = vadd.f32 %v2853_v42, %v2811_v2  ;;  %v3136_v51 = vadd.f32 %v12514_v15, %v12513_v62  ;;  %v12524_v31 = vld [vmem:[#allocation75_spill] sm:$0xff]  ;;  %v12529_v15 = vld [vmem:[#allocation20_spill] sm:$0xff] }
 0x4b2   :  { %v3139_v40 = vadd.f32 %v12516_v55, %v12515_v38  ;;  %v10004_v12 = vmul.f32 0.0010283801, %v8785_v5  ;;  %v12518_v35 = vrot.slane %v9853_v36, 6  ;;  %v12519_v48 = vrot.slane %v9825_v37, 7  ;;  %v12528_v62 = vld [vmem:[#allocation79_spill] sm:$0xff] }
 0x4b3   :  { %4584 = vrot.lane.b32.xlu1 %v12512_v60, %s5458_s30  ;;  %v10015_v20 = vmul.f32 0.0010283801, %v8736_v7  ;;  %v4350_v13 = vadd.f32 %v9883_v63, %v4278_v53  ;;  %v10018_v47 = vpop.permute.xlu1 %4114  ;;  %v10021_v5 = vadd.f32 %v9812_v56, %v2977_v17  ;;  %v2936_v11 = vrot.slane %v9939_v49, 6 }
 0x4b4   :  { %4540 = vrot.lane.b32.xlu0 %v12517_v22, %s5457_s29  ;;  %v2934_v57 = vsel %vm938_vm3, %v2932_v45, %v12518_v35  ;;  %v2964_v33 = vsel %vm969_vm4, %v2962_v29, %v12519_v48  ;;  %v2966_v36 = vrot.slane %v9922_v14, 7  ;;  %v2935_v45 = vrot.slane %v9955_v41, 6  ;;  %v4389_v2 = vpop.permute.xlu0 %4388  ;;  %v12523_v29 = vld [vmem:[#allocation21_spill] sm:$0xff]  ;;  %v12531_v35 = vld [vmem:[#allocation24_spill] sm:$0xff] }
 0x4b5   :  { %12520 = vst [vmem:[#allocation239_spill] sm:$0xff] %v10021_v5  ;;  %v2948_v37 = vadd.f32 %v2934_v57, %v2918_v54  ;;  %v2907_v28 = vsel %vm907_vm2, %v2905_v61, %v2906_v23  ;;  %v2965_v7 = vrot.slane %v9925_v24, 7  ;;  %v10028_v43 = vadd.f32 %v4389_v2, %v4350_v13  ;;  %v12522_v24 = vld [vmem:[#allocation68_spill] sm:$0xff]  ;;  %v12530_v22 = vld [vmem:[#allocation81_spill] sm:$0xff]  ;;  %v12537_v2 = vld [vmem:[#allocation58_spill] sm:$0xff] }
 0x4b6   :  { %v10032_v63 = vmul.f32 0.036000773, %v9894_v32  ;;  %v2919_v56 = vadd.f32 %v2907_v28, %v2865_v25  ;;  %v4135_v49 = vadd.f32 %v9724_v34, %v10004_v12  ;;  %v4371_v14 = vmul.f32 0.26601171, %v9311_v52  ;;  %v12526_v23 = vld [vmem:[#allocation76_spill] sm:$0xff]  ;;  %v12532_v57 = vld [vmem:[#allocation85_spill] sm:$0xff] }
 0x4b7   :  { %4640 = vrot.lane.b32.xlu1 %v4062_v58, %s5459_s5  ;;  %v10040_v41 = vmul.f32 0.007598758, %v9894_v32  ;;  %v3138_v0 = vadd.f32 %v12523_v29, %v12522_v24  ;;  %v12525_v58 = vld [vmem:[#allocation74_spill] sm:$0xff]  ;;  %v4133_v17 = vadd.f32 %v9686_v16, %v10015_v20  ;;  %v10048_v54 = vpop.permute.xlu1 %4250  ;;  %v2937_v34 = vsel %vm938_vm3, %v2935_v45, %v2936_v11  ;;  %v12535_v11 = vld [vmem:[#allocation25_spill] sm:$0xff]  ;;  %v12536_v45 = vld [vmem:[#allocation95_spill] sm:$0xff] }
 0x4b8   :  { %4636 = vrot.lane.b32.xlu0 %v9912_v30, %s5459_s5  ;;  %v3141_v9 = vadd.f32 %v12525_v58, %v12524_v31  ;;  %v12527_v30 = vld [vmem:[#allocation23_spill] sm:$0xff]  ;;  %v4207_v42 = vadd.f32 %v9793_v27, %v4135_v49  ;;  %v10055_v61 = vmul.f32 0.0010283801, %v8907_v4  ;;  %v10057_v53 = vpop.permute.xlu0 %4182  ;;  %v2978_v60 = vadd.f32 %v2964_v33, %v2948_v37  ;;  %v12533_v4 = vld [vmem:[#allocation77_spill] sm:$0xff]  ;;  %v12534_v33 = vld [vmem:[#allocation86_spill] sm:$0xff] }
 0x4b9   :  { %12521 = vst [vmem:[#allocation366_spill] sm:$0xff] %v10040_v41  ;;  %v3140_v39 = vadd.f32 %v12527_v30, %v12526_v23  ;;  %v2967_v25 = vsel %vm969_vm4, %v2965_v7, %v2966_v36  ;;  %v3143_v16 = vadd.f32 %v12529_v15, %v12528_v62  ;;  %v4205_v38 = vadd.f32 %v9803_v18, %v4133_v17  ;;  %v12538_v37 = vld [vmem:[#allocation130_spill] sm:$0xff]  ;;  %v12539_v28 = vld [vmem:[#allocation17_spill] sm:$0xff]  ;;  %v12542_v17 = vld [vmem:[#allocation27_spill] sm:$0xff] }
 0x4ba   :  { %v2949_v55 = vadd.f32 %v2937_v34, %v2919_v56  ;;  %v3142_v27 = vadd.f32 %v12531_v35, %v12530_v22  ;;  %v3145_v48 = vadd.f32 %v12533_v4, %v12532_v57  ;;  %v4279_v13 = vadd.f32 %v9950_v26, %v4207_v42  ;;  %v12540_v49 = vld [vmem:[#allocation26_spill] sm:$0xff]  ;;  %v12543_v23 = vld [vmem:[#allocation80_spill] sm:$0xff]  ;;  %v12547_v22 = vld [vmem:[#allocation29_spill] sm:$0xff] }
 0x4bb   :  { %4450 = vrot.lane.b32.xlu1 %v9696_v1, %s5455_s27  ;;  %v3144_v36 = vadd.f32 %v12535_v11, %v12534_v33  ;;  %v3147_v18 = vadd.f32 %v12537_v2, %v12536_v45  ;;  %v3146_v1 = vadd.f32 %v12539_v28, %v12538_v37  ;;  %v4277_v7 = vadd.f32 %v9908_v8, %v4205_v38  ;;  %v4319_v56 = vpop.permute.xlu1 %4318  ;;  %v12541_v29 = vld [vmem:[#allocation18_spill] sm:$0xff]  ;;  %v12544_v42 = vld [vmem:[#allocation28_spill] sm:$0xff]  ;;  %v12545_v8 = vld [vmem:[#allocation365_spill] sm:$0xff] }
 0x4bc   :  { %4406 = vrot.lane.b32.xlu0 %v4371_v14, %s5454_s26  ;;  %v3209_v24 = vadd.f32 %v12540_v49, %v9932_v10  ;;  %v3208_v31 = vadd.f32 %v12541_v29, %v3136_v51  ;;  %v4140_v26 = vadd.f32 %v9828_v46, %v10055_v61  ;;  %v10083_v14 = vadd.f32 %v4319_v56, %v4279_v13  ;;  %v4315_v58 = vpop.permute.xlu0 %4314  ;;  %v12546_v38 = vld [vmem:[#allocation83_spill] sm:$0xff]  ;;  %v12548_v57 = vld [vmem:[#allocation381_spill] sm:$0xff]  ;;  %v12555_v28 = vld [vmem:[#allocation70_spill] sm:$0xff] }
 0x4bd   :  { %v3211_v34 = vadd.f32 %v12542_v17, %v3139_v40  ;;  %v3210_v30 = vadd.f32 %v12543_v23, %v3138_v0  ;;  %v3213_v62 = vadd.f32 %v12544_v42, %v3141_v9  ;;  %v10088_v15 = vadd.f32 %v4315_v58, %v4277_v7  ;;  %v12549_v40 = vld [vmem:[#allocation84_spill] sm:$0xff]  ;;  %v12550_v0 = vld [vmem:[#allocation30_spill] sm:$0xff]  ;;  %v12552_v11 = vld [vmem:[#allocation31_spill] sm:$0xff] }
 0x4be   :  { %v2979_v10 = vadd.f32 %v2967_v25, %v2949_v55  ;;  %v3212_v51 = vadd.f32 %v12546_v38, %v3140_v39  ;;  %v3215_v35 = vadd.f32 %v12547_v22, %v3143_v16  ;;  %v4212_v46 = vadd.f32 %v9973_v44, %v4140_v26  ;;  %v12551_v9 = vld [vmem:[#allocation88_spill] sm:$0xff]  ;;  %v12553_v37 = vld [vmem:[#allocation89_spill] sm:$0xff]  ;;  %v12564_v42 = vld [vmem:[#allocation223_spill] sm:$0xff] }
 0x4bf   :  { %4538 = vrot.lane.b32.xlu1 %v12545_v8, %s5457_s29  ;;  %v3214_v4 = vadd.f32 %v12549_v40, %v3142_v27  ;;  %v3217_v13 = vadd.f32 %v12550_v0, %v3145_v48  ;;  %v3216_v33 = vadd.f32 %v12551_v9, %v3144_v36  ;;  %v3219_v45 = vadd.f32 %v12552_v11, %v3147_v18  ;;  %v4257_v2 = vpop.permute.xlu1 %4256  ;;  %v12554_v55 = vld [vmem:[#allocation32_spill] sm:$0xff]  ;;  %v12556_v56 = vld [vmem:[#allocation33_spill] sm:$0xff]  ;;  %v12557_v27 = vld [vmem:[#allocation35_spill] sm:$0xff] }
 0x4c0   :  { %4494 = vrot.lane.b32.xlu0 %v12548_v57, %s5456_s28  ;;  %v3218_v25 = vadd.f32 %v12553_v37, %v3146_v1  ;;  %v3281_v39 = vadd.f32 %v12554_v55, %v3209_v24  ;;  %v3280_v16 = vadd.f32 %v12555_v28, %v3208_v31  ;;  %v10104_v7 = vadd.f32 %v4257_v2, %v4212_v46  ;;  %v10106_v44 = vpop.permute.xlu0 %4188  ;;  %v12558_v48 = vld [vmem:[#allocation36_spill] sm:$0xff]  ;;  %v12559_v36 = vld [vmem:[#allocation37_spill] sm:$0xff]  ;;  %v12561_v1 = vld [vmem:[#allocation38_spill] sm:$0xff] }
 0x4c1   :  { %v3283_v49 = vadd.f32 %v12556_v56, %v3211_v34  ;;  %v3282_v29 = vadd.f32 %v12557_v27, %v3210_v30  ;;  %v3285_v26 = vadd.f32 %v12558_v48, %v3213_v62  ;;  %v3284_v58 = vadd.f32 %v12559_v36, %v3212_v51  ;;  %v12560_v18 = vld [vmem:[#allocation145_spill] sm:$0xff]  ;;  %v12562_v24 = vld [vmem:[#allocation39_spill] sm:$0xff]  ;;  %v12567_v30 = vld [vmem:[#allocation40_spill] sm:$0xff] }
 0x4c2   :  { %v3287_v17 = vadd.f32 %v12561_v1, %v3215_v35  ;;  %v3286_v23 = vadd.f32 %v12562_v24, %v3214_v4  ;;  %v12563_v31 = vld [vmem:[#allocation133_spill] sm:$0xff]  ;;  %v10119_v8 = vadd.f32 %v12564_v42, %v2978_v60  ;;  %v10122_v34 = vadd.f32 %v10032_v63, %v2979_v10  ;;  %v12568_v38 = vld [vmem:[#allocation91_spill] sm:$0xff]  ;;  %v12570_v57 = vld [vmem:[#allocation42_spill] sm:$0xff] }
 0x4c3   :  { %4582 = vrot.lane.b32.xlu1 %v12560_v18, %s5458_s30  ;;  %v3289_v62 = vadd.f32 %v12567_v30, %v3217_v13  ;;  %v3288_v51 = vadd.f32 %v12568_v38, %v3216_v33  ;;  %v12569_v22 = vld [vmem:[#allocation41_spill] sm:$0xff]  ;;  %v3290_v40 = vadd.f32 %v12570_v57, %v3218_v25  ;;  %v4393_v35 = vpop.permute.xlu1 %4392  ;;  %v12571_v0 = vld [vmem:[#allocation43_spill] sm:$0xff]  ;;  %v12573_v2 = vld [vmem:[#allocation44_spill] sm:$0xff] }
 0x4c4   :  { %4578 = vrot.lane.b32.xlu0 %v12563_v31, %s5458_s30  ;;  %12565 = vst [vmem:[#allocation216_spill] sm:$0xff] %v10119_v8  ;;  %12566 = vst [vmem:[#allocation217_spill] sm:$0xff] %v10122_v34  ;;  %v3291_v46 = vadd.f32 %v12569_v22, %v3219_v45  ;;  %v3353_v4 = vadd.f32 %v12571_v0, %v3281_v39  ;;  %v12572_v9 = vld [vmem:[#allocation45_spill] sm:$0xff]  ;;  %v3355_v37 = vadd.f32 %v12573_v2, %v3283_v49  ;;  %v4325_v63 = vpop.permute.xlu0 %4324  ;;  %v12574_v10 = vld [vmem:[#allocation47_spill] sm:$0xff] }
 0x4c5   :  { %v3352_v11 = vadd.f32 %v12572_v9, %v3280_v16  ;;  %v10132_v60 = vadd.f32 %v4393_v35, %v9995_v59  ;;  %v3354_v55 = vadd.f32 %v12574_v10, %v3282_v29  ;;  %v12575_v13 = vld [vmem:[#allocation48_spill] sm:$0xff]  ;;  %v12576_v33 = vld [vmem:[#allocation107_spill] sm:$0xff]  ;;  %v10138_v45 = vadd.f32 %v4325_v63, %v9971_v3  ;;  %v12577_v25 = vld [vmem:[#allocation157_spill] sm:$0xff] }
 0x4c6   :  { %v3357_v28 = vadd.f32 %v12575_v13, %v3285_v26  ;;  %v3356_v56 = vadd.f32 %v12576_v33, %v3284_v58  ;;  %v12578_v39 = vld [vmem:[#allocation49_spill] sm:$0xff]  ;;  %v12579_v27 = vld [vmem:[#allocation50_spill] sm:$0xff]  ;;  %v12580_v48 = vld [vmem:[#allocation123_spill] sm:$0xff] }
 0x4c7   :  { %4544 = vrot.lane.b32.xlu1 %v12577_v25, %s5457_s29  ;;  %v3359_v16 = vadd.f32 %v12578_v39, %v3287_v17  ;;  %v3358_v49 = vadd.f32 %v12579_v27, %v3286_v23  ;;  %v10145_v59 = vmul.f32 0.0010283801, %v12580_v48  ;;  %v12581_v36 = vld [vmem:[#allocation158_spill] sm:$0xff]  ;;  %v12582_v29 = vld [vmem:[#allocation184_spill] sm:$0xff]  ;;  %v12583_v26 = vld [vmem:[#allocation51_spill] sm:$0xff]  ;;  %v4437_v17 = vpop.permute.xlu1 %4436 }
 0x4c8   :  { %v10148_v18 = vmul.f32 0.0010283801, %v12581_v36  ;;  %4500 = vrot.lane.b32.xlu0 %v12582_v29, %s5456_s28  ;;  %v3361_v58 = vadd.f32 %v12583_v26, %v3289_v62  ;;  %v12584_v3 = vld [vmem:[#allocation57_spill] sm:$0xff]  ;;  %v12585_v24 = vld [vmem:[#allocation52_spill] sm:$0xff]  ;;  %v12587_v38 = vld [vmem:[#allocation54_spill] sm:$0xff]  ;;  %v10160_v9 = vadd.f32 %v4437_v17, %v10028_v43  ;;  %v4433_v2 = vpop.permute.xlu0 %4432 }
 0x4c9   :  { %v3360_v1 = vadd.f32 %v12584_v3, %v3288_v51  ;;  %v3363_v31 = vadd.f32 %v12585_v24, %v3291_v46  ;;  %v12586_v42 = vld [vmem:[#allocation53_spill] sm:$0xff]  ;;  %v3425_v23 = vadd.f32 %v12587_v38, %v3353_v4  ;;  %v12588_v22 = vld [vmem:[#allocation55_spill] sm:$0xff]  ;;  %v12591_v62 = vld [vmem:[#allocation148_spill] sm:$0xff]  ;;  %v10167_v51 = vadd.f32 %v4433_v2, %v9991_v50 }
 0x4ca   :  { %v3362_v30 = vadd.f32 %v12586_v42, %v3290_v40  ;;  %v3424_v57 = vadd.f32 %v12588_v22, %v3352_v11  ;;  %v12589_v35 = vld [vmem:[#allocation61_spill] sm:$0xff]  ;;  %v10164_v13 = vmul.f32 0.0010283801, %v12591_v62  ;;  %v10172_v46 = vmul.f32 0.0010283801, %v9311_v52  ;;  %v12592_v40 = vld [vmem:[#allocation143_spill] sm:$0xff] }
 0x4cb   :  { %v3427_v0 = vadd.f32 %v12589_v35, %v3355_v37  ;;  %v12590_v63 = vld [vmem:[#allocation65_spill] sm:$0xff]  ;;  %4644 = vrot.lane.b32.xlu1 %v9942_v6, %s5459_s5  ;;  %v3429_v4 = vadd.f32 %v12592_v40, %v3357_v28  ;;  %v12593_v11 = vld [vmem:[#allocation71_spill] sm:$0xff]  ;;  %v12594_v37 = vld [vmem:[#allocation360_spill] sm:$0xff]  ;;  %v4187_v28 = vpop.permute.xlu1 %4186 }
 0x4cc   :  { %v3426_v10 = vadd.f32 %v12590_v63, %v3354_v55  ;;  %v3428_v43 = vadd.f32 %v12593_v11, %v3356_v56  ;;  %v4137_v33 = vadd.f32 %v12594_v37, %v10145_v59  ;;  %v4141_v55 = vadd.f32 %v10018_v47, %v10148_v18  ;;  %v12595_v25 = vld [vmem:[#allocation116_spill] sm:$0xff]  ;;  %v12596_v50 = vld [vmem:[#allocation106_spill] sm:$0xff]  ;;  %v12598_v48 = vld [vmem:[#allocation93_spill] sm:$0xff]  ;;  %v4119_v47 = vpop.permute.xlu0 %4118 }
 0x4cd   :  { %4588 = vrot.lane.b32.xlu0 %v12595_v25, %s5458_s30  ;;  %v3431_v39 = vadd.f32 %v12596_v50, %v3359_v16  ;;  %v12597_v27 = vld [vmem:[#allocation78_spill] sm:$0xff]  ;;  %v3433_v52 = vadd.f32 %v12598_v48, %v3361_v58  ;;  %v12599_v36 = vld [vmem:[#allocation97_spill] sm:$0xff]  ;;  %v12602_v42 = vld [vmem:[#allocation212_spill] sm:$0xff]  ;;  %v10196_v58 = vadd.f32 %v4119_v47, %v10172_v46 }
 0x4ce   :  { %v3430_v6 = vadd.f32 %v12597_v27, %v3358_v49  ;;  %v3472_v29 = vadd.f32 %v12599_v36, %v3424_v57  ;;  %v12600_v26 = vld [vmem:[#allocation82_spill] sm:$0xff]  ;;  %v4209_v17 = vadd.f32 %v12602_v42, %v4137_v33  ;;  %v10189_v38 = vadd.f32 %v4187_v28, %v4141_v55  ;;  %v12603_v22 = vld [vmem:[#allocation92_spill] sm:$0xff]  ;;  %v12609_v11 = vld [vmem:[#allocation103_spill] sm:$0xff] }
 0x4cf   :  { %v3432_v56 = vadd.f32 %v12600_v26, %v3360_v1  ;;  %v12601_v3 = vld [vmem:[#allocation118_spill] sm:$0xff]  ;;  %v3434_v35 = vadd.f32 %v12603_v22, %v3362_v30  ;;  %v12606_v57 = vld [vmem:[#allocation188_spill] sm:$0xff]  ;;  %v3474_v37 = vadd.f32 %v12609_v11, %v3426_v10  ;;  %v12610_v30 = vld [vmem:[#allocation105_spill] sm:$0xff]  ;;  %v4323_v28 = vpop.permute.xlu1 %4322 }
 0x4d0   :  { %v3435_v24 = vadd.f32 %v12601_v3, %v3363_v31  ;;  %v12604_v2 = vld [vmem:[#allocation134_spill] sm:$0xff]  ;;  %4498 = vrot.lane.b32.xlu1 %v12606_v57, %s5456_s28  ;;  %v12607_v1 = vld [vmem:[#allocation96_spill] sm:$0xff]  ;;  %v4281_v33 = vadd.f32 %v10048_v54, %v4209_v17  ;;  %v12612_v50 = vld [vmem:[#allocation111_spill] sm:$0xff]  ;;  %v4255_v54 = vpop.permute.xlu0 %4254 }
 0x4d1   :  { %v3520_v16 = vadd.f32 %v12604_v2, %v3472_v29  ;;  %v12605_v49 = vld [vmem:[#allocation202_spill] sm:$0xff]  ;;  %v3473_v31 = vadd.f32 %v12607_v1, %v3425_v23  ;;  %4454 = vrot.lane.b32.xlu0 %v12610_v30, %s5455_s27  ;;  %v3476_v27 = vadd.f32 %v12612_v50, %v3428_v43  ;;  %v12613_v48 = vld [vmem:[#allocation156_spill] sm:$0xff]  ;;  %v12615_v3 = vld [vmem:[#allocation115_spill] sm:$0xff] }
 0x4d2   :  { %v4139_v63 = vadd.f32 %v12605_v49, %v10164_v13  ;;  %v12608_v62 = vld [vmem:[#allocation102_spill] sm:$0xff]  ;;  %v12616_v42 = vld [vmem:[#allocation117_spill] sm:$0xff]  ;;  %v10213_v47 = vadd.f32 %v4323_v28, %v4281_v33  ;;  %v12617_v17 = vld [vmem:[#allocation120_spill] sm:$0xff] }
 0x4d3   :  { %v3475_v40 = vadd.f32 %v12608_v62, %v3427_v0  ;;  %v12611_v55 = vld [vmem:[#allocation110_spill] sm:$0xff]  ;;  %v3568_v36 = vadd.f32 %v12613_v48, %v3520_v16  ;;  %v3478_v0 = vadd.f32 %v12615_v3, %v3430_v6  ;;  %v3481_v10 = vadd.f32 %v12616_v42, %v3433_v52  ;;  %v12618_v2 = vld [vmem:[#allocation165_spill] sm:$0xff]  ;;  %v12619_v49 = vld [vmem:[#allocation363_spill] sm:$0xff] }
 0x4d4   :  { %v3477_v25 = vadd.f32 %v12611_v55, %v3429_v4  ;;  %v4211_v29 = vadd.f32 %v10057_v53, %v4139_v63  ;;  %v12614_v26 = vld [vmem:[#allocation114_spill] sm:$0xff]  ;;  %v3480_v22 = vadd.f32 %v12617_v17, %v3432_v56  ;;  %v10218_v43 = vmul.f32 0.0010283801, %v12619_v49  ;;  %v12620_v53 = vld [vmem:[#allocation128_spill] sm:$0xff]  ;;  %v12624_v62 = vld [vmem:[#allocation137_spill] sm:$0xff]  ;;  %v4387_v17 = vpop.permute.xlu0 %4386 }
 0x4d5   :  { %v3479_v23 = vadd.f32 %v12614_v26, %v3431_v39  ;;  %v3616_v4 = vadd.f32 %v12618_v2, %v3568_v36  ;;  %4586 = vrot.lane.b32.xlu1 %v12620_v53, %s5458_s30  ;;  %v12621_v39 = vld [vmem:[#allocation125_spill] sm:$0xff]  ;;  %v12622_v6 = vld [vmem:[#allocation126_spill] sm:$0xff]  ;;  %v12623_v52 = vld [vmem:[#allocation132_spill] sm:$0xff]  ;;  %v3523_v11 = vadd.f32 %v12624_v62, %v3475_v40  ;;  %v4391_v26 = vpop.permute.xlu1 %4390 }
 0x4d6   :  { %v10220_v16 = vadd.f32 %v4255_v54, %v4211_v29  ;;  %v3483_v63 = vadd.f32 %v12621_v39, %v3435_v24  ;;  %v3482_v57 = vadd.f32 %v12622_v6, %v3434_v35  ;;  %v3521_v1 = vadd.f32 %v12623_v52, %v3473_v31  ;;  %v12625_v56 = vld [vmem:[#allocation161_spill] sm:$0xff]  ;;  %v12626_v33 = vld [vmem:[#allocation138_spill] sm:$0xff]  ;;  %v12628_v48 = vld [vmem:[#allocation147_spill] sm:$0xff] }
 0x4d7   :  { %4542 = vrot.lane.b32.xlu0 %v12625_v56, %s5457_s29  ;;  %v3522_v30 = vadd.f32 %v12626_v33, %v3474_v37  ;;  %v12627_v55 = vld [vmem:[#allocation141_spill] sm:$0xff]  ;;  %v3524_v36 = vadd.f32 %v12628_v48, %v3476_v27  ;;  %v12629_v29 = vld [vmem:[#allocation388_spill] sm:$0xff]  ;;  %v12631_v35 = vld [vmem:[#allocation150_spill] sm:$0xff]  ;;  %v10240_v40 = vadd.f32 %v4391_v26, %v10083_v14 }
 0x4d8   :  { %v3525_v50 = vadd.f32 %v12627_v55, %v3477_v25  ;;  %v10234_v28 = vadd.f32 %v12629_v29, %v3616_v4  ;;  %v12630_v24 = vld [vmem:[#allocation153_spill] sm:$0xff]  ;;  %v3526_v42 = vadd.f32 %v12631_v35, %v3478_v0  ;;  %v12632_v31 = vld [vmem:[#allocation399_spill] sm:$0xff]  ;;  %v12633_v2 = vld [vmem:[#allocation402_spill] sm:$0xff]  ;;  %v10247_v4 = vadd.f32 %v4387_v17, %v10088_v15 }
 0x4d9   :  { %v3527_v3 = vadd.f32 %v12630_v24, %v3479_v23  ;;  %v3529_v54 = vadd.f32 %v12632_v31, %v3481_v10  ;;  %v3528_v37 = vadd.f32 %v12633_v2, %v3480_v22  ;;  %v12634_v49 = vld [vmem:[#allocation207_spill] sm:$0xff]  ;;  %v12635_v27 = vld [vmem:[#allocation213_spill] sm:$0xff]  ;;  %4642 = vrot.lane.b32.xlu1 %v10004_v12, %s5459_s5  ;;  %v12636_v23 = vld [vmem:[#allocation104_spill] sm:$0xff]  ;;  %v4329_v12 = vpop.permute.xlu1 %4328  ;;  %v4261_v24 = vpop.permute.xlu0 %4260 }
 0x4da   :  { %v3570_v25 = vadd.f32 %v12634_v49, %v3522_v30  ;;  %v4142_v53 = vadd.f32 %v12635_v27, %v10218_v43  ;;  %v3531_v0 = vadd.f32 %v12636_v23, %v3483_v63  ;;  %v12637_v10 = vld [vmem:[#allocation154_spill] sm:$0xff]  ;;  %v12638_v14 = vld [vmem:[#allocation203_spill] sm:$0xff]  ;;  %v12639_v52 = vld [vmem:[#allocation369_spill] sm:$0xff]  ;;  %v3694_v15 = vmul.f32 0.007598758, %v10234_v28 }
 0x4db   :  { %v3530_v39 = vadd.f32 %v12637_v10, %v3482_v57  ;;  %v3569_v6 = vadd.f32 %v12638_v14, %v3521_v1  ;;  %v3571_v62 = vadd.f32 %v12639_v52, %v3523_v11  ;;  %4638 = vrot.lane.b32.xlu0 %v10015_v20, %s5459_s5  ;;  %v12640_v22 = vld [vmem:[#allocation159_spill] sm:$0xff]  ;;  %v12641_v33 = vld [vmem:[#allocation166_spill] sm:$0xff]  ;;  %v12643_v29 = vld [vmem:[#allocation160_spill] sm:$0xff]  ;;  %v10265_v11 = vadd.f32 %v4329_v12, %v10104_v7 }
 0x4dc   :  { %v3573_v56 = vadd.f32 %v12640_v22, %v3525_v50  ;;  %v3618_v30 = vadd.f32 %v12641_v33, %v3570_v25  ;;  %v4214_v55 = vadd.f32 %v10106_v44, %v4142_v53  ;;  %v12642_v48 = vld [vmem:[#allocation371_spill] sm:$0xff]  ;;  %v3575_v57 = vadd.f32 %v12643_v29, %v3527_v3  ;;  %v12644_v26 = vld [vmem:[#allocation224_spill] sm:$0xff]  ;;  %v12645_v20 = vld [vmem:[#allocation214_spill] sm:$0xff] }
 0x4dd   :  { %v3572_v63 = vadd.f32 %v12642_v48, %v3524_v36  ;;  %v3617_v1 = vadd.f32 %v12644_v26, %v3569_v6  ;;  %v3574_v35 = vadd.f32 %v12645_v20, %v3526_v42  ;;  %v12646_v50 = vld [vmem:[#allocation215_spill] sm:$0xff]  ;;  %v12647_v17 = vld [vmem:[#allocation352_spill] sm:$0xff]  ;;  %v12649_v36 = vld [vmem:[#allocation162_spill] sm:$0xff] }
 0x4de   :  { %v3577_v31 = vadd.f32 %v12646_v50, %v3529_v54  ;;  %v10270_v2 = vadd.f32 %v12647_v17, %v3618_v30  ;;  %v10272_v49 = vadd.f32 %v4261_v24, %v4214_v55  ;;  %v12648_v44 = vld [vmem:[#allocation144_spill] sm:$0xff]  ;;  %v3576_v3 = vadd.f32 %v12649_v36, %v3528_v37  ;;  %v12650_v25 = vld [vmem:[#allocation218_spill] sm:$0xff]  ;;  %v12651_v53 = vld [vmem:[#allocation163_spill] sm:$0xff]  ;;  %v4441_v55 = vpop.permute.xlu1 %4440 }
 0x4df   :  { %4592 = vrot.lane.b32.xlu1 %v12648_v44, %s5458_s30  ;;  %v3579_v27 = vadd.f32 %v12650_v25, %v3531_v0  ;;  %v3578_v7 = vadd.f32 %v12651_v53, %v3530_v39  ;;  %v12652_v23 = vld [vmem:[#allocation185_spill] sm:$0xff]  ;;  %v12653_v42 = vld [vmem:[#allocation164_spill] sm:$0xff]  ;;  %v12654_v54 = vld [vmem:[#allocation375_spill] sm:$0xff]  ;;  %v3706_v30 = vrot.slane %v3694_v15, 1  ;;  %v10299_v26 = vadd.f32 %v4441_v55, %v10132_v60 }
 0x4e0   :  { %v3677_v10 = vadd.f32 %v12652_v23, %v3617_v1  ;;  %4548 = vrot.lane.b32.xlu0 %v12653_v42, %s5457_s29  ;;  %v3619_v14 = vadd.f32 %v12654_v54, %v3571_v62  ;;  %v12655_v6 = vld [vmem:[#allocation167_spill] sm:$0xff]  ;;  %v12656_v22 = vld [vmem:[#allocation168_spill] sm:$0xff]  ;;  %v12657_v37 = vld [vmem:[#allocation170_spill] sm:$0xff]  ;;  %v4397_v62 = vpop.permute.xlu0 %4396  ;;  %v3695_v15 = vmul.f32 0.007598758, %v10270_v2 }
 0x4e1   :  { %v10284_v52 = vadd.f32 %v12655_v6, %v3573_v56  ;;  %v10287_v33 = vadd.f32 %v12656_v22, %v3572_v63  ;;  %v10290_v12 = vadd.f32 %v12657_v37, %v3575_v57  ;;  %v12658_v0 = vld [vmem:[#allocation171_spill] sm:$0xff]  ;;  %v12659_v48 = vld [vmem:[#allocation176_spill] sm:$0xff]  ;;  %v3688_v56 = vmul.f32 0.0010283801, %v10234_v28  ;;  %v12660_v57 = vld [vmem:[#allocation358_spill] sm:$0xff] }
 0x4e2   :  { %v10293_v39 = vadd.f32 %v12658_v0, %v3574_v35  ;;  %v10296_v29 = vadd.f32 %v12659_v48, %v3577_v31  ;;  %v3724_v63 = vmul.f32 0.036000773, %v10234_v28  ;;  %v10305_v1 = vadd.f32 %v4397_v62, %v10138_v45  ;;  %v12661_v24 = vld [vmem:[#allocation177_spill] sm:$0xff]  ;;  %v12662_v31 = vld [vmem:[#allocation364_spill] sm:$0xff]  ;;  %v12663_v17 = vld [vmem:[#allocation182_spill] sm:$0xff] }
 0x4e3   :  { %4502 = vrot.lane.b32.xlu1 %v12660_v57, %s5456_s28  ;;  %v10310_v20 = vadd.f32 %v12661_v24, %v3576_v3  ;;  %v10312_v35 = vmul.f32 0.10936069, %v3677_v10  ;;  %v10314_v60 = vmul.f32 0.21300554, %v3677_v10  ;;  %v3754_v50 = vmul.f32 0.10936069, %v10234_v28  ;;  %v4485_v3 = vpop.permute.xlu1 %4484 }
 0x4e4   :  { %4648 = vrot.lane.b32.xlu0 %v12662_v31, %s5459_s5  ;;  %v10320_v44 = vadd.f32 %v12663_v17, %v3579_v27  ;;  %v12664_v45 = vld [vmem:[#allocation183_spill] sm:$0xff]  ;;  %v3718_v25 = vadd.f32 %v3706_v30, %v3688_v56  ;;  %v10328_v42 = vmul.f32 0.26601171, %v3677_v10  ;;  %v10330_v54 = vmul.f32 0.036000773, %v3677_v10  ;;  %v4481_v55 = vpop.permute.xlu0 %4480  ;;  %v12674_v31 = vld [vmem:[#allocation189_spill] sm:$0xff] }
 0x4e5   :  { %v10323_v36 = vadd.f32 %v12664_v45, %v3578_v7  ;;  %v12665_v53 = vld [vmem:[#allocation351_spill] sm:$0xff]  ;;  %v10332_v6 = vmul.f32 0.007598758, %v3677_v10  ;;  %v10335_v22 = vadd.f32 %v4485_v3, %v10160_v9  ;;  %v10337_v27 = vmul.f32 0.0010283801, %v3677_v10  ;;  %v12670_v9 = vld [vmem:[#allocation169_spill] sm:$0xff] }
 0x4e6   :  { %v10326_v23 = vadd.f32 %v12665_v53, %v3619_v14  ;;  %12666 = vst [vmem:[#allocation222_spill] sm:$0xff] %v10330_v54  ;;  %v3736_v37 = vrot.slane %v3724_v63, 2  ;;  %v3707_v7 = vrot.slane %v3695_v15, 1  ;;  %v10340_v30 = vadd.f32 %v4481_v55, %v10167_v51  ;;  %v12669_v14 = vld [vmem:[#allocation152_spill] sm:$0xff] }
 0x4e7   :  { %12667 = vst [vmem:[#allocation225_spill] sm:$0xff] %v10332_v6  ;;  %12668 = vst [vmem:[#allocation226_spill] sm:$0xff] %v10337_v27  ;;  %4590 = vrot.lane.b32.xlu1 %v12669_v14, %s5458_s30  ;;  %v3779_v0 = vrot.slane %v10312_v35, 3  ;;  %v3833_v48 = vrot.slane %v10314_v60, 4  ;;  %v3778_v62 = vrot.slane %v3754_v50, 3  ;;  %v4259_v57 = vpop.permute.xlu1 %4258  ;;  %v3887_v24 = vrot.slane %v10328_v42, 5 }
 0x4e8   :  { %v10347_v56 = vmul.f32 0.21300554, %v10234_v28  ;;  %4546 = vrot.lane.b32.xlu0 %v12670_v9, %s5457_s29  ;;  %v3748_v10 = vadd.f32 %v3736_v37, %v3718_v25  ;;  %v10352_v63 = vmul.f32 0.10936069, %v10326_v23  ;;  %v3689_v51 = vmul.f32 0.0010283801, %v10270_v2  ;;  %v4191_v53 = vpop.permute.xlu0 %4190 }
 0x4e9   :  { %v3725_v15 = vmul.f32 0.036000773, %v10270_v2  ;;  %v10359_v17 = vmul.f32 0.10936069, %v10270_v2  ;;  %v10362_v45 = vadd.f32 %v4259_v57, %v10189_v38  ;;  %v3947_v25 = vrot.slane %v10312_v35, 7  ;;  %v12671_v14 = vld [vmem:[#allocation87_spill] sm:$0xff] }
 0x4ea   :  { %v3862_v3 = vmul.f32 0.26601171, %v10234_v28  ;;  %v3719_v55 = vadd.f32 %v3707_v7, %v3689_v51  ;;  %v10367_v37 = vadd.f32 %v4191_v53, %v10196_v58  ;;  %v3780_v9 = vsel %vm797_vm0, %v3778_v62, %v3779_v0  ;;  %v12672_v0 = vld [vmem:[#allocation187_spill] sm:$0xff] }
 0x4eb   :  { %4596 = vrot.lane.b32.xlu1 %v12671_v14, %s5458_s30  ;;  %v3832_v19 = vrot.slane %v10347_v56, 4  ;;  %v3946_v38 = vrot.slane %v3754_v50, 7  ;;  %v3802_v35 = vadd.f32 %v3780_v9, %v3748_v10  ;;  %v3782_v28 = vrot.slane %v10352_v63, 3  ;;  %v4395_v51 = vpop.permute.xlu1 %4394  ;;  %v12673_v9 = vld [vmem:[#allocation186_spill] sm:$0xff] }
 0x4ec   :  { %4646 = vrot.lane.b32.xlu0 %v10145_v59, %s5459_s5  ;;  %v10378_v7 = vmul.f32 0.21300554, %v10326_v23  ;;  %v3737_v58 = vrot.slane %v3725_v15, 2  ;;  %v3781_v57 = vrot.slane %v10359_v17, 3  ;;  %v10382_v53 = vmul.f32 0.21300554, %v10270_v2  ;;  %v4327_v59 = vpop.permute.xlu0 %4326 }
 0x4ed   :  { %v10386_v62 = vadd.f32 %v12672_v0, %v10287_v33  ;;  %v10389_v50 = vadd.f32 %v4395_v51, %v10213_v47  ;;  %v3886_v10 = vrot.slane %v3862_v3, 5  ;;  %v10393_v42 = vadd.f32 %v12673_v9, %v10284_v52 }
 0x4ee   :  { %v3749_v14 = vadd.f32 %v3737_v58, %v3719_v55  ;;  %v10396_v15 = vadd.f32 %v4327_v59, %v10220_v16  ;;  %v3834_v33 = vsel %vm852_vm1, %v3832_v19, %v3833_v48  ;;  %v3916_v47 = vrot.slane %v10347_v56, 6 }
 0x4ef   :  { %4550 = vrot.lane.b32.xlu1 %v12674_v31, %s5457_s29  ;;  %v10404_v51 = vsel %vm969_vm4, %v3946_v38, %v3947_v25  ;;  %v3856_v52 = vadd.f32 %v3834_v33, %v3802_v35  ;;  %v3836_v3 = vrot.slane %v10378_v7, 4  ;;  %v3865_v16 = vmul.f32 0.26601171, %v10326_v23  ;;  %v4439_v31 = vpop.permute.xlu1 %4438 }
 0x4f0   :  { %4652 = vrot.lane.b32.xlu0 %v10055_v61, %s5459_s5  ;;  %v3864_v55 = vmul.f32 0.26601171, %v10270_v2  ;;  %v3783_v58 = vsel %vm797_vm0, %v3781_v57, %v3782_v28  ;;  %v3835_v19 = vrot.slane %v10382_v53, 4  ;;  %v3696_v48 = vmul.f32 0.007598758, %v10386_v62  ;;  %v4435_v25 = vpop.permute.xlu0 %4434 }
 0x4f1   :  { %v10415_v56 = vadd.f32 %v4439_v31, %v10240_v40  ;;  %v3888_v61 = vsel %vm907_vm2, %v3886_v10, %v3887_v24  ;;  %v3803_v38 = vadd.f32 %v3783_v58, %v3749_v14  ;;  %v10419_v35 = vmul.f32 0.10936069, %v10393_v42  ;;  %v12677_v24 = vld [vmem:[#allocation211_spill] sm:$0xff] }
 0x4f2   :  { %v10422_v0 = vadd.f32 %v4435_v25, %v10247_v4  ;;  %v3920_v2 = vrot.slane %v10378_v7, 6  ;;  %v10429_v40 = vmul.f32 0.036000773, %v10326_v23  ;;  %v10432_v57 = vmul.f32 0.007598758, %v10326_v23 }
 0x4f3   :  { %4650 = vrot.lane.b32.xlu1 %v10164_v13, %s5459_s5  ;;  %v3910_v59 = vadd.f32 %v3888_v61, %v3856_v52  ;;  %v3890_v10 = vrot.slane %v3865_v16, 5  ;;  %v10437_v4 = vmul.f32 0.0010283801, %v10326_v23  ;;  %v3919_v13 = vrot.slane %v10382_v53, 6  ;;  %v4401_v14 = vpop.permute.xlu1 %4400  ;;  %v12679_v23 = vld [vmem:[#allocation377_spill] sm:$0xff] }
 0x4f4   :  { %12675 = vst [vmem:[#allocation227_spill] sm:$0xff] %v10429_v40  ;;  %12676 = vst [vmem:[#allocation228_spill] sm:$0xff] %v10432_v57  ;;  %4594 = vrot.lane.b32.xlu0 %v12677_v24, %s5458_s30  ;;  %v3837_v7 = vsel %vm852_vm1, %v3835_v19, %v3836_v3  ;;  %v3889_v9 = vrot.slane %v3864_v55, 5  ;;  %v3708_v33 = vrot.slane %v3696_v48, 1  ;;  %v10442_v31 = vadd.f32 %v4401_v14, %v10265_v11  ;;  %v4333_v58 = vpop.permute.xlu0 %4332 }
 0x4f5   :  { %12678 = vst [vmem:[#allocation251_spill] sm:$0xff] %v10437_v4  ;;  %v3857_v25 = vadd.f32 %v3837_v7, %v3803_v38  ;;  %v3785_v52 = vrot.slane %v10419_v35, 3  ;;  %v10447_v16 = vadd.f32 %v4333_v58, %v10272_v49  ;;  %v12680_v53 = vrot.slane %v10314_v60, 6  ;;  %v12681_v60 = vld [vmem:[#allocation191_spill] sm:$0xff] }
 0x4f6   :  { %v10455_v55 = vmul.f32 0.21300554, %v10393_v42  ;;  %v3690_v11 = vmul.f32 0.0010283801, %v10386_v62  ;;  %v3726_v19 = vmul.f32 0.036000773, %v10386_v62  ;;  %v3891_v24 = vsel %vm907_vm2, %v3889_v9, %v3890_v10 }
 0x4f7   :  { %4598 = vrot.lane.b32.xlu1 %v12679_v23, %s5458_s30  ;;  %v3918_v3 = vsel %vm938_vm3, %v3916_v47, %v12680_v53  ;;  %v10464_v49 = vmul.f32 0.26601171, %v10393_v42  ;;  %v10467_v61 = vmul.f32 0.10936069, %v10386_v62  ;;  %v10471_v47 = vadd.f32 %v12681_v60, %v10293_v39  ;;  %v4489_v38 = vpop.permute.xlu1 %4488  ;;  %v12682_v9 = vld [vmem:[#allocation190_spill] sm:$0xff] }
 0x4f8   :  { %4656 = vrot.lane.b32.xlu0 %v10218_v43, %s5459_s5  ;;  %v10461_v48 = vadd.f32 %v3918_v3, %v3910_v59  ;;  %v3720_v14 = vadd.f32 %v3708_v33, %v3690_v11  ;;  %v10475_v7 = vmul.f32 0.21300554, %v10386_v62  ;;  %v10478_v43 = vadd.f32 %v4489_v38, %v10299_v26  ;;  %v4445_v59 = vpop.permute.xlu0 %4444  ;;  %v12684_v26 = vld [vmem:[#allocation193_spill] sm:$0xff] }
 0x4f9   :  { %v3911_v58 = vadd.f32 %v3891_v24, %v3857_v25  ;;  %v3921_v23 = vsel %vm938_vm3, %v3919_v13, %v3920_v2  ;;  %v10483_v3 = vadd.f32 %v4445_v59, %v10305_v1  ;;  %v3839_v39 = vrot.slane %v10455_v55, 4 }
 0x4fa   :  { %v3738_v10 = vrot.slane %v3726_v19, 2  ;;  %v10490_v33 = vadd.f32 %v12682_v9, %v10290_v12  ;;  %v10494_v25 = vadd.f32 %v12684_v26, %v10310_v20  ;;  %v3697_v13 = vmul.f32 0.007598758, %v10471_v47  ;;  %v12687_v26 = vld [vmem:[#allocation195_spill] sm:$0xff] }
 0x4fb   :  { %4658 = vrot.lane.b32.xlu1 %v10172_v46, %s5459_s5  ;;  %v3784_v46 = vrot.slane %v10467_v61, 3  ;;  %v4533_v11 = vpop.permute.xlu1 %4532  ;;  %v3838_v12 = vrot.slane %v10475_v7, 4  ;;  %v10504_v60 = vmul.f32 0.26601171, %v10386_v62  ;;  %v10569_v32 = vmul.f32 0.26601171, %v10471_v47 }
 0x4fc   :  { %12683 = vst [vmem:[#allocation229_spill] sm:$0xff] %v10490_v33  ;;  %4654 = vrot.lane.b32.xlu0 %v10148_v18, %s5459_s5  ;;  %v3750_v19 = vadd.f32 %v3738_v10, %v3720_v14  ;;  %v10507_v20 = vadd.f32 %v4533_v11, %v10335_v22  ;;  %v4529_v38 = vpop.permute.xlu0 %4528  ;;  %v10509_v18 = vadd.f32 %v3921_v23, %v3911_v58  ;;  %v10517_v14 = vmul.f32 0.10936069, %v10490_v33  ;;  %v12685_v10 = vld [vmem:[#allocation192_spill] sm:$0xff] }
 0x4fd   :  { %v10514_v9 = vadd.f32 %v4529_v38, %v10340_v30  ;;  %v10521_v62 = vadd.f32 %v12685_v10, %v10296_v29  ;;  %v3698_v22 = vmul.f32 0.007598758, %v10494_v25  ;;  %v10526_v58 = vadd.f32 %v12687_v26, %v10323_v36 }
 0x4fe   :  { %v3786_v23 = vsel %vm797_vm0, %v3784_v46, %v3785_v52  ;;  %v10530_v11 = vmul.f32 0.21300554, %v10490_v33  ;;  %v10533_v30 = vmul.f32 0.26601171, %v10490_v33  ;;  %v3709_v38 = vrot.slane %v3697_v13, 1 }
 0x4ff   :  { %12686 = vst [vmem:[#allocation230_spill] sm:$0xff] %v10521_v62  ;;  %v4331_v59 = vpop.permute.xlu1 %4330  ;;  %v10535_v53 = vadd.f32 %v3786_v23, %v3750_v19  ;;  %v3840_v29 = vsel %vm852_vm1, %v3838_v12, %v3839_v39  ;;  %v3691_v52 = vmul.f32 0.0010283801, %v10471_v47  ;;  %v3727_v46 = vmul.f32 0.036000773, %v10471_v47 }
 0x500   :  { %v10540_v21 = vadd.f32 %v4331_v59, %v10362_v45  ;;  %v4263_v36 = vpop.permute.xlu0 %4262  ;;  %v10545_v26 = vmul.f32 0.10936069, %v10471_v47  ;;  %v3788_v19 = vrot.slane %v10517_v14, 3  ;;  %v10552_v39 = vmul.f32 0.10936069, %v10521_v62 }
 0x501   :  { %v10548_v13 = vadd.f32 %v4263_v36, %v10367_v37  ;;  %v3710_v12 = vrot.slane %v3698_v22, 1  ;;  %v3699_v45 = vmul.f32 0.007598758, %v10526_v58  ;;  %v3842_v59 = vrot.slane %v10530_v11, 4 }
 0x502   :  { %v3721_v28 = vadd.f32 %v3709_v38, %v3691_v52  ;;  %v3728_v24 = vmul.f32 0.036000773, %v10494_v25  ;;  %v10559_v10 = vmul.f32 0.21300554, %v10471_v47  ;;  %v3692_v37 = vmul.f32 0.0010283801, %v10494_v25 }
 0x503   :  { %v4443_v2 = vpop.permute.xlu1 %4442  ;;  %v10563_v36 = vmul.f32 0.10936069, %v10494_v25  ;;  %v3739_v34 = vrot.slane %v3727_v46, 2  ;;  %v12689_v38 = vld [vmem:[#allocation194_spill] sm:$0xff]  ;;  %v3787_v41 = vrot.slane %v10545_v26, 3  ;;  %v3791_v8 = vrot.slane %v10552_v39, 3 }
 0x504   :  { %v10566_v22 = vadd.f32 %v4443_v2, %v10389_v50  ;;  %v4399_v1 = vpop.permute.xlu0 %4398  ;;  %v10573_v52 = vadd.f32 %v12689_v38, %v10320_v44  ;;  %v3722_v27 = vadd.f32 %v3710_v12, %v3692_v37  ;;  %v3711_v5 = vrot.slane %v3699_v45, 1 }
 0x505   :  { %v10576_v23 = vadd.f32 %v4399_v1, %v10396_v15  ;;  %v3751_v50 = vadd.f32 %v3739_v34, %v3721_v28  ;;  %v10581_v2 = vmul.f32 0.21300554, %v10521_v62  ;;  %v3740_v46 = vrot.slane %v3728_v24, 2 }
 0x506   :  { %12688 = vst [vmem:[#allocation231_spill] sm:$0xff] %v10566_v22  ;;  %v10584_v47 = vmul.f32 0.21300554, %v10494_v25  ;;  %v3790_v44 = vrot.slane %v10563_v36, 3  ;;  %v3693_v15 = vmul.f32 0.0010283801, %v10526_v58  ;;  %v3789_v37 = vsel %vm797_vm0, %v3787_v41, %v3788_v19 }
 0x507   :  { %12690 = vst [vmem:[#allocation370_spill] sm:$0xff] %v10576_v23  ;;  %v4487_v4 = vpop.permute.xlu1 %4486  ;;  %v3729_v1 = vmul.f32 0.036000773, %v10526_v58  ;;  %v3841_v34 = vrot.slane %v10559_v10, 4  ;;  %v10594_v28 = vmul.f32 0.10936069, %v10573_v52  ;;  %v3752_v33 = vadd.f32 %v3740_v46, %v3722_v27 }
 0x508   :  { %v10590_v38 = vadd.f32 %v4487_v4, %v10415_v56  ;;  %v4483_v12 = vpop.permute.xlu0 %4482  ;;  %v10597_v24 = vmul.f32 0.10936069, %v10526_v58  ;;  %v3871_v6 = vmul.f32 0.26601171, %v10521_v62  ;;  %v3723_v40 = vadd.f32 %v3711_v5, %v3693_v15 }
 0x509   :  { %v10600_v45 = vadd.f32 %v4483_v12, %v10422_v0  ;;  %v3805_v56 = vadd.f32 %v3789_v37, %v3751_v50  ;;  %v3845_v4 = vrot.slane %v10581_v2, 4  ;;  %v3870_v57 = vmul.f32 0.26601171, %v10494_v25 }
 0x50a   :  { %12691 = vst [vmem:[#allocation232_spill] sm:$0xff] %v10590_v38  ;;  %v3844_v38 = vrot.slane %v10584_v47, 4  ;;  %v3792_v23 = vsel %vm797_vm0, %v3790_v44, %v3791_v8  ;;  %v10609_v22 = vmul.f32 0.21300554, %v10573_v52  ;;  %v3741_v0 = vrot.slane %v3729_v1, 2 }
 0x50b   :  { %12692 = vst [vmem:[#allocation234_spill] sm:$0xff] %v10600_v45  ;;  %v4449_v54 = vpop.permute.xlu1 %4448  ;;  %v3794_v5 = vrot.slane %v10594_v28, 3  ;;  %v3793_v27 = vrot.slane %v10597_v24, 3  ;;  %v10617_v50 = vmul.f32 0.21300554, %v10526_v58  ;;  %v3858_v8 = vadd.f32 %v3840_v29, %v10535_v53 }
 0x50c   :  { %v10612_v41 = vadd.f32 %v4449_v54, %v10442_v31  ;;  %v4405_v19 = vpop.permute.xlu0 %4404  ;;  %v3843_v46 = vsel %vm852_vm1, %v3841_v34, %v3842_v59  ;;  %v3806_v44 = vadd.f32 %v3792_v23, %v3752_v33  ;;  %v3753_v15 = vadd.f32 %v3741_v0, %v3723_v40 }
 0x50d   :  { %v10620_v25 = vadd.f32 %v4405_v19, %v10447_v16  ;;  %v3859_v1 = vadd.f32 %v3843_v46, %v3805_v56  ;;  %v3895_v54 = vrot.slane %v10569_v32, 5  ;;  %v3899_v31 = vrot.slane %v3871_v6, 5 }
 0x50e   :  { %12693 = vst [vmem:[#allocation263_spill] sm:$0xff] %v10612_v41  ;;  %v3898_v12 = vrot.slane %v3870_v57, 5  ;;  %v3846_v41 = vsel %vm852_vm1, %v3844_v38, %v3845_v4  ;;  %v3848_v45 = vrot.slane %v10609_v22, 4  ;;  %v3873_v62 = vmul.f32 0.26601171, %v10573_v52 }
 0x50f   :  { %v4537_v37 = vpop.permute.xlu1 %4536  ;;  %v3795_v29 = vsel %vm797_vm0, %v3793_v27, %v3794_v5  ;;  %v3847_v40 = vrot.slane %v10617_v50, 4  ;;  %v3872_v33 = vmul.f32 0.26601171, %v10526_v58  ;;  %v12694_v6 = vrot.slane %v10464_v49, 5 }
 0x510   :  { %v10629_v16 = vadd.f32 %v4537_v37, %v10478_v43  ;;  %v4493_v53 = vpop.permute.xlu0 %4492  ;;  %v12695_v57 = vrot.slane %v10504_v60, 5  ;;  %v3926_v23 = vrot.slane %v10530_v11, 6  ;;  %v3860_v43 = vadd.f32 %v3846_v41, %v3806_v44 }
 0x511   :  { %v10635_v32 = vadd.f32 %v4493_v53, %v10483_v3  ;;  %v3807_v38 = vadd.f32 %v3795_v29, %v3753_v15  ;;  %v12696_v56 = vrot.slane %v10533_v30, 5  ;;  %v3925_v58 = vrot.slane %v10559_v10, 6 }
 0x512   :  { %v3894_v59 = vsel %vm907_vm2, %v12695_v57, %v12694_v6  ;;  %v3929_v3 = vrot.slane %v10581_v2, 6  ;;  %v3900_v49 = vsel %vm907_vm2, %v3898_v12, %v3899_v31  ;;  %v3928_v60 = vrot.slane %v10584_v47, 6 }
 0x513   :  { %v3912_v34 = vadd.f32 %v3894_v59, %v3858_v8  ;;  %v3897_v4 = vsel %vm907_vm2, %v3895_v54, %v12696_v56  ;;  %v4581_v0 = vpop.permute.xlu1 %4580  ;;  %v3902_v41 = vrot.slane %v3873_v62, 5  ;;  %v3849_v27 = vsel %vm852_vm1, %v3847_v40, %v3848_v45 }
 0x514   :  { %v3913_v19 = vadd.f32 %v3897_v4, %v3859_v1  ;;  %v10651_v5 = vadd.f32 %v4581_v0, %v10507_v20  ;;  %v4577_v11 = vpop.permute.xlu0 %4576  ;;  %v3901_v30 = vrot.slane %v3872_v33, 5  ;;  %v12697_v10 = vrot.slane %v10455_v55, 6  ;;  %v12705_v4 = vld [vmem:[#allocation222_spill] sm:$0xff] }
 0x515   :  { %v10655_v8 = vadd.f32 %v4577_v11, %v10514_v9  ;;  %v12698_v2 = vrot.slane %v10475_v7, 6  ;;  %v3956_v44 = vrot.slane %v10517_v14, 7  ;;  %v3914_v47 = vadd.f32 %v3900_v49, %v3860_v43  ;;  %v12706_v49 = vld [vmem:[#allocation228_spill] sm:$0xff]  ;;  %v12707_v11 = vld [vmem:[#allocation227_spill] sm:$0xff] }
 0x516   :  { %v3861_v15 = vadd.f32 %v3849_v27, %v3807_v38  ;;  %v3927_v1 = vsel %vm938_vm3, %v3925_v58, %v3926_v23  ;;  %v3955_v62 = vrot.slane %v10545_v26, 7  ;;  %v3959_v45 = vrot.slane %v10552_v39, 7  ;;  %v12703_v23 = vld [vmem:[#allocation231_spill] sm:$0xff]  ;;  %v12708_v27 = vld [vmem:[#allocation229_spill] sm:$0xff] }
 0x517   :  { %v3924_v46 = vsel %vm938_vm3, %v12698_v2, %v12697_v10  ;;  %v4403_v54 = vpop.permute.xlu1 %4402  ;;  %v3943_v9 = vadd.f32 %v3927_v1, %v3913_v19  ;;  %v3930_v31 = vsel %vm938_vm3, %v3928_v60, %v3929_v3  ;;  %v3958_v55 = vrot.slane %v10563_v36, 7 }
 0x518   :  { %v3942_v20 = vadd.f32 %v3924_v46, %v3912_v34  ;;  %v10669_v7 = vadd.f32 %v4403_v54, %v10540_v21  ;;  %v4335_v12 = vpop.permute.xlu0 %4334  ;;  %v3932_v14 = vrot.slane %v10609_v22, 6  ;;  %v3903_v37 = vsel %vm907_vm2, %v3901_v30, %v3902_v41  ;;  %v12711_v54 = vld [vmem:[#allocation234_spill] sm:$0xff] }
 0x519   :  { %v3931_v53 = vrot.slane %v10617_v50, 6  ;;  %v10675_v26 = vadd.f32 %v4335_v12, %v10548_v13  ;;  %v3970_v39 = vadd.f32 %v10404_v51, %v10461_v48  ;;  %v12699_v29 = vrot.slane %v10352_v63, 7 }
 0x51a   :  { %v12700_v36 = vrot.slane %v10359_v17, 7  ;;  %v3944_v40 = vadd.f32 %v3930_v31, %v3914_v47  ;;  %v3915_v33 = vadd.f32 %v3903_v37, %v3861_v15  ;;  %v3978_v6 = vmul.f32 0.036000773, %v10393_v42  ;;  %v12710_v47 = vld [vmem:[#allocation232_spill] sm:$0xff]  ;;  %v12712_v31 = vld [vmem:[#allocation225_spill] sm:$0xff] }
 0x51b   :  { %v12701_v50 = vrot.slane %v10419_v35, 7  ;;  %v12702_v13 = vrot.slane %v10467_v61, 7  ;;  %v3957_v51 = vsel %vm969_vm4, %v3955_v62, %v3956_v44  ;;  %v4491_v48 = vpop.permute.xlu1 %4490  ;;  %v3960_v17 = vsel %vm969_vm4, %v3958_v55, %v3959_v45  ;;  %v12704_v61 = vld [vmem:[#allocation370_spill] sm:$0xff] }
 0x51c   :  { %v3951_v21 = vsel %vm969_vm4, %v12700_v36, %v12699_v29  ;;  %v3973_v59 = vadd.f32 %v3957_v51, %v3943_v9  ;;  %v10694_v43 = vadd.f32 %v4491_v48, %v12703_v23  ;;  %v4447_v38 = vpop.permute.xlu0 %4446  ;;  %v3933_v34 = vsel %vm938_vm3, %v3931_v53, %v3932_v14  ;;  %v12715_v51 = vld [vmem:[#allocation204_spill] sm:$0xff]  ;;  %v12716_v48 = vld [vmem:[#allocation198_spill] sm:$0xff] }
 0x51d   :  { %v3971_v22 = vadd.f32 %v3951_v21, %v10509_v18  ;;  %v3954_v57 = vsel %vm969_vm4, %v12702_v13, %v12701_v50  ;;  %v3962_v18 = vrot.slane %v10594_v28, 7  ;;  %v3961_v35 = vrot.slane %v10597_v24, 7  ;;  %v12709_v24 = vld [vmem:[#allocation230_spill] sm:$0xff]  ;;  %v12714_v13 = vld [vmem:[#allocation251_spill] sm:$0xff]  ;;  %v12719_v23 = vld [vmem:[#allocation200_spill] sm:$0xff] }
 0x51e   :  { %v3972_v63 = vadd.f32 %v3954_v57, %v3942_v20  ;;  %v10700_v56 = vadd.f32 %v4447_v38, %v12704_v61  ;;  %v3982_v58 = vadd.f32 %v12705_v4, %v3970_v39  ;;  %v3990_v3 = vmul.f32 0.007598758, %v10393_v42 }
 0x51f   :  { %v3974_v0 = vadd.f32 %v3960_v17, %v3944_v40  ;;  %v3945_v19 = vadd.f32 %v3933_v34, %v3915_v33  ;;  %v4001_v60 = vrot.slane %v12706_v49, 1  ;;  %v3983_v41 = vadd.f32 %v12707_v11, %v3971_v22  ;;  %v4535_v10 = vpop.permute.xlu1 %4534  ;;  %v12718_v17 = vld [vmem:[#allocation239_spill] sm:$0xff]  ;;  %v12724_v11 = vld [vmem:[#allocation205_spill] sm:$0xff] }
 0x520   :  { %v3979_v30 = vmul.f32 0.036000773, %v12708_v27  ;;  %v3991_v28 = vmul.f32 0.007598758, %v12708_v27  ;;  %v3984_v2 = vadd.f32 %v3978_v6, %v3972_v63  ;;  %v3980_v46 = vmul.f32 0.036000773, %v12709_v24  ;;  %v4531_v20 = vpop.permute.xlu0 %4530 }
 0x521   :  { %v3992_v44 = vmul.f32 0.007598758, %v12709_v24  ;;  %v10711_v15 = vadd.f32 %v4535_v10, %v12710_v47  ;;  %v4020_v1 = vmul.f32 0.0010283801, %v10393_v42  ;;  %v3963_v45 = vsel %vm969_vm4, %v3961_v35, %v3962_v18 }
 0x522   :  { %v3985_v62 = vadd.f32 %v3979_v30, %v3973_v59  ;;  %v10716_v9 = vadd.f32 %v4531_v20, %v12711_v54  ;;  %v12713_v55 = vrot.slane %v12712_v31, 1  ;;  %v4002_v14 = vrot.slane %v3990_v3, 1  ;;  %v12726_v30 = vld [vmem:[#allocation199_spill] sm:$0xff]  ;;  %v12730_v54 = vld [vmem:[#allocation208_spill] sm:$0xff] }
 0x523   :  { %v3975_v37 = vadd.f32 %v3963_v45, %v3945_v19  ;;  %v3986_v53 = vadd.f32 %v3980_v46, %v3974_v0  ;;  %v4013_v39 = vadd.f32 %v4001_v60, %v3983_v41  ;;  %v4003_v29 = vrot.slane %v3991_v28, 1  ;;  %v10722_v40 = vpop.permute.xlu1 %4496  ;;  %v12723_v60 = vld [vmem:[#allocation216_spill] sm:$0xff] }
 0x524   :  { %v4012_v12 = vadd.f32 %v12713_v55, %v3982_v58  ;;  %v4021_v36 = vmul.f32 0.0010283801, %v12708_v27  ;;  %v4022_v21 = vmul.f32 0.0010283801, %v12709_v24  ;;  %v4004_v42 = vrot.slane %v3992_v44, 1  ;;  %v10726_v6 = vpop.permute.xlu0 %4452  ;;  %v12721_v58 = vld [vmem:[#allocation226_spill] sm:$0xff] }
 0x525   :  { %v3981_v33 = vmul.f32 0.036000773, %v10573_v52  ;;  %v3993_v22 = vmul.f32 0.007598758, %v10573_v52  ;;  %v4014_v50 = vadd.f32 %v4002_v14, %v3984_v2  ;;  %v4031_v57 = vrot.slane %v12714_v13, 2  ;;  %v12727_v28 = vld [vmem:[#allocation196_spill] sm:$0xff] }
 0x526   :  { %v12717_v63 = vrot.slane %v12716_v48, 1  ;;  %v12720_v38 = vrot.slane %v12719_v23, 1  ;;  %v4015_v34 = vadd.f32 %v4003_v29, %v3985_v62  ;;  %v4032_v35 = vrot.slane %v4020_v1, 2  ;;  %v12729_v62 = vld [vmem:[#allocation366_spill] sm:$0xff]  ;;  %v12731_v55 = vld [vmem:[#allocation100_spill] sm:$0xff]  ;;  %v12734_v29 = vld [vmem:[#allocation101_spill] sm:$0xff] }
 0x527   :  { %v3987_v61 = vadd.f32 %v3981_v33, %v3975_v37  ;;  %v4016_v4 = vadd.f32 %v4004_v42, %v3986_v53  ;;  %v12722_v3 = vrot.slane %v12721_v58, 2  ;;  %v4033_v19 = vrot.slane %v4021_v36, 2  ;;  %v10737_v49 = vpop.permute.xlu1 %4584  ;;  %v12741_v23 = vld [vmem:[#allocation180_spill] sm:$0xff]  ;;  %v12742_v58 = vld [vmem:[#allocation209_spill] sm:$0xff] }
 0x528   :  { %v3018_v59 = vadd.f32 %v12717_v63, %v12715_v51  ;;  %v3019_v18 = vadd.f32 %v12720_v38, %v12718_v17  ;;  %v12725_v41 = vrot.slane %v12724_v11, 1  ;;  %v12728_v10 = vrot.slane %v12727_v28, 2  ;;  %v10748_v20 = vpop.permute.xlu0 %4540  ;;  %v12740_v63 = vld [vmem:[#allocation383_spill] sm:$0xff]  ;;  %v12746_v11 = vld [vmem:[#allocation62_spill] sm:$0xff] }
 0x529   :  { %v4042_v0 = vadd.f32 %v12722_v3, %v4012_v12  ;;  %v4043_v24 = vadd.f32 %v4031_v57, %v4013_v39  ;;  %v4034_v46 = vrot.slane %v4022_v21, 2  ;;  %v4005_v44 = vrot.slane %v3993_v22, 1  ;;  %v12732_v12 = vld [vmem:[#allocation197_spill] sm:$0xff]  ;;  %v12748_v28 = vld [vmem:[#allocation387_spill] sm:$0xff] }
 0x52a   :  { %v3020_v27 = vadd.f32 %v12725_v41, %v12723_v60  ;;  %v3046_v2 = vadd.f32 %v12728_v10, %v12726_v30  ;;  %v4023_v47 = vmul.f32 0.0010283801, %v10573_v52  ;;  %v4044_v1 = vadd.f32 %v4032_v35, %v4014_v50  ;;  %v12736_v52 = vld [vmem:[#allocation179_spill] sm:$0xff]  ;;  %v12737_v50 = vld [vmem:[#allocation217_spill] sm:$0xff] }
 0x52b   :  { %v3009_v45 = vrot.slane %v12729_v62, 1  ;;  %v3027_v31 = vmul.f32 0.0010283801, %v12730_v54  ;;  %v12733_v14 = vrot.slane %v12732_v12, 2  ;;  %v4045_v53 = vadd.f32 %v4033_v19, %v4015_v34  ;;  %v4641_v22 = vpop.permute.xlu1 %4640  ;;  %v12738_v57 = vld [vmem:[#allocation201_spill] sm:$0xff] }
 0x52c   :  { %v12735_v39 = vrot.slane %v12734_v29, 2  ;;  %v4017_v21 = vadd.f32 %v4005_v44, %v3987_v61  ;;  %v4046_v42 = vadd.f32 %v4034_v46, %v4016_v4  ;;  %v5068_v33 = vsub.f32 %v4042_v0, %v12736_v52  ;;  %v4637_v35 = vpop.permute.xlu0 %4636  ;;  %v12744_v4 = vld [vmem:[#allocation63_spill] sm:$0xff]  ;;  %v12745_v0 = vld [vmem:[#allocation181_spill] sm:$0xff] }
 0x52d   :  { %v3047_v37 = vadd.f32 %v12733_v14, %v12731_v55  ;;  %v3021_v13 = vadd.f32 %v3009_v45, %v12737_v50  ;;  %v12739_v51 = vrot.slane %v12738_v57, 2  ;;  %v5054_v17 = vmul.f32 %v12740_v63, %v12740_v63 }
 0x52e   :  { %v3048_v36 = vadd.f32 %v12735_v39, %v3018_v59  ;;  %v5069_v38 = vsub.f32 %v4043_v24, %v12741_v23  ;;  %v4035_v34 = vrot.slane %v4023_v47, 2  ;;  %v12743_v59 = vrot.slane %v12742_v58, 2  ;;  %v12749_v24 = vld [vmem:[#allocation66_spill] sm:$0xff]  ;;  %v12756_v58 = vld [vmem:[#allocation56_spill] sm:$0xff] }
 0x52f   :  { %v3049_v48 = vadd.f32 %v12739_v51, %v3019_v18  ;;  %v5062_v3 = vsub.f32 %v3046_v2, %v12744_v4  ;;  %v5070_v19 = vsub.f32 %v4044_v1, %v12745_v0  ;;  %v3039_v60 = vrot.slane %v3027_v31, 2  ;;  %v12747_v18 = vld [vmem:[#allocation90_spill] sm:$0xff]  ;;  %v10775_v45 = vpop.permute.xlu1 %4450  ;;  %v12751_v1 = vld [vmem:[#allocation67_spill] sm:$0xff] }
 0x530   :  { %v3050_v61 = vadd.f32 %v12743_v59, %v3020_v27  ;;  %v5048_v41 = vmul.f32 %v12746_v11, %v12746_v11  ;;  %v5063_v30 = vsub.f32 %v3047_v37, %v12747_v18  ;;  %v5071_v10 = vsub.f32 %v4045_v53, %v12748_v28  ;;  %v12750_v27 = vld [vmem:[#allocation131_spill] sm:$0xff]  ;;  %v10783_v12 = vpop.permute.xlu0 %4406  ;;  %v12752_v37 = vld [vmem:[#allocation178_spill] sm:$0xff]  ;;  %v12757_v59 = vld [vmem:[#allocation173_spill] sm:$0xff] }
 0x531   :  { %v4047_v46 = vadd.f32 %v4035_v34, %v4017_v21  ;;  %v5064_v44 = vsub.f32 %v3048_v36, %v12749_v24  ;;  %v5072_v47 = vsub.f32 %v4046_v42, %v5054_v17  ;;  %v5093_v62 = vadd.f32 %v5068_v33, %v5062_v3  ;;  %v12753_v36 = vld [vmem:[#allocation119_spill] sm:$0xff]  ;;  %v12754_v21 = vld [vmem:[#allocation172_spill] sm:$0xff] }
 0x532   :  { %v5049_v2 = vmul.f32 %v12750_v27, %v12750_v27  ;;  %v5065_v54 = vsub.f32 %v3049_v48, %v12751_v1  ;;  %v10781_v31 = vstv %s10739_s6  ;;  %v5094_v55 = vadd.f32 %v5069_v38, %v5063_v30  ;;  %v12758_v3 = vld [vmem:[#allocation59_spill] sm:$0xff] }
 0x533   :  { %v3051_v14 = vadd.f32 %v3039_v60, %v3021_v13  ;;  %v5055_v53 = vmul.f32 %v12752_v37, %v12752_v37  ;;  %v5066_v29 = vsub.f32 %v3050_v61, %v5048_v41  ;;  %v5095_v39 = vadd.f32 %v5070_v19, %v5064_v44  ;;  %v10799_v34 = vpop.permute.xlu1 %4538  ;;  %v12759_v19 = vld [vmem:[#allocation174_spill] sm:$0xff] }
 0x534   :  { %v10789_v42 = vmul.f32 %v12754_v21, %v12753_v36  ;;  %v5096_v33 = vadd.f32 %v5071_v10, %v5065_v54  ;;  %v5136_v50 = vadd.f32 %v12736_v52, %v12744_v4  ;;  %v10794_v57 = vstv %s10755_s7  ;;  %v10812_v30 = vpop.permute.xlu0 %4494  ;;  %v12760_v10 = vld [vmem:[#allocation69_spill] sm:$0xff] }
 0x535   :  { %12755 = vst [vmem:[#allocation372_spill] sm:$0xff] %v10794_v57  ;;  %v5073_v51 = vsub.f32 %v4047_v46, %v5055_v53  ;;  %v5097_v48 = vadd.f32 %v5072_v47, %v5066_v29  ;;  %v5099_v38 = vadd.f32 %v5093_v62, %v10781_v31  ;;  %v5137_v13 = vadd.f32 %v12741_v23, %v12747_v18  ;;  %v12761_v46 = vld [vmem:[#allocation175_spill] sm:$0xff] }
 0x536   :  { %v10803_v61 = vmul.f32 %v12757_v59, %v12756_v58  ;;  %v10807_v60 = vmul.f32 %v12759_v19, %v12758_v3  ;;  %v5100_v52 = vadd.f32 %v5094_v55, %v10781_v31  ;;  %v5138_v4 = vadd.f32 %v12745_v0, %v12749_v24 }
 0x537   :  { %v10816_v23 = vmul.f32 %v12761_v46, %v12760_v10  ;;  %v5067_v18 = vsub.f32 %v3051_v14, %v5049_v2  ;;  %v5101_v44 = vadd.f32 %v5095_v39, %v10781_v31  ;;  %v5139_v47 = vadd.f32 %v12748_v28, %v12751_v1  ;;  %v10830_v36 = vpop.permute.xlu1 %4582 }
 0x538   :  { %v10823_v62 = vmul.f32 %v12752_v37, %v12750_v27  ;;  %v5102_v54 = vadd.f32 %v5096_v33, %v10781_v31  ;;  %v5140_v55 = vadd.f32 %v5054_v17, %v5048_v41  ;;  %v5142_v0 = vadd.f32 %v5136_v50, %v10794_v57  ;;  %v10833_v1 = vpop.permute.xlu0 %4578 }
 0x539   :  { %v5098_v24 = vadd.f32 %v5073_v51, %v5067_v18  ;;  %v5103_v29 = vadd.f32 %v5097_v48, %v10781_v31  ;;  %5265 = vrcp.f32 %v5099_v38  ;;  %v5143_v14 = vadd.f32 %v5137_v13, %v10794_v57 }
 0x53a   :  { %12762 = vst [vmem:[#allocation235_spill] sm:$0xff] %v10823_v62  ;;  %v4674_v39 = vadd.f32 %v4641_v22, %v10651_v5  ;;  %5267 = vrcp.f32 %v5100_v52  ;;  %v5144_v28 = vadd.f32 %v5138_v4, %v10794_v57  ;;  %v5148_v27 = vmul.f32 %v5142_v0, %v5099_v38 }
 0x53b   :  { %5269 = vrcp.f32 %v5101_v44  ;;  %v5141_v17 = vadd.f32 %v5055_v53, %v5049_v2  ;;  %v5145_v41 = vadd.f32 %v5139_v47, %v10794_v57  ;;  %v5149_v37 = vmul.f32 %v5143_v14, %v5100_v52  ;;  %v10840_v38 = vpop.permute.xlu1 %4544 }
 0x53c   :  { %v4672_v21 = vadd.f32 %v4637_v35, %v10655_v8  ;;  %5271 = vrcp.f32 %v5102_v54  ;;  %v5117_v33 = vmul.f32 2.0, %v10789_v42  ;;  %v5150_v50 = vmul.f32 %v5144_v28, %v5101_v44  ;;  %v10844_v13 = vpop.permute.xlu0 %4500 }
 0x53d   :  { %v5104_v5 = vadd.f32 %v5098_v24, %v10781_v31  ;;  %5273 = vrcp.f32 %v5103_v29  ;;  %v5146_v22 = vadd.f32 %v5140_v55, %v10794_v57  ;;  %v5151_v51 = vmul.f32 %v5145_v41, %v5102_v54 }
 0x53e   :  { %v4691_v48 = vmul.f32 0.007598758, %v4674_v39  ;;  %v5118_v2 = vmul.f32 2.0, %v10803_v61  ;;  %v5119_v53 = vmul.f32 2.0, %v10807_v60  ;;  %5275 = vrcp.f32 %v5148_v27 }
 0x53f   :  { %v5120_v8 = vmul.f32 2.0, %v10816_v23  ;;  %v5147_v35 = vadd.f32 %v5141_v17, %v10794_v57  ;;  %v5152_v58 = vmul.f32 %v5146_v22, %v5103_v29  ;;  %5277 = vrcp.f32 %v5149_v37  ;;  %v4645_v46 = vpop.permute.xlu1 %4644  ;;  %v12765_v17 = vld [vmem:[#allocation263_spill] sm:$0xff] }
 0x540   :  { %v4690_v59 = vmul.f32 0.007598758, %v4672_v21  ;;  %v10850_v3 = vmul.f32 %v12740_v63, %v12746_v11  ;;  %5279 = vrcp.f32 %v5150_v50  ;;  %v10853_v19 = vmul.f32 2.0, %v10823_v62  ;;  %v10866_v54 = vpop.permute.xlu0 %4588 }
 0x541   :  { %v10856_v52 = vadd.f32 %v10794_v57, %v5117_v33  ;;  %v5153_v4 = vmul.f32 %v5147_v35, %v5104_v5  ;;  %5281 = vrcp.f32 %v5151_v51  ;;  %v4703_v10 = vrot.slane %v4691_v48, 1 }
 0x542   :  { %12763 = vst [vmem:[#allocation238_spill] sm:$0xff] %v10850_v3  ;;  %12764 = vst [vmem:[#allocation240_spill] sm:$0xff] %v10853_v19  ;;  %5283 = vrcp.f32 %v5104_v5  ;;  %v10859_v18 = vadd.f32 %v10794_v57, %v5118_v2  ;;  %v10862_v44 = vadd.f32 %v10794_v57, %v5119_v53  ;;  %v4685_v11 = vmul.f32 0.0010283801, %v4674_v39 }
 0x543   :  { %v10864_v63 = vpop.eup %5265  ;;  %v4721_v47 = vmul.f32 0.036000773, %v4674_v39  ;;  %v10869_v55 = vadd.f32 %v10794_v57, %v5120_v8  ;;  %5285 = vrcp.f32 %v5152_v58  ;;  %v4616_v24 = vadd.f32 %v10737_v49, %v10629_v16  ;;  %v4499_v51 = vpop.permute.xlu1 %4498 }
 0x544   :  { %v10871_v0 = vpop.eup %5267  ;;  %v10875_v29 = vmul.f32 0.10936069, %v4674_v39  ;;  %v10877_v14 = vmul.f32 0.21300554, %v4674_v39  ;;  %v4702_v28 = vrot.slane %v4690_v59, 1  ;;  %v4524_v41 = vadd.f32 %v10722_v40, %v12765_v17 }
 0x545   :  { %v10879_v27 = vpop.eup %5269  ;;  %v4478_v37 = vadd.f32 %v10726_v6, %v10620_v25  ;;  %v10885_v33 = vmul.f32 0.26601171, %v4674_v39  ;;  %5287 = vrcp.f32 %v5153_v4  ;;  %v4715_v5 = vadd.f32 %v4703_v10, %v4685_v11  ;;  %v4455_v6 = vpop.permute.xlu0 %4454 }
 0x546   :  { %v10887_v50 = vpop.eup %5271  ;;  %v4684_v16 = vmul.f32 0.0010283801, %v4672_v21  ;;  %v4720_v49 = vmul.f32 0.036000773, %v4672_v21  ;;  %v4676_v22 = vadd.f32 %v4645_v46, %v4616_v24  ;;  %v4570_v2 = vadd.f32 %v10748_v20, %v10635_v32 }
 0x547   :  { %v10889_v48 = vpop.eup %5273  ;;  %v10893_v53 = vmul.f32 0.10936069, %v4672_v21  ;;  %v10895_v40 = vmul.f32 0.21300554, %v4672_v21  ;;  %v10897_v25 = vmul.f32 0.26601171, %v4672_v21  ;;  %v4477_v21 = vadd.f32 %v10775_v45, %v10669_v7 }
 0x548   :  { %12766 = vst [vmem:[#allocation241_spill] sm:$0xff] %v10889_v48  ;;  %v10899_v39 = vpop.eup %5275  ;;  %v4733_v8 = vrot.slane %v4721_v47, 2  ;;  %v4714_v59 = vadd.f32 %v4702_v28, %v4684_v16  ;;  %v4885_v10 = vrot.slane %v10885_v33, 5  ;;  %v4915_v32 = vrot.slane %v10877_v14, 6  ;;  %v10914_v28 = vpop.permute.xlu1 %4586 }
 0x549   :  { %v10903_v4 = vpop.eup %5277  ;;  %v4732_v47 = vrot.slane %v4720_v49, 2  ;;  %v4431_v24 = vadd.f32 %v10783_v12, %v10675_v26  ;;  %v4692_v17 = vmul.f32 0.007598758, %v4676_v22  ;;  %v10922_v45 = vpop.permute.xlu0 %4542  ;;  %v10926_v26 = vmul.f32 0.10936069, %v4676_v22 }
 0x54a   :  { %12767 = vst [vmem:[#allocation242_spill] sm:$0xff] %v10903_v4  ;;  %v10910_v46 = vpop.eup %5279  ;;  %v4745_v11 = vadd.f32 %v4733_v8, %v4715_v5  ;;  %v4722_v8 = vmul.f32 0.036000773, %v4676_v22  ;;  %v10928_v12 = vmul.f32 0.21300554, %v4676_v22  ;;  %v4942_v33 = vrot.slane %v10893_v53, 7 }
 0x54b   :  { %12768 = vst [vmem:[#allocation243_spill] sm:$0xff] %v10910_v46  ;;  %v10916_v16 = vpop.eup %5281  ;;  %v4744_v49 = vadd.f32 %v4732_v47, %v4714_v59  ;;  %v4569_v58 = vadd.f32 %v10799_v34, %v10694_v43  ;;  %v4523_v20 = vadd.f32 %v10812_v30, %v10700_v56  ;;  %v4615_v7 = vadd.f32 %v10830_v36, %v10711_v15 }
 0x54c   :  { %12769 = vst [vmem:[#allocation244_spill] sm:$0xff] %v10916_v16  ;;  %v10924_v5 = vpop.eup %5283  ;;  %v4613_v59 = vadd.f32 %v10833_v1, %v10716_v9  ;;  %v10942_v47 = vadd.f32 %v10840_v38, %v4524_v41  ;;  %v10944_v48 = vmul.f32 0.26601171, %v4676_v22  ;;  %v10949_v43 = vadd.f32 %v10844_v13, %v4478_v37 }
 0x54d   :  { %12770 = vst [vmem:[#allocation275_spill] sm:$0xff] %v10924_v5  ;;  %v10930_v35 = vpop.eup %5285  ;;  %v4704_v5 = vrot.slane %v4692_v17, 1  ;;  %v4686_v34 = vmul.f32 0.0010283801, %v4676_v22  ;;  %v4618_v56 = vadd.f32 %v10866_v54, %v4570_v2  ;;  %v4639_v15 = vpop.permute.xlu0 %4638  ;;  %v4734_v36 = vrot.slane %v4722_v8, 2 }
 0x54e   :  { %12771 = vst [vmem:[#allocation245_spill] sm:$0xff] %v10930_v35  ;;  %v4643_v35 = vpop.permute.xlu1 %4642  ;;  %v4673_v38 = vadd.f32 %v4639_v15, %v4613_v59  ;;  %v10954_v41 = vadd.f32 %v4499_v51, %v4477_v21  ;;  %v4479_v1 = vadd.f32 %v4455_v6, %v4431_v24  ;;  %v12773_v15 = vrot.slane %v10875_v29, 3 }
 0x54f   :  { %v10946_v57 = vpop.eup %5287  ;;  %v4675_v30 = vadd.f32 %v4643_v35, %v4615_v7 }
 0x550   :  { %12772 = vst [vmem:[#allocation246_spill] sm:$0xff] %v10946_v57  ;;  %v4716_v57 = vadd.f32 %v4704_v5, %v4686_v34  ;;  %v4751_v21 = vmul.f32 0.10936069, %v4673_v38  ;;  %v12774_v34 = vrot.slane %v10877_v14, 4  ;;  %v4805_v24 = vmul.f32 0.21300554, %v4673_v38 }
 0x551   :  { %v4753_v17 = vmul.f32 0.10936069, %v4675_v30  ;;  %v4807_v19 = vmul.f32 0.21300554, %v4675_v30  ;;  %v4861_v3 = vmul.f32 0.26601171, %v4675_v30 }
 0x552   :  { %v4593_v22 = vpop.permute.xlu1 %4592  ;;  %v4549_v9 = vpop.permute.xlu0 %4548  ;;  %v4985_v51 = vmul.f32 0.007598758, %v4675_v30  ;;  %v4775_v6 = vrot.slane %v4751_v21, 3  ;;  %v10970_v46 = vadd.f32 %v4734_v36, %v4716_v57  ;;  %v5015_v4 = vmul.f32 0.0010283801, %v4675_v30 }
 0x553   :  { %v4778_v2 = vrot.slane %v4753_v17, 3  ;;  %v4832_v35 = vrot.slane %v4807_v19, 4  ;;  %v4886_v7 = vrot.slane %v4861_v3, 5  ;;  %v4916_v8 = vrot.slane %v4807_v19, 6 }
 0x554   :  { %v4946_v59 = vrot.slane %v4753_v17, 7  ;;  %v12775_v3 = vrot.slane %v10875_v29, 7  ;;  %v4617_v29 = vadd.f32 %v10914_v28, %v4569_v58  ;;  %v12777_v57 = vrot.slane %v10895_v40, 4 }
 0x555   :  { %v4779_v5 = vsel %vm797_vm0, %v12773_v15, %v4778_v2  ;;  %v4833_v37 = vsel %vm852_vm1, %v12774_v34, %v4832_v35  ;;  %v4887_v54 = vsel %vm907_vm2, %v4885_v10, %v4886_v7  ;;  %v4917_v13 = vsel %vm938_vm3, %v4915_v32, %v4916_v8 }
 0x556   :  { %v4799_v16 = vadd.f32 %v4779_v5, %v4745_v11  ;;  %v4947_v19 = vsel %vm969_vm4, %v12775_v3, %v4946_v59  ;;  %v4503_v17 = vpop.permute.xlu1 %4502  ;;  %v4859_v2 = vmul.f32 0.26601171, %v4673_v38  ;;  %v4943_v15 = vrot.slane %v4751_v21, 7  ;;  %v4649_v14 = vpop.permute.xlu0 %4648 }
 0x557   :  { %v12776_v35 = vrot.slane %v10893_v53, 3  ;;  %v4829_v32 = vrot.slane %v4805_v24, 4  ;;  %v4913_v11 = vrot.slane %v4805_v24, 6  ;;  %v12778_v21 = vrot.slane %v10895_v40, 6 }
 0x558   :  { %v4853_v62 = vadd.f32 %v4833_v37, %v4799_v16  ;;  %v4883_v8 = vrot.slane %v4859_v2, 5  ;;  %v4944_v59 = vsel %vm969_vm4, %v4942_v33, %v4943_v15  ;;  %v4984_v53 = vmul.f32 0.007598758, %v4673_v38 }
 0x559   :  { %v4776_v10 = vsel %vm797_vm0, %v12776_v35, %v4775_v6  ;;  %v4830_v36 = vsel %vm852_vm1, %v12777_v57, %v4829_v32  ;;  %v4914_v16 = vsel %vm938_vm3, %v12778_v21, %v4913_v11  ;;  %v4571_v34 = vadd.f32 %v10922_v45, %v4523_v20 }
 0x55a   :  { %v4798_v7 = vadd.f32 %v4776_v10, %v4744_v49  ;;  %v4907_v5 = vadd.f32 %v4887_v54, %v4853_v62  ;;  %v4591_v37 = vpop.permute.xlu1 %4590  ;;  %v4973_v3 = vmul.f32 0.036000773, %v4675_v30  ;;  %v12779_v58 = vrot.slane %v10897_v25, 5  ;;  %v4547_v33 = vpop.permute.xlu0 %4546 }
 0x55b   :  { %v4997_v49 = vrot.slane %v4985_v51, 1  ;;  %v5027_v54 = vrot.slane %v5015_v4, 2  ;;  %v4678_v24 = vadd.f32 %v4649_v14, %v4618_v56  ;;  %v4972_v15 = vmul.f32 0.036000773, %v4673_v38 }
 0x55c   :  { %v4852_v6 = vadd.f32 %v4830_v36, %v4798_v7  ;;  %v4884_v28 = vsel %vm907_vm2, %v12779_v58, %v4883_v8  ;;  %v4937_v62 = vadd.f32 %v4917_v13, %v4907_v5  ;;  %v5014_v40 = vmul.f32 0.0010283801, %v4673_v38 }
 0x55d   :  { %v4620_v35 = vadd.f32 %v4593_v22, %v10942_v47  ;;  %v4996_v32 = vrot.slane %v4984_v53, 1  ;;  %v4693_v11 = vmul.f32 0.007598758, %v4678_v24  ;;  %v4723_v20 = vmul.f32 0.036000773, %v4678_v24 }
 0x55e   :  { %v4906_v2 = vadd.f32 %v4884_v28, %v4852_v6  ;;  %v4967_v10 = vadd.f32 %v4947_v19, %v4937_v62  ;;  %v4597_v45 = vpop.permute.xlu1 %4596  ;;  %v4574_v25 = vadd.f32 %v4549_v9, %v10949_v43  ;;  %v4687_v7 = vmul.f32 0.0010283801, %v4678_v24  ;;  %v4647_v13 = vpop.permute.xlu0 %4646 }
 0x55f   :  { %v10989_v8 = vmul.f32 0.10936069, %v4678_v24  ;;  %v4705_v4 = vrot.slane %v4693_v11, 1  ;;  %v10991_v56 = vmul.f32 0.21300554, %v4678_v24  ;;  %v5026_v47 = vrot.slane %v5014_v40, 2 }
 0x560   :  { %v4936_v30 = vadd.f32 %v4914_v16, %v4906_v2  ;;  %v4979_v51 = vadd.f32 %v4973_v3, %v4967_v10  ;;  %v10993_v14 = vmul.f32 0.26601171, %v4678_v24  ;;  %v4527_v22 = vadd.f32 %v4503_v17, %v4479_v1 }
 0x561   :  { %v4619_v19 = vadd.f32 %v4591_v37, %v4571_v34  ;;  %v4717_v57 = vadd.f32 %v4705_v4, %v4687_v7  ;;  %v4735_v36 = vrot.slane %v4723_v20, 2  ;;  %v4573_v21 = vadd.f32 %v4547_v33, %v10954_v41 }
 0x562   :  { %v4966_v38 = vadd.f32 %v4944_v59, %v4936_v30  ;;  %v5009_v5 = vadd.f32 %v4997_v49, %v4979_v51  ;;  %v4551_v43 = vpop.permute.xlu1 %4550  ;;  %v4783_v16 = vrot.slane %v10989_v8, 3  ;;  %v10997_v53 = vadd.f32 %v4597_v45, %v4574_v25  ;;  %v4653_v6 = vpop.permute.xlu0 %4652 }
 0x563   :  { %v4677_v3 = vadd.f32 %v4647_v13, %v4617_v29  ;;  %v4837_v59 = vrot.slane %v10991_v56, 4  ;;  %v4891_v1 = vrot.slane %v10993_v14, 5  ;;  %v4921_v17 = vrot.slane %v10991_v56, 6 }
 0x564   :  { %v4978_v9 = vadd.f32 %v4972_v15, %v4966_v38  ;;  %v10999_v58 = vadd.f32 %v5027_v54, %v5009_v5  ;;  %v11004_v33 = vadd.f32 %v4735_v36, %v4717_v57  ;;  %v4951_v62 = vrot.slane %v10989_v8, 7 }
 0x565   :  { %v4755_v34 = vmul.f32 0.10936069, %v4677_v3  ;;  %v4809_v28 = vmul.f32 0.21300554, %v4677_v3  ;;  %v4863_v41 = vmul.f32 0.26601171, %v4677_v3  ;;  %v4575_v49 = vadd.f32 %v4551_v43, %v4527_v22 }
 0x566   :  { %v5008_v37 = vadd.f32 %v4996_v32, %v4978_v9  ;;  %v4680_v24 = vadd.f32 %v4653_v6, %v4620_v35  ;;  %v4651_v29 = vpop.permute.xlu1 %4650  ;;  %v4974_v20 = vmul.f32 0.036000773, %v4677_v3  ;;  %v4986_v45 = vmul.f32 0.007598758, %v4677_v3  ;;  %v4595_v32 = vpop.permute.xlu0 %4594 }
 0x567   :  { %v4781_v54 = vrot.slane %v4755_v34, 3  ;;  %v4835_v15 = vrot.slane %v4809_v28, 4  ;;  %v4889_v40 = vrot.slane %v4863_v41, 5  ;;  %v4919_v10 = vrot.slane %v4809_v28, 6 }
 0x568   :  { %v11007_v2 = vadd.f32 %v5026_v47, %v5008_v37  ;;  %v4949_v11 = vrot.slane %v4755_v34, 7  ;;  %v12780_v30 = vrot.slane %v10926_v26, 3  ;;  %v12781_v7 = vrot.slane %v10928_v12, 4 }
 0x569   :  { %v12782_v35 = vrot.slane %v10944_v48, 5  ;;  %v11018_v4 = vmul.f32 0.0010283801, %v4677_v3  ;;  %v12783_v47 = vrot.slane %v10928_v12, 6  ;;  %v12784_v5 = vrot.slane %v10926_v26, 7 }
 0x56a   :  { %v4782_v25 = vsel %vm797_vm0, %v12780_v30, %v4781_v54  ;;  %v4836_v13 = vsel %vm852_vm1, %v12781_v7, %v4835_v15  ;;  %v4694_v36 = vmul.f32 0.007598758, %v4680_v24  ;;  %v4724_v43 = vmul.f32 0.036000773, %v4680_v24 }
 0x56b   :  { %v4890_v51 = vsel %vm907_vm2, %v12782_v35, %v4889_v40  ;;  %v4800_v38 = vadd.f32 %v4782_v25, %v10970_v46  ;;  %v4920_v22 = vsel %vm938_vm3, %v12783_v47, %v4919_v10  ;;  %v4950_v57 = vsel %vm969_vm4, %v12784_v5, %v4949_v11  ;;  %v4599_v46 = vpop.permute.xlu1 %4598 }
 0x56c   :  { %v11027_v9 = vmul.f32 0.10936069, %v4680_v24  ;;  %v11029_v6 = vmul.f32 0.21300554, %v4680_v24  ;;  %v4679_v48 = vadd.f32 %v4651_v29, %v4619_v19  ;;  %v4706_v3 = vrot.slane %v4694_v36, 1  ;;  %v4657_v29 = vpop.permute.xlu0 %4656 }
 0x56d   :  { %v4854_v37 = vadd.f32 %v4836_v13, %v4800_v38  ;;  %v11031_v34 = vmul.f32 0.26601171, %v4680_v24  ;;  %v5075_v12 = vsub.f32 %v10999_v58, %v10803_v61  ;;  %v4998_v28 = vrot.slane %v4986_v45, 1 }
 0x56e   :  { %v5028_v26 = vrot.slane %v11018_v4, 2  ;;  %v4688_v41 = vmul.f32 0.0010283801, %v4680_v24  ;;  %v4736_v54 = vrot.slane %v4724_v43, 2  ;;  %v4786_v40 = vrot.slane %v11027_v9, 3 }
 0x56f   :  { %v4908_v15 = vadd.f32 %v4890_v51, %v4854_v37  ;;  %v4840_v10 = vrot.slane %v11029_v6, 4  ;;  %v4924_v19 = vrot.slane %v11029_v6, 6  ;;  %v4757_v11 = vmul.f32 0.10936069, %v4679_v48  ;;  %v4659_v37 = vpop.permute.xlu1 %4658 }
 0x570   :  { %v4811_v30 = vmul.f32 0.21300554, %v4679_v48  ;;  %v4865_v25 = vmul.f32 0.26601171, %v4679_v48  ;;  %v4621_v7 = vadd.f32 %v4595_v32, %v4573_v21  ;;  %v4718_v35 = vadd.f32 %v4706_v3, %v4688_v41  ;;  %v4655_v41 = vpop.permute.xlu0 %4654 }
 0x571   :  { %v4938_v13 = vadd.f32 %v4920_v22, %v4908_v15  ;;  %v4894_v61 = vrot.slane %v11031_v34, 5  ;;  %v4623_v58 = vadd.f32 %v4599_v46, %v4575_v49  ;;  %v4784_v45 = vrot.slane %v4757_v11, 3 }
 0x572   :  { %v4838_v24 = vrot.slane %v4811_v30, 4  ;;  %v4892_v38 = vrot.slane %v4865_v25, 5  ;;  %v4922_v51 = vrot.slane %v4811_v30, 6  ;;  %v4952_v5 = vrot.slane %v4757_v11, 7 }
 0x573   :  { %v4968_v47 = vadd.f32 %v4950_v57, %v4938_v13  ;;  %v11040_v36 = vmul.f32 0.007598758, %v4679_v48  ;;  %v11042_v43 = vmul.f32 0.0010283801, %v4679_v48  ;;  %v4785_v21 = vsel %vm797_vm0, %v4783_v16, %v4784_v45 }
 0x574   :  { %v4839_v32 = vsel %vm852_vm1, %v4837_v59, %v4838_v24  ;;  %v4893_v49 = vsel %vm907_vm2, %v4891_v1, %v4892_v38  ;;  %v4923_v22 = vsel %vm938_vm3, %v4921_v17, %v4922_v51  ;;  %v4954_v3 = vrot.slane %v11027_v9, 7 }
 0x575   :  { %v4980_v57 = vadd.f32 %v4974_v20, %v4968_v47  ;;  %v4801_v46 = vadd.f32 %v4785_v21, %v11004_v33  ;;  %v4953_v16 = vsel %vm969_vm4, %v4951_v62, %v4952_v5  ;;  %v4748_v15 = vadd.f32 %v4736_v54, %v4718_v35 }
 0x576   :  { %v4975_v59 = vmul.f32 0.036000773, %v4679_v48  ;;  %v4682_v14 = vadd.f32 %v4657_v29, %v10997_v53  ;;  %v11062_v11 = vadd.f32 %v4659_v37, %v4623_v58  ;;  %v4999_v17 = vrot.slane %v11040_v36, 1 }
 0x577   :  { %v11064_v1 = vadd.f32 %v4998_v28, %v4980_v57  ;;  %v4855_v56 = vadd.f32 %v4839_v32, %v4801_v46  ;;  %v5029_v20 = vrot.slane %v11042_v43, 2  ;;  %v4681_v8 = vadd.f32 %v4655_v41, %v4621_v7 }
 0x578   :  { %v4689_v30 = vmul.f32 0.0010283801, %v4682_v14  ;;  %v4695_v33 = vmul.f32 0.007598758, %v4682_v14  ;;  %v4725_v25 = vmul.f32 0.036000773, %v4682_v14  ;;  %v5074_v28 = vsub.f32 %v11007_v2, %v10789_v42 }
 0x579   :  { %v4909_v13 = vadd.f32 %v4893_v49, %v4855_v56  ;;  %v4760_v62 = vmul.f32 0.10936069, %v4682_v14  ;;  %v4814_v45 = vmul.f32 0.21300554, %v4682_v14  ;;  %v4868_v54 = vmul.f32 0.26601171, %v4682_v14 }
 0x57a   :  { %v4707_v48 = vrot.slane %v4695_v33, 1  ;;  %v4761_v53 = vmul.f32 0.10936069, %v11062_v11  ;;  %v4815_v29 = vmul.f32 0.21300554, %v11062_v11  ;;  %v4737_v58 = vrot.slane %v4725_v25, 2 }
 0x57b   :  { %v4939_v35 = vadd.f32 %v4923_v22, %v4909_v13  ;;  %v4789_v24 = vrot.slane %v4760_v62, 3  ;;  %v5081_v38 = vmul.f32 2.0, %v5075_v12  ;;  %v4843_v47 = vrot.slane %v4814_v45, 4 }
 0x57c   :  { %v4719_v51 = vadd.f32 %v4707_v48, %v4689_v30  ;;  %v4897_v5 = vrot.slane %v4868_v54, 5  ;;  %v4790_v7 = vrot.slane %v4761_v53, 3  ;;  %v4927_v37 = vrot.slane %v4814_v45, 6 }
 0x57d   :  { %v4969_v36 = vadd.f32 %v4953_v16, %v4939_v35  ;;  %v4844_v21 = vrot.slane %v4815_v29, 4  ;;  %v4869_v32 = vmul.f32 0.26601171, %v11062_v11  ;;  %v4957_v57 = vrot.slane %v4760_v62, 7 }
 0x57e   :  { %v4749_v49 = vadd.f32 %v4737_v58, %v4719_v51  ;;  %v4791_v46 = vsel %vm797_vm0, %v4789_v24, %v4790_v7  ;;  %v4928_v41 = vrot.slane %v4815_v29, 6  ;;  %v4759_v22 = vmul.f32 0.10936069, %v4681_v8 }
 0x57f   :  { %v4981_v14 = vadd.f32 %v4975_v59, %v4969_v36  ;;  %v4845_v42 = vsel %vm852_vm1, %v4843_v47, %v4844_v21  ;;  %v4898_v2 = vrot.slane %v4869_v32, 5  ;;  %v4958_v56 = vrot.slane %v4761_v53, 7 }
 0x580   :  { %v4803_v12 = vadd.f32 %v4791_v46, %v4749_v49  ;;  %v4813_v30 = vmul.f32 0.21300554, %v4681_v8  ;;  %v4867_v33 = vmul.f32 0.26601171, %v4681_v8  ;;  %v4977_v25 = vmul.f32 0.036000773, %v11062_v11 }
 0x581   :  { %v4899_v16 = vsel %vm907_vm2, %v4897_v5, %v4898_v2  ;;  %v4787_v13 = vrot.slane %v4759_v22, 3  ;;  %v4955_v45 = vrot.slane %v4759_v22, 7  ;;  %v4988_v29 = vmul.f32 0.007598758, %v4681_v8 }
 0x582   :  { %v4841_v54 = vrot.slane %v4813_v30, 4  ;;  %v4895_v62 = vrot.slane %v4867_v33, 5  ;;  %v4925_v48 = vrot.slane %v4813_v30, 6  ;;  %v4857_v35 = vadd.f32 %v4845_v42, %v4803_v12 }
 0x583   :  { %v4788_v59 = vsel %vm797_vm0, %v4786_v40, %v4787_v13  ;;  %v4929_v53 = vsel %vm938_vm3, %v4927_v37, %v4928_v41  ;;  %v4956_v58 = vsel %vm969_vm4, %v4954_v3, %v4955_v45  ;;  %v4959_v40 = vsel %vm969_vm4, %v4957_v57, %v4958_v56  ;;  %v12785_v45 = vld [vmem:[#allocation235_spill] sm:$0xff] }
 0x584   :  { %v4802_v24 = vadd.f32 %v4788_v59, %v4748_v15  ;;  %v4842_v51 = vsel %vm852_vm1, %v4840_v10, %v4841_v54  ;;  %v4896_v47 = vsel %vm907_vm2, %v4894_v61, %v4895_v62  ;;  %v4911_v5 = vadd.f32 %v4899_v16, %v4857_v35  ;;  %v12786_v62 = vld [vmem:[#allocation242_spill] sm:$0xff] }
 0x585   :  { %v4926_v9 = vsel %vm938_vm3, %v4924_v19, %v4925_v48  ;;  %v4989_v7 = vmul.f32 0.007598758, %v11062_v11  ;;  %v5011_v36 = vadd.f32 %v4999_v17, %v4981_v14  ;;  %v5018_v37 = vmul.f32 0.0010283801, %v4681_v8 }
 0x586   :  { %v4856_v3 = vadd.f32 %v4842_v51, %v4802_v24  ;;  %v4941_v15 = vadd.f32 %v4929_v53, %v4911_v5  ;;  %v5019_v21 = vmul.f32 0.0010283801, %v11062_v11  ;;  %v4976_v10 = vmul.f32 0.036000773, %v4681_v8  ;;  %v12789_v51 = vld [vmem:[#allocation238_spill] sm:$0xff] }
 0x587   :  { %v5040_v34 = vadd.f32 %v5028_v26, %v11064_v1  ;;  %v5041_v6 = vadd.f32 %v5029_v20, %v5011_v36  ;;  %v5080_v61 = vmul.f32 2.0, %v5074_v28  ;;  %v5000_v32 = vrot.slane %v4988_v29, 1 }
 0x588   :  { %v4910_v19 = vadd.f32 %v4896_v47, %v4856_v3  ;;  %v4971_v49 = vadd.f32 %v4959_v40, %v4941_v15  ;;  %v5001_v57 = vrot.slane %v4989_v7, 1  ;;  %v5088_v11 = vadd.f32 %v10781_v31, %v5081_v38 }
 0x589   :  { %v5076_v17 = vsub.f32 %v5040_v34, %v10807_v60  ;;  %v5077_v46 = vsub.f32 %v5041_v6, %v10816_v23  ;;  %v5087_v41 = vadd.f32 %v10781_v31, %v5080_v61  ;;  %v5030_v4 = vrot.slane %v5018_v37, 2 }
 0x58a   :  { %v4940_v8 = vadd.f32 %v4926_v9, %v4910_v19  ;;  %v4983_v14 = vadd.f32 %v4977_v25, %v4971_v49  ;;  %v5031_v26 = vrot.slane %v5019_v21, 2  ;;  %v5108_v28 = vmul.f32 %v10871_v0, %v5088_v11  ;;  %v12790_v21 = vld [vmem:[#allocation240_spill] sm:$0xff]  ;;  %v12792_v49 = vld [vmem:[#allocation241_spill] sm:$0xff] }
 0x58b   :  { %v5082_v1 = vmul.f32 2.0, %v5076_v17  ;;  %v5083_v43 = vmul.f32 2.0, %v5077_v46  ;;  %v5106_v20 = vmul.f32 %v10864_v63, %v5087_v41  ;;  %v5130_v60 = vmul.f32 %v10856_v52, %v5087_v41  ;;  %v12793_v17 = vld [vmem:[#allocation275_spill] sm:$0xff] }
 0x58c   :  { %v4970_v42 = vadd.f32 %v4956_v58, %v4940_v8  ;;  %v5013_v2 = vadd.f32 %v5001_v57, %v4983_v14  ;;  %v5131_v23 = vmul.f32 %v10859_v18, %v5088_v11  ;;  %v5191_v56 = vsel %vm5166_vm5, %v5108_v28, 0.0  ;;  %v12794_v8 = vld [vmem:[#allocation245_spill] sm:$0xff] }
 0x58d   :  { %v5089_v22 = vadd.f32 %v10781_v31, %v5082_v1  ;;  %v5090_v38 = vadd.f32 %v10781_v31, %v5083_v43  ;;  %v5190_v12 = vsel %vm5166_vm5, %v5106_v20, 0.0  ;;  %v5155_v63 = vmul.f32 %v10899_v39, %v5130_v60  ;;  %v12787_v39 = vld [vmem:[#allocation243_spill] sm:$0xff] }
 0x58e   :  { %v4982_v30 = vadd.f32 %v4976_v10, %v4970_v42  ;;  %v5043_v33 = vadd.f32 %v5031_v26, %v5013_v2  ;;  %v5192_v16 = vadd.f32 %v5191_v56, %v5190_v12  ;;  %v5157_v48 = vmul.f32 %v12786_v62, %v5131_v23  ;;  %v12791_v10 = vld [vmem:[#allocation372_spill] sm:$0xff] }
 0x58f   :  { %v5110_v0 = vmul.f32 %v10879_v27, %v5089_v22  ;;  %v5112_v25 = vmul.f32 %v10887_v50, %v5090_v38  ;;  %v5132_v52 = vmul.f32 %v10862_v44, %v5089_v22  ;;  %v5133_v18 = vmul.f32 %v10869_v55, %v5090_v38  ;;  %v12788_v27 = vld [vmem:[#allocation244_spill] sm:$0xff] }
 0x590   :  { %v5012_v13 = vadd.f32 %v5000_v32, %v4982_v30  ;;  %v5079_v54 = vsub.f32 %v5043_v33, %v12785_v45  ;;  %v5167_v35 = vsel %vm5166_vm5, %v5155_v63, 0.0  ;;  %v5168_v55 = vsel %vm5166_vm5, %v5157_v48, 0.0 }
 0x591   :  { %v5193_v59 = vsel %vm5166_vm5, %v5110_v0, 0.0  ;;  %v5195_v29 = vsel %vm5166_vm5, %v5112_v25, 0.0  ;;  %v5159_v53 = vmul.f32 %v12787_v39, %v5132_v52  ;;  %v5161_v58 = vmul.f32 %v12788_v27, %v5133_v18 }
 0x592   :  { %v5042_v50 = vadd.f32 %v5030_v4, %v5012_v13  ;;  %v5085_v24 = vmul.f32 2.0, %v5079_v54  ;;  %v5194_v44 = vadd.f32 %v5193_v59, %v5192_v16  ;;  %v5121_v47 = vmul.f32 2.0, %v12789_v51  ;;  %v12795_v4 = vld [vmem:[#allocation246_spill] sm:$0xff] }
 0x593   :  { %v5169_v5 = vadd.f32 %v5168_v55, %v5167_v35  ;;  %v5170_v9 = vsel %vm5166_vm5, %v5159_v53, 0.0  ;;  %v5172_v3 = vsel %vm5166_vm5, %v5161_v58, 0.0  ;;  %v5129_v34 = vadd.f32 %v12791_v10, %v12790_v21 }
 0x594   :  { %v5078_v40 = vsub.f32 %v5042_v50, %v12789_v51  ;;  %v5092_v7 = vadd.f32 %v10781_v31, %v5085_v24  ;;  %v5196_v36 = vadd.f32 %v5195_v29, %v5194_v44  ;;  %v5128_v19 = vadd.f32 %v12791_v10, %v5121_v47 }
 0x595   :  { %v5171_v15 = vadd.f32 %v5170_v9, %v5169_v5 }
 0x596   :  { %v5084_v37 = vmul.f32 2.0, %v5078_v40  ;;  %v5135_v32 = vmul.f32 %v5129_v34, %v5092_v7  ;;  %v5116_v46 = vmul.f32 %v12793_v17, %v5092_v7 }
 0x597   :  { %v5173_v6 = vadd.f32 %v5172_v3, %v5171_v15 }
 0x598   :  { %v5091_v61 = vadd.f32 %v10781_v31, %v5084_v37  ;;  %v5165_v26 = vmul.f32 %v12795_v4, %v5135_v32  ;;  %v5199_v43 = vsel %vm5166_vm5, %v5116_v46, 0.0 }
 0x59a   :  { %v5114_v57 = vmul.f32 %v12792_v49, %v5091_v61  ;;  %v5134_v41 = vmul.f32 %v5128_v19, %v5091_v61  ;;  %v5176_v42 = vsel %vm5166_vm5, %v5165_v26, 0.0 }
 0x59c   :  { %v5197_v11 = vsel %vm5166_vm5, %v5114_v57, 0.0  ;;  %v5163_v14 = vmul.f32 %v12794_v8, %v5134_v41 }
 0x59d   :  { %v5198_v1 = vadd.f32 %v5197_v11, %v5196_v36 }
 0x59e   :  { %v5174_v20 = vsel %vm5166_vm5, %v5163_v14, 0.0 }
 0x59f   :  { %v5200_v31 = vadd.f32 %v5199_v43, %v5198_v1  ;;  %v5175_v28 = vadd.f32 %v5174_v20, %v5173_v6 }
 0x5a1   :  { %5201 = vadd.xlane.f32.xlu1 %v5200_v31  ;;  %v5177_v2 = vadd.f32 %v5176_v42, %v5175_v28 }
 0x5a3   :  { %5178 = vadd.xlane.f32.xlu0 %v5177_v2 }
 0x62e   :  { %v5202_v60 = vpop.xlane.xlu1 %5201 }
 0x62f   :  { %v5203_v23 = vrot.slane %v5202_v60, 4 }
 0x630   :  { %v5179_v22 = vpop.xlane.xlu0 %5178 }
 0x631   :  { %v5204_v38 = vadd.f32 %v5203_v23, %v5202_v60  ;;  %v5180_v12 = vrot.slane %v5179_v22, 4 }
 0x633   :  { %v5205_v56 = vrot.slane %v5204_v38, 2  ;;  %v5181_v30 = vadd.f32 %v5180_v12, %v5179_v22 }
 0x635   :  { %v5206_v33 = vadd.f32 %v5205_v56, %v5204_v38  ;;  %v5182_v16 = vrot.slane %v5181_v30, 2 }
 0x637   :  { %v5183_v63 = vadd.f32 %v5182_v16, %v5181_v30  ;;  %v5207_v0 = vrot.slane %v5206_v33, 1 }
 0x639   :  { %v5184_v25 = vrot.slane %v5183_v63, 1  ;;  %v5208_v18 = vadd.f32 %v5207_v0, %v5206_v33 }
 0x63b   :  { %v5185_v52 = vadd.f32 %v5184_v25, %v5183_v63 }
 0x63d   :  { %5244 = vpush %v5185_v52 }
 0x63e   :  { %5246 = vpush %v5208_v18 }
 0x66e   :  { %s5245_s11 = spop %5244 }
 0x66f   :  { %v5187_v13 = vstv %s5245_s11  ;;  %s5247_s12 = spop %5246 }
 0x670   :  { %v5210_v45 = vstv %s5247_s12  ;;  %5189 = vst.msk [vmem:[#allocation9] sm:$0x1] %vm5188_vm6, %v5187_v13 }
 0x671   :  { %5402 = shalt.err (!%p5399_p9)
}
 0x672   :  { %s5403_s17 = scalar_lea.hbm %s11178_s3, 16 }
 0x673   :  { %p5404_p10 = scmp.ne.s32.totalorder %s11178_s3, %s5403_s17  ;;  %p5407_p11 = scmp.lt.u32.totalorder %s5403_s17, %s11178_s3 }
 0x675   :  { %p5409_p12 = pnand %p5407_p11, %p5404_p10 }
 0x677   :  { %5412 = shalt.err (!%p5409_p12)
}
 0x678   :  { %5221 = dma.vmem_to_hbm [thread:$0]  %s5219_s0, 16, %s11178_s3, [#allocation4]   ;;  %5211 = vst.msk [vmem:[#allocation10] sm:$0x1] %vm5188_vm6, %v5210_v45 }
 0x679   :  { %s5413_s2 = scalar_lea.vmem %s11141_s10, 16  ;;  %s5417_s23 = scalar_lea.vmem %s11141_s10, 32 }
 0x67a   :  { %p5414_p13 = scmp.ne.s32.totalorder %s11141_s10, %s5413_s2  ;;  %p5418_p0 = scmp.lt.s32.totalorder %s11141_s10, %s11141_s10 }
 0x67b   :  { %p5419_p1 = scmp.lt.s32.totalorder %s5417_s23, %s5413_s2 }
 0x67d   :  { %p5420_p2 = por %p5419_p1, %p5418_p0 }
 0x67f   :  { %p5421_p3 = pnand %p5420_p2, %p5414_p13 }
 0x681   :  { %5424 = shalt.err (!%p5421_p3)
}
 0x682   :  { %s5425_s26 = scalar_lea.hbm %s11179_s4, 16 }
 0x683   :  { %p5426_p4 = scmp.ne.s32.totalorder %s11179_s4, %s5425_s26  ;;  %p5429_p5 = scmp.lt.u32.totalorder %s5425_s26, %s11179_s4 }
 0x685   :  { %p5431_p6 = pnand %p5429_p5, %p5426_p4 }
 0x687   :  { %5434 = shalt.err (!%p5431_p6)
}
 0x688   :  { %5231 = dma.vmem_to_hbm [thread:$0]  %s11141_s10, 16, %s11179_s4, [#allocation11]  }
 0x689   :  { %5441 = dma.done.wait [#allocation4], 16  }
 0x68a   :  { %5442 = vsyncadd [#allocation4], 4294967280 }
 0x68b   :  { %5443 = dma.done.wait [#allocation11], 16  }
 0x68c   :  { %5444 = vsyncadd [#allocation11], 4294967280 }
 0x68d   :  { %5238 = vsyncpa [#allocation3], 1 }
 0x68e   :  { %5239 = vsyncpa [#allocation8], 1 }
 0x68f   :  { %5240 = vsyncpa [#allocation4], 1 }
 0x690   :  { %5241 = vsyncpa [#allocation11], 1 }
 0x691   :  { %5242 = vsyncpa [#allocation5], 1 }

</bundles_post_ra>
